<compile_context>
chip_gen: v7x
topology: tpu7x:2x2x1
jax: 0.10.0
libtpu: 0.0.40
codegen_flags: <defaults>
</compile_context>

<pallas_src>
import functools

import jax
import jax.numpy as jnp
from jax.experimental import pallas as pl
from jax.experimental.pallas import tpu as pltpu

MASK_VALUE = -1e30          # finite large negative (equivalent to torch's -f32.max here)
LN_EPS = 1e-5
OPM_EPS = 1e-5

_ROW_BLOCK = 512            # row tile for the flattened (R, D) kernels
_TRI_BLOCK_I = 256          # i-tile for the triangle-mix matmul (use 128 on v5e)
_OPM_ROW_TILE = 8           # pair rows batched per OPM outer-product block


def _pick_rows(r, blk=_ROW_BLOCK):
    return r if r <= blk else blk


def _ln(x, g, b, eps):
    mu = jnp.mean(x, axis=-1, keepdims=True)
    xc = x - mu
    var = jnp.mean(xc * xc, axis=-1, keepdims=True)
    return xc * jax.lax.rsqrt(var + eps) * g + b


# ----------------------------------------------------------------------------
# Pallas kernels
# ----------------------------------------------------------------------------
def _linear_kernel(x_ref, w_ref, b_ref, o_ref):
    y = jnp.dot(x_ref[...].astype(jnp.bfloat16), w_ref[...],
                preferred_element_type=jnp.float32) + b_ref[...]
    o_ref[...] = y.astype(o_ref.dtype)


def _opm_proj_kernel(x_ref, m_ref, g_ref, b_ref, w_ref, bb_ref, l_ref, r_ref, *, c, eps):
    # LN(msa) -> [left | right] projections, masked; emitted in bf16 (feeds MXU only).
    xn = _ln(x_ref[...], g_ref[...], b_ref[...], eps)
    y = jnp.dot(xn.astype(jnp.bfloat16), w_ref[...],
                preferred_element_type=jnp.float32) + bb_ref[...]
    m = m_ref[...]
    l_ref[...] = (y[:, :c] * m).astype(l_ref.dtype)
    r_ref[...] = (y[:, c:] * m).astype(r_ref.dtype)


def _opm_outer_kernel(l_ref, r_ref, o_ref):
    # l: (M, Ti*C), r: (M, N*C): out[x, y] = sum_m l[m, x] * r[m, y]
    o = jax.lax.dot_general(l_ref[0], r_ref[0], (((0,), (0,)), ((), ())),
                            preferred_element_type=jnp.float32)
    o_ref[0] = o.astype(o_ref.dtype)


def _tri_proj_kernel(x_ref, m_ref, g_ref, b_ref, w_ref, bb_ref, l_ref, r_ref, *, dh, eps):
    # LN(x) -> left/right projections, masked, gated; one matmul over concatenated weights.
    xn = _ln(x_ref[...], g_ref[...], b_ref[...], eps)
    y = jnp.dot(xn.astype(jnp.bfloat16), w_ref[...],
                preferred_element_type=jnp.float32) + bb_ref[...]
    m = m_ref[...]
    left = y[:, :dh] * m * jax.nn.sigmoid(y[:, dh:2 * dh])
    right = y[:, 2 * dh:3 * dh] * m * jax.nn.sigmoid(y[:, 3 * dh:])
    l_ref[...] = left.astype(l_ref.dtype)
    r_ref[...] = right.astype(r_ref.dtype)


def _tri_mix_kernel(a_ref, b_ref, o_ref, *, contract_first):
    # channel-major blocks: out[i, j] = sum_k a[i, k] * b[j, k]  (or a[k, i] * b[k, j])
    dn = (((0,), (0,)), ((), ())) if contract_first else (((1,), (1,)), ((), ()))
    o = jax.lax.dot_general(a_ref[0, 0], b_ref[0, 0], dn,
                            preferred_element_type=jnp.float32)
    o_ref[0, 0] = o.astype(o_ref.dtype)


def _tri_out_kernel(mix_ref, x_ref, g_ref, b_ref, og_ref, ob_ref,
                    wog_ref, bog_ref, wo_ref, bo_ref, o_ref, *, eps):
    # LN(mix) * sigmoid(LN(x) @ Wog + bog) -> @ Wo + bo, fused.
    xn = _ln(x_ref[...], g_ref[...], b_ref[...], eps)
    t = _ln(mix_ref[...], og_ref[...], ob_ref[...], eps)
    gate = jax.nn.sigmoid(jnp.dot(xn.astype(jnp.bfloat16), wog_ref[...],
                                  preferred_element_type=jnp.float32) + bog_ref[...])
    y = jnp.dot((t * gate).astype(jnp.bfloat16), wo_ref[...],
                preferred_element_type=jnp.float32) + bo_ref[...]
    o_ref[...] = y.astype(o_ref.dtype)


def _axial_proj_kernel(x_ref, g1_ref, b1_ref, g2_ref, b2_ref,
                       w_ref, bb_ref, we_ref, qkv_ref, gate_ref, bias_ref, *, inner, eps):
    # reads x once: LN -> q/k/v/gate; edge-LN -> attention bias logits.
    x = x_ref[...]
    xn = _ln(x, g1_ref[...], b1_ref[...], eps)
    eb = _ln(x, g2_ref[...], b2_ref[...], eps)
    y = jnp.dot(xn.astype(jnp.bfloat16), w_ref[...],
                preferred_element_type=jnp.float32) + bb_ref[...]
    qkv_ref[...] = y[:, :3 * inner].astype(qkv_ref.dtype)
    gate_ref[...] = y[:, 3 * inner:].astype(gate_ref.dtype)
    bias_ref[...] = jnp.dot(eb.astype(jnp.bfloat16), we_ref[...],
                            preferred_element_type=jnp.float32).astype(bias_ref.dtype)


def _attn_kernel(qkv_ref, bias_ref, pm_ref, mq_ref, mk_ref, o_ref, *, heads, dh, scale):
    # one (batch, sequence) per grid step; per-head loop; masks built in-kernel.
    inner = heads * dh
    qkv = qkv_ref[0, 0]                         # (W, 3*inner) bf16
    pm = pm_ref[0] > 0.5                        # (W, W) edge mask for the bias
    qm = mq_ref[0, 0] > 0.5                     # (W, 1) query mask
    km = mk_ref[0, 0] > 0.5                     # (1, W) key mask
    amask = jnp.logical_and(qm, km)             # (W, W)
    outs = []
    for h in range(heads):
        q = qkv[:, h * dh:(h + 1) * dh]
        k = qkv[:, inner + h * dh: inner + (h + 1) * dh]
        v = qkv[:, 2 * inner + h * dh: 2 * inner + (h + 1) * dh]
        dots = jax.lax.dot_general(q, k, (((1,), (1,)), ((), ())),
                                   preferred_element_type=jnp.float32) * scale
        bias_h = jnp.where(pm, bias_ref[0, h], MASK_VALUE)
        dots = jnp.where(amask, dots + bias_h, MASK_VALUE)
        dots = dots - jnp.max(dots, axis=-1, keepdims=True)
        p = jnp.exp(dots)
        p = p * pl.reciprocal(jnp.sum(p, axis=-1, keepdims=True), approx=True)
        outs.append(jnp.dot(p.astype(jnp.bfloat16), v, preferred_element_type=jnp.float32))
    o_ref[0, 0] = jnp.concatenate(outs, axis=-1).astype(o_ref.dtype)


def _gate_out_kernel(a_ref, g_ref, w_ref, b_ref, o_ref):
    y = a_ref[...] * jax.nn.sigmoid(g_ref[...])
    o_ref[...] = (jnp.dot(y.astype(jnp.bfloat16), w_ref[...],
                          preferred_element_type=jnp.float32) + b_ref[...]).astype(o_ref.dtype)


# ----------------------------------------------------------------------------
# Pallas wrappers
# ----------------------------------------------------------------------------
def linear(x, w, b=None):
    *lead, din = x.shape
    dout = w.shape[-1]
    xf = x.reshape(-1, din)
    r = xf.shape[0]
    tr = _pick_rows(r)
    bb = (jnp.zeros((1, dout), jnp.float32) if b is None
          else b.reshape(1, dout).astype(jnp.float32))
    out = pl.pallas_call(
        _linear_kernel,
        out_shape=jax.ShapeDtypeStruct((r, dout), jnp.float32),
        grid=(pl.cdiv(r, tr),),
        in_specs=[pl.BlockSpec((tr, din), lambda i: (i, 0)),
                  pl.BlockSpec((din, dout), lambda i: (0, 0)),
                  pl.BlockSpec((1, dout), lambda i: (0, 0))],
        out_specs=pl.BlockSpec((tr, dout), lambda i: (i, 0)),
        compiler_params=pltpu.CompilerParams(dimension_semantics=("parallel",)),
    )(xf, w.astype(jnp.bfloat16), bb)
    return out.reshape(*lead, dout)


def opm_projections(p, msa, msa_mask):
    B, M, N, dm = msa.shape
    c = p['wl'].shape[1]
    xf = msa.reshape(-1, dm)
    r = xf.shape[0]
    tr = _pick_rows(r)
    mcol = (jnp.ones((r, 1), jnp.float32) if msa_mask is None
            else msa_mask.reshape(r, 1).astype(jnp.float32))
    wcat = jnp.concatenate([p['wl'], p['wr']], axis=1).astype(jnp.bfloat16)
    bcat = jnp.concatenate([p['bl'], p['br']], axis=0).reshape(1, 2 * c)
    left, right = pl.pallas_call(
        functools.partial(_opm_proj_kernel, c=c, eps=LN_EPS),
        out_shape=(jax.ShapeDtypeStruct((r, c), jnp.bfloat16),
                   jax.ShapeDtypeStruct((r, c), jnp.bfloat16)),
        grid=(pl.cdiv(r, tr),),
        in_specs=[pl.BlockSpec((tr, dm), lambda i: (i, 0)),
                  pl.BlockSpec((tr, 1), lambda i: (i, 0)),
                  pl.BlockSpec((1, dm), lambda i: (0, 0)),
                  pl.BlockSpec((1, dm), lambda i: (0, 0)),
                  pl.BlockSpec((dm, 2 * c), lambda i: (0, 0)),
                  pl.BlockSpec((1, 2 * c), lambda i: (0, 0))],
        out_specs=[pl.BlockSpec((tr, c), lambda i: (i, 0)),
                   pl.BlockSpec((tr, c), lambda i: (i, 0))],
        compiler_params=pltpu.CompilerParams(dimension_semantics=("parallel",)),
    )(xf, mcol, p['norm_g'].reshape(1, dm), p['norm_b'].reshape(1, dm), wcat, bcat)
    return left.reshape(B, M, N, c), right.reshape(B, M, N, c)


def opm_outer(left, right, row_tile=_OPM_ROW_TILE):
    # left, right: (B, M, N, C) bf16 -> out (B, N*C, N*C) f32 (rows = (i, c), cols = (j, d))
    B, M, N, C = left.shape
    nc = N * C
    lf = left.reshape(B, M, nc)
    rf = right.reshape(B, M, nc)
    ti = N if N <= row_tile else row_tile
    txc = ti * C
    return pl.pallas_call(
        _opm_outer_kernel,
        out_shape=jax.ShapeDtypeStruct((B, nc, nc), jnp.float32),
        grid=(B, pl.cdiv(N, ti)),
        in_specs=[pl.BlockSpec((1, M, txc), lambda b, i: (b, 0, i)),
                  pl.BlockSpec((1, M, nc), lambda b, i: (b, 0, 0))],
        out_specs=pl.BlockSpec((1, txc, nc), lambda b, i: (b, i, 0)),
        compiler_params=pltpu.CompilerParams(dimension_semantics=("parallel", "parallel")),
    )(lf, rf)


def tri_mix(left_cm, right_cm, outgoing, block_i=_TRI_BLOCK_I):
    # left_cm/right_cm: (B, D, N, N) bf16 channel-major.
    B, D, N, _ = left_cm.shape
    ti = N if N <= block_i else block_i
    if outgoing:   # out[d,i,j] = sum_k L[d,i,k] * R[d,j,k]
        a_in, b_in = left_cm, right_cm
        a_spec = pl.BlockSpec((1, 1, ti, N), lambda b, d, i: (b, d, i, 0))
        contract_first = False
    else:          # out[d,i,j] = sum_k R[d,k,i] * L[d,k,j]
        a_in, b_in = right_cm, left_cm
        a_spec = pl.BlockSpec((1, 1, N, ti), lambda b, d, i: (b, d, 0, i))
        contract_first = True
    return pl.pallas_call(
        functools.partial(_tri_mix_kernel, contract_first=contract_first),
        out_shape=jax.ShapeDtypeStruct((B, D, N, N), jnp.float32),
        grid=(B, D, pl.cdiv(N, ti)),
        in_specs=[a_spec,
                  pl.BlockSpec((1, 1, N, N), lambda b, d, i: (b, d, 0, 0))],
        out_specs=pl.BlockSpec((1, 1, ti, N), lambda b, d, i: (b, d, i, 0)),
        compiler_params=pltpu.CompilerParams(
            dimension_semantics=("parallel", "parallel", "parallel")),
    )(a_in, b_in)


# ----------------------------------------------------------------------------
# Module forward functions
# ----------------------------------------------------------------------------
def outer_product_mean(p, msa, msa_mask, eps=OPM_EPS):
    B, M, N, _ = msa.shape
    C = p['wl'].shape[1]
    left, right = opm_projections(p, msa, msa_mask)
    outer = opm_outer(left, right)                                      # (B, N*C, N*C)
    outer = outer.reshape(B, N, C, N, C)
    outer = jnp.transpose(outer, (0, 1, 3, 2, 4)).reshape(B, N, N, C * C)
    out = linear(outer, p['wout'], p['bout'])                           # (B, N, N, Dp)
    if msa_mask is not None:
        norm = jnp.einsum('bmi,bmj->bij', msa_mask, msa_mask)           # small m-reduction
        out = out / (norm[..., None] + eps)
    else:
        out = out / (M + eps)
    return out


def triangle_multiply(p, x, mask, outgoing):
    B, N, _, D = x.shape
    xf = x.reshape(-1, D)
    r = xf.shape[0]
    tr = _pick_rows(r)
    mcol = (jnp.ones((r, 1), jnp.float32) if mask is None
            else mask.reshape(r, 1).astype(jnp.float32))
    wcat = jnp.concatenate([p['wl'], p['wlg'], p['wr'], p['wrg']], axis=1).astype(jnp.bfloat16)
    bcat = jnp.concatenate([p['bl'], p['blg'], p['br'], p['brg']], axis=0).reshape(1, 4 * D)

    left, right = pl.pallas_call(
        functools.partial(_tri_proj_kernel, dh=D, eps=LN_EPS),
        out_shape=(jax.ShapeDtypeStruct((r, D), jnp.bfloat16),
                   jax.ShapeDtypeStruct((r, D), jnp.bfloat16)),
        grid=(pl.cdiv(r, tr),),
        in_specs=[pl.BlockSpec((tr, D), lambda i: (i, 0)),
                  pl.BlockSpec((tr, 1), lambda i: (i, 0)),
                  pl.BlockSpec((1, D), lambda i: (0, 0)),
                  pl.BlockSpec((1, D), lambda i: (0, 0)),
                  pl.BlockSpec((D, 4 * D), lambda i: (0, 0)),
                  pl.BlockSpec((1, 4 * D), lambda i: (0, 0))],
        out_specs=[pl.BlockSpec((tr, D), lambda i: (i, 0)),
                   pl.BlockSpec((tr, D), lambda i: (i, 0))],
        compiler_params=pltpu.CompilerParams(dimension_semantics=("parallel",)),
    )(xf, mcol, p['norm_g'].reshape(1, D), p['norm_b'].reshape(1, D), wcat, bcat)

    # channel-major layout for the triangle matmul (bf16 halves the transpose traffic).
    # TODO(synk): fold these layout transposes into the projection out_specs.
    left_cm = jnp.transpose(left.reshape(B, N, N, D), (0, 3, 1, 2))
    right_cm = jnp.transpose(right.reshape(B, N, N, D), (0, 3, 1, 2))
    mix = tri_mix(left_cm, right_cm, outgoing)                          # (B, D, N, N) f32
    mix = jnp.transpose(mix, (0, 2, 3, 1)).reshape(r, D)

    out = pl.pallas_call(
        functools.partial(_tri_out_kernel, eps=LN_EPS),
        out_shape=jax.ShapeDtypeStruct((r, D), jnp.float32),
        grid=(pl.cdiv(r, tr),),
        in_specs=[pl.BlockSpec((tr, D), lambda i: (i, 0)),
                  pl.BlockSpec((tr, D), lambda i: (i, 0)),
                  pl.BlockSpec((1, D), lambda i: (0, 0)),
                  pl.BlockSpec((1, D), lambda i: (0, 0)),
                  pl.BlockSpec((1, D), lambda i: (0, 0)),
                  pl.BlockSpec((1, D), lambda i: (0, 0)),
                  pl.BlockSpec((D, D), lambda i: (0, 0)),
                  pl.BlockSpec((1, D), lambda i: (0, 0)),
                  pl.BlockSpec((D, D), lambda i: (0, 0)),
                  pl.BlockSpec((1, D), lambda i: (0, 0))],
        out_specs=pl.BlockSpec((tr, D), lambda i: (i, 0)),
        compiler_params=pltpu.CompilerParams(dimension_semantics=("parallel",)),
    )(mix, xf,
      p['norm_g'].reshape(1, D), p['norm_b'].reshape(1, D),
      p['out_norm_g'].reshape(1, D), p['out_norm_b'].reshape(1, D),
      p['wog'].astype(jnp.bfloat16), p['bog'].reshape(1, D),
      p['wo'].astype(jnp.bfloat16), p['bo'].reshape(1, D))
    return out.reshape(B, N, N, D)


def axial_attention(p, x, mask, row_attn):
    B, N, _, D = x.shape
    heads = p['edge_w'].shape[1]
    inner = p['wq'].shape[1]
    dh = inner // heads

    if not row_attn:
        # column attention == row attention on the spatially transposed tensor.
        x = jnp.swapaxes(x, 1, 2)
        mask = None if mask is None else jnp.swapaxes(mask, 1, 2)

    r = B * N * N
    tr = _pick_rows(r)
    xf = x.reshape(r, D)
    wcat = jnp.concatenate([p['wq'], p['wkv'], p['wg']], axis=1).astype(jnp.bfloat16)
    bcat = jnp.concatenate([jnp.zeros((3 * inner,), jnp.float32), p['bg']],
                           axis=0).reshape(1, 4 * inner)

    qkv, gates, bias = pl.pallas_call(
        functools.partial(_axial_proj_kernel, inner=inner, eps=LN_EPS),
        out_shape=(jax.ShapeDtypeStruct((r, 3 * inner), jnp.bfloat16),
                   jax.ShapeDtypeStruct((r, inner), jnp.float32),
                   jax.ShapeDtypeStruct((r, heads), jnp.float32)),
        grid=(pl.cdiv(r, tr),),
        in_specs=[pl.BlockSpec((tr, D), lambda i: (i, 0)),
                  pl.BlockSpec((1, D), lambda i: (0, 0)),
                  pl.BlockSpec((1, D), lambda i: (0, 0)),
                  pl.BlockSpec((1, D), lambda i: (0, 0)),
                  pl.BlockSpec((1, D), lambda i: (0, 0)),
                  pl.BlockSpec((D, 4 * inner), lambda i: (0, 0)),
                  pl.BlockSpec((1, 4 * inner), lambda i: (0, 0)),
                  pl.BlockSpec((D, heads), lambda i: (0, 0))],
        out_specs=[pl.BlockSpec((tr, 3 * inner), lambda i: (i, 0)),
                   pl.BlockSpec((tr, inner), lambda i: (i, 0)),
                   pl.BlockSpec((tr, heads), lambda i: (i, 0))],
        compiler_params=pltpu.CompilerParams(dimension_semantics=("parallel",)),
    )(xf, p['norm_g'].reshape(1, D), p['norm_b'].reshape(1, D),
      p['edge_norm_g'].reshape(1, D), p['edge_norm_b'].reshape(1, D),
      wcat, bcat, p['edge_w'].astype(jnp.bfloat16))

    qkv = qkv.reshape(B, N, N, 3 * inner)
    bias = jnp.transpose(bias.reshape(B, N, N, heads), (0, 3, 1, 2))    # (B, H, N, N) small

    pm = jnp.ones((B, N, N), jnp.float32) if mask is None else mask.astype(jnp.float32)
    mq = pm.reshape(B, N, N, 1)     # query mask per sequence
    mk = pm.reshape(B, N, 1, N)     # key mask per sequence

    attn_out = pl.pallas_call(
        functools.partial(_attn_kernel, heads=heads, dh=dh, scale=dh ** -0.5),
        out_shape=jax.ShapeDtypeStruct((B, N, N, inner), jnp.float32),
        grid=(B, N),
        in_specs=[pl.BlockSpec((1, 1, N, 3 * inner), lambda b, i: (b, i, 0, 0)),
                  pl.BlockSpec((1, heads, N, N), lambda b, i: (b, 0, 0, 0)),
                  pl.BlockSpec((1, N, N), lambda b, i: (b, 0, 0)),
                  pl.BlockSpec((1, 1, N, 1), lambda b, i: (b, i, 0, 0)),
                  pl.BlockSpec((1, 1, 1, N), lambda b, i: (b, i, 0, 0))],
        out_specs=pl.BlockSpec((1, 1, N, inner), lambda b, i: (b, i, 0, 0)),
        compiler_params=pltpu.CompilerParams(dimension_semantics=("parallel", "parallel")),
    )(qkv, bias, pm, mq, mk)

    out = pl.pallas_call(
        _gate_out_kernel,
        out_shape=jax.ShapeDtypeStruct((r, D), jnp.float32),
        grid=(pl.cdiv(r, tr),),
        in_specs=[pl.BlockSpec((tr, inner), lambda i: (i, 0)),
                  pl.BlockSpec((tr, inner), lambda i: (i, 0)),
                  pl.BlockSpec((inner, D), lambda i: (0, 0)),
                  pl.BlockSpec((1, D), lambda i: (0, 0))],
        out_specs=pl.BlockSpec((tr, D), lambda i: (i, 0)),
        compiler_params=pltpu.CompilerParams(dimension_semantics=("parallel",)),
    )(attn_out.reshape(r, inner), gates,
      p['wo'].astype(jnp.bfloat16), p['bo'].reshape(1, D))

    out = out.reshape(B, N, N, D)
    if not row_attn:
        out = jnp.swapaxes(out, 1, 2)
    return out


def pairwise_attention_block(params, x, mask=None, msa_repr=None, msa_mask=None):
    """Eval-mode forward of PairwiseAttentionBlock (dropout == identity)."""
    if msa_repr is not None:
        x = x + outer_product_mean(params['opm'], msa_repr, msa_mask)
    x = x + triangle_multiply(params['tm_out'], x, mask, outgoing=True)
    x = x + triangle_multiply(params['tm_in'], x, mask, outgoing=False)
    x = x + axial_attention(params['ta_out'], x, mask, row_attn=True)
    x = x + axial_attention(params['ta_in'], x, mask, row_attn=False)
    return x


# ----------------------------------------------------------------------------
# Deterministic synthetic parameter init (shapes per the PyTorch __init__)
# ----------------------------------------------------------------------------
def _linear_init(key, din, dout, bias=True, scale=0.1):
    kw, kb = jax.random.split(key)
    w = scale * jax.random.normal(kw, (din, dout), jnp.float32)
    b = scale * jax.random.normal(kb, (dout,), jnp.float32) if bias else None
    return w, b


def init_params(key, dim_msa, dim_pairwise, heads, dim_head, dim_hidden=32):
    ks = iter(jax.random.split(key, 64))

    def lin(din, dout, bias=True):
        return _linear_init(next(ks), din, dout, bias)

    def ln(d):
        return jnp.ones((d,), jnp.float32), jnp.zeros((d,), jnp.float32)

    inner = heads * dim_head

    def axial_params():
        wq, _ = lin(dim_pairwise, inner, bias=False)
        wkv, _ = lin(dim_pairwise, 2 * inner, bias=False)
        wg, bg = lin(dim_pairwise, inner)
        wo, bo = lin(inner, dim_pairwise)
        ew, _ = lin(dim_pairwise, heads, bias=False)
        ng, nb = ln(dim_pairwise)
        eng, enb = ln(dim_pairwise)
        return dict(norm_g=ng, norm_b=nb, edge_norm_g=eng, edge_norm_b=enb, edge_w=ew,
                    wq=wq, wkv=wkv, wg=wg, bg=bg, wo=wo, bo=bo)

    def trimul_params():
        ng, nb = ln(dim_pairwise)
        ong, onb = ln(dim_pairwise)
        wl, bl = lin(dim_pairwise, dim_pairwise)
        wr, br = lin(dim_pairwise, dim_pairwise)
        wlg, blg = lin(dim_pairwise, dim_pairwise)
        wrg, brg = lin(dim_pairwise, dim_pairwise)
        wog, bog = lin(dim_pairwise, dim_pairwise)
        wo, bo = lin(dim_pairwise, dim_pairwise)
        return dict(norm_g=ng, norm_b=nb, wl=wl, bl=bl, wr=wr, br=br,
                    wlg=wlg, blg=blg, wrg=wrg, brg=brg, wog=wog, bog=bog,
                    out_norm_g=ong, out_norm_b=onb, wo=wo, bo=bo)

    ng, nb = ln(dim_msa)
    wl, bl = lin(dim_msa, dim_hidden)
    wr, br = lin(dim_msa, dim_hidden)
    wout, bout = lin(dim_hidden * dim_hidden, dim_pairwise)
    opm = dict(norm_g=ng, norm_b=nb, wl=wl, bl=bl, wr=wr, br=br, wout=wout, bout=bout)

    return dict(opm=opm, tm_out=trimul_params(), tm_in=trimul_params(),
                ta_out=axial_params(), ta_in=axial_params())


# ----------------------------------------------------------------------------
if __name__ == "__main__":
    B, N, M = 2, 8, 4
    DIM_MSA, DIM_PAIR, HEADS, DIM_HEAD = 16, 16, 2, 8

    key = jax.random.PRNGKey(0)
    k_x, k_msa, k_sm, k_mm, k_p = jax.random.split(key, 5)
    x = jax.random.normal(k_x, (B, N, N, DIM_PAIR), jnp.float32)
    msa = jax.random.normal(k_msa, (B, M, N, DIM_MSA), jnp.float32)
    seq_mask = (jax.random.uniform(k_sm, (B, N)) > 0.15).astype(jnp.float32)
    mask = seq_mask[:, :, None] * seq_mask[:, None, :]          # pairwise mask (B, N, N)
    msa_mask = (jax.random.uniform(k_mm, (B, M, N)) > 0.15).astype(jnp.float32)

    params = init_params(k_p, DIM_MSA, DIM_PAIR, HEADS, DIM_HEAD)

    fwd = jax.jit(pairwise_attention_block)
    out = fwd(params, x, mask=mask, msa_repr=msa, msa_mask=msa_mask)
    jax.block_until_ready(out)

    assert out.shape == (B, N, N, DIM_PAIR)
    assert bool(jnp.isfinite(out).all())
    print("KERNEL_OK")
</pallas_src>

<mosaic_0001>
module attributes {stable_mosaic.version = 11 : i64} {
  func.func @_opm_proj_kernel(%arg0: i32, %arg1: memref<64x16xf32, #tpu.memory_space<vmem>>, %arg2: memref<64x1xf32, #tpu.memory_space<vmem>>, %arg3: memref<1x16xf32, #tpu.memory_space<vmem>>, %arg4: memref<1x16xf32, #tpu.memory_space<vmem>>, %arg5: memref<16x64xbf16, #tpu.memory_space<vmem>>, %arg6: memref<1x64xf32, #tpu.memory_space<vmem>>, %arg7: memref<64x32xbf16, #tpu.memory_space<vmem>>, %arg8: memref<64x32xbf16, #tpu.memory_space<vmem>>) attributes {dimension_semantics = [#tpu.dimension_semantics<parallel>], iteration_bounds = array<i64: 1>, scalar_prefetch = 0 : i64, scratch_operands = 0 : i64, tpu.core_type = #tpu.core_type<tc>, window_params = [{transform_indices = @transform_0, window_bounds = array<i64: 64, 16>}, {transform_indices = @transform_1, window_bounds = array<i64: 64, 1>}, {pipeline_mode = #tpu.pipeline_mode<synchronous>, transform_indices = @transform_2, window_bounds = array<i64: 1, 16>}, {pipeline_mode = #tpu.pipeline_mode<synchronous>, transform_indices = @transform_3, window_bounds = array<i64: 1, 16>}, {pipeline_mode = #tpu.pipeline_mode<synchronous>, transform_indices = @transform_4, window_bounds = array<i64: 16, 64>}, {pipeline_mode = #tpu.pipeline_mode<synchronous>, transform_indices = @transform_5, window_bounds = array<i64: 1, 64>}, {transform_indices = @transform_6, window_bounds = array<i64: 64, 32>}, {transform_indices = @transform_7, window_bounds = array<i64: 64, 32>}]} {
    %c0 = arith.constant 0 : index
    %c0_0 = arith.constant 0 : index
    %0 = vector.load %arg1[%c0, %c0_0] : memref<64x16xf32, #tpu.memory_space<vmem>>, vector<64x16xf32>
    %c0_1 = arith.constant 0 : index
    %c0_2 = arith.constant 0 : index
    %1 = vector.load %arg3[%c0_1, %c0_2] : memref<1x16xf32, #tpu.memory_space<vmem>>, vector<1x16xf32>
    %c0_3 = arith.constant 0 : index
    %c0_4 = arith.constant 0 : index
    %2 = vector.load %arg4[%c0_3, %c0_4] : memref<1x16xf32, #tpu.memory_space<vmem>>, vector<1x16xf32>
    %cst = arith.constant dense<0.000000e+00> : vector<64xf32>
    %3 = vector.multi_reduction <add>, %0, %cst [1] : vector<64x16xf32> to vector<64xf32>
    %4 = vector.shape_cast %3 : vector<64xf32> to vector<64x1xf32>
    %cst_5 = arith.constant 1.600000e+01 : f32
    %5 = vector.broadcast %cst_5 : f32 to vector<64x1xf32>
    %6 = arith.divf %4, %5 : vector<64x1xf32>
    %7 = vector.broadcast %6 : vector<64x1xf32> to vector<64x16xf32>
    %8 = arith.subf %0, %7 : vector<64x16xf32>
    %9 = arith.mulf %8, %8 : vector<64x16xf32>
    %cst_6 = arith.constant dense<0.000000e+00> : vector<64xf32>
    %10 = vector.multi_reduction <add>, %9, %cst_6 [1] : vector<64x16xf32> to vector<64xf32>
    %11 = vector.shape_cast %10 : vector<64xf32> to vector<64x1xf32>
    %cst_7 = arith.constant 1.600000e+01 : f32
    %12 = vector.broadcast %cst_7 : f32 to vector<64x1xf32>
    %13 = arith.divf %11, %12 : vector<64x1xf32>
    %cst_8 = arith.constant 9.99999974E-6 : f32
    %14 = vector.broadcast %cst_8 : f32 to vector<64x1xf32>
    %15 = arith.addf %13, %14 : vector<64x1xf32>
    %16 = math.rsqrt %15 : vector<64x1xf32>
    %17 = vector.broadcast %16 : vector<64x1xf32> to vector<64x16xf32>
    %18 = arith.mulf %8, %17 : vector<64x16xf32>
    %19 = vector.broadcast %1 : vector<1x16xf32> to vector<64x16xf32>
    %20 = arith.mulf %18, %19 : vector<64x16xf32>
    %21 = vector.broadcast %2 : vector<1x16xf32> to vector<64x16xf32>
    %22 = arith.addf %20, %21 : vector<64x16xf32>
    %23 = arith.truncf %22 : vector<64x16xf32> to vector<64x16xbf16>
    %c0_9 = arith.constant 0 : index
    %c0_10 = arith.constant 0 : index
    %24 = vector.load %arg5[%c0_9, %c0_10] : memref<16x64xbf16, #tpu.memory_space<vmem>>, vector<16x64xbf16>
    %cst_11 = arith.constant dense<0.000000e+00> : vector<64x64xf32>
    %25 = tpu.matmul %23, %24, %cst_11 {dimension_numbers = #tpu.dot_dimension_numbers<[1], [0], [0], [1], [0, 0, 1, 1], [], []>} : vector<64x16xbf16>, vector<16x64xbf16>, vector<64x64xf32> -> vector<64x64xf32>
    %c0_12 = arith.constant 0 : index
    %c0_13 = arith.constant 0 : index
    %26 = vector.load %arg6[%c0_12, %c0_13] : memref<1x64xf32, #tpu.memory_space<vmem>>, vector<1x64xf32>
    %27 = vector.broadcast %26 : vector<1x64xf32> to vector<64x64xf32>
    %28 = arith.addf %25, %27 : vector<64x64xf32>
    %c0_14 = arith.constant 0 : index
    %c0_15 = arith.constant 0 : index
    %29 = vector.load %arg2[%c0_14, %c0_15] : memref<64x1xf32, #tpu.memory_space<vmem>>, vector<64x1xf32>
    %30 = vector.extract_strided_slice %28 {offsets = [0, 0], sizes = [64, 32], strides = [1, 1]} : vector<64x64xf32> to vector<64x32xf32>
    %31 = vector.broadcast %29 : vector<64x1xf32> to vector<64x32xf32>
    %32 = arith.mulf %30, %31 : vector<64x32xf32>
    %33 = arith.truncf %32 : vector<64x32xf32> to vector<64x32xbf16>
    %c0_16 = arith.constant 0 : index
    %c0_17 = arith.constant 0 : index
    %34 = vector.load %arg7[%c0_16, %c0_17] : memref<64x32xbf16, #tpu.memory_space<vmem>>, vector<64x32xbf16>
    tpu.vector_store %arg7[%c0_16, %c0_17], %33 {strides = array<i32>} : memref<64x32xbf16, #tpu.memory_space<vmem>>, vector<64x32xbf16>,
    %35 = vector.extract_strided_slice %28 {offsets = [0, 32], sizes = [64, 32], strides = [1, 1]} : vector<64x64xf32> to vector<64x32xf32>
    %36 = vector.broadcast %29 : vector<64x1xf32> to vector<64x32xf32>
    %37 = arith.mulf %35, %36 : vector<64x32xf32>
    %38 = arith.truncf %37 : vector<64x32xf32> to vector<64x32xbf16>
    %c0_18 = arith.constant 0 : index
    %c0_19 = arith.constant 0 : index
    %39 = vector.load %arg8[%c0_18, %c0_19] : memref<64x32xbf16, #tpu.memory_space<vmem>>, vector<64x32xbf16>
    tpu.vector_store %arg8[%c0_18, %c0_19], %38 {strides = array<i32>} : memref<64x32xbf16, #tpu.memory_space<vmem>>, vector<64x32xbf16>,
    return
  }
  func.func @transform_0(%arg0: i32) -> (i32, i32) {
    %c0_i32 = arith.constant 0 : i32
    %c0_i32_0 = arith.constant 0 : i32
    return %arg0, %c0_i32 : i32, i32
  }
  func.func @transform_1(%arg0: i32) -> (i32, i32) {
    %c0_i32 = arith.constant 0 : i32
    %c0_i32_0 = arith.constant 0 : i32
    return %arg0, %c0_i32 : i32, i32
  }
  func.func @transform_2(%arg0: i32) -> (i32, i32) {
    %c0_i32 = arith.constant 0 : i32
    %c0_i32_0 = arith.constant 0 : i32
    %c0_i32_1 = arith.constant 0 : i32
    return %c0_i32, %c0_i32_0 : i32, i32
  }
  func.func @transform_3(%arg0: i32) -> (i32, i32) {
    %c0_i32 = arith.constant 0 : i32
    %c0_i32_0 = arith.constant 0 : i32
    %c0_i32_1 = arith.constant 0 : i32
    return %c0_i32, %c0_i32_0 : i32, i32
  }
  func.func @transform_4(%arg0: i32) -> (i32, i32) {
    %c0_i32 = arith.constant 0 : i32
    %c0_i32_0 = arith.constant 0 : i32
    %c0_i32_1 = arith.constant 0 : i32
    return %c0_i32, %c0_i32_0 : i32, i32
  }
  func.func @transform_5(%arg0: i32) -> (i32, i32) {
    %c0_i32 = arith.constant 0 : i32
    %c0_i32_0 = arith.constant 0 : i32
    %c0_i32_1 = arith.constant 0 : i32
    return %c0_i32, %c0_i32_0 : i32, i32
  }
  func.func @transform_6(%arg0: i32) -> (i32, i32) {
    %c0_i32 = arith.constant 0 : i32
    %c0_i32_0 = arith.constant 0 : i32
    return %arg0, %c0_i32 : i32, i32
  }
  func.func @transform_7(%arg0: i32) -> (i32, i32) {
    %c0_i32 = arith.constant 0 : i32
    %c0_i32_0 = arith.constant 0 : i32
    return %arg0, %c0_i32 : i32, i32
  }
}

module attributes {stable_mosaic.version = 11 : i64} {
  func.func @_opm_outer_kernel(%arg0: i32, %arg1: i32, %arg2: memref<1x4x256xbf16, #tpu.memory_space<vmem>>, %arg3: memref<1x4x256xbf16, #tpu.memory_space<vmem>>, %arg4: memref<1x256x256xf32, #tpu.memory_space<vmem>>) attributes {dimension_semantics = [#tpu.dimension_semantics<parallel>, #tpu.dimension_semantics<parallel>], iteration_bounds = array<i64: 2, 1>, scalar_prefetch = 0 : i64, scratch_operands = 0 : i64, tpu.core_type = #tpu.core_type<tc>, window_params = [{transform_indices = @transform_0, window_bounds = array<i64: 1, 4, 256>}, {transform_indices = @transform_1, window_bounds = array<i64: 1, 4, 256>}, {transform_indices = @transform_2, window_bounds = array<i64: 1, 256, 256>}]} {
    %c0 = arith.constant 0 : index
    %c0_0 = arith.constant 0 : index
    %c0_1 = arith.constant 0 : index
    %0 = vector.load %arg2[%c0, %c0_0, %c0_1] : memref<1x4x256xbf16, #tpu.memory_space<vmem>>, vector<1x4x256xbf16>
    %1 = vector.shape_cast %0 : vector<1x4x256xbf16> to vector<4x256xbf16>
    %c0_2 = arith.constant 0 : index
    %c0_3 = arith.constant 0 : index
    %c0_4 = arith.constant 0 : index
    %2 = vector.load %arg3[%c0_2, %c0_3, %c0_4] : memref<1x4x256xbf16, #tpu.memory_space<vmem>>, vector<1x4x256xbf16>
    %3 = vector.shape_cast %2 : vector<1x4x256xbf16> to vector<4x256xbf16>
    %cst = arith.constant dense<0.000000e+00> : vector<256x256xf32>
    %4 = tpu.matmul %1, %3, %cst {dimension_numbers = #tpu.dot_dimension_numbers<[0], [0], [1], [1], [0, 1, 1, 1], [], []>} : vector<4x256xbf16>, vector<4x256xbf16>, vector<256x256xf32> -> vector<256x256xf32>
    %c0_5 = arith.constant 0 : index
    %c0_6 = arith.constant 0 : index
    %c0_7 = arith.constant 0 : index
    %5 = vector.load %arg4[%c0_5, %c0_6, %c0_7] : memref<1x256x256xf32, #tpu.memory_space<vmem>>, vector<1x256x256xf32>
    %6 = vector.shape_cast %5 : vector<1x256x256xf32> to vector<256x256xf32>
    %7 = vector.shape_cast %4 : vector<256x256xf32> to vector<1x256x256xf32>
    tpu.vector_store %arg4[%c0_5, %c0_6, %c0_7], %7 {strides = array<i32>} : memref<1x256x256xf32, #tpu.memory_space<vmem>>, vector<1x256x256xf32>,
    return
  }
  func.func @transform_0(%arg0: i32, %arg1: i32) -> (i32, i32, i32) {
    %c0_i32 = arith.constant 0 : i32
    %c0_i32_0 = arith.constant 0 : i32
    return %arg0, %c0_i32, %arg1 : i32, i32, i32
  }
  func.func @transform_1(%arg0: i32, %arg1: i32) -> (i32, i32, i32) {
    %c0_i32 = arith.constant 0 : i32
    %c0_i32_0 = arith.constant 0 : i32
    %c0_i32_1 = arith.constant 0 : i32
    return %arg0, %c0_i32, %c0_i32_0 : i32, i32, i32
  }
  func.func @transform_2(%arg0: i32, %arg1: i32) -> (i32, i32, i32) {
    %c0_i32 = arith.constant 0 : i32
    %c0_i32_0 = arith.constant 0 : i32
    return %arg0, %arg1, %c0_i32 : i32, i32, i32
  }
}

module attributes {stable_mosaic.version = 11 : i64} {
  func.func @_linear_kernel(%arg0: i32, %arg1: memref<128x1024xf32, #tpu.memory_space<vmem>>, %arg2: memref<1024x16xbf16, #tpu.memory_space<vmem>>, %arg3: memref<1x16xf32, #tpu.memory_space<vmem>>, %arg4: memref<128x16xf32, #tpu.memory_space<vmem>>) attributes {dimension_semantics = [#tpu.dimension_semantics<parallel>], iteration_bounds = array<i64: 1>, scalar_prefetch = 0 : i64, scratch_operands = 0 : i64, tpu.core_type = #tpu.core_type<tc>, window_params = [{transform_indices = @transform_0, window_bounds = array<i64: 128, 1024>}, {pipeline_mode = #tpu.pipeline_mode<synchronous>, transform_indices = @transform_1, window_bounds = array<i64: 1024, 16>}, {pipeline_mode = #tpu.pipeline_mode<synchronous>, transform_indices = @transform_2, window_bounds = array<i64: 1, 16>}, {transform_indices = @transform_3, window_bounds = array<i64: 128, 16>}]} {
    %c0 = arith.constant 0 : index
    %c0_0 = arith.constant 0 : index
    %0 = vector.load %arg1[%c0, %c0_0] : memref<128x1024xf32, #tpu.memory_space<vmem>>, vector<128x1024xf32>
    %1 = arith.truncf %0 : vector<128x1024xf32> to vector<128x1024xbf16>
    %c0_1 = arith.constant 0 : index
    %c0_2 = arith.constant 0 : index
    %2 = vector.load %arg2[%c0_1, %c0_2] : memref<1024x16xbf16, #tpu.memory_space<vmem>>, vector<1024x16xbf16>
    %cst = arith.constant dense<0.000000e+00> : vector<128x16xf32>
    %3 = tpu.matmul %1, %2, %cst {dimension_numbers = #tpu.dot_dimension_numbers<[1], [0], [0], [1], [0, 0, 1, 1], [], []>} : vector<128x1024xbf16>, vector<1024x16xbf16>, vector<128x16xf32> -> vector<128x16xf32>
    %c0_3 = arith.constant 0 : index
    %c0_4 = arith.constant 0 : index
    %4 = vector.load %arg3[%c0_3, %c0_4] : memref<1x16xf32, #tpu.memory_space<vmem>>, vector<1x16xf32>
    %5 = vector.broadcast %4 : vector<1x16xf32> to vector<128x16xf32>
    %6 = arith.addf %3, %5 : vector<128x16xf32>
    %c0_5 = arith.constant 0 : index
    %c0_6 = arith.constant 0 : index
    %7 = vector.load %arg4[%c0_5, %c0_6] : memref<128x16xf32, #tpu.memory_space<vmem>>, vector<128x16xf32>
    tpu.vector_store %arg4[%c0_5, %c0_6], %6 {strides = array<i32>} : memref<128x16xf32, #tpu.memory_space<vmem>>, vector<128x16xf32>,
    return
  }
  func.func @transform_0(%arg0: i32) -> (i32, i32) {
    %c0_i32 = arith.constant 0 : i32
    %c0_i32_0 = arith.constant 0 : i32
    return %arg0, %c0_i32 : i32, i32
  }
  func.func @transform_1(%arg0: i32) -> (i32, i32) {
    %c0_i32 = arith.constant 0 : i32
    %c0_i32_0 = arith.constant 0 : i32
    %c0_i32_1 = arith.constant 0 : i32
    return %c0_i32, %c0_i32_0 : i32, i32
  }
  func.func @transform_2(%arg0: i32) -> (i32, i32) {
    %c0_i32 = arith.constant 0 : i32
    %c0_i32_0 = arith.constant 0 : i32
    %c0_i32_1 = arith.constant 0 : i32
    return %c0_i32, %c0_i32_0 : i32, i32
  }
  func.func @transform_3(%arg0: i32) -> (i32, i32) {
    %c0_i32 = arith.constant 0 : i32
    %c0_i32_0 = arith.constant 0 : i32
    return %arg0, %c0_i32 : i32, i32
  }
}

module attributes {stable_mosaic.version = 11 : i64} {
  func.func @_tri_proj_kernel(%arg0: i32, %arg1: memref<128x16xf32, #tpu.memory_space<vmem>>, %arg2: memref<128x1xf32, #tpu.memory_space<vmem>>, %arg3: memref<1x16xf32, #tpu.memory_space<vmem>>, %arg4: memref<1x16xf32, #tpu.memory_space<vmem>>, %arg5: memref<16x64xbf16, #tpu.memory_space<vmem>>, %arg6: memref<1x64xf32, #tpu.memory_space<vmem>>, %arg7: memref<128x16xbf16, #tpu.memory_space<vmem>>, %arg8: memref<128x16xbf16, #tpu.memory_space<vmem>>) attributes {dimension_semantics = [#tpu.dimension_semantics<parallel>], iteration_bounds = array<i64: 1>, scalar_prefetch = 0 : i64, scratch_operands = 0 : i64, tpu.core_type = #tpu.core_type<tc>, window_params = [{transform_indices = @transform_0, window_bounds = array<i64: 128, 16>}, {transform_indices = @transform_1, window_bounds = array<i64: 128, 1>}, {pipeline_mode = #tpu.pipeline_mode<synchronous>, transform_indices = @transform_2, window_bounds = array<i64: 1, 16>}, {pipeline_mode = #tpu.pipeline_mode<synchronous>, transform_indices = @transform_3, window_bounds = array<i64: 1, 16>}, {pipeline_mode = #tpu.pipeline_mode<synchronous>, transform_indices = @transform_4, window_bounds = array<i64: 16, 64>}, {pipeline_mode = #tpu.pipeline_mode<synchronous>, transform_indices = @transform_5, window_bounds = array<i64: 1, 64>}, {transform_indices = @transform_6, window_bounds = array<i64: 128, 16>}, {transform_indices = @transform_7, window_bounds = array<i64: 128, 16>}]} {
    %c0 = arith.constant 0 : index
    %c0_0 = arith.constant 0 : index
    %0 = vector.load %arg1[%c0, %c0_0] : memref<128x16xf32, #tpu.memory_space<vmem>>, vector<128x16xf32>
    %c0_1 = arith.constant 0 : index
    %c0_2 = arith.constant 0 : index
    %1 = vector.load %arg3[%c0_1, %c0_2] : memref<1x16xf32, #tpu.memory_space<vmem>>, vector<1x16xf32>
    %c0_3 = arith.constant 0 : index
    %c0_4 = arith.constant 0 : index
    %2 = vector.load %arg4[%c0_3, %c0_4] : memref<1x16xf32, #tpu.memory_space<vmem>>, vector<1x16xf32>
    %cst = arith.constant dense<0.000000e+00> : vector<128xf32>
    %3 = vector.multi_reduction <add>, %0, %cst [1] : vector<128x16xf32> to vector<128xf32>
    %4 = vector.shape_cast %3 : vector<128xf32> to vector<128x1xf32>
    %cst_5 = arith.constant 1.600000e+01 : f32
    %5 = vector.broadcast %cst_5 : f32 to vector<128x1xf32>
    %6 = arith.divf %4, %5 : vector<128x1xf32>
    %7 = vector.broadcast %6 : vector<128x1xf32> to vector<128x16xf32>
    %8 = arith.subf %0, %7 : vector<128x16xf32>
    %9 = arith.mulf %8, %8 : vector<128x16xf32>
    %cst_6 = arith.constant dense<0.000000e+00> : vector<128xf32>
    %10 = vector.multi_reduction <add>, %9, %cst_6 [1] : vector<128x16xf32> to vector<128xf32>
    %11 = vector.shape_cast %10 : vector<128xf32> to vector<128x1xf32>
    %cst_7 = arith.constant 1.600000e+01 : f32
    %12 = vector.broadcast %cst_7 : f32 to vector<128x1xf32>
    %13 = arith.divf %11, %12 : vector<128x1xf32>
    %cst_8 = arith.constant 9.99999974E-6 : f32
    %14 = vector.broadcast %cst_8 : f32 to vector<128x1xf32>
    %15 = arith.addf %13, %14 : vector<128x1xf32>
    %16 = math.rsqrt %15 : vector<128x1xf32>
    %17 = vector.broadcast %16 : vector<128x1xf32> to vector<128x16xf32>
    %18 = arith.mulf %8, %17 : vector<128x16xf32>
    %19 = vector.broadcast %1 : vector<1x16xf32> to vector<128x16xf32>
    %20 = arith.mulf %18, %19 : vector<128x16xf32>
    %21 = vector.broadcast %2 : vector<1x16xf32> to vector<128x16xf32>
    %22 = arith.addf %20, %21 : vector<128x16xf32>
    %23 = arith.truncf %22 : vector<128x16xf32> to vector<128x16xbf16>
    %c0_9 = arith.constant 0 : index
    %c0_10 = arith.constant 0 : index
    %24 = vector.load %arg5[%c0_9, %c0_10] : memref<16x64xbf16, #tpu.memory_space<vmem>>, vector<16x64xbf16>
    %cst_11 = arith.constant dense<0.000000e+00> : vector<128x64xf32>
    %25 = tpu.matmul %23, %24, %cst_11 {dimension_numbers = #tpu.dot_dimension_numbers<[1], [0], [0], [1], [0, 0, 1, 1], [], []>} : vector<128x16xbf16>, vector<16x64xbf16>, vector<128x64xf32> -> vector<128x64xf32>
    %c0_12 = arith.constant 0 : index
    %c0_13 = arith.constant 0 : index
    %26 = vector.load %arg6[%c0_12, %c0_13] : memref<1x64xf32, #tpu.memory_space<vmem>>, vector<1x64xf32>
    %27 = vector.broadcast %26 : vector<1x64xf32> to vector<128x64xf32>
    %28 = arith.addf %25, %27 : vector<128x64xf32>
    %c0_14 = arith.constant 0 : index
    %c0_15 = arith.constant 0 : index
    %29 = vector.load %arg2[%c0_14, %c0_15] : memref<128x1xf32, #tpu.memory_space<vmem>>, vector<128x1xf32>
    %30 = vector.extract_strided_slice %28 {offsets = [0, 0], sizes = [128, 16], strides = [1, 1]} : vector<128x64xf32> to vector<128x16xf32>
    %31 = vector.broadcast %29 : vector<128x1xf32> to vector<128x16xf32>
    %32 = arith.mulf %30, %31 : vector<128x16xf32>
    %33 = vector.extract_strided_slice %28 {offsets = [0, 16], sizes = [128, 16], strides = [1, 1]} : vector<128x64xf32> to vector<128x16xf32>
    %34 = arith.negf %33 : vector<128x16xf32>
    %35 = math.exp %34 : vector<128x16xf32>
    %cst_16 = arith.constant 1.000000e+00 : f32
    %36 = vector.broadcast %cst_16 : f32 to vector<128x16xf32>
    %37 = arith.addf %36, %35 : vector<128x16xf32>
    %38 = arith.divf %36, %37 : vector<128x16xf32>
    %39 = arith.mulf %32, %38 : vector<128x16xf32>
    %40 = vector.extract_strided_slice %28 {offsets = [0, 32], sizes = [128, 16], strides = [1, 1]} : vector<128x64xf32> to vector<128x16xf32>
    %41 = vector.broadcast %29 : vector<128x1xf32> to vector<128x16xf32>
    %42 = arith.mulf %40, %41 : vector<128x16xf32>
    %43 = vector.extract_strided_slice %28 {offsets = [0, 48], sizes = [128, 16], strides = [1, 1]} : vector<128x64xf32> to vector<128x16xf32>
    %44 = arith.negf %43 : vector<128x16xf32>
    %45 = math.exp %44 : vector<128x16xf32>
    %cst_17 = arith.constant 1.000000e+00 : f32
    %46 = vector.broadcast %cst_17 : f32 to vector<128x16xf32>
    %47 = arith.addf %46, %45 : vector<128x16xf32>
    %48 = arith.divf %46, %47 : vector<128x16xf32>
    %49 = arith.mulf %42, %48 : vector<128x16xf32>
    %50 = arith.truncf %39 : vector<128x16xf32> to vector<128x16xbf16>
    %c0_18 = arith.constant 0 : index
    %c0_19 = arith.constant 0 : index
    %51 = vector.load %arg7[%c0_18, %c0_19] : memref<128x16xbf16, #tpu.memory_space<vmem>>, vector<128x16xbf16>
    tpu.vector_store %arg7[%c0_18, %c0_19], %50 {strides = array<i32>} : memref<128x16xbf16, #tpu.memory_space<vmem>>, vector<128x16xbf16>,
    %52 = arith.truncf %49 : vector<128x16xf32> to vector<128x16xbf16>
    %c0_20 = arith.constant 0 : index
    %c0_21 = arith.constant 0 : index
    %53 = vector.load %arg8[%c0_20, %c0_21] : memref<128x16xbf16, #tpu.memory_space<vmem>>, vector<128x16xbf16>
    tpu.vector_store %arg8[%c0_20, %c0_21], %52 {strides = array<i32>} : memref<128x16xbf16, #tpu.memory_space<vmem>>, vector<128x16xbf16>,
    return
  }
  func.func @transform_0(%arg0: i32) -> (i32, i32) {
    %c0_i32 = arith.constant 0 : i32
    %c0_i32_0 = arith.constant 0 : i32
    return %arg0, %c0_i32 : i32, i32
  }
  func.func @transform_1(%arg0: i32) -> (i32, i32) {
    %c0_i32 = arith.constant 0 : i32
    %c0_i32_0 = arith.constant 0 : i32
    return %arg0, %c0_i32 : i32, i32
  }
  func.func @transform_2(%arg0: i32) -> (i32, i32) {
    %c0_i32 = arith.constant 0 : i32
    %c0_i32_0 = arith.constant 0 : i32
    %c0_i32_1 = arith.constant 0 : i32
    return %c0_i32, %c0_i32_0 : i32, i32
  }
  func.func @transform_3(%arg0: i32) -> (i32, i32) {
    %c0_i32 = arith.constant 0 : i32
    %c0_i32_0 = arith.constant 0 : i32
    %c0_i32_1 = arith.constant 0 : i32
    return %c0_i32, %c0_i32_0 : i32, i32
  }
  func.func @transform_4(%arg0: i32) -> (i32, i32) {
    %c0_i32 = arith.constant 0 : i32
    %c0_i32_0 = arith.constant 0 : i32
    %c0_i32_1 = arith.constant 0 : i32
    return %c0_i32, %c0_i32_0 : i32, i32
  }
  func.func @transform_5(%arg0: i32) -> (i32, i32) {
    %c0_i32 = arith.constant 0 : i32
    %c0_i32_0 = arith.constant 0 : i32
    %c0_i32_1 = arith.constant 0 : i32
    return %c0_i32, %c0_i32_0 : i32, i32
  }
  func.func @transform_6(%arg0: i32) -> (i32, i32) {
    %c0_i32 = arith.constant 0 : i32
    %c0_i32_0 = arith.constant 0 : i32
    return %arg0, %c0_i32 : i32, i32
  }
  func.func @transform_7(%arg0: i32) -> (i32, i32) {
    %c0_i32 = arith.constant 0 : i32
    %c0_i32_0 = arith.constant 0 : i32
    return %arg0, %c0_i32 : i32, i32
  }
}

module attributes {stable_mosaic.version = 11 : i64} {
  func.func @_tri_mix_kernel(%arg0: i32, %arg1: i32, %arg2: i32, %arg3: memref<1x1x8x8xbf16, #tpu.memory_space<vmem>>, %arg4: memref<1x1x8x8xbf16, #tpu.memory_space<vmem>>, %arg5: memref<1x1x8x8xf32, #tpu.memory_space<vmem>>) attributes {dimension_semantics = [#tpu.dimension_semantics<parallel>, #tpu.dimension_semantics<parallel>, #tpu.dimension_semantics<parallel>], iteration_bounds = array<i64: 2, 16, 1>, scalar_prefetch = 0 : i64, scratch_operands = 0 : i64, tpu.core_type = #tpu.core_type<tc>, window_params = [{transform_indices = @transform_0, window_bounds = array<i64: 1, 1, 8, 8>}, {transform_indices = @transform_1, window_bounds = array<i64: 1, 1, 8, 8>}, {transform_indices = @transform_2, window_bounds = array<i64: 1, 1, 8, 8>}]} {
    %c0 = arith.constant 0 : index
    %c0_0 = arith.constant 0 : index
    %c0_1 = arith.constant 0 : index
    %c0_2 = arith.constant 0 : index
    %0 = vector.load %arg3[%c0, %c0_0, %c0_1, %c0_2] : memref<1x1x8x8xbf16, #tpu.memory_space<vmem>>, vector<1x1x8x8xbf16>
    %1 = vector.shape_cast %0 : vector<1x1x8x8xbf16> to vector<8x8xbf16>
    %c0_3 = arith.constant 0 : index
    %c0_4 = arith.constant 0 : index
    %c0_5 = arith.constant 0 : index
    %c0_6 = arith.constant 0 : index
    %2 = vector.load %arg4[%c0_3, %c0_4, %c0_5, %c0_6] : memref<1x1x8x8xbf16, #tpu.memory_space<vmem>>, vector<1x1x8x8xbf16>
    %3 = vector.shape_cast %2 : vector<1x1x8x8xbf16> to vector<8x8xbf16>
    %cst = arith.constant dense<0.000000e+00> : vector<8x8xf32>
    %4 = tpu.matmul %1, %3, %cst {dimension_numbers = #tpu.dot_dimension_numbers<[1], [1], [0], [0], [0, 0, 1, 0], [], []>} : vector<8x8xbf16>, vector<8x8xbf16>, vector<8x8xf32> -> vector<8x8xf32>
    %c0_7 = arith.constant 0 : index
    %c0_8 = arith.constant 0 : index
    %c0_9 = arith.constant 0 : index
    %c0_10 = arith.constant 0 : index
    %5 = vector.load %arg5[%c0_7, %c0_8, %c0_9, %c0_10] : memref<1x1x8x8xf32, #tpu.memory_space<vmem>>, vector<1x1x8x8xf32>
    %6 = vector.shape_cast %5 : vector<1x1x8x8xf32> to vector<8x8xf32>
    %7 = vector.shape_cast %4 : vector<8x8xf32> to vector<1x1x8x8xf32>
    tpu.vector_store %arg5[%c0_7, %c0_8, %c0_9, %c0_10], %7 {strides = array<i32>} : memref<1x1x8x8xf32, #tpu.memory_space<vmem>>, vector<1x1x8x8xf32>,
    return
  }
  func.func @transform_0(%arg0: i32, %arg1: i32, %arg2: i32) -> (i32, i32, i32, i32) {
    %c0_i32 = arith.constant 0 : i32
    %c0_i32_0 = arith.constant 0 : i32
    return %arg0, %arg1, %arg2, %c0_i32 : i32, i32, i32, i32
  }
  func.func @transform_1(%arg0: i32, %arg1: i32, %arg2: i32) -> (i32, i32, i32, i32) {
    %c0_i32 = arith.constant 0 : i32
    %c0_i32_0 = arith.constant 0 : i32
    %c0_i32_1 = arith.constant 0 : i32
    return %arg0, %arg1, %c0_i32, %c0_i32_0 : i32, i32, i32, i32
  }
  func.func @transform_2(%arg0: i32, %arg1: i32, %arg2: i32) -> (i32, i32, i32, i32) {
    %c0_i32 = arith.constant 0 : i32
    %c0_i32_0 = arith.constant 0 : i32
    return %arg0, %arg1, %arg2, %c0_i32 : i32, i32, i32, i32
  }
}

module attributes {stable_mosaic.version = 11 : i64} {
  func.func @_tri_out_kernel(%arg0: i32, %arg1: memref<128x16xf32, #tpu.memory_space<vmem>>, %arg2: memref<128x16xf32, #tpu.memory_space<vmem>>, %arg3: memref<1x16xf32, #tpu.memory_space<vmem>>, %arg4: memref<1x16xf32, #tpu.memory_space<vmem>>, %arg5: memref<1x16xf32, #tpu.memory_space<vmem>>, %arg6: memref<1x16xf32, #tpu.memory_space<vmem>>, %arg7: memref<16x16xbf16, #tpu.memory_space<vmem>>, %arg8: memref<1x16xf32, #tpu.memory_space<vmem>>, %arg9: memref<16x16xbf16, #tpu.memory_space<vmem>>, %arg10: memref<1x16xf32, #tpu.memory_space<vmem>>, %arg11: memref<128x16xf32, #tpu.memory_space<vmem>>) attributes {dimension_semantics = [#tpu.dimension_semantics<parallel>], iteration_bounds = array<i64: 1>, scalar_prefetch = 0 : i64, scratch_operands = 0 : i64, tpu.core_type = #tpu.core_type<tc>, window_params = [{transform_indices = @transform_0, window_bounds = array<i64: 128, 16>}, {transform_indices = @transform_1, window_bounds = array<i64: 128, 16>}, {pipeline_mode = #tpu.pipeline_mode<synchronous>, transform_indices = @transform_2, window_bounds = array<i64: 1, 16>}, {pipeline_mode = #tpu.pipeline_mode<synchronous>, transform_indices = @transform_3, window_bounds = array<i64: 1, 16>}, {pipeline_mode = #tpu.pipeline_mode<synchronous>, transform_indices = @transform_4, window_bounds = array<i64: 1, 16>}, {pipeline_mode = #tpu.pipeline_mode<synchronous>, transform_indices = @transform_5, window_bounds = array<i64: 1, 16>}, {pipeline_mode = #tpu.pipeline_mode<synchronous>, transform_indices = @transform_6, window_bounds = array<i64: 16, 16>}, {pipeline_mode = #tpu.pipeline_mode<synchronous>, transform_indices = @transform_7, window_bounds = array<i64: 1, 16>}, {pipeline_mode = #tpu.pipeline_mode<synchronous>, transform_indices = @transform_8, window_bounds = array<i64: 16, 16>}, {pipeline_mode = #tpu.pipeline_mode<synchronous>, transform_indices = @transform_9, window_bounds = array<i64: 1, 16>}, {transform_indices = @transform_10, window_bounds = array<i64: 128, 16>}]} {
    %c0 = arith.constant 0 : index
    %c0_0 = arith.constant 0 : index
    %0 = vector.load %arg2[%c0, %c0_0] : memref<128x16xf32, #tpu.memory_space<vmem>>, vector<128x16xf32>
    %c0_1 = arith.constant 0 : index
    %c0_2 = arith.constant 0 : index
    %1 = vector.load %arg3[%c0_1, %c0_2] : memref<1x16xf32, #tpu.memory_space<vmem>>, vector<1x16xf32>
    %c0_3 = arith.constant 0 : index
    %c0_4 = arith.constant 0 : index
    %2 = vector.load %arg4[%c0_3, %c0_4] : memref<1x16xf32, #tpu.memory_space<vmem>>, vector<1x16xf32>
    %cst = arith.constant dense<0.000000e+00> : vector<128xf32>
    %3 = vector.multi_reduction <add>, %0, %cst [1] : vector<128x16xf32> to vector<128xf32>
    %4 = vector.shape_cast %3 : vector<128xf32> to vector<128x1xf32>
    %cst_5 = arith.constant 1.600000e+01 : f32
    %5 = vector.broadcast %cst_5 : f32 to vector<128x1xf32>
    %6 = arith.divf %4, %5 : vector<128x1xf32>
    %7 = vector.broadcast %6 : vector<128x1xf32> to vector<128x16xf32>
    %8 = arith.subf %0, %7 : vector<128x16xf32>
    %9 = arith.mulf %8, %8 : vector<128x16xf32>
    %cst_6 = arith.constant dense<0.000000e+00> : vector<128xf32>
    %10 = vector.multi_reduction <add>, %9, %cst_6 [1] : vector<128x16xf32> to vector<128xf32>
    %11 = vector.shape_cast %10 : vector<128xf32> to vector<128x1xf32>
    %cst_7 = arith.constant 1.600000e+01 : f32
    %12 = vector.broadcast %cst_7 : f32 to vector<128x1xf32>
    %13 = arith.divf %11, %12 : vector<128x1xf32>
    %cst_8 = arith.constant 9.99999974E-6 : f32
    %14 = vector.broadcast %cst_8 : f32 to vector<128x1xf32>
    %15 = arith.addf %13, %14 : vector<128x1xf32>
    %16 = math.rsqrt %15 : vector<128x1xf32>
    %17 = vector.broadcast %16 : vector<128x1xf32> to vector<128x16xf32>
    %18 = arith.mulf %8, %17 : vector<128x16xf32>
    %19 = vector.broadcast %1 : vector<1x16xf32> to vector<128x16xf32>
    %20 = arith.mulf %18, %19 : vector<128x16xf32>
    %21 = vector.broadcast %2 : vector<1x16xf32> to vector<128x16xf32>
    %22 = arith.addf %20, %21 : vector<128x16xf32>
    %c0_9 = arith.constant 0 : index
    %c0_10 = arith.constant 0 : index
    %23 = vector.load %arg1[%c0_9, %c0_10] : memref<128x16xf32, #tpu.memory_space<vmem>>, vector<128x16xf32>
    %c0_11 = arith.constant 0 : index
    %c0_12 = arith.constant 0 : index
    %24 = vector.load %arg5[%c0_11, %c0_12] : memref<1x16xf32, #tpu.memory_space<vmem>>, vector<1x16xf32>
    %c0_13 = arith.constant 0 : index
    %c0_14 = arith.constant 0 : index
    %25 = vector.load %arg6[%c0_13, %c0_14] : memref<1x16xf32, #tpu.memory_space<vmem>>, vector<1x16xf32>
    %cst_15 = arith.constant dense<0.000000e+00> : vector<128xf32>
    %26 = vector.multi_reduction <add>, %23, %cst_15 [1] : vector<128x16xf32> to vector<128xf32>
    %27 = vector.shape_cast %26 : vector<128xf32> to vector<128x1xf32>
    %cst_16 = arith.constant 1.600000e+01 : f32
    %28 = vector.broadcast %cst_16 : f32 to vector<128x1xf32>
    %29 = arith.divf %27, %28 : vector<128x1xf32>
    %30 = vector.broadcast %29 : vector<128x1xf32> to vector<128x16xf32>
    %31 = arith.subf %23, %30 : vector<128x16xf32>
    %32 = arith.mulf %31, %31 : vector<128x16xf32>
    %cst_17 = arith.constant dense<0.000000e+00> : vector<128xf32>
    %33 = vector.multi_reduction <add>, %32, %cst_17 [1] : vector<128x16xf32> to vector<128xf32>
    %34 = vector.shape_cast %33 : vector<128xf32> to vector<128x1xf32>
    %cst_18 = arith.constant 1.600000e+01 : f32
    %35 = vector.broadcast %cst_18 : f32 to vector<128x1xf32>
    %36 = arith.divf %34, %35 : vector<128x1xf32>
    %cst_19 = arith.constant 9.99999974E-6 : f32
    %37 = vector.broadcast %cst_19 : f32 to vector<128x1xf32>
    %38 = arith.addf %36, %37 : vector<128x1xf32>
    %39 = math.rsqrt %38 : vector<128x1xf32>
    %40 = vector.broadcast %39 : vector<128x1xf32> to vector<128x16xf32>
    %41 = arith.mulf %31, %40 : vector<128x16xf32>
    %42 = vector.broadcast %24 : vector<1x16xf32> to vector<128x16xf32>
    %43 = arith.mulf %41, %42 : vector<128x16xf32>
    %44 = vector.broadcast %25 : vector<1x16xf32> to vector<128x16xf32>
    %45 = arith.addf %43, %44 : vector<128x16xf32>
    %46 = arith.truncf %22 : vector<128x16xf32> to vector<128x16xbf16>
    %c0_20 = arith.constant 0 : index
    %c0_21 = arith.constant 0 : index
    %47 = vector.load %arg7[%c0_20, %c0_21] : memref<16x16xbf16, #tpu.memory_space<vmem>>, vector<16x16xbf16>
    %cst_22 = arith.constant dense<0.000000e+00> : vector<128x16xf32>
    %48 = tpu.matmul %46, %47, %cst_22 {dimension_numbers = #tpu.dot_dimension_numbers<[1], [0], [0], [1], [0, 0, 1, 1], [], []>} : vector<128x16xbf16>, vector<16x16xbf16>, vector<128x16xf32> -> vector<128x16xf32>
    %c0_23 = arith.constant 0 : index
    %c0_24 = arith.constant 0 : index
    %49 = vector.load %arg8[%c0_23, %c0_24] : memref<1x16xf32, #tpu.memory_space<vmem>>, vector<1x16xf32>
    %50 = vector.broadcast %49 : vector<1x16xf32> to vector<128x16xf32>
    %51 = arith.addf %48, %50 : vector<128x16xf32>
    %52 = arith.negf %51 : vector<128x16xf32>
    %53 = math.exp %52 : vector<128x16xf32>
    %cst_25 = arith.constant 1.000000e+00 : f32
    %54 = vector.broadcast %cst_25 : f32 to vector<128x16xf32>
    %55 = arith.addf %54, %53 : vector<128x16xf32>
    %56 = arith.divf %54, %55 : vector<128x16xf32>
    %57 = arith.mulf %45, %56 : vector<128x16xf32>
    %58 = arith.truncf %57 : vector<128x16xf32> to vector<128x16xbf16>
    %c0_26 = arith.constant 0 : index
    %c0_27 = arith.constant 0 : index
    %59 = vector.load %arg9[%c0_26, %c0_27] : memref<16x16xbf16, #tpu.memory_space<vmem>>, vector<16x16xbf16>
    %cst_28 = arith.constant dense<0.000000e+00> : vector<128x16xf32>
    %60 = tpu.matmul %58, %59, %cst_28 {dimension_numbers = #tpu.dot_dimension_numbers<[1], [0], [0], [1], [0, 0, 1, 1], [], []>} : vector<128x16xbf16>, vector<16x16xbf16>, vector<128x16xf32> -> vector<128x16xf32>
    %c0_29 = arith.constant 0 : index
    %c0_30 = arith.constant 0 : index
    %61 = vector.load %arg10[%c0_29, %c0_30] : memref<1x16xf32, #tpu.memory_space<vmem>>, vector<1x16xf32>
    %62 = vector.broadcast %61 : vector<1x16xf32> to vector<128x16xf32>
    %63 = arith.addf %60, %62 : vector<128x16xf32>
    %c0_31 = arith.constant 0 : index
    %c0_32 = arith.constant 0 : index
    %64 = vector.load %arg11[%c0_31, %c0_32] : memref<128x16xf32, #tpu.memory_space<vmem>>, vector<128x16xf32>
    tpu.vector_store %arg11[%c0_31, %c0_32], %63 {strides = array<i32>} : memref<128x16xf32, #tpu.memory_space<vmem>>, vector<128x16xf32>,
    return
  }
  func.func @transform_0(%arg0: i32) -> (i32, i32) {
    %c0_i32 = arith.constant 0 : i32
    %c0_i32_0 = arith.constant 0 : i32
    return %arg0, %c0_i32 : i32, i32
  }
  func.func @transform_1(%arg0: i32) -> (i32, i32) {
    %c0_i32 = arith.constant 0 : i32
    %c0_i32_0 = arith.constant 0 : i32
    return %arg0, %c0_i32 : i32, i32
  }
  func.func @transform_2(%arg0: i32) -> (i32, i32) {
    %c0_i32 = arith.constant 0 : i32
    %c0_i32_0 = arith.constant 0 : i32
    %c0_i32_1 = arith.constant 0 : i32
    return %c0_i32, %c0_i32_0 : i32, i32
  }
  func.func @transform_3(%arg0: i32) -> (i32, i32) {
    %c0_i32 = arith.constant 0 : i32
    %c0_i32_0 = arith.constant 0 : i32
    %c0_i32_1 = arith.constant 0 : i32
    return %c0_i32, %c0_i32_0 : i32, i32
  }
  func.func @transform_4(%arg0: i32) -> (i32, i32) {
    %c0_i32 = arith.constant 0 : i32
    %c0_i32_0 = arith.constant 0 : i32
    %c0_i32_1 = arith.constant 0 : i32
    return %c0_i32, %c0_i32_0 : i32, i32
  }
  func.func @transform_5(%arg0: i32) -> (i32, i32) {
    %c0_i32 = arith.constant 0 : i32
    %c0_i32_0 = arith.constant 0 : i32
    %c0_i32_1 = arith.constant 0 : i32
    return %c0_i32, %c0_i32_0 : i32, i32
  }
  func.func @transform_6(%arg0: i32) -> (i32, i32) {
    %c0_i32 = arith.constant 0 : i32
    %c0_i32_0 = arith.constant 0 : i32
    %c0_i32_1 = arith.constant 0 : i32
    return %c0_i32, %c0_i32_0 : i32, i32
  }
  func.func @transform_7(%arg0: i32) -> (i32, i32) {
    %c0_i32 = arith.constant 0 : i32
    %c0_i32_0 = arith.constant 0 : i32
    %c0_i32_1 = arith.constant 0 : i32
    return %c0_i32, %c0_i32_0 : i32, i32
  }
  func.func @transform_8(%arg0: i32) -> (i32, i32) {
    %c0_i32 = arith.constant 0 : i32
    %c0_i32_0 = arith.constant 0 : i32
    %c0_i32_1 = arith.constant 0 : i32
    return %c0_i32, %c0_i32_0 : i32, i32
  }
  func.func @transform_9(%arg0: i32) -> (i32, i32) {
    %c0_i32 = arith.constant 0 : i32
    %c0_i32_0 = arith.constant 0 : i32
    %c0_i32_1 = arith.constant 0 : i32
    return %c0_i32, %c0_i32_0 : i32, i32
  }
  func.func @transform_10(%arg0: i32) -> (i32, i32) {
    %c0_i32 = arith.constant 0 : i32
    %c0_i32_0 = arith.constant 0 : i32
    return %arg0, %c0_i32 : i32, i32
  }
}

module attributes {stable_mosaic.version = 11 : i64} {
  func.func @_tri_mix_kernel(%arg0: i32, %arg1: i32, %arg2: i32, %arg3: memref<1x1x8x8xbf16, #tpu.memory_space<vmem>>, %arg4: memref<1x1x8x8xbf16, #tpu.memory_space<vmem>>, %arg5: memref<1x1x8x8xf32, #tpu.memory_space<vmem>>) attributes {dimension_semantics = [#tpu.dimension_semantics<parallel>, #tpu.dimension_semantics<parallel>, #tpu.dimension_semantics<parallel>], iteration_bounds = array<i64: 2, 16, 1>, scalar_prefetch = 0 : i64, scratch_operands = 0 : i64, tpu.core_type = #tpu.core_type<tc>, window_params = [{transform_indices = @transform_0, window_bounds = array<i64: 1, 1, 8, 8>}, {transform_indices = @transform_1, window_bounds = array<i64: 1, 1, 8, 8>}, {transform_indices = @transform_2, window_bounds = array<i64: 1, 1, 8, 8>}]} {
    %c0 = arith.constant 0 : index
    %c0_0 = arith.constant 0 : index
    %c0_1 = arith.constant 0 : index
    %c0_2 = arith.constant 0 : index
    %0 = vector.load %arg3[%c0, %c0_0, %c0_1, %c0_2] : memref<1x1x8x8xbf16, #tpu.memory_space<vmem>>, vector<1x1x8x8xbf16>
    %1 = vector.shape_cast %0 : vector<1x1x8x8xbf16> to vector<8x8xbf16>
    %c0_3 = arith.constant 0 : index
    %c0_4 = arith.constant 0 : index
    %c0_5 = arith.constant 0 : index
    %c0_6 = arith.constant 0 : index
    %2 = vector.load %arg4[%c0_3, %c0_4, %c0_5, %c0_6] : memref<1x1x8x8xbf16, #tpu.memory_space<vmem>>, vector<1x1x8x8xbf16>
    %3 = vector.shape_cast %2 : vector<1x1x8x8xbf16> to vector<8x8xbf16>
    %cst = arith.constant dense<0.000000e+00> : vector<8x8xf32>
    %4 = tpu.matmul %1, %3, %cst {dimension_numbers = #tpu.dot_dimension_numbers<[0], [0], [1], [1], [0, 1, 1, 1], [], []>} : vector<8x8xbf16>, vector<8x8xbf16>, vector<8x8xf32> -> vector<8x8xf32>
    %c0_7 = arith.constant 0 : index
    %c0_8 = arith.constant 0 : index
    %c0_9 = arith.constant 0 : index
    %c0_10 = arith.constant 0 : index
    %5 = vector.load %arg5[%c0_7, %c0_8, %c0_9, %c0_10] : memref<1x1x8x8xf32, #tpu.memory_space<vmem>>, vector<1x1x8x8xf32>
    %6 = vector.shape_cast %5 : vector<1x1x8x8xf32> to vector<8x8xf32>
    %7 = vector.shape_cast %4 : vector<8x8xf32> to vector<1x1x8x8xf32>
    tpu.vector_store %arg5[%c0_7, %c0_8, %c0_9, %c0_10], %7 {strides = array<i32>} : memref<1x1x8x8xf32, #tpu.memory_space<vmem>>, vector<1x1x8x8xf32>,
    return
  }
  func.func @transform_0(%arg0: i32, %arg1: i32, %arg2: i32) -> (i32, i32, i32, i32) {
    %c0_i32 = arith.constant 0 : i32
    %c0_i32_0 = arith.constant 0 : i32
    return %arg0, %arg1, %c0_i32, %arg2 : i32, i32, i32, i32
  }
  func.func @transform_1(%arg0: i32, %arg1: i32, %arg2: i32) -> (i32, i32, i32, i32) {
    %c0_i32 = arith.constant 0 : i32
    %c0_i32_0 = arith.constant 0 : i32
    %c0_i32_1 = arith.constant 0 : i32
    return %arg0, %arg1, %c0_i32, %c0_i32_0 : i32, i32, i32, i32
  }
  func.func @transform_2(%arg0: i32, %arg1: i32, %arg2: i32) -> (i32, i32, i32, i32) {
    %c0_i32 = arith.constant 0 : i32
    %c0_i32_0 = arith.constant 0 : i32
    return %arg0, %arg1, %arg2, %c0_i32 : i32, i32, i32, i32
  }
}

module attributes {stable_mosaic.version = 11 : i64} {
  func.func @_axial_proj_kernel(%arg0: i32, %arg1: memref<128x16xf32, #tpu.memory_space<vmem>>, %arg2: memref<1x16xf32, #tpu.memory_space<vmem>>, %arg3: memref<1x16xf32, #tpu.memory_space<vmem>>, %arg4: memref<1x16xf32, #tpu.memory_space<vmem>>, %arg5: memref<1x16xf32, #tpu.memory_space<vmem>>, %arg6: memref<16x64xbf16, #tpu.memory_space<vmem>>, %arg7: memref<1x64xf32, #tpu.memory_space<vmem>>, %arg8: memref<16x2xbf16, #tpu.memory_space<vmem>>, %arg9: memref<128x48xbf16, #tpu.memory_space<vmem>>, %arg10: memref<128x16xf32, #tpu.memory_space<vmem>>, %arg11: memref<128x2xf32, #tpu.memory_space<vmem>>) attributes {dimension_semantics = [#tpu.dimension_semantics<parallel>], iteration_bounds = array<i64: 1>, scalar_prefetch = 0 : i64, scratch_operands = 0 : i64, tpu.core_type = #tpu.core_type<tc>, window_params = [{transform_indices = @transform_0, window_bounds = array<i64: 128, 16>}, {pipeline_mode = #tpu.pipeline_mode<synchronous>, transform_indices = @transform_1, window_bounds = array<i64: 1, 16>}, {pipeline_mode = #tpu.pipeline_mode<synchronous>, transform_indices = @transform_2, window_bounds = array<i64: 1, 16>}, {pipeline_mode = #tpu.pipeline_mode<synchronous>, transform_indices = @transform_3, window_bounds = array<i64: 1, 16>}, {pipeline_mode = #tpu.pipeline_mode<synchronous>, transform_indices = @transform_4, window_bounds = array<i64: 1, 16>}, {pipeline_mode = #tpu.pipeline_mode<synchronous>, transform_indices = @transform_5, window_bounds = array<i64: 16, 64>}, {pipeline_mode = #tpu.pipeline_mode<synchronous>, transform_indices = @transform_6, window_bounds = array<i64: 1, 64>}, {pipeline_mode = #tpu.pipeline_mode<synchronous>, transform_indices = @transform_7, window_bounds = array<i64: 16, 2>}, {transform_indices = @transform_8, window_bounds = array<i64: 128, 48>}, {transform_indices = @transform_9, window_bounds = array<i64: 128, 16>}, {transform_indices = @transform_10, window_bounds = array<i64: 128, 2>}]} {
    %c0 = arith.constant 0 : index
    %c0_0 = arith.constant 0 : index
    %0 = vector.load %arg1[%c0, %c0_0] : memref<128x16xf32, #tpu.memory_space<vmem>>, vector<128x16xf32>
    %c0_1 = arith.constant 0 : index
    %c0_2 = arith.constant 0 : index
    %1 = vector.load %arg2[%c0_1, %c0_2] : memref<1x16xf32, #tpu.memory_space<vmem>>, vector<1x16xf32>
    %c0_3 = arith.constant 0 : index
    %c0_4 = arith.constant 0 : index
    %2 = vector.load %arg3[%c0_3, %c0_4] : memref<1x16xf32, #tpu.memory_space<vmem>>, vector<1x16xf32>
    %cst = arith.constant dense<0.000000e+00> : vector<128xf32>
    %3 = vector.multi_reduction <add>, %0, %cst [1] : vector<128x16xf32> to vector<128xf32>
    %4 = vector.shape_cast %3 : vector<128xf32> to vector<128x1xf32>
    %cst_5 = arith.constant 1.600000e+01 : f32
    %5 = vector.broadcast %cst_5 : f32 to vector<128x1xf32>
    %6 = arith.divf %4, %5 : vector<128x1xf32>
    %7 = vector.broadcast %6 : vector<128x1xf32> to vector<128x16xf32>
    %8 = arith.subf %0, %7 : vector<128x16xf32>
    %9 = arith.mulf %8, %8 : vector<128x16xf32>
    %cst_6 = arith.constant dense<0.000000e+00> : vector<128xf32>
    %10 = vector.multi_reduction <add>, %9, %cst_6 [1] : vector<128x16xf32> to vector<128xf32>
    %11 = vector.shape_cast %10 : vector<128xf32> to vector<128x1xf32>
    %cst_7 = arith.constant 1.600000e+01 : f32
    %12 = vector.broadcast %cst_7 : f32 to vector<128x1xf32>
    %13 = arith.divf %11, %12 : vector<128x1xf32>
    %cst_8 = arith.constant 9.99999974E-6 : f32
    %14 = vector.broadcast %cst_8 : f32 to vector<128x1xf32>
    %15 = arith.addf %13, %14 : vector<128x1xf32>
    %16 = math.rsqrt %15 : vector<128x1xf32>
    %17 = vector.broadcast %16 : vector<128x1xf32> to vector<128x16xf32>
    %18 = arith.mulf %8, %17 : vector<128x16xf32>
    %19 = vector.broadcast %1 : vector<1x16xf32> to vector<128x16xf32>
    %20 = arith.mulf %18, %19 : vector<128x16xf32>
    %21 = vector.broadcast %2 : vector<1x16xf32> to vector<128x16xf32>
    %22 = arith.addf %20, %21 : vector<128x16xf32>
    %c0_9 = arith.constant 0 : index
    %c0_10 = arith.constant 0 : index
    %23 = vector.load %arg4[%c0_9, %c0_10] : memref<1x16xf32, #tpu.memory_space<vmem>>, vector<1x16xf32>
    %c0_11 = arith.constant 0 : index
    %c0_12 = arith.constant 0 : index
    %24 = vector.load %arg5[%c0_11, %c0_12] : memref<1x16xf32, #tpu.memory_space<vmem>>, vector<1x16xf32>
    %cst_13 = arith.constant dense<0.000000e+00> : vector<128xf32>
    %25 = vector.multi_reduction <add>, %0, %cst_13 [1] : vector<128x16xf32> to vector<128xf32>
    %26 = vector.shape_cast %25 : vector<128xf32> to vector<128x1xf32>
    %cst_14 = arith.constant 1.600000e+01 : f32
    %27 = vector.broadcast %cst_14 : f32 to vector<128x1xf32>
    %28 = arith.divf %26, %27 : vector<128x1xf32>
    %29 = vector.broadcast %28 : vector<128x1xf32> to vector<128x16xf32>
    %30 = arith.subf %0, %29 : vector<128x16xf32>
    %31 = arith.mulf %30, %30 : vector<128x16xf32>
    %cst_15 = arith.constant dense<0.000000e+00> : vector<128xf32>
    %32 = vector.multi_reduction <add>, %31, %cst_15 [1] : vector<128x16xf32> to vector<128xf32>
    %33 = vector.shape_cast %32 : vector<128xf32> to vector<128x1xf32>
    %cst_16 = arith.constant 1.600000e+01 : f32
    %34 = vector.broadcast %cst_16 : f32 to vector<128x1xf32>
    %35 = arith.divf %33, %34 : vector<128x1xf32>
    %cst_17 = arith.constant 9.99999974E-6 : f32
    %36 = vector.broadcast %cst_17 : f32 to vector<128x1xf32>
    %37 = arith.addf %35, %36 : vector<128x1xf32>
    %38 = math.rsqrt %37 : vector<128x1xf32>
    %39 = vector.broadcast %38 : vector<128x1xf32> to vector<128x16xf32>
    %40 = arith.mulf %30, %39 : vector<128x16xf32>
    %41 = vector.broadcast %23 : vector<1x16xf32> to vector<128x16xf32>
    %42 = arith.mulf %40, %41 : vector<128x16xf32>
    %43 = vector.broadcast %24 : vector<1x16xf32> to vector<128x16xf32>
    %44 = arith.addf %42, %43 : vector<128x16xf32>
    %45 = arith.truncf %22 : vector<128x16xf32> to vector<128x16xbf16>
    %c0_18 = arith.constant 0 : index
    %c0_19 = arith.constant 0 : index
    %46 = vector.load %arg6[%c0_18, %c0_19] : memref<16x64xbf16, #tpu.memory_space<vmem>>, vector<16x64xbf16>
    %cst_20 = arith.constant dense<0.000000e+00> : vector<128x64xf32>
    %47 = tpu.matmul %45, %46, %cst_20 {dimension_numbers = #tpu.dot_dimension_numbers<[1], [0], [0], [1], [0, 0, 1, 1], [], []>} : vector<128x16xbf16>, vector<16x64xbf16>, vector<128x64xf32> -> vector<128x64xf32>
    %c0_21 = arith.constant 0 : index
    %c0_22 = arith.constant 0 : index
    %48 = vector.load %arg7[%c0_21, %c0_22] : memref<1x64xf32, #tpu.memory_space<vmem>>, vector<1x64xf32>
    %49 = vector.broadcast %48 : vector<1x64xf32> to vector<128x64xf32>
    %50 = arith.addf %47, %49 : vector<128x64xf32>
    %51 = vector.extract_strided_slice %50 {offsets = [0, 0], sizes = [128, 48], strides = [1, 1]} : vector<128x64xf32> to vector<128x48xf32>
    %52 = arith.truncf %51 : vector<128x48xf32> to vector<128x48xbf16>
    %c0_23 = arith.constant 0 : index
    %c0_24 = arith.constant 0 : index
    %53 = vector.load %arg9[%c0_23, %c0_24] : memref<128x48xbf16, #tpu.memory_space<vmem>>, vector<128x48xbf16>
    tpu.vector_store %arg9[%c0_23, %c0_24], %52 {strides = array<i32>} : memref<128x48xbf16, #tpu.memory_space<vmem>>, vector<128x48xbf16>,
    %54 = vector.extract_strided_slice %50 {offsets = [0, 48], sizes = [128, 16], strides = [1, 1]} : vector<128x64xf32> to vector<128x16xf32>
    %c0_25 = arith.constant 0 : index
    %c0_26 = arith.constant 0 : index
    %55 = vector.load %arg10[%c0_25, %c0_26] : memref<128x16xf32, #tpu.memory_space<vmem>>, vector<128x16xf32>
    tpu.vector_store %arg10[%c0_25, %c0_26], %54 {strides = array<i32>} : memref<128x16xf32, #tpu.memory_space<vmem>>, vector<128x16xf32>,
    %56 = arith.truncf %44 : vector<128x16xf32> to vector<128x16xbf16>
    %c0_27 = arith.constant 0 : index
    %c0_28 = arith.constant 0 : index
    %57 = vector.load %arg8[%c0_27, %c0_28] : memref<16x2xbf16, #tpu.memory_space<vmem>>, vector<16x2xbf16>
    %cst_29 = arith.constant dense<0.000000e+00> : vector<128x2xf32>
    %58 = tpu.matmul %56, %57, %cst_29 {dimension_numbers = #tpu.dot_dimension_numbers<[1], [0], [0], [1], [0, 0, 1, 1], [], []>} : vector<128x16xbf16>, vector<16x2xbf16>, vector<128x2xf32> -> vector<128x2xf32>
    %c0_30 = arith.constant 0 : index
    %c0_31 = arith.constant 0 : index
    %59 = vector.load %arg11[%c0_30, %c0_31] : memref<128x2xf32, #tpu.memory_space<vmem>>, vector<128x2xf32>
    tpu.vector_store %arg11[%c0_30, %c0_31], %58 {strides = array<i32>} : memref<128x2xf32, #tpu.memory_space<vmem>>, vector<128x2xf32>,
    return
  }
  func.func @transform_0(%arg0: i32) -> (i32, i32) {
    %c0_i32 = arith.constant 0 : i32
    %c0_i32_0 = arith.constant 0 : i32
    return %arg0, %c0_i32 : i32, i32
  }
  func.func @transform_1(%arg0: i32) -> (i32, i32) {
    %c0_i32 = arith.constant 0 : i32
    %c0_i32_0 = arith.constant 0 : i32
    %c0_i32_1 = arith.constant 0 : i32
    return %c0_i32, %c0_i32_0 : i32, i32
  }
  func.func @transform_2(%arg0: i32) -> (i32, i32) {
    %c0_i32 = arith.constant 0 : i32
    %c0_i32_0 = arith.constant 0 : i32
    %c0_i32_1 = arith.constant 0 : i32
    return %c0_i32, %c0_i32_0 : i32, i32
  }
  func.func @transform_3(%arg0: i32) -> (i32, i32) {
    %c0_i32 = arith.constant 0 : i32
    %c0_i32_0 = arith.constant 0 : i32
    %c0_i32_1 = arith.constant 0 : i32
    return %c0_i32, %c0_i32_0 : i32, i32
  }
  func.func @transform_4(%arg0: i32) -> (i32, i32) {
    %c0_i32 = arith.constant 0 : i32
    %c0_i32_0 = arith.constant 0 : i32
    %c0_i32_1 = arith.constant 0 : i32
    return %c0_i32, %c0_i32_0 : i32, i32
  }
  func.func @transform_5(%arg0: i32) -> (i32, i32) {
    %c0_i32 = arith.constant 0 : i32
    %c0_i32_0 = arith.constant 0 : i32
    %c0_i32_1 = arith.constant 0 : i32
    return %c0_i32, %c0_i32_0 : i32, i32
  }
  func.func @transform_6(%arg0: i32) -> (i32, i32) {
    %c0_i32 = arith.constant 0 : i32
    %c0_i32_0 = arith.constant 0 : i32
    %c0_i32_1 = arith.constant 0 : i32
    return %c0_i32, %c0_i32_0 : i32, i32
  }
  func.func @transform_7(%arg0: i32) -> (i32, i32) {
    %c0_i32 = arith.constant 0 : i32
    %c0_i32_0 = arith.constant 0 : i32
    %c0_i32_1 = arith.constant 0 : i32
    return %c0_i32, %c0_i32_0 : i32, i32
  }
  func.func @transform_8(%arg0: i32) -> (i32, i32) {
    %c0_i32 = arith.constant 0 : i32
    %c0_i32_0 = arith.constant 0 : i32
    return %arg0, %c0_i32 : i32, i32
  }
  func.func @transform_9(%arg0: i32) -> (i32, i32) {
    %c0_i32 = arith.constant 0 : i32
    %c0_i32_0 = arith.constant 0 : i32
    return %arg0, %c0_i32 : i32, i32
  }
  func.func @transform_10(%arg0: i32) -> (i32, i32) {
    %c0_i32 = arith.constant 0 : i32
    %c0_i32_0 = arith.constant 0 : i32
    return %arg0, %c0_i32 : i32, i32
  }
}

module attributes {stable_mosaic.version = 11 : i64} {
  func.func @_attn_kernel(%arg0: i32, %arg1: i32, %arg2: memref<1x1x8x48xbf16, #tpu.memory_space<vmem>>, %arg3: memref<1x2x8x8xf32, #tpu.memory_space<vmem>>, %arg4: memref<1x8x8xf32, #tpu.memory_space<vmem>>, %arg5: memref<1x1x8x1xf32, #tpu.memory_space<vmem>>, %arg6: memref<1x1x1x8xf32, #tpu.memory_space<vmem>>, %arg7: memref<1x1x8x16xf32, #tpu.memory_space<vmem>>) attributes {dimension_semantics = [#tpu.dimension_semantics<parallel>, #tpu.dimension_semantics<parallel>], iteration_bounds = array<i64: 2, 8>, scalar_prefetch = 0 : i64, scratch_operands = 0 : i64, tpu.core_type = #tpu.core_type<tc>, window_params = [{transform_indices = @transform_0, window_bounds = array<i64: 1, 1, 8, 48>}, {transform_indices = @transform_1, window_bounds = array<i64: 1, 2, 8, 8>}, {transform_indices = @transform_2, window_bounds = array<i64: 1, 8, 8>}, {transform_indices = @transform_3, window_bounds = array<i64: 1, 1, 8, 1>}, {transform_indices = @transform_4, window_bounds = array<i64: 1, 1, 1, 8>}, {transform_indices = @transform_5, window_bounds = array<i64: 1, 1, 8, 16>}]} {
    %c0 = arith.constant 0 : index
    %c0_0 = arith.constant 0 : index
    %c0_1 = arith.constant 0 : index
    %c0_2 = arith.constant 0 : index
    %0 = vector.load %arg2[%c0, %c0_0, %c0_1, %c0_2] : memref<1x1x8x48xbf16, #tpu.memory_space<vmem>>, vector<1x1x8x48xbf16>
    %1 = vector.shape_cast %0 : vector<1x1x8x48xbf16> to vector<8x48xbf16>
    %c0_3 = arith.constant 0 : index
    %c0_4 = arith.constant 0 : index
    %c0_5 = arith.constant 0 : index
    %2 = vector.load %arg4[%c0_3, %c0_4, %c0_5] : memref<1x8x8xf32, #tpu.memory_space<vmem>>, vector<1x8x8xf32>
    %3 = vector.shape_cast %2 : vector<1x8x8xf32> to vector<8x8xf32>
    %cst = arith.constant 5.000000e-01 : f32
    %4 = vector.broadcast %cst : f32 to vector<8x8xf32>
    %5 = arith.cmpf ogt, %3, %4 : vector<8x8xf32>
    %c0_6 = arith.constant 0 : index
    %c0_7 = arith.constant 0 : index
    %c0_8 = arith.constant 0 : index
    %c0_9 = arith.constant 0 : index
    %6 = vector.load %arg5[%c0_6, %c0_7, %c0_8, %c0_9] : memref<1x1x8x1xf32, #tpu.memory_space<vmem>>, vector<1x1x8x1xf32>
    %7 = vector.shape_cast %6 : vector<1x1x8x1xf32> to vector<8x1xf32>
    %cst_10 = arith.constant 5.000000e-01 : f32
    %8 = vector.broadcast %cst_10 : f32 to vector<8x1xf32>
    %9 = arith.cmpf ogt, %7, %8 : vector<8x1xf32>
    %c0_11 = arith.constant 0 : index
    %c0_12 = arith.constant 0 : index
    %c0_13 = arith.constant 0 : index
    %c0_14 = arith.constant 0 : index
    %10 = vector.load %arg6[%c0_11, %c0_12, %c0_13, %c0_14] : memref<1x1x1x8xf32, #tpu.memory_space<vmem>>, vector<1x1x1x8xf32>
    %11 = vector.shape_cast %10 : vector<1x1x1x8xf32> to vector<1x8xf32>
    %cst_15 = arith.constant 5.000000e-01 : f32
    %12 = vector.broadcast %cst_15 : f32 to vector<1x8xf32>
    %13 = arith.cmpf ogt, %11, %12 : vector<1x8xf32>
    %14 = vector.broadcast %9 : vector<8x1xi1> to vector<8x8xi1>
    %15 = vector.broadcast %13 : vector<1x8xi1> to vector<8x8xi1>
    %16 = arith.andi %14, %15 : vector<8x8xi1>
    %17 = vector.extract_strided_slice %1 {offsets = [0, 0], sizes = [8, 8], strides = [1, 1]} : vector<8x48xbf16> to vector<8x8xbf16>
    %18 = vector.extract_strided_slice %1 {offsets = [0, 16], sizes = [8, 8], strides = [1, 1]} : vector<8x48xbf16> to vector<8x8xbf16>
    %19 = vector.extract_strided_slice %1 {offsets = [0, 32], sizes = [8, 8], strides = [1, 1]} : vector<8x48xbf16> to vector<8x8xbf16>
    %cst_16 = arith.constant dense<0.000000e+00> : vector<8x8xf32>
    %20 = tpu.matmul %17, %18, %cst_16 {dimension_numbers = #tpu.dot_dimension_numbers<[1], [1], [0], [0], [0, 0, 1, 0], [], []>} : vector<8x8xbf16>, vector<8x8xbf16>, vector<8x8xf32> -> vector<8x8xf32>
    %cst_17 = arith.constant 0.353553385 : f32
    %21 = vector.broadcast %cst_17 : f32 to vector<8x8xf32>
    %22 = arith.mulf %20, %21 : vector<8x8xf32>
    %c0_18 = arith.constant 0 : index
    %c0_19 = arith.constant 0 : index
    %c0_20 = arith.constant 0 : index
    %c0_21 = arith.constant 0 : index
    %23 = vector.load %arg3[%c0_18, %c0_19, %c0_20, %c0_21] : memref<1x2x8x8xf32, #tpu.memory_space<vmem>>, vector<1x1x8x8xf32>
    %24 = vector.shape_cast %23 : vector<1x1x8x8xf32> to vector<8x8xf32>
    %cst_22 = arith.constant -1.000000e+30 : f32
    %25 = vector.broadcast %cst_22 : f32 to vector<8x8xf32>
    %26 = arith.select %5, %24, %25 : vector<8x8xi1>, vector<8x8xf32>
    %27 = arith.addf %22, %26 : vector<8x8xf32>
    %cst_23 = arith.constant -1.000000e+30 : f32
    %28 = vector.broadcast %cst_23 : f32 to vector<8x8xf32>
    %29 = arith.select %16, %27, %28 : vector<8x8xi1>, vector<8x8xf32>
    %cst_24 = arith.constant dense<0xFF800000> : vector<8xf32>
    %30 = vector.multi_reduction <maximumf>, %29, %cst_24 [1] : vector<8x8xf32> to vector<8xf32>
    %31 = vector.shape_cast %30 : vector<8xf32> to vector<8x1xf32>
    %32 = vector.broadcast %31 : vector<8x1xf32> to vector<8x8xf32>
    %33 = arith.subf %29, %32 : vector<8x8xf32>
    %34 = math.exp %33 : vector<8x8xf32>
    %cst_25 = arith.constant dense<0.000000e+00> : vector<8xf32>
    %35 = vector.multi_reduction <add>, %34, %cst_25 [1] : vector<8x8xf32> to vector<8xf32>
    %36 = vector.shape_cast %35 : vector<8xf32> to vector<8x1xf32>
    %37 = tpu.reciprocal %36 {approx = true} : vector<8x1xf32> -> vector<8x1xf32>
    %38 = vector.broadcast %37 : vector<8x1xf32> to vector<8x8xf32>
    %39 = arith.mulf %34, %38 : vector<8x8xf32>
    %40 = arith.truncf %39 : vector<8x8xf32> to vector<8x8xbf16>
    %cst_26 = arith.constant dense<0.000000e+00> : vector<8x8xf32>
    %41 = tpu.matmul %40, %19, %cst_26 {dimension_numbers = #tpu.dot_dimension_numbers<[1], [0], [0], [1], [0, 0, 1, 1], [], []>} : vector<8x8xbf16>, vector<8x8xbf16>, vector<8x8xf32> -> vector<8x8xf32>
    %42 = vector.extract_strided_slice %1 {offsets = [0, 8], sizes = [8, 8], strides = [1, 1]} : vector<8x48xbf16> to vector<8x8xbf16>
    %43 = vector.extract_strided_slice %1 {offsets = [0, 24], sizes = [8, 8], strides = [1, 1]} : vector<8x48xbf16> to vector<8x8xbf16>
    %44 = vector.extract_strided_slice %1 {offsets = [0, 40], sizes = [8, 8], strides = [1, 1]} : vector<8x48xbf16> to vector<8x8xbf16>
    %cst_27 = arith.constant dense<0.000000e+00> : vector<8x8xf32>
    %45 = tpu.matmul %42, %43, %cst_27 {dimension_numbers = #tpu.dot_dimension_numbers<[1], [1], [0], [0], [0, 0, 1, 0], [], []>} : vector<8x8xbf16>, vector<8x8xbf16>, vector<8x8xf32> -> vector<8x8xf32>
    %cst_28 = arith.constant 0.353553385 : f32
    %46 = vector.broadcast %cst_28 : f32 to vector<8x8xf32>
    %47 = arith.mulf %45, %46 : vector<8x8xf32>
    %c0_29 = arith.constant 0 : index
    %c1 = arith.constant 1 : index
    %c0_30 = arith.constant 0 : index
    %c0_31 = arith.constant 0 : index
    %48 = vector.load %arg3[%c0_29, %c1, %c0_30, %c0_31] : memref<1x2x8x8xf32, #tpu.memory_space<vmem>>, vector<1x1x8x8xf32>
    %49 = vector.shape_cast %48 : vector<1x1x8x8xf32> to vector<8x8xf32>
    %cst_32 = arith.constant -1.000000e+30 : f32
    %50 = vector.broadcast %cst_32 : f32 to vector<8x8xf32>
    %51 = arith.select %5, %49, %50 : vector<8x8xi1>, vector<8x8xf32>
    %52 = arith.addf %47, %51 : vector<8x8xf32>
    %cst_33 = arith.constant -1.000000e+30 : f32
    %53 = vector.broadcast %cst_33 : f32 to vector<8x8xf32>
    %54 = arith.select %16, %52, %53 : vector<8x8xi1>, vector<8x8xf32>
    %cst_34 = arith.constant dense<0xFF800000> : vector<8xf32>
    %55 = vector.multi_reduction <maximumf>, %54, %cst_34 [1] : vector<8x8xf32> to vector<8xf32>
    %56 = vector.shape_cast %55 : vector<8xf32> to vector<8x1xf32>
    %57 = vector.broadcast %56 : vector<8x1xf32> to vector<8x8xf32>
    %58 = arith.subf %54, %57 : vector<8x8xf32>
    %59 = math.exp %58 : vector<8x8xf32>
    %cst_35 = arith.constant dense<0.000000e+00> : vector<8xf32>
    %60 = vector.multi_reduction <add>, %59, %cst_35 [1] : vector<8x8xf32> to vector<8xf32>
    %61 = vector.shape_cast %60 : vector<8xf32> to vector<8x1xf32>
    %62 = tpu.reciprocal %61 {approx = true} : vector<8x1xf32> -> vector<8x1xf32>
    %63 = vector.broadcast %62 : vector<8x1xf32> to vector<8x8xf32>
    %64 = arith.mulf %59, %63 : vector<8x8xf32>
    %65 = arith.truncf %64 : vector<8x8xf32> to vector<8x8xbf16>
    %cst_36 = arith.constant dense<0.000000e+00> : vector<8x8xf32>
    %66 = tpu.matmul %65, %44, %cst_36 {dimension_numbers = #tpu.dot_dimension_numbers<[1], [0], [0], [1], [0, 0, 1, 1], [], []>} : vector<8x8xbf16>, vector<8x8xbf16>, vector<8x8xf32> -> vector<8x8xf32>
    %67 = tpu.concatenate %41, %66 in 1 : vector<8x8xf32>, vector<8x8xf32> -> vector<8x16xf32>
    %c0_37 = arith.constant 0 : index
    %c0_38 = arith.constant 0 : index
    %c0_39 = arith.constant 0 : index
    %c0_40 = arith.constant 0 : index
    %68 = vector.load %arg7[%c0_37, %c0_38, %c0_39, %c0_40] : memref<1x1x8x16xf32, #tpu.memory_space<vmem>>, vector<1x1x8x16xf32>
    %69 = vector.shape_cast %68 : vector<1x1x8x16xf32> to vector<8x16xf32>
    %70 = vector.shape_cast %67 : vector<8x16xf32> to vector<1x1x8x16xf32>
    tpu.vector_store %arg7[%c0_37, %c0_38, %c0_39, %c0_40], %70 {strides = array<i32>} : memref<1x1x8x16xf32, #tpu.memory_space<vmem>>, vector<1x1x8x16xf32>,
    return
  }
  func.func @transform_0(%arg0: i32, %arg1: i32) -> (i32, i32, i32, i32) {
    %c0_i32 = arith.constant 0 : i32
    %c0_i32_0 = arith.constant 0 : i32
    %c0_i32_1 = arith.constant 0 : i32
    return %arg0, %arg1, %c0_i32, %c0_i32_0 : i32, i32, i32, i32
  }
  func.func @transform_1(%arg0: i32, %arg1: i32) -> (i32, i32, i32, i32) {
    %c0_i32 = arith.constant 0 : i32
    %c0_i32_0 = arith.constant 0 : i32
    %c0_i32_1 = arith.constant 0 : i32
    %c0_i32_2 = arith.constant 0 : i32
    return %arg0, %c0_i32, %c0_i32_0, %c0_i32_1 : i32, i32, i32, i32
  }
  func.func @transform_2(%arg0: i32, %arg1: i32) -> (i32, i32, i32) {
    %c0_i32 = arith.constant 0 : i32
    %c0_i32_0 = arith.constant 0 : i32
    %c0_i32_1 = arith.constant 0 : i32
    return %arg0, %c0_i32, %c0_i32_0 : i32, i32, i32
  }
  func.func @transform_3(%arg0: i32, %arg1: i32) -> (i32, i32, i32, i32) {
    %c0_i32 = arith.constant 0 : i32
    %c0_i32_0 = arith.constant 0 : i32
    %c0_i32_1 = arith.constant 0 : i32
    return %arg0, %arg1, %c0_i32, %c0_i32_0 : i32, i32, i32, i32
  }
  func.func @transform_4(%arg0: i32, %arg1: i32) -> (i32, i32, i32, i32) {
    %c0_i32 = arith.constant 0 : i32
    %c0_i32_0 = arith.constant 0 : i32
    %c0_i32_1 = arith.constant 0 : i32
    return %arg0, %arg1, %c0_i32, %c0_i32_0 : i32, i32, i32, i32
  }
  func.func @transform_5(%arg0: i32, %arg1: i32) -> (i32, i32, i32, i32) {
    %c0_i32 = arith.constant 0 : i32
    %c0_i32_0 = arith.constant 0 : i32
    %c0_i32_1 = arith.constant 0 : i32
    return %arg0, %arg1, %c0_i32, %c0_i32_0 : i32, i32, i32, i32
  }
}

module attributes {stable_mosaic.version = 11 : i64} {
  func.func @_gate_out_kernel(%arg0: i32, %arg1: memref<128x16xf32, #tpu.memory_space<vmem>>, %arg2: memref<128x16xf32, #tpu.memory_space<vmem>>, %arg3: memref<16x16xbf16, #tpu.memory_space<vmem>>, %arg4: memref<1x16xf32, #tpu.memory_space<vmem>>, %arg5: memref<128x16xf32, #tpu.memory_space<vmem>>) attributes {dimension_semantics = [#tpu.dimension_semantics<parallel>], iteration_bounds = array<i64: 1>, scalar_prefetch = 0 : i64, scratch_operands = 0 : i64, tpu.core_type = #tpu.core_type<tc>, window_params = [{transform_indices = @transform_0, window_bounds = array<i64: 128, 16>}, {transform_indices = @transform_1, window_bounds = array<i64: 128, 16>}, {pipeline_mode = #tpu.pipeline_mode<synchronous>, transform_indices = @transform_2, window_bounds = array<i64: 16, 16>}, {pipeline_mode = #tpu.pipeline_mode<synchronous>, transform_indices = @transform_3, window_bounds = array<i64: 1, 16>}, {transform_indices = @transform_4, window_bounds = array<i64: 128, 16>}]} {
    %c0 = arith.constant 0 : index
    %c0_0 = arith.constant 0 : index
    %0 = vector.load %arg1[%c0, %c0_0] : memref<128x16xf32, #tpu.memory_space<vmem>>, vector<128x16xf32>
    %c0_1 = arith.constant 0 : index
    %c0_2 = arith.constant 0 : index
    %1 = vector.load %arg2[%c0_1, %c0_2] : memref<128x16xf32, #tpu.memory_space<vmem>>, vector<128x16xf32>
    %2 = arith.negf %1 : vector<128x16xf32>
    %3 = math.exp %2 : vector<128x16xf32>
    %cst = arith.constant 1.000000e+00 : f32
    %4 = vector.broadcast %cst : f32 to vector<128x16xf32>
    %5 = arith.addf %4, %3 : vector<128x16xf32>
    %6 = arith.divf %4, %5 : vector<128x16xf32>
    %7 = arith.mulf %0, %6 : vector<128x16xf32>
    %8 = arith.truncf %7 : vector<128x16xf32> to vector<128x16xbf16>
    %c0_3 = arith.constant 0 : index
    %c0_4 = arith.constant 0 : index
    %9 = vector.load %arg3[%c0_3, %c0_4] : memref<16x16xbf16, #tpu.memory_space<vmem>>, vector<16x16xbf16>
    %cst_5 = arith.constant dense<0.000000e+00> : vector<128x16xf32>
    %10 = tpu.matmul %8, %9, %cst_5 {dimension_numbers = #tpu.dot_dimension_numbers<[1], [0], [0], [1], [0, 0, 1, 1], [], []>} : vector<128x16xbf16>, vector<16x16xbf16>, vector<128x16xf32> -> vector<128x16xf32>
    %c0_6 = arith.constant 0 : index
    %c0_7 = arith.constant 0 : index
    %11 = vector.load %arg4[%c0_6, %c0_7] : memref<1x16xf32, #tpu.memory_space<vmem>>, vector<1x16xf32>
    %12 = vector.broadcast %11 : vector<1x16xf32> to vector<128x16xf32>
    %13 = arith.addf %10, %12 : vector<128x16xf32>
    %c0_8 = arith.constant 0 : index
    %c0_9 = arith.constant 0 : index
    %14 = vector.load %arg5[%c0_8, %c0_9] : memref<128x16xf32, #tpu.memory_space<vmem>>, vector<128x16xf32>
    tpu.vector_store %arg5[%c0_8, %c0_9], %13 {strides = array<i32>} : memref<128x16xf32, #tpu.memory_space<vmem>>, vector<128x16xf32>,
    return
  }
  func.func @transform_0(%arg0: i32) -> (i32, i32) {
    %c0_i32 = arith.constant 0 : i32
    %c0_i32_0 = arith.constant 0 : i32
    return %arg0, %c0_i32 : i32, i32
  }
  func.func @transform_1(%arg0: i32) -> (i32, i32) {
    %c0_i32 = arith.constant 0 : i32
    %c0_i32_0 = arith.constant 0 : i32
    return %arg0, %c0_i32 : i32, i32
  }
  func.func @transform_2(%arg0: i32) -> (i32, i32) {
    %c0_i32 = arith.constant 0 : i32
    %c0_i32_0 = arith.constant 0 : i32
    %c0_i32_1 = arith.constant 0 : i32
    return %c0_i32, %c0_i32_0 : i32, i32
  }
  func.func @transform_3(%arg0: i32) -> (i32, i32) {
    %c0_i32 = arith.constant 0 : i32
    %c0_i32_0 = arith.constant 0 : i32
    %c0_i32_1 = arith.constant 0 : i32
    return %c0_i32, %c0_i32_0 : i32, i32
  }
  func.func @transform_4(%arg0: i32) -> (i32, i32) {
    %c0_i32 = arith.constant 0 : i32
    %c0_i32_0 = arith.constant 0 : i32
    return %arg0, %c0_i32 : i32, i32
  }
}

</mosaic_0001>

<bundles_post_ra>
// kernel: pairwise_attention_block.15
= control target key start
LH: loop header
LB: loop body
LE: loop exit
PB: predicated region body
PF: predicated region fallthrough
CT: control target
= control target key end

     0   :  { %13 = vsyncpa [#allocation3], 0  ;;  %s823_s0 = inlined_call_operand.hbm [shape: f32[64,16], index: 0, kind: input, shape index: {}]   ;;  %s824_s1 = inlined_call_operand.vmem [shape: f32[64,1], index: 1, kind: input, shape index: {}]   ;;  %s825_s2 = inlined_call_operand.hbm [shape: f32[1,16], index: 2, kind: input, shape index: {}]   ;;  %s826_s3 = inlined_call_operand.hbm [shape: f32[1,16], index: 3, kind: input, shape index: {}]   ;;  %s827_s4 = inlined_call_operand.vmem [shape: bf16[16,64], index: 4, kind: input, shape index: {}]   ;;  %s828_s5 = inlined_call_operand.vmem [shape: f32[1,64], index: 5, kind: input, shape index: {}]   ;;  %s829_s6 = inlined_call_operand.vmem [shape: bf16[64,32], index: 6, kind: output, shape index: {0}]   ;;  %s830_s7 = inlined_call_operand.vmem [shape: bf16[64,32], index: 7, kind: output, shape index: {1}]  }
   0x1   :  { %14 = vsyncpa [#allocation5], 0  ;;  %s579_s24 = smov [#allocation4]   ;;  %s580_s26 = smov [#allocation2]  }
   0x2   :  { %s35_s25 = sshll.u32 %s579_s24, 4  ;;  %s20_s27 = sshll.u32 %s580_s26, 4  ;;  %s36_s25 = int_to_ptr.vmem [resolvable:$true] %s35_s25  ;;  %s626_s27 = int_to_ptr.vmem [resolvable:$true] %s20_s27 }
   0x3   :  { %s509_s30 = scalar_lea.hbm %s825_s2, 16 }
   0x4   :  { %p510_p0 = scmp.ne.s32.totalorder %s825_s2, %s509_s30  ;;  %p513_p1 = scmp.lt.u32.totalorder %s509_s30, %s825_s2 }
   0x6   :  { %p515_p2 = pnand %p513_p1, %p510_p0 }
   0x8   :  { %518 = shalt.err (!%p515_p2)
}
   0x9   :  { %s519_s12 = scalar_lea.vmem %s36_s25, 16  ;;  %s523_s13 = scalar_lea.vmem %s36_s25, 32 }
   0xa   :  { %p520_p3 = scmp.ne.s32.totalorder %s36_s25, %s519_s12  ;;  %p524_p4 = scmp.lt.s32.totalorder %s36_s25, %s36_s25 }
   0xb   :  { %p525_p5 = scmp.lt.s32.totalorder %s523_s13, %s519_s12 }
   0xd   :  { %p526_p6 = por %p525_p5, %p524_p4 }
   0xf   :  { %p527_p7 = pnand %p526_p6, %p520_p3 }
  0x11   :  { %530 = shalt.err (!%p527_p7)
}
  0x12   :  { %38 = dma.hbm_to_vmem [thread:$0]  %s825_s2, 16, %s36_s25, [#allocation5]  }
  0x13   :  { %s531_s18 = scalar_lea.hbm %s823_s0, 1024 }
  0x14   :  { %p532_p8 = scmp.ne.s32.totalorder %s823_s0, %s531_s18  ;;  %p535_p9 = scmp.lt.u32.totalorder %s531_s18, %s823_s0 }
  0x16   :  { %p537_p10 = pnand %p535_p9, %p532_p8 }
  0x18   :  { %540 = shalt.err (!%p537_p10)
}
  0x19   :  { %s541_s23 = scalar_lea.vmem %s626_s27, 1024  ;;  %p546_p12 = scmp.lt.s32.totalorder %s626_s27, %s626_s27 }
  0x1a   :  { %p542_p11 = scmp.ne.s32.totalorder %s626_s27, %s541_s23  ;;  %p547_p13 = scmp.lt.s32.totalorder %s541_s23, %s541_s23 }
  0x1c   :  { %p548_p0 = por %p547_p13, %p546_p12 }
  0x1e   :  { %p549_p1 = pnand %p548_p0, %p542_p11 }
  0x20   :  { %552 = shalt.err (!%p549_p1)
}
  0x21   :  { %s581_s2 = smov 128   ;;  %s582_s24 = smov 8  }
  0x22   :  { %26 = dma.hbm_to_vmem [thread:$0]  %s823_s0, 1024, %s626_s27, [#allocation3], %s581_s2, %s581_s2, %s582_s24  }
  0x23   :  { %s583_s28 = smov [#allocation6]   ;;  %s553_s9 = scalar_lea.hbm %s826_s3, 16 }
  0x24   :  { %s45_s29 = sshll.u32 %s583_s28, 4  ;;  %p554_p2 = scmp.ne.s32.totalorder %s826_s3, %s553_s9  ;;  %s46_s29 = int_to_ptr.vmem [resolvable:$true] %s45_s29 }
  0x25   :  { %p557_p3 = scmp.lt.u32.totalorder %s553_s9, %s826_s3 }
  0x27   :  { %p559_p4 = pnand %p557_p3, %p554_p2 }
  0x29   :  { %562 = shalt.err (!%p559_p4)
}
  0x2a   :  { %s563_s14 = scalar_lea.vmem %s46_s29, 16  ;;  %s567_s0 = scalar_lea.vmem %s46_s29, 32 }
  0x2b   :  { %p564_p5 = scmp.ne.s32.totalorder %s46_s29, %s563_s14  ;;  %p568_p6 = scmp.lt.s32.totalorder %s46_s29, %s46_s29 }
  0x2c   :  { %p569_p7 = scmp.lt.s32.totalorder %s567_s0, %s563_s14 }
  0x2e   :  { %p570_p8 = por %p569_p7, %p568_p6 }
  0x30   :  { %p571_p9 = pnand %p570_p8, %p564_p5 }
  0x32   :  { %574 = shalt.err (!%p571_p9)
}
  0x33   :  { %48 = dma.hbm_to_vmem [thread:$0]  %s826_s3, 16, %s46_s29, [#allocation5]  }
  0x34   :  { %575 = dma.done.wait [#allocation3], 1024  }
  0x35   :  { %576 = vsyncadd [#allocation3], 4294966272 }
  0x36   :  { %577 = dma.done.wait [#allocation5], 32  }
  0x37   :  { %578 = vsyncadd [#allocation5], 4294967264  ;;  %vm73_vm0 = vcmask 130048   ;;  %v63_v0 = vld [vmem:[#allocation2] sm:$0xff]  ;;  %v64_v2 = vld [vmem:[#allocation2 + $0x8] sm:$0xff]  ;;  %v584_v58 = vmov 0  }
  0x38   :  { %v67_v1 = vld [vmem:[#allocation2 + $0x20] sm:$0xff]  ;;  %v74_v3 = vsel %vm73_vm0, %v63_v0, 0.0  ;;  %v68_v5 = vld [vmem:[#allocation2 + $0x28] sm:$0xff]  ;;  %v77_v6 = vsel %vm73_vm0, %v64_v2, 0.0  ;;  %v65_v8 = vld [vmem:[#allocation2 + $0x10] sm:$0xff]  ;;  %491 = vset.pattern.permute.xlu1 %v584_v58  ;;  %490 = vset.pattern.permute.xlu0 %v584_v58  ;;  %vm391_vm1 = vcmask 257024  }
  0x39   :  { %v86_v4 = vsel %vm73_vm0, %v67_v1, 0.0  ;;  %75 = vadd.xlane.f32.xlu0 %v74_v3  ;;  %v89_v7 = vsel %vm73_vm0, %v68_v5, 0.0  ;;  %v66_v9 = vld [vmem:[#allocation2 + $0x18] sm:$0xff]  ;;  %v80_v10 = vsel %vm73_vm0, %v65_v8, 0.0  ;;  %v69_v12 = vld [vmem:[#allocation2 + $0x30] sm:$0xff]  ;;  %v492_v56 = vld [vmem:[%s827_s4] sm:$0xff]  }
  0x3a   :  { %87 = vadd.xlane.f32.xlu1 %v86_v4  ;;  %v83_v11 = vsel %vm73_vm0, %v66_v9, 0.0  ;;  %v70_v13 = vld [vmem:[#allocation2 + $0x38] sm:$0xff]  ;;  %v92_v14 = vsel %vm73_vm0, %v69_v12, 0.0  ;;  %471 = vmatprep.subr.bf16.mxu0 %v492_v56  ;;  %v304_v57 = vld [vmem:[%s824_s1 + $0x8] sm:$0xff]  ;;  %v303_v59 = vld [vmem:[%s824_s1] sm:$0xff]  ;;  %s585_s11 = smov 96  }
  0x3b   :  { %v95_v15 = vsel %vm73_vm0, %v70_v13, 0.0  ;;  %481 = vmatprep.subr.bf16.mxu1 %v492_v56  ;;  %472 = vmatpush3.bf16.msra.mxu0 %v492_v56  ;;  %v305_v60 = vld [vmem:[%s824_s1 + $0x10] sm:$0xff]  ;;  %v306_v61 = vld [vmem:[%s824_s1 + $0x18] sm:$0xff]  ;;  %v307_v62 = vld [vmem:[%s824_s1 + $0x20] sm:$0xff] }
  0x3c   :  { %482 = vmatpush3.bf16.msra.mxu1 %v492_v56  ;;  %v308_v63 = vld [vmem:[%s824_s1 + $0x28] sm:$0xff] }
  0x3d   :  { %78 = vadd.xlane.f32.xlu0 %v77_v6 }
  0x3e   :  { %90 = vadd.xlane.f32.xlu1 %v89_v7 }
  0x41   :  { %81 = vadd.xlane.f32.xlu0 %v80_v10 }
  0x42   :  { %84 = vadd.xlane.f32.xlu1 %v83_v11 }
  0x45   :  { %93 = vadd.xlane.f32.xlu0 %v92_v14 }
  0x46   :  { %96 = vadd.xlane.f32.xlu1 %v95_v15 }
  0xc6   :  { %v76_v16 = vpop.xlane.xlu0 %75 }
  0xc7   :  { %v88_v17 = vpop.xlane.xlu1 %87  ;;  %v99_v18 = vmul.f32 0.0625, %v76_v16 }
  0xc8   :  { %v103_v19 = vmul.f32 0.0625, %v88_v17 }
  0xc9   :  { %v677_v20 = vsub.f32 %v63_v0, %v99_v18  ;;  %v309_v0 = vld [vmem:[%s824_s1 + $0x30] sm:$0xff] }
  0xca   :  { %v679_v21 = vsub.f32 %v67_v1, %v103_v19  ;;  %v79_v22 = vpop.xlane.xlu0 %78  ;;  %v310_v1 = vld [vmem:[%s824_s1 + $0x38] sm:$0xff] }
  0xcb   :  { %v91_v23 = vpop.xlane.xlu1 %90  ;;  %v100_v24 = vmul.f32 0.0625, %v79_v22  ;;  %v115_v26 = vmul.f32 %v677_v20, %v677_v20 }
  0xcc   :  { %v104_v25 = vmul.f32 0.0625, %v91_v23  ;;  %v119_v27 = vmul.f32 %v679_v21, %v679_v21 }
  0xcd   :  { %v685_v28 = vsub.f32 %v64_v2, %v100_v24  ;;  %v123_v30 = vsel %vm73_vm0, %v115_v26, 0.0 }
  0xce   :  { %v687_v29 = vsub.f32 %v68_v5, %v104_v25  ;;  %124 = vadd.xlane.f32.xlu0 %v123_v30  ;;  %v82_v31 = vpop.xlane.xlu0 %81  ;;  %v135_v33 = vsel %vm73_vm0, %v119_v27, 0.0 }
  0xcf   :  { %v85_v32 = vpop.xlane.xlu1 %84  ;;  %v101_v34 = vmul.f32 0.0625, %v82_v31  ;;  %v116_v36 = vmul.f32 %v685_v28, %v685_v28  ;;  %v442_v31 = vld [vmem:[#allocation4] ss:$0 sm:$0xff] }
  0xd0   :  { %v102_v35 = vmul.f32 0.0625, %v85_v32  ;;  %v120_v37 = vmul.f32 %v687_v29, %v687_v29 }
  0xd1   :  { %v695_v38 = vsub.f32 %v65_v8, %v101_v34  ;;  %v126_v40 = vsel %vm73_vm0, %v116_v36, 0.0 }
  0xd2   :  { %v697_v39 = vsub.f32 %v66_v9, %v102_v35  ;;  %136 = vadd.xlane.f32.xlu0 %v135_v33  ;;  %127 = vadd.xlane.f32.xlu1 %v126_v40  ;;  %v94_v41 = vpop.xlane.xlu0 %93  ;;  %v138_v43 = vsel %vm73_vm0, %v120_v37, 0.0  ;;  %v443_v37 = vld [vmem:[#allocation6] ss:$0 sm:$0xff] }
  0xd3   :  { %v97_v42 = vpop.xlane.xlu1 %96  ;;  %v105_v44 = vmul.f32 0.0625, %v94_v41  ;;  %v117_v46 = vmul.f32 %v695_v38, %v695_v38 }
  0xd4   :  { %v106_v45 = vmul.f32 0.0625, %v97_v42  ;;  %v118_v47 = vmul.f32 %v697_v39, %v697_v39 }
  0xd5   :  { %v705_v48 = vsub.f32 %v69_v12, %v105_v44  ;;  %v129_v50 = vsel %vm73_vm0, %v117_v46, 0.0 }
  0xd6   :  { %v707_v49 = vsub.f32 %v70_v13, %v106_v45  ;;  %139 = vadd.xlane.f32.xlu1 %v138_v43  ;;  %130 = vadd.xlane.f32.xlu0 %v129_v50  ;;  %v132_v51 = vsel %vm73_vm0, %v118_v47, 0.0 }
  0xd7   :  { %v121_v52 = vmul.f32 %v705_v48, %v705_v48 }
  0xd8   :  { %v122_v53 = vmul.f32 %v707_v49, %v707_v49 }
  0xd9   :  { %v141_v54 = vsel %vm73_vm0, %v121_v52, 0.0 }
  0xda   :  { %133 = vadd.xlane.f32.xlu1 %v132_v51  ;;  %142 = vadd.xlane.f32.xlu0 %v141_v54  ;;  %v144_v55 = vsel %vm73_vm0, %v122_v53, 0.0 }
  0xde   :  { %145 = vadd.xlane.f32.xlu1 %v144_v55 }
  0xef   :  { %318 = vperm.xlu1 %491, %v304_v57  }
  0xf0   :  { %313 = vperm.xlu0 %490, %v303_v59  }
  0xf3   :  { %323 = vperm.xlu1 %491, %v305_v60  }
  0xf7   :  { %328 = vperm.xlu1 %491, %v306_v61  }
  0xfb   :  { %333 = vperm.xlu1 %491, %v307_v62  }
  0xff   :  { %338 = vperm.xlu1 %491, %v308_v63  }
 0x103   :  { %343 = vperm.xlu1 %491, %v309_v0  }
 0x107   :  { %348 = vperm.xlu1 %491, %v310_v1  }
 0x15b   :  { %v125_v2 = vpop.xlane.xlu0 %124 }
 0x15c   :  { %v147_v3 = vmul.f32 0.0625, %v125_v2 }
 0x15e   :  { %v155_v4 = vadd.f32 1e-05, %v147_v3 }
 0x15f   :  { %v128_v5 = vpop.xlane.xlu1 %127  ;;  %v137_v6 = vpop.xlane.xlu0 %136 }
 0x160   :  { %493 = vrsqrt.f32 %v155_v4  ;;  %v148_v7 = vmul.f32 0.0625, %v128_v5  ;;  %v151_v8 = vmul.f32 0.0625, %v137_v6 }
 0x162   :  { %v156_v9 = vadd.f32 1e-05, %v148_v7  ;;  %v159_v10 = vadd.f32 1e-05, %v151_v8 }
 0x163   :  { %v140_v11 = vpop.xlane.xlu1 %139  ;;  %v131_v12 = vpop.xlane.xlu0 %130 }
 0x164   :  { %495 = vrsqrt.f32 %v156_v9  ;;  %v152_v13 = vmul.f32 0.0625, %v140_v11  ;;  %v149_v14 = vmul.f32 0.0625, %v131_v12 }
 0x165   :  { %497 = vrsqrt.f32 %v159_v10 }
 0x166   :  { %v160_v15 = vadd.f32 1e-05, %v152_v13  ;;  %v157_v16 = vadd.f32 1e-05, %v149_v14 }
 0x167   :  { %v134_v17 = vpop.xlane.xlu1 %133  ;;  %v143_v18 = vpop.xlane.xlu0 %142 }
 0x168   :  { %499 = vrsqrt.f32 %v160_v15  ;;  %v150_v19 = vmul.f32 0.0625, %v134_v17  ;;  %v153_v22 = vmul.f32 0.0625, %v143_v18 }
 0x169   :  { %501 = vrsqrt.f32 %v157_v16 }
 0x16a   :  { %v494_v23 = vpop.eup %493  ;;  %v158_v24 = vadd.f32 1e-05, %v150_v19  ;;  %v161_v25 = vadd.f32 1e-05, %v153_v22 }
 0x16b   :  { %v146_v26 = vpop.xlane.xlu1 %145  ;;  %v171_v27 = vmul.f32 %v494_v23, %v677_v20 }
 0x16c   :  { %503 = vrsqrt.f32 %v158_v24  ;;  %v154_v30 = vmul.f32 0.0625, %v146_v26 }
 0x16d   :  { %505 = vrsqrt.f32 %v161_v25  ;;  %v185_v36 = vmul.f32 %v442_v31, %v171_v27 }
 0x16e   :  { %v496_v32 = vpop.eup %495  ;;  %v162_v33 = vadd.f32 1e-05, %v154_v30 }
 0x16f   :  { %v498_v34 = vpop.eup %497  ;;  %v172_v35 = vmul.f32 %v496_v32, %v685_v28  ;;  %v199_v44 = vadd.f32 %v443_v37, %v185_v36  ;;  %v314_v9 = vpop.permute.xlu0 %313 }
 0x170   :  { %507 = vrsqrt.f32 %v162_v33  ;;  %v175_v40 = vmul.f32 %v498_v34, %v679_v21 }
 0x171   :  { %v186_v41 = vmul.f32 %v442_v31, %v172_v35 }
 0x172   :  { %v500_v42 = vpop.eup %499  ;;  %v189_v46 = vmul.f32 %v442_v31, %v175_v40 }
 0x173   :  { %v502_v43 = vpop.eup %501  ;;  %v200_v45 = vadd.f32 %v443_v37, %v186_v41  ;;  %v176_v20 = vmul.f32 %v500_v42, %v687_v29 }
 0x174   :  { %v173_v47 = vmul.f32 %v502_v43, %v695_v38  ;;  %v203_v54 = vadd.f32 %v443_v37, %v189_v46 }
 0x175   :  { %v207_v50 = vpack.c.bf16 %v200_v45, %v199_v44  ;;  %v190_v51 = vmul.f32 %v442_v31, %v176_v20 }
 0x176   :  { %v504_v52 = vpop.eup %503  ;;  %v187_v55 = vmul.f32 %v442_v31, %v173_v47 }
 0x177   :  { %v506_v53 = vpop.eup %505  ;;  %v174_v28 = vmul.f32 %v504_v52, %v697_v39  ;;  %473 = vmatprep.mubr.msk.bf16.mxu0 %vm73_vm0, %v207_v50  ;;  %v204_v21 = vadd.f32 %v443_v37, %v190_v51 }
 0x178   :  { %v177_v56 = vmul.f32 %v506_v53, %v705_v48  ;;  %v201_v38 = vadd.f32 %v443_v37, %v187_v55  ;;  %v319_v48 = vpop.permute.xlu1 %318 }
 0x179   :  { %v209_v57 = vpack.c.bf16 %v204_v21, %v203_v54  ;;  %v188_v58 = vmul.f32 %v442_v31, %v174_v28 }
 0x17a   :  { %v508_v59 = vpop.eup %507  ;;  %v191_v61 = vmul.f32 %v442_v31, %v177_v56 }
 0x17b   :  { %v178_v29 = vmul.f32 %v508_v59, %v707_v49  ;;  %477 = vmatprep.mubr.msk.bf16.mxu1 %vm73_vm0, %v209_v57  ;;  %v202_v60 = vadd.f32 %v443_v37, %v188_v58  ;;  %v444_v49 = vld [vmem:[%s828_s5] ss:$0 sm:$0xff] }
 0x17c   :  { %v205_v39 = vadd.f32 %v443_v37, %v191_v61  ;;  %v324_v2 = vpop.permute.xlu1 %323 }
 0x17d   :  { %v208_v62 = vpack.c.bf16 %v202_v60, %v201_v38  ;;  %v192_v63 = vmul.f32 %v442_v31, %v178_v29 }
 0x17f   :  { %474 = vmatmul.mubr.msk.bf16.vlgmr.msra.gmra.mrb[0].mxu0 %vm73_vm0, %v208_v62  ;;  %v206_v0 = vadd.f32 %v443_v37, %v192_v63 }
 0x180   :  { %v329_v3 = vpop.permute.xlu1 %328 }
 0x181   :  { %v210_v1 = vpack.c.bf16 %v206_v0, %v205_v39 }
 0x183   :  { %478 = vmatmul.mubr.msk.bf16.vlgmr.msra.gmra.mrb[0].mxu1 %vm73_vm0, %v210_v1 }
 0x184   :  { %v334_v4 = vpop.permute.xlu1 %333 }
 0x188   :  { %v339_v5 = vpop.permute.xlu1 %338 }
 0x18c   :  { %v344_v10 = vpop.permute.xlu1 %343 }
 0x190   :  { %v349_v35 = vpop.permute.xlu1 %348 }
 0x252   :  { %v475_v6 = vpop.f32.mrb[0].mxu0 }
 0x253   :  { %v281_v7 = vadd.f32 %v475_v6, %v444_v49  ;;  %v272_v8 = vpop.f32.mrb[1].mxu0 }
 0x254   :  { %v273_v11 = vadd.f32 %v444_v49, %v272_v8  ;;  %v476_v12 = vpop.f32.mrb[2].mxu0 }
 0x255   :  { %v353_v13 = vmul.f32 %v324_v2, %v281_v7  ;;  %v284_v14 = vadd.f32 %v476_v12, %v444_v49  ;;  %v275_v15 = vpop.f32.mrb[3].mxu0 }
 0x256   :  { %v276_v16 = vadd.f32 %v444_v49, %v275_v15  ;;  %v351_v17 = vmul.f32 %v314_v9, %v273_v11  ;;  %v479_v18 = vpop.f32.mrb[0].mxu1 }
 0x257   :  { %v460_v19 = vpack.c.bf16 %v353_v13, %v353_v13  ;;  %v354_v22 = vmul.f32 %v329_v3, %v284_v14  ;;  %v297_v23 = vadd.f32 %v479_v18, %v444_v49  ;;  %v288_v24 = vpop.f32.mrb[1].mxu1 }
 0x258   :  { %v352_v25 = vmul.f32 %v319_v48, %v276_v16  ;;  %v458_v26 = vpack.c.bf16 %v351_v17, %v351_v17  ;;  %v289_v27 = vadd.f32 %v444_v49, %v288_v24  ;;  %v480_v30 = vpop.f32.mrb[2].mxu1 }
 0x259   :  { %394 = vst.msk [vmem:[%s829_s6 + $0x8] sm:$0xf] %vm391_vm1, %v460_v19  ;;  %v461_v31 = vpack.c.bf16 %v354_v22, %v354_v22  ;;  %v357_v32 = vmul.f32 %v344_v10, %v297_v23  ;;  %v300_v33 = vadd.f32 %v480_v30, %v444_v49  ;;  %404 = vrot.lane.b32.xlu1 %v460_v19, %s585_s11  ;;  %v291_v34 = vpop.f32.mrb[3].mxu1 }
 0x25a   :  { %v459_v36 = vpack.c.bf16 %v352_v25, %v352_v25  ;;  %392 = vst.msk [vmem:[%s829_s6] sm:$0xf] %vm391_vm1, %v458_v26  ;;  %v355_v37 = vmul.f32 %v334_v4, %v289_v27  ;;  %v292_v40 = vadd.f32 %v444_v49, %v291_v34 }
 0x25b   :  { %395 = vst.msk [vmem:[%s829_s6 + $0xc] sm:$0xf] %vm391_vm1, %v461_v31  ;;  %v464_v41 = vpack.c.bf16 %v357_v32, %v357_v32  ;;  %v358_v42 = vmul.f32 %v349_v35, %v300_v33  ;;  %406 = vrot.lane.b32.xlu0 %v461_v31, %s585_s11 }
 0x25c   :  { %393 = vst.msk [vmem:[%s829_s6 + $0x4] sm:$0xf] %vm391_vm1, %v459_v36  ;;  %v462_v43 = vpack.c.bf16 %v355_v37, %v355_v37  ;;  %v356_v44 = vmul.f32 %v339_v5, %v292_v40 }
 0x25d   :  { %398 = vst.msk [vmem:[%s829_s6 + $0x18] sm:$0xf] %vm391_vm1, %v464_v41  ;;  %v465_v45 = vpack.c.bf16 %v358_v42, %v358_v42  ;;  %400 = vrot.lane.b32.xlu1 %v458_v26, %s585_s11 }
 0x25e   :  { %396 = vst.msk [vmem:[%s829_s6 + $0x10] sm:$0xf] %vm391_vm1, %v462_v43  ;;  %v463_v20 = vpack.c.bf16 %v356_v44, %v356_v44 }
 0x25f   :  { %399 = vst.msk [vmem:[%s829_s6 + $0x1c] sm:$0xf] %vm391_vm1, %v465_v45  ;;  %402 = vrot.lane.b32.xlu0 %v459_v36, %s585_s11 }
 0x260   :  { %397 = vst.msk [vmem:[%s829_s6 + $0x14] sm:$0xf] %vm391_vm1, %v463_v20 }
 0x261   :  { %408 = vrot.lane.b32.xlu1 %v462_v43, %s585_s11 }
 0x263   :  { %410 = vrot.lane.b32.xlu0 %v463_v20, %s585_s11 }
 0x265   :  { %412 = vrot.lane.b32.xlu1 %v464_v41, %s585_s11 }
 0x267   :  { %414 = vrot.lane.b32.xlu0 %v465_v45, %s585_s11 }
 0x2cb   :  { %v405_v46 = vpop.permute.xlu1 %404 }
 0x2cc   :  { %426 = vst.msk [vmem:[%s830_s7 + $0x8] sm:$0xf] %vm391_vm1, %v405_v46 }
 0x2cd   :  { %v407_v47 = vpop.permute.xlu0 %406 }
 0x2ce   :  { %427 = vst.msk [vmem:[%s830_s7 + $0xc] sm:$0xf] %vm391_vm1, %v407_v47 }
 0x2cf   :  { %v401_v50 = vpop.permute.xlu1 %400 }
 0x2d0   :  { %424 = vst.msk [vmem:[%s830_s7] sm:$0xf] %vm391_vm1, %v401_v50 }
 0x2d1   :  { %v403_v51 = vpop.permute.xlu0 %402 }
 0x2d2   :  { %425 = vst.msk [vmem:[%s830_s7 + $0x4] sm:$0xf] %vm391_vm1, %v403_v51 }
 0x2d3   :  { %v409_v52 = vpop.permute.xlu1 %408 }
 0x2d4   :  { %428 = vst.msk [vmem:[%s830_s7 + $0x10] sm:$0xf] %vm391_vm1, %v409_v52 }
 0x2d5   :  { %v411_v53 = vpop.permute.xlu0 %410 }
 0x2d6   :  { %429 = vst.msk [vmem:[%s830_s7 + $0x14] sm:$0xf] %vm391_vm1, %v411_v53 }
 0x2d7   :  { %v413_v28 = vpop.permute.xlu1 %412 }
 0x2d8   :  { %430 = vst.msk [vmem:[%s830_s7 + $0x18] sm:$0xf] %vm391_vm1, %v413_v28 }
 0x2d9   :  { %v415_v54 = vpop.permute.xlu0 %414 }
 0x2da   :  { %431 = vst.msk [vmem:[%s830_s7 + $0x1c] sm:$0xf] %vm391_vm1, %v415_v54 }
 0x2db   :  { %440 = vsyncpa [#allocation3], 1 }
 0x2dc   :  { %441 = vsyncpa [#allocation5], 1 }

// kernel: pairwise_attention_block.16
= control target key start
LH: loop header
LB: loop body
LE: loop exit
PB: predicated region body
PF: predicated region fallthrough
CT: control target
= control target key end

     0   :  { %s780_s9 = smov 0   ;;  %s782_s10 = smov 0   ;;  %s918_s0 = inlined_call_operand.vmem [shape: bf16[2,4,256], index: 0, kind: input, shape index: {}]   ;;  %s919_s1 = inlined_call_operand.vmem [shape: bf16[2,4,256], index: 1, kind: input, shape index: {}]   ;;  %s920_s2 = inlined_call_operand.vmem [shape: f32[2,256,256], index: 2, kind: output, shape index: {}]  }
   0x1   :  { %s784_s11 = smov 0  }
   0x2 LB: > { %s24_s12 = sadd.s32 1, %s758_s10  ;;  %p682_p0 = scmp.ge.s32.totalorder %s762_s11, 1  ;;  %s762_s11 = sphi %s784_s11, %s12_s11   ;;  %s758_s10 = sphi %s782_s10, %s922_s10   ;;  %s754_s9 = sphi %s780_s9, %s921_s9  }
   0x3   : > { %p26_p1 = scmp.ge.s32.totalorder %s24_s12, 2  ;;  %p143_p2 = scmp.lt.s32.totalorder %s762_s11, 3 }
   0x5   : > { %s924_s12 = smov (%p26_p1, %s24_s12), 0  ;;  %p144_p3 = pnand %p682_p0, %p143_p2 }
   0x6   : > { %p180_p4 = scmp.lt.s32.totalorder (!%p144_p3), %s754_s9, 1  ;;  %v764_v0 = vmov (!%p144_p3), 0   ;;  %vm309_vm0 = vcmask (!%p144_p3), 1041408   ;;  %vm260_vm1 = vcmask (!%p144_p3), 31744  }
   0x7   : > { %147 = sbr.rel (%p144_p3) target bundleno = 425 (0x1a9), region = 28  ;;  %348 = vmatprep.mubr.bf16.mxu0 (!%p144_p3), %v764_v0  ;;  %428 = vmatprep.mubr.bf16.mxu1 (!%p144_p3), %v764_v0 }
   0xe   : > { %s926_s9 = smov (!%p180_p4, %s754_s9), 1 }
   0xf   : > { %s710_s13 = sshll.u32 %s926_s9, 2  ;;  %s712_s20 = sshll.u32 %s926_s9, 9 }
  0x10   : > { %s187_s16 = scalar_lea.vmem %s918_s0, %s710_s13  ;;  %s193_s19 = scalar_lea.vmem %s919_s1, %s710_s13 }
  0x11   : > { %v689_v1 = vld.sshfl [vmem:[%s187_s16] sm:$0x33 pattern:$0x76325410]  ;;  %s843_s23 = scalar_lea.vmem %s920_s2, %s712_s20 }
  0x12   : > { %219 = vxpose.xlu0.c.b16.start.end [1/1] (short) %v689_v1, 128  ;;  %v690_v2 = vld.sshfl [vmem:[%s193_s19] sm:$0x33 pattern:$0x76325410]  ;;  %v216_v5 = vcombine.high %v689_v1, %v689_v1 }
  0x13   : > { %v259_v3 = vcombine.high %v690_v2, %v690_v2  ;;  %v311_v4 = vsel %vm309_vm0, %v690_v2, 0 }
  0x15   : > { %691 = vmatprep.subr.msk.bf16.mxu0 %vm309_vm0, %v259_v3  ;;  %713 = vmatprep.subr.msk.bf16.mxu1 %vm309_vm0, %v259_v3 }
  0x16   : > { %317 = vmatpush1.bf16.msra.mxu0 %v311_v4  ;;  %714 = vmatpush1.bf16.msra.mxu1 %v311_v4 }
  0x2f   : > { %235 = vxpose.xlu0.c.b16.start.end [1/1] (short) %v216_v5, 128 }
  0x78   : > { %v227_v6 = vpop.trf.xlu0 }
  0x79   : > { %692 = vmatmul.mubr.msk.bf16.vlgmr.msra.gmra.mrb[0].mxu0 %vm260_vm1, %v227_v6 }
  0x7a   : > { %358 = vmatprep.mubr.bf16.mxu0 %v764_v0 }
  0x7c   : > { %v228_v7 = vpop.trf.xlu0 }
  0x80   : > { %v229_v8 = vpop.trf.xlu0 }
  0x81   : > { %693 = vmatmul.mubr.msk.bf16.gmra.mrb[4].mxu0 %vm260_vm1, %v228_v7 }
  0x82   : > { %368 = vmatprep.mubr.bf16.mxu0 %v764_v0 }
  0x84   : > { %v230_v9 = vpop.trf.xlu0 }
  0x88   : > { %v231_v10 = vpop.trf.xlu0 }
  0x89   : > { %694 = vmatmul.mubr.msk.bf16.gmra.mrb[8].mxu0 %vm260_vm1, %v229_v8 }
  0x8a   : > { %378 = vmatprep.mubr.bf16.mxu0 %v764_v0 }
  0x8c   : > { %v232_v11 = vpop.trf.xlu0 }
  0x90   : > { %v233_v12 = vpop.trf.xlu0 }
  0x91   : > { %695 = vmatmul.mubr.msk.bf16.gmra.mrb[12].mxu0 %vm260_vm1, %v230_v9 }
  0x92   : > { %388 = vmatprep.mubr.bf16.mxu0 %v764_v0 }
  0x94   : > { %v234_v13 = vpop.trf.xlu0 }
  0x98   : > { %v243_v14 = vpop.trf.xlu0 }
  0x99   : > { %696 = vmatmul.mubr.msk.bf16.gmra.mrb[16].mxu0 %vm260_vm1, %v231_v10  ;;  %700 = vmatmul.mubr.msk.bf16.vlgmr.msra.gmra.mrb[0].mxu1 %vm260_vm1, %v243_v14 }
  0x9a   : > { %398 = vmatprep.mubr.bf16.mxu0 %v764_v0  ;;  %438 = vmatprep.mubr.bf16.mxu1 %v764_v0 }
  0x9c   : > { %v244_v15 = vpop.trf.xlu0 }
  0xa0   : > { %v245_v16 = vpop.trf.xlu0 }
  0xa1   : > { %697 = vmatmul.mubr.msk.bf16.gmra.mrb[20].mxu0 %vm260_vm1, %v232_v11  ;;  %701 = vmatmul.mubr.msk.bf16.gmra.mrb[4].mxu1 %vm260_vm1, %v244_v15 }
  0xa2   : > { %408 = vmatprep.mubr.bf16.mxu0 %v764_v0  ;;  %448 = vmatprep.mubr.bf16.mxu1 %v764_v0 }
  0xa4   : > { %v246_v17 = vpop.trf.xlu0 }
  0xa8   : > { %v247_v18 = vpop.trf.xlu0 }
  0xa9   : > { %698 = vmatmul.mubr.msk.bf16.gmra.mrb[24].mxu0 %vm260_vm1, %v233_v12  ;;  %702 = vmatmul.mubr.msk.bf16.gmra.mrb[8].mxu1 %vm260_vm1, %v245_v16 }
  0xaa   : > { %418 = vmatprep.mubr.bf16.mxu0 %v764_v0  ;;  %458 = vmatprep.mubr.bf16.mxu1 %v764_v0 }
  0xac   : > { %v248_v19 = vpop.trf.xlu0 }
  0xb0   : > { %v249_v20 = vpop.trf.xlu0 }
  0xb1   : > { %699 = vmatmul.mubr.msk.bf16.gmra.mrb[28].mxu0 %vm260_vm1, %v234_v13  ;;  %703 = vmatmul.mubr.msk.bf16.gmra.mrb[12].mxu1 %vm260_vm1, %v246_v17 }
  0xb2   : > { %468 = vmatprep.mubr.bf16.mxu1 %v764_v0 }
  0xb4   : > { %v250_v21 = vpop.trf.xlu0 }
  0xb9   : > { %704 = vmatmul.mubr.msk.bf16.gmra.mrb[16].mxu1 %vm260_vm1, %v247_v18 }
  0xba   : > { %478 = vmatprep.mubr.bf16.mxu1 %v764_v0 }
  0xc1   : > { %705 = vmatmul.mubr.msk.bf16.gmra.mrb[20].mxu1 %vm260_vm1, %v248_v19 }
  0xc2   : > { %488 = vmatprep.mubr.bf16.mxu1 %v764_v0 }
  0xc9   : > { %706 = vmatmul.mubr.msk.bf16.gmra.mrb[24].mxu1 %vm260_vm1, %v249_v20 }
  0xca   : > { %498 = vmatprep.mubr.bf16.mxu1 %v764_v0 }
  0xd1   : > { %707 = vmatmul.mubr.msk.bf16.gmra.mrb[28].mxu1 %vm260_vm1, %v250_v21 }
 0x14c   : > { %v350_v22 = vpop.f32.mrb[0].mxu0 }
 0x14d   : > { %509 = vst [vmem:[%s843_s23] sm:$0xff] %v350_v22  ;;  %v352_v23 = vpop.f32.mrb[1].mxu0 }
 0x14e   : > { %510 = vst [vmem:[%s843_s23 + $0x8] sm:$0xff] %v352_v23  ;;  %v354_v24 = vpop.f32.mrb[2].mxu0 }
 0x14f   : > { %511 = vst [vmem:[%s843_s23 + $0x10] sm:$0xff] %v354_v24  ;;  %v356_v25 = vpop.f32.mrb[3].mxu0 }
 0x150   : > { %512 = vst [vmem:[%s843_s23 + $0x18] sm:$0xff] %v356_v25 }
 0x154   : > { %v360_v26 = vpop.f32.mrb[4].mxu0 }
 0x155   : > { %513 = vst [vmem:[%s843_s23 + $0x20] sm:$0xff] %v360_v26  ;;  %v362_v27 = vpop.f32.mrb[5].mxu0 }
 0x156   : > { %514 = vst [vmem:[%s843_s23 + $0x28] sm:$0xff] %v362_v27  ;;  %v364_v28 = vpop.f32.mrb[6].mxu0 }
 0x157   : > { %515 = vst [vmem:[%s843_s23 + $0x30] sm:$0xff] %v364_v28  ;;  %v366_v29 = vpop.f32.mrb[7].mxu0 }
 0x158   : > { %516 = vst [vmem:[%s843_s23 + $0x38] sm:$0xff] %v366_v29 }
 0x15c   : > { %v370_v30 = vpop.f32.mrb[8].mxu0 }
 0x15d   : > { %517 = vst [vmem:[%s843_s23 + $0x40] sm:$0xff] %v370_v30  ;;  %v372_v31 = vpop.f32.mrb[9].mxu0 }
 0x15e   : > { %518 = vst [vmem:[%s843_s23 + $0x48] sm:$0xff] %v372_v31  ;;  %v374_v32 = vpop.f32.mrb[10].mxu0 }
 0x15f   : > { %519 = vst [vmem:[%s843_s23 + $0x50] sm:$0xff] %v374_v32  ;;  %v376_v33 = vpop.f32.mrb[11].mxu0 }
 0x160   : > { %520 = vst [vmem:[%s843_s23 + $0x58] sm:$0xff] %v376_v33 }
 0x164   : > { %v380_v34 = vpop.f32.mrb[12].mxu0 }
 0x165   : > { %521 = vst [vmem:[%s843_s23 + $0x60] sm:$0xff] %v380_v34  ;;  %v382_v35 = vpop.f32.mrb[13].mxu0 }
 0x166   : > { %522 = vst [vmem:[%s843_s23 + $0x68] sm:$0xff] %v382_v35  ;;  %v384_v36 = vpop.f32.mrb[14].mxu0 }
 0x167   : > { %523 = vst [vmem:[%s843_s23 + $0x70] sm:$0xff] %v384_v36  ;;  %v386_v37 = vpop.f32.mrb[15].mxu0 }
 0x168   : > { %524 = vst [vmem:[%s843_s23 + $0x78] sm:$0xff] %v386_v37 }
 0x16c   : > { %v390_v38 = vpop.f32.mrb[16].mxu0  ;;  %v430_v39 = vpop.f32.mrb[0].mxu1 }
 0x16d   : > { %525 = vst [vmem:[%s843_s23 + $0x80] sm:$0xff] %v390_v38  ;;  %541 = vst [vmem:[%s843_s23 + $0x100] sm:$0xff] %v430_v39  ;;  %v392_v40 = vpop.f32.mrb[17].mxu0  ;;  %v432_v41 = vpop.f32.mrb[1].mxu1 }
 0x16e   : > { %526 = vst [vmem:[%s843_s23 + $0x88] sm:$0xff] %v392_v40  ;;  %542 = vst [vmem:[%s843_s23 + $0x108] sm:$0xff] %v432_v41  ;;  %v394_v42 = vpop.f32.mrb[18].mxu0  ;;  %v434_v43 = vpop.f32.mrb[2].mxu1 }
 0x16f   : > { %527 = vst [vmem:[%s843_s23 + $0x90] sm:$0xff] %v394_v42  ;;  %543 = vst [vmem:[%s843_s23 + $0x110] sm:$0xff] %v434_v43  ;;  %v396_v44 = vpop.f32.mrb[19].mxu0  ;;  %v436_v45 = vpop.f32.mrb[3].mxu1 }
 0x170   : > { %528 = vst [vmem:[%s843_s23 + $0x98] sm:$0xff] %v396_v44  ;;  %544 = vst [vmem:[%s843_s23 + $0x118] sm:$0xff] %v436_v45 }
 0x174   : > { %v400_v46 = vpop.f32.mrb[20].mxu0  ;;  %v440_v47 = vpop.f32.mrb[4].mxu1 }
 0x175   : > { %529 = vst [vmem:[%s843_s23 + $0xa0] sm:$0xff] %v400_v46  ;;  %545 = vst [vmem:[%s843_s23 + $0x120] sm:$0xff] %v440_v47  ;;  %v402_v48 = vpop.f32.mrb[21].mxu0  ;;  %v442_v49 = vpop.f32.mrb[5].mxu1 }
 0x176   : > { %530 = vst [vmem:[%s843_s23 + $0xa8] sm:$0xff] %v402_v48  ;;  %546 = vst [vmem:[%s843_s23 + $0x128] sm:$0xff] %v442_v49  ;;  %v404_v50 = vpop.f32.mrb[22].mxu0  ;;  %v444_v51 = vpop.f32.mrb[6].mxu1 }
 0x177   : > { %531 = vst [vmem:[%s843_s23 + $0xb0] sm:$0xff] %v404_v50  ;;  %547 = vst [vmem:[%s843_s23 + $0x130] sm:$0xff] %v444_v51  ;;  %v406_v52 = vpop.f32.mrb[23].mxu0  ;;  %v446_v53 = vpop.f32.mrb[7].mxu1 }
 0x178   : > { %532 = vst [vmem:[%s843_s23 + $0xb8] sm:$0xff] %v406_v52  ;;  %548 = vst [vmem:[%s843_s23 + $0x138] sm:$0xff] %v446_v53 }
 0x17c   : > { %v410_v54 = vpop.f32.mrb[24].mxu0  ;;  %v450_v55 = vpop.f32.mrb[8].mxu1 }
 0x17d   : > { %533 = vst [vmem:[%s843_s23 + $0xc0] sm:$0xff] %v410_v54  ;;  %549 = vst [vmem:[%s843_s23 + $0x140] sm:$0xff] %v450_v55  ;;  %v412_v56 = vpop.f32.mrb[25].mxu0  ;;  %v452_v57 = vpop.f32.mrb[9].mxu1 }
 0x17e   : > { %534 = vst [vmem:[%s843_s23 + $0xc8] sm:$0xff] %v412_v56  ;;  %550 = vst [vmem:[%s843_s23 + $0x148] sm:$0xff] %v452_v57  ;;  %v414_v58 = vpop.f32.mrb[26].mxu0  ;;  %v454_v59 = vpop.f32.mrb[10].mxu1 }
 0x17f   : > { %535 = vst [vmem:[%s843_s23 + $0xd0] sm:$0xff] %v414_v58  ;;  %551 = vst [vmem:[%s843_s23 + $0x150] sm:$0xff] %v454_v59  ;;  %v416_v60 = vpop.f32.mrb[27].mxu0  ;;  %v456_v61 = vpop.f32.mrb[11].mxu1 }
 0x180   : > { %536 = vst [vmem:[%s843_s23 + $0xd8] sm:$0xff] %v416_v60  ;;  %552 = vst [vmem:[%s843_s23 + $0x158] sm:$0xff] %v456_v61 }
 0x184   : > { %v420_v62 = vpop.f32.mrb[28].mxu0  ;;  %v460_v63 = vpop.f32.mrb[12].mxu1 }
 0x185   : > { %537 = vst [vmem:[%s843_s23 + $0xe0] sm:$0xff] %v420_v62  ;;  %553 = vst [vmem:[%s843_s23 + $0x160] sm:$0xff] %v460_v63  ;;  %v422_v0 = vpop.f32.mrb[29].mxu0  ;;  %v462_v1 = vpop.f32.mrb[13].mxu1 }
 0x186   : > { %538 = vst [vmem:[%s843_s23 + $0xe8] sm:$0xff] %v422_v0  ;;  %554 = vst [vmem:[%s843_s23 + $0x168] sm:$0xff] %v462_v1  ;;  %v424_v2 = vpop.f32.mrb[30].mxu0  ;;  %v464_v3 = vpop.f32.mrb[14].mxu1 }
 0x187   : > { %539 = vst [vmem:[%s843_s23 + $0xf0] sm:$0xff] %v424_v2  ;;  %555 = vst [vmem:[%s843_s23 + $0x170] sm:$0xff] %v464_v3  ;;  %v426_v4 = vpop.f32.mrb[31].mxu0  ;;  %v466_v5 = vpop.f32.mrb[15].mxu1 }
 0x188   : > { %540 = vst [vmem:[%s843_s23 + $0xf8] sm:$0xff] %v426_v4  ;;  %556 = vst [vmem:[%s843_s23 + $0x178] sm:$0xff] %v466_v5 }
 0x18c   : > { %v470_v6 = vpop.f32.mrb[16].mxu1 }
 0x18d   : > { %557 = vst [vmem:[%s843_s23 + $0x180] sm:$0xff] %v470_v6  ;;  %v472_v7 = vpop.f32.mrb[17].mxu1 }
 0x18e   : > { %558 = vst [vmem:[%s843_s23 + $0x188] sm:$0xff] %v472_v7  ;;  %v474_v8 = vpop.f32.mrb[18].mxu1 }
 0x18f   : > { %559 = vst [vmem:[%s843_s23 + $0x190] sm:$0xff] %v474_v8  ;;  %v476_v9 = vpop.f32.mrb[19].mxu1 }
 0x190   : > { %560 = vst [vmem:[%s843_s23 + $0x198] sm:$0xff] %v476_v9 }
 0x194   : > { %v480_v10 = vpop.f32.mrb[20].mxu1 }
 0x195   : > { %561 = vst [vmem:[%s843_s23 + $0x1a0] sm:$0xff] %v480_v10  ;;  %v482_v11 = vpop.f32.mrb[21].mxu1 }
 0x196   : > { %562 = vst [vmem:[%s843_s23 + $0x1a8] sm:$0xff] %v482_v11  ;;  %v484_v12 = vpop.f32.mrb[22].mxu1 }
 0x197   : > { %563 = vst [vmem:[%s843_s23 + $0x1b0] sm:$0xff] %v484_v12  ;;  %v486_v13 = vpop.f32.mrb[23].mxu1 }
 0x198   : > { %564 = vst [vmem:[%s843_s23 + $0x1b8] sm:$0xff] %v486_v13 }
 0x19c   : > { %v490_v14 = vpop.f32.mrb[24].mxu1 }
 0x19d   : > { %565 = vst [vmem:[%s843_s23 + $0x1c0] sm:$0xff] %v490_v14  ;;  %v492_v15 = vpop.f32.mrb[25].mxu1 }
 0x19e   : > { %566 = vst [vmem:[%s843_s23 + $0x1c8] sm:$0xff] %v492_v15  ;;  %v494_v16 = vpop.f32.mrb[26].mxu1 }
 0x19f   : > { %567 = vst [vmem:[%s843_s23 + $0x1d0] sm:$0xff] %v494_v16  ;;  %v496_v17 = vpop.f32.mrb[27].mxu1 }
 0x1a0   : > { %568 = vst [vmem:[%s843_s23 + $0x1d8] sm:$0xff] %v496_v17 }
 0x1a4   : > { %v500_v18 = vpop.f32.mrb[28].mxu1 }
 0x1a5   : > { %569 = vst [vmem:[%s843_s23 + $0x1e0] sm:$0xff] %v500_v18  ;;  %v502_v19 = vpop.f32.mrb[29].mxu1 }
 0x1a6   : > { %570 = vst [vmem:[%s843_s23 + $0x1e8] sm:$0xff] %v502_v19  ;;  %v504_v20 = vpop.f32.mrb[30].mxu1 }
 0x1a7   : > { %571 = vst [vmem:[%s843_s23 + $0x1f0] sm:$0xff] %v504_v20  ;;  %v506_v21 = vpop.f32.mrb[31].mxu1 }
 0x1a8   : > { %572 = vst [vmem:[%s843_s23 + $0x1f8] sm:$0xff] %v506_v21 }
 0x1a9 PF: > { %s12_s11 = sadd.s32 1, %s762_s11   ;;  %s921_s9 = smov %s758_s10 }
 0x1aa   : > { %p9_p5 = scmp.ge.s32.totalorder %s12_s11, 4   ;;  %s922_s10 = smov %s924_s12 }
 0x1ac   :  { %11 = sbr.rel (!%p9_p5) target bundleno = 2 (0x2), region = 61 }

// kernel: pairwise_attention_block.17
= control target key start
LH: loop header
LB: loop body
LE: loop exit
PB: predicated region body
PF: predicated region fallthrough
CT: control target
= control target key end

     0   :  { %vm1114_vm0 = vcmask 130048   ;;  %s2249_s1 = inlined_call_operand.vmem [shape: bf16[1024,16], index: 1, kind: input, shape index: {}]   ;;  %s2250_s0 = inlined_call_operand.vmem [shape: f32[128,1024], index: 0, kind: input, shape index: {}]   ;;  %s2251_s2 = inlined_call_operand.vmem [shape: f32[1,16], index: 2, kind: input, shape index: {}]   ;;  %s2252_s3 = inlined_call_operand.vmem [shape: f32[128,16], index: 3, kind: output, shape index: {}]  }
   0x1   :  { %v1456_v0 = vld [vmem:[%s2249_s1 + $0x40] sm:$0xff]   ;;  %v1460_v4 = vld [vmem:[%s2249_s1 + $0x48] sm:$0xff]   ;;  %v1464_v8 = vld [vmem:[%s2249_s1 + $0x50] sm:$0xff]  }
   0x2   :  { %v1457_v1 = vld [vmem:[%s2249_s1 + $0xc0] sm:$0xff]   ;;  %1200 = vmatprep.subr.bf16.mxu0 %v1456_v0  ;;  %v1461_v5 = vld [vmem:[%s2249_s1 + $0xc8] sm:$0xff]   ;;  %v1465_v9 = vld [vmem:[%s2249_s1 + $0xd0] sm:$0xff]  }
   0x3   :  { %v1458_v2 = vld [vmem:[%s2249_s1] sm:$0xff]   ;;  %1264 = vmatprep.subr.bf16.mxu1 %v1457_v1  ;;  %v1462_v6 = vld [vmem:[%s2249_s1 + $0x8] sm:$0xff]   ;;  %v1466_v10 = vld [vmem:[%s2249_s1 + $0x10] sm:$0xff]  }
   0x4   :  { %v1459_v3 = vld [vmem:[%s2249_s1 + $0x80] sm:$0xff]   ;;  %1201 = vmatpush3.bf16.msra.mxu0 %v1458_v2  ;;  %v1463_v7 = vld [vmem:[%s2249_s1 + $0x88] sm:$0xff]   ;;  %v1467_v11 = vld [vmem:[%s2249_s1 + $0x90] sm:$0xff]  }
   0x5   :  { %1265 = vmatpush3.bf16.msra.mxu1 %v1459_v3  ;;  %1202 = vmatprep.subr.bf16.mxu0 %v1460_v4  ;;  %v1468_v12 = vld [vmem:[%s2249_s1 + $0x58] sm:$0xff]   ;;  %v1472_v16 = vld [vmem:[%s2249_s1 + $0x60] sm:$0xff]   ;;  %v1476_v20 = vld [vmem:[%s2249_s1 + $0x68] sm:$0xff]  }
   0x6   :  { %1266 = vmatprep.subr.bf16.mxu1 %v1461_v5  ;;  %v1469_v13 = vld [vmem:[%s2249_s1 + $0xd8] sm:$0xff]   ;;  %v1473_v17 = vld [vmem:[%s2249_s1 + $0xe0] sm:$0xff]   ;;  %v1477_v21 = vld [vmem:[%s2249_s1 + $0xe8] sm:$0xff]  }
   0x7   :  { %v1470_v14 = vld [vmem:[%s2249_s1 + $0x18] sm:$0xff]   ;;  %v1474_v18 = vld [vmem:[%s2249_s1 + $0x20] sm:$0xff]   ;;  %v1478_v22 = vld [vmem:[%s2249_s1 + $0x28] sm:$0xff]  }
   0x8   :  { %1203 = vmatpush3.bf16.msra.mxu0 %v1462_v6  ;;  %v1471_v15 = vld [vmem:[%s2249_s1 + $0x98] sm:$0xff]   ;;  %v1475_v19 = vld [vmem:[%s2249_s1 + $0xa0] sm:$0xff]   ;;  %v1479_v23 = vld [vmem:[%s2249_s1 + $0xa8] sm:$0xff]  }
   0x9   :  { %1267 = vmatpush3.bf16.msra.mxu1 %v1463_v7  ;;  %1204 = vmatprep.subr.bf16.mxu0 %v1464_v8  ;;  %v1480_v24 = vld [vmem:[%s2249_s1 + $0x70] sm:$0xff]   ;;  %v1484_v28 = vld [vmem:[%s2249_s1 + $0x78] sm:$0xff]   ;;  %v16_v32 = vld [vmem:[%s2250_s0 + $0x8] sm:$0xff] }
   0xa   :  { %1268 = vmatprep.subr.bf16.mxu1 %v1465_v9  ;;  %v1481_v25 = vld [vmem:[%s2249_s1 + $0xf0] sm:$0xff]   ;;  %v1485_v29 = vld [vmem:[%s2249_s1 + $0xf8] sm:$0xff]   ;;  %v24_v33 = vld [vmem:[%s2250_s0 + $0x48] sm:$0xff] }
   0xb   :  { %v1482_v26 = vld [vmem:[%s2249_s1 + $0x30] sm:$0xff]   ;;  %v1486_v30 = vld [vmem:[%s2249_s1 + $0x38] sm:$0xff]   ;;  %v144_v35 = vpack.c.bf16 %v24_v33, %v16_v32  ;;  %v15_v37 = vld [vmem:[%s2250_s0] sm:$0xff] }
   0xc   :  { %1205 = vmatpush3.bf16.msra.mxu0 %v1466_v10  ;;  %v1483_v27 = vld [vmem:[%s2249_s1 + $0xb0] sm:$0xff]   ;;  %v1487_v31 = vld [vmem:[%s2249_s1 + $0xb8] sm:$0xff]   ;;  %v23_v38 = vld [vmem:[%s2250_s0 + $0x40] sm:$0xff] }
   0xd   :  { %1269 = vmatpush3.bf16.msra.mxu1 %v1467_v11  ;;  %1206 = vmatprep.subr.bf16.mxu0 %v1468_v12  ;;  %v18_v34 = vld [vmem:[%s2250_s0 + $0x18] sm:$0xff]  ;;  %v143_v40 = vpack.c.bf16 %v23_v38, %v15_v37  ;;  %v17_v41 = vld [vmem:[%s2250_s0 + $0x10] sm:$0xff]  ;;  %v1488_v44 = vld [vmem:[%s2249_s1 + $0x140] sm:$0xff]  }
   0xe   :  { %1270 = vmatprep.subr.bf16.mxu1 %v1469_v13  ;;  %v26_v36 = vld [vmem:[%s2250_s0 + $0x58] sm:$0xff]  ;;  %v25_v42 = vld [vmem:[%s2250_s0 + $0x50] sm:$0xff]  ;;  %758 = vmatprep.mubr.bf16.mxu0 %v144_v35  ;;  %v1489_v45 = vld [vmem:[%s2249_s1 + $0x100] sm:$0xff]  }
   0xf   :  { %v146_v39 = vpack.c.bf16 %v26_v36, %v18_v34  ;;  %v145_v43 = vpack.c.bf16 %v25_v42, %v17_v41  ;;  %v1490_v46 = vld [vmem:[%s2249_s1 + $0x1c0] sm:$0xff]   ;;  %v32_v48 = vld [vmem:[%s2250_s0 + $0x88] sm:$0xff]  ;;  %v34_v50 = vld [vmem:[%s2250_s0 + $0x98] sm:$0xff] }
  0x10   :  { %1207 = vmatpush3.bf16.msra.mxu0 %v1470_v14  ;;  %v1491_v47 = vld [vmem:[%s2249_s1 + $0x180] sm:$0xff]   ;;  %v40_v49 = vld [vmem:[%s2250_s0 + $0xc8] sm:$0xff]  ;;  %v42_v51 = vld [vmem:[%s2250_s0 + $0xd8] sm:$0xff] }
  0x11   :  { %1271 = vmatpush3.bf16.msra.mxu1 %v1471_v15  ;;  %1208 = vmatprep.subr.bf16.mxu0 %v1472_v16  ;;  %v152_v52 = vpack.c.bf16 %v40_v49, %v32_v48  ;;  %v154_v53 = vpack.c.bf16 %v42_v51, %v34_v50  ;;  %v31_v54 = vld [vmem:[%s2250_s0 + $0x80] sm:$0xff]  ;;  %v33_v56 = vld [vmem:[%s2250_s0 + $0x90] sm:$0xff]  ;;  %v1492_v60 = vld [vmem:[%s2249_s1 + $0x148] sm:$0xff]  }
  0x12   :  { %1272 = vmatprep.subr.bf16.mxu1 %v1473_v17  ;;  %855 = vmatprep.mubr.bf16.mxu1 %v146_v39  ;;  %v39_v55 = vld [vmem:[%s2250_s0 + $0xc0] sm:$0xff]  ;;  %v41_v58 = vld [vmem:[%s2250_s0 + $0xd0] sm:$0xff]  ;;  %v1493_v61 = vld [vmem:[%s2249_s1 + $0x108] sm:$0xff]  }
  0x13   :  { %v151_v57 = vpack.c.bf16 %v39_v55, %v31_v54  ;;  %v153_v59 = vpack.c.bf16 %v41_v58, %v33_v56  ;;  %v1494_v62 = vld [vmem:[%s2249_s1 + $0x1c8] sm:$0xff]   ;;  %v50_v3 = vld [vmem:[%s2250_s0 + $0x118] sm:$0xff]  ;;  %v47_v5 = vld [vmem:[%s2250_s0 + $0x100] sm:$0xff] }
  0x14   :  { %1209 = vmatpush3.bf16.msra.mxu0 %v1474_v18  ;;  %v1495_v63 = vld [vmem:[%s2249_s1 + $0x188] sm:$0xff]   ;;  %v58_v4 = vld [vmem:[%s2250_s0 + $0x158] sm:$0xff]  ;;  %v55_v7 = vld [vmem:[%s2250_s0 + $0x140] sm:$0xff] }
  0x15   :  { %1273 = vmatpush3.bf16.msra.mxu1 %v1475_v19  ;;  %1210 = vmatprep.subr.bf16.mxu0 %v1476_v20  ;;  %v48_v0 = vld [vmem:[%s2250_s0 + $0x108] sm:$0xff]  ;;  %v162_v6 = vpack.c.bf16 %v58_v4, %v50_v3  ;;  %v49_v8 = vld [vmem:[%s2250_s0 + $0x110] sm:$0xff]  ;;  %v159_v10 = vpack.c.bf16 %v55_v7, %v47_v5  ;;  %v66_v18 = vld [vmem:[%s2250_s0 + $0x198] sm:$0xff] }
  0x16   :  { %1274 = vmatprep.subr.bf16.mxu1 %v1477_v21  ;;  %v56_v1 = vld [vmem:[%s2250_s0 + $0x148] sm:$0xff]  ;;  %v57_v9 = vld [vmem:[%s2250_s0 + $0x150] sm:$0xff]  ;;  %v74_v20 = vld [vmem:[%s2250_s0 + $0x1d8] sm:$0xff] }
  0x17   :  { %v160_v2 = vpack.c.bf16 %v56_v1, %v48_v0  ;;  %v1496_v11 = vld [vmem:[%s2249_s1 + $0x150] sm:$0xff]   ;;  %v161_v12 = vpack.c.bf16 %v57_v9, %v49_v8  ;;  %v64_v16 = vld [vmem:[%s2250_s0 + $0x188] sm:$0xff]  ;;  %v63_v21 = vld [vmem:[%s2250_s0 + $0x180] sm:$0xff] }
  0x18   :  { %1211 = vmatpush3.bf16.msra.mxu0 %v1478_v22  ;;  %v1497_v13 = vld [vmem:[%s2249_s1 + $0x110] sm:$0xff]   ;;  %v72_v17 = vld [vmem:[%s2250_s0 + $0x1c8] sm:$0xff]  ;;  %v71_v22 = vld [vmem:[%s2250_s0 + $0x1c0] sm:$0xff] }
  0x19   :  { %1275 = vmatpush3.bf16.msra.mxu1 %v1479_v23  ;;  %1212 = vmatprep.subr.bf16.mxu0 %v1480_v24  ;;  %v1498_v14 = vld [vmem:[%s2249_s1 + $0x1d0] sm:$0xff]   ;;  %v168_v19 = vpack.c.bf16 %v72_v17, %v64_v16  ;;  %v170_v23 = vpack.c.bf16 %v74_v20, %v66_v18  ;;  %v80_v32 = vld [vmem:[%s2250_s0 + $0x208] sm:$0xff]  ;;  %v82_v34 = vld [vmem:[%s2250_s0 + $0x218] sm:$0xff] }
  0x1a   :  { %1276 = vmatprep.subr.bf16.mxu1 %v1481_v25  ;;  %v1499_v15 = vld [vmem:[%s2249_s1 + $0x190] sm:$0xff]   ;;  %v88_v33 = vld [vmem:[%s2250_s0 + $0x248] sm:$0xff]  ;;  %v90_v35 = vld [vmem:[%s2250_s0 + $0x258] sm:$0xff] }
  0x1b   :  { %v65_v24 = vld [vmem:[%s2250_s0 + $0x190] sm:$0xff]  ;;  %v176_v36 = vpack.c.bf16 %v88_v33, %v80_v32  ;;  %v178_v37 = vpack.c.bf16 %v90_v35, %v82_v34  ;;  %v79_v38 = vld [vmem:[%s2250_s0 + $0x200] sm:$0xff]  ;;  %v96_v48 = vld [vmem:[%s2250_s0 + $0x288] sm:$0xff] }
  0x1c   :  { %1213 = vmatpush3.bf16.msra.mxu0 %v1482_v26  ;;  %v73_v25 = vld [vmem:[%s2250_s0 + $0x1d0] sm:$0xff]  ;;  %v1500_v26 = vld [vmem:[%s2249_s1 + $0x158] sm:$0xff]   ;;  %v87_v39 = vld [vmem:[%s2250_s0 + $0x240] sm:$0xff] }
  0x1d   :  { %1277 = vmatpush3.bf16.msra.mxu1 %v1483_v27  ;;  %1214 = vmatprep.subr.bf16.mxu0 %v1484_v28  ;;  %v167_v27 = vpack.c.bf16 %v71_v22, %v63_v21  ;;  %v1501_v28 = vld [vmem:[%s2249_s1 + $0x118] sm:$0xff]   ;;  %v89_v41 = vld [vmem:[%s2250_s0 + $0x250] sm:$0xff]  ;;  %v1504_v42 = vld [vmem:[%s2249_s1 + $0x160] sm:$0xff]  }
  0x1e   :  { %1278 = vmatprep.subr.bf16.mxu1 %v1485_v29  ;;  %v169_v29 = vpack.c.bf16 %v73_v25, %v65_v24  ;;  %v104_v49 = vld [vmem:[%s2250_s0 + $0x2c8] sm:$0xff]  ;;  %v98_v51 = vld [vmem:[%s2250_s0 + $0x298] sm:$0xff]  ;;  %v95_v54 = vld [vmem:[%s2250_s0 + $0x280] sm:$0xff] }
  0x1f   :  { %v184_v50 = vpack.c.bf16 %v104_v49, %v96_v48  ;;  %v103_v55 = vld [vmem:[%s2250_s0 + $0x2c0] sm:$0xff]  ;;  %v97_v56 = vld [vmem:[%s2250_s0 + $0x290] sm:$0xff]  ;;  %v1508_v58 = vld [vmem:[%s2249_s1 + $0x168] sm:$0xff]  }
  0x20   :  { %1215 = vmatpush3.bf16.msra.mxu0 %v1486_v30  ;;  %v1502_v30 = vld [vmem:[%s2249_s1 + $0x1d8] sm:$0xff]   ;;  %v120_v0 = vld [vmem:[%s2250_s0 + $0x348] sm:$0xff]  ;;  %v119_v7 = vld [vmem:[%s2250_s0 + $0x340] sm:$0xff] }
  0x21   :  { %1279 = vmatpush3.bf16.msra.mxu1 %v1487_v31  ;;  %1328 = vmatprep.subr.bf16.mxu0 %v1488_v44  ;;  %v1503_v31 = vld [vmem:[%s2249_s1 + $0x198] sm:$0xff]   ;;  %v175_v44 = vpack.c.bf16 %v87_v39, %v79_v38  ;;  %v1512_v8 = vld [vmem:[%s2249_s1 + $0x170] sm:$0xff]   ;;  %v19_v38 = vld [vmem:[%s2250_s0 + $0x20] sm:$0xff] }
  0x22   :  { %1392 = vmatprep.subr.bf16.mxu1 %v1490_v46  ;;  %v114_v1 = vld [vmem:[%s2250_s0 + $0x318] sm:$0xff]  ;;  %v113_v9 = vld [vmem:[%s2250_s0 + $0x310] sm:$0xff]  ;;  %v27_v39 = vld [vmem:[%s2250_s0 + $0x60] sm:$0xff] }
  0x23   :  { %759 = vmatmul.mubr.bf16.vlgmr.msra.gmra.mrb[0].mxu0 %v143_v40  ;;  %v81_v40 = vld [vmem:[%s2250_s0 + $0x210] sm:$0xff]  ;;  %v122_v4 = vld [vmem:[%s2250_s0 + $0x358] sm:$0xff] }
  0x24   :  { %856 = vmatmul.mubr.bf16.vlgmr.msra.gmra.mrb[0].mxu1 %v145_v43  ;;  %1329 = vmatpush3.bf16.msra.mxu0 %v1489_v45  ;;  %v1505_v43 = vld [vmem:[%s2249_s1 + $0x120] sm:$0xff]   ;;  %v177_v46 = vpack.c.bf16 %v89_v41, %v81_v40  ;;  %v194_v5 = vpack.c.bf16 %v122_v4, %v114_v1  ;;  %v130_v16 = vld [vmem:[%s2250_s0 + $0x398] sm:$0xff]  ;;  %v21_v40 = vld [vmem:[%s2250_s0 + $0x30] sm:$0xff] }
  0x25   :  { %1393 = vmatpush3.bf16.msra.mxu1 %v1491_v47  ;;  %766 = vmatprep.mubr.bf16.mxu0 %v152_v52  ;;  %v1506_v45 = vld [vmem:[%s2249_s1 + $0x1e0] sm:$0xff]   ;;  %v106_v52 = vld [vmem:[%s2250_s0 + $0x2d8] sm:$0xff]  ;;  %v29_v41 = vld [vmem:[%s2250_s0 + $0x70] sm:$0xff] }
  0x26   :  { %863 = vmatprep.mubr.bf16.mxu1 %v154_v53  ;;  %1330 = vmatprep.subr.bf16.mxu0 %v1492_v60  ;;  %v1507_v47 = vld [vmem:[%s2249_s1 + $0x1a0] sm:$0xff]   ;;  %v186_v53 = vpack.c.bf16 %v106_v52, %v98_v51  ;;  %v1510_v60 = vld [vmem:[%s2249_s1 + $0x1e8] sm:$0xff]   ;;  %v138_v17 = vld [vmem:[%s2250_s0 + $0x3d8] sm:$0xff] }
  0x27   :  { %1394 = vmatprep.subr.bf16.mxu1 %v1494_v62  ;;  %v183_v62 = vpack.c.bf16 %v103_v55, %v95_v54  ;;  %v202_v21 = vpack.c.bf16 %v138_v17, %v130_v16  ;;  %v1516_v22 = vld [vmem:[%s2249_s1 + $0x178] sm:$0xff]   ;;  %v43_v51 = vld [vmem:[%s2250_s0 + $0xe0] sm:$0xff]  ;;  %v37_v52 = vld [vmem:[%s2250_s0 + $0xb0] sm:$0xff] }
  0x28   :  { %1331 = vmatpush3.bf16.msra.mxu0 %v1493_v61  ;;  %v1511_v61 = vld [vmem:[%s2249_s1 + $0x1a8] sm:$0xff]   ;;  %v1517_v24 = vld [vmem:[%s2249_s1 + $0x138] sm:$0xff]   ;;  %v61_v1 = vld [vmem:[%s2250_s0 + $0x170] sm:$0xff] }
  0x29   :  { %1395 = vmatpush3.bf16.msra.mxu1 %v1495_v63  ;;  %1332 = vmatprep.subr.bf16.mxu0 %v1496_v11  ;;  %v112_v63 = vld [vmem:[%s2250_s0 + $0x308] sm:$0xff]  ;;  %v1513_v11 = vld [vmem:[%s2249_s1 + $0x130] sm:$0xff]   ;;  %v1518_v25 = vld [vmem:[%s2249_s1 + $0x1f8] sm:$0xff]  }
  0x2a   :  { %1396 = vmatprep.subr.bf16.mxu1 %v1498_v14  ;;  %v192_v3 = vpack.c.bf16 %v120_v0, %v112_v63  ;;  %v128_v14 = vld [vmem:[%s2250_s0 + $0x388] sm:$0xff]  ;;  %v22_v32 = vld [vmem:[%s2250_s0 + $0x38] sm:$0xff]  ;;  %v59_v63 = vld [vmem:[%s2250_s0 + $0x160] sm:$0xff] }
  0x2b   :  { %767 = vmatmul.mubr.bf16.gmra.mrb[4].mxu0 %v151_v57  ;;  %v105_v57 = vld [vmem:[%s2250_s0 + $0x2d0] sm:$0xff]  ;;  %v30_v33 = vld [vmem:[%s2250_s0 + $0x78] sm:$0xff]  ;;  %v52_v54 = vld [vmem:[%s2250_s0 + $0x128] sm:$0xff] }
  0x2c   :  { %864 = vmatmul.mubr.bf16.gmra.mrb[4].mxu1 %v153_v59  ;;  %774 = vmatprep.mubr.bf16.mxu0 %v160_v2  ;;  %v1509_v59 = vld [vmem:[%s2249_s1 + $0x128] sm:$0xff]   ;;  %v185_v2 = vpack.c.bf16 %v105_v57, %v97_v56  ;;  %v54_v56 = vld [vmem:[%s2250_s0 + $0x138] sm:$0xff]  ;;  %v53_v0 = vld [vmem:[%s2250_s0 + $0x130] sm:$0xff] }
  0x2d   :  { %871 = vmatprep.mubr.bf16.mxu1 %v162_v6  ;;  %1333 = vmatpush3.bf16.msra.mxu0 %v1497_v13  ;;  %v111_v6 = vld [vmem:[%s2250_s0 + $0x300] sm:$0xff]  ;;  %v1515_v13 = vld [vmem:[%s2249_s1 + $0x1b0] sm:$0xff]   ;;  %v60_v55 = vld [vmem:[%s2250_s0 + $0x168] sm:$0xff] }
  0x2e   :  { %1397 = vmatpush3.bf16.msra.mxu1 %v1499_v15  ;;  %1334 = vmatprep.subr.bf16.mxu0 %v1500_v26  ;;  %v136_v15 = vld [vmem:[%s2250_s0 + $0x3c8] sm:$0xff]  ;;  %v191_v18 = vpack.c.bf16 %v119_v7, %v111_v6  ;;  %v135_v26 = vld [vmem:[%s2250_s0 + $0x3c0] sm:$0xff]  ;;  %v62_v57 = vld [vmem:[%s2250_s0 + $0x178] sm:$0xff]  ;;  %v165_v7 = vpack.c.bf16 %v61_v1, %v53_v0 }
  0x2f   :  { %1398 = vmatprep.subr.bf16.mxu1 %v1502_v30  ;;  %v200_v20 = vpack.c.bf16 %v136_v15, %v128_v14  ;;  %v20_v30 = vld [vmem:[%s2250_s0 + $0x28] sm:$0xff]  ;;  %v70_v4 = vld [vmem:[%s2250_s0 + $0x1b8] sm:$0xff] }
  0x30   :  { %v84_v14 = vld [vmem:[%s2250_s0 + $0x228] sm:$0xff]  ;;  %v86_v16 = vld [vmem:[%s2250_s0 + $0x238] sm:$0xff] }
  0x31   :  { %1335 = vmatpush3.bf16.msra.mxu0 %v1501_v28  ;;  %v1519_v28 = vld [vmem:[%s2249_s1 + $0x1b8] sm:$0xff]   ;;  %v92_v15 = vld [vmem:[%s2250_s0 + $0x268] sm:$0xff] }
  0x32   :  { %1399 = vmatpush3.bf16.msra.mxu1 %v1503_v31  ;;  %1336 = vmatprep.subr.bf16.mxu0 %v1504_v42  ;;  %v28_v31 = vld [vmem:[%s2250_s0 + $0x68] sm:$0xff]  ;;  %v94_v17 = vld [vmem:[%s2250_s0 + $0x278] sm:$0xff] }
  0x33   :  { %775 = vmatmul.mubr.bf16.gmra.mrb[8].mxu0 %v159_v10  ;;  %1400 = vmatprep.subr.bf16.mxu1 %v1506_v45  ;;  %v121_v10 = vld [vmem:[%s2250_s0 + $0x350] sm:$0xff]  ;;  %v36_v42 = vld [vmem:[%s2250_s0 + $0xa8] sm:$0xff]  ;;  %v46_v45 = vld [vmem:[%s2250_s0 + $0xf8] sm:$0xff] }
  0x34   :  { %872 = vmatmul.mubr.bf16.gmra.mrb[8].mxu1 %v161_v12  ;;  %782 = vmatprep.mubr.bf16.mxu0 %v168_v19  ;;  %v1514_v12 = vld [vmem:[%s2249_s1 + $0x1f0] sm:$0xff]   ;;  %v193_v19 = vpack.c.bf16 %v121_v10, %v113_v9  ;;  %v67_v10 = vld [vmem:[%s2250_s0 + $0x1a0] sm:$0xff] }
  0x35   :  { %879 = vmatprep.mubr.bf16.mxu1 %v170_v23  ;;  %1337 = vmatpush3.bf16.msra.mxu0 %v1505_v43  ;;  %v127_v23 = vld [vmem:[%s2250_s0 + $0x380] sm:$0xff]  ;;  %v44_v43 = vld [vmem:[%s2250_s0 + $0xe8] sm:$0xff] }
  0x36   :  { %1401 = vmatpush3.bf16.msra.mxu1 %v1507_v47  ;;  %1338 = vmatprep.subr.bf16.mxu0 %v1508_v58  ;;  %v199_v34 = vpack.c.bf16 %v135_v26, %v127_v23  ;;  %v149_v47 = vpack.c.bf16 %v29_v41, %v21_v40  ;;  %v156_v48 = vpack.c.bf16 %v44_v43, %v36_v42  ;;  %v91_v23 = vld [vmem:[%s2250_s0 + $0x260] sm:$0xff]  ;;  %v100_v26 = vld [vmem:[%s2250_s0 + $0x2a8] sm:$0xff]  ;;  %v118_v40 = vld [vmem:[%s2250_s0 + $0x338] sm:$0xff] }
  0x37   :  { %1402 = vmatprep.subr.bf16.mxu1 %v1510_v60  ;;  %v164_v60 = vpack.c.bf16 %v60_v55, %v52_v54  ;;  %v126_v41 = vld [vmem:[%s2250_s0 + $0x378] sm:$0xff] }
  0x39   :  { %1339 = vmatpush3.bf16.msra.mxu0 %v1509_v59 }
  0x3a   :  { %1403 = vmatpush3.bf16.msra.mxu1 %v1511_v61  ;;  %1340 = vmatprep.subr.bf16.mxu0 %v1512_v8  ;;  %v166_v61 = vpack.c.bf16 %v62_v57, %v54_v56 }
  0x3b   :  { %783 = vmatmul.mubr.bf16.gmra.mrb[12].mxu0 %v167_v27  ;;  %1404 = vmatprep.subr.bf16.mxu1 %v1514_v12  ;;  %v129_v27 = vld [vmem:[%s2250_s0 + $0x390] sm:$0xff] }
  0x3c   :  { %880 = vmatmul.mubr.bf16.gmra.mrb[12].mxu1 %v169_v29  ;;  %790 = vmatprep.mubr.bf16.mxu0 %v176_v36  ;;  %v137_v29 = vld [vmem:[%s2250_s0 + $0x3d0] sm:$0xff]  ;;  %v148_v36 = vpack.c.bf16 %v28_v31, %v20_v30 }
  0x3d   :  { %887 = vmatprep.mubr.bf16.mxu1 %v178_v37  ;;  %1341 = vmatpush3.bf16.msra.mxu0 %v1513_v11  ;;  %v201_v35 = vpack.c.bf16 %v137_v29, %v129_v27  ;;  %v150_v37 = vpack.c.bf16 %v30_v33, %v22_v32  ;;  %v75_v11 = vld [vmem:[%s2250_s0 + $0x1e0] sm:$0xff]  ;;  %v69_v12 = vld [vmem:[%s2250_s0 + $0x1b0] sm:$0xff]  ;;  %v108_v27 = vld [vmem:[%s2250_s0 + $0x2e8] sm:$0xff] }
  0x3e   :  { %1405 = vmatpush3.bf16.msra.mxu1 %v1515_v13  ;;  %1342 = vmatprep.subr.bf16.mxu0 %v1516_v22  ;;  %v77_v13 = vld [vmem:[%s2250_s0 + $0x1f0] sm:$0xff]  ;;  %v83_v22 = vld [vmem:[%s2250_s0 + $0x220] sm:$0xff]  ;;  %v110_v29 = vld [vmem:[%s2250_s0 + $0x2f8] sm:$0xff]  ;;  %v188_v32 = vpack.c.bf16 %v108_v27, %v100_v26 }
  0x3f   :  { %1406 = vmatprep.subr.bf16.mxu1 %v1518_v25  ;;  %v93_v25 = vld [vmem:[%s2250_s0 + $0x270] sm:$0xff]  ;;  %v179_v30 = vpack.c.bf16 %v91_v23, %v83_v22 }
  0x41   :  { %1343 = vmatpush3.bf16.msra.mxu0 %v1517_v24  ;;  %v85_v24 = vld [vmem:[%s2250_s0 + $0x230] sm:$0xff] }
  0x42   :  { %1407 = vmatpush3.bf16.msra.mxu1 %v1519_v28  ;;  %v102_v28 = vld [vmem:[%s2250_s0 + $0x2b8] sm:$0xff]  ;;  %v181_v31 = vpack.c.bf16 %v93_v25, %v85_v24 }
  0x43   :  { %791 = vmatmul.mubr.bf16.gmra.mrb[16].mxu0 %v175_v44  ;;  %v38_v44 = vld [vmem:[%s2250_s0 + $0xb8] sm:$0xff]  ;;  %v190_v33 = vpack.c.bf16 %v110_v29, %v102_v28 }
  0x44   :  { %888 = vmatmul.mubr.bf16.gmra.mrb[16].mxu1 %v177_v46  ;;  %798 = vmatprep.mubr.bf16.mxu0 %v184_v50  ;;  %v147_v46 = vpack.c.bf16 %v27_v39, %v19_v38  ;;  %v158_v49 = vpack.c.bf16 %v46_v45, %v38_v44  ;;  %v35_v50 = vld [vmem:[%s2250_s0 + $0xa0] sm:$0xff]  ;;  %v116_v38 = vld [vmem:[%s2250_s0 + $0x328] sm:$0xff]  ;;  %v198_v45 = vpack.c.bf16 %v126_v41, %v118_v40 }
  0x45   :  { %895 = vmatprep.mubr.bf16.mxu1 %v186_v53  ;;  %v45_v53 = vld [vmem:[%s2250_s0 + $0xf0] sm:$0xff]  ;;  %v155_v58 = vpack.c.bf16 %v43_v51, %v35_v50  ;;  %v124_v39 = vld [vmem:[%s2250_s0 + $0x368] sm:$0xff] }
  0x46   :  { %v157_v59 = vpack.c.bf16 %v45_v53, %v37_v52  ;;  %v196_v44 = vpack.c.bf16 %v124_v39, %v116_v38  ;;  %v132_v50 = vld [vmem:[%s2250_s0 + $0x3a8] sm:$0xff]  ;;  %v134_v52 = vld [vmem:[%s2250_s0 + $0x3b8] sm:$0xff] }
  0x47   :  { %v140_v51 = vld [vmem:[%s2250_s0 + $0x3e8] sm:$0xff]  ;;  %v142_v53 = vld [vmem:[%s2250_s0 + $0x3f8] sm:$0xff] }
  0x48   :  { %v204_v56 = vpack.c.bf16 %v140_v51, %v132_v50  ;;  %v206_v57 = vpack.c.bf16 %v142_v53, %v134_v52 }
  0x4b   :  { %799 = vmatmul.mubr.bf16.gmra.mrb[20].mxu0 %v183_v62  ;;  %v51_v62 = vld [vmem:[%s2250_s0 + $0x120] sm:$0xff] }
  0x4c   :  { %896 = vmatmul.mubr.bf16.gmra.mrb[20].mxu1 %v185_v2  ;;  %806 = vmatprep.mubr.bf16.mxu0 %v192_v3  ;;  %v68_v2 = vld [vmem:[%s2250_s0 + $0x1a8] sm:$0xff]  ;;  %v163_v6 = vpack.c.bf16 %v59_v63, %v51_v62 }
  0x4d   :  { %903 = vmatprep.mubr.bf16.mxu1 %v194_v5  ;;  %v76_v3 = vld [vmem:[%s2250_s0 + $0x1e8] sm:$0xff]  ;;  %v78_v5 = vld [vmem:[%s2250_s0 + $0x1f8] sm:$0xff] }
  0x4e   :  { %v172_v8 = vpack.c.bf16 %v76_v3, %v68_v2  ;;  %v174_v9 = vpack.c.bf16 %v78_v5, %v70_v4  ;;  %v2119_v2 = vld [vmem:[%s2251_s2] ss:$0 sm:$0xff] }
  0x53   :  { %807 = vmatmul.mubr.bf16.gmra.mrb[24].mxu0 %v191_v18  ;;  %v171_v18 = vpack.c.bf16 %v75_v11, %v67_v10 }
  0x54   :  { %904 = vmatmul.mubr.bf16.gmra.mrb[24].mxu1 %v193_v19  ;;  %814 = vmatprep.mubr.bf16.mxu0 %v200_v20  ;;  %v173_v19 = vpack.c.bf16 %v77_v13, %v69_v12  ;;  %v180_v20 = vpack.c.bf16 %v92_v15, %v84_v14 }
  0x55   :  { %911 = vmatprep.mubr.bf16.mxu1 %v202_v21  ;;  %v182_v21 = vpack.c.bf16 %v94_v17, %v86_v16 }
  0x5b   :  { %815 = vmatmul.mubr.bf16.gmra.mrb[28].mxu0 %v199_v34  ;;  %v99_v34 = vld [vmem:[%s2250_s0 + $0x2a0] sm:$0xff] }
  0x5c   :  { %912 = vmatmul.mubr.bf16.gmra.mrb[28].mxu1 %v201_v35  ;;  %952 = vmatprep.mubr.bf16.mxu0 %v148_v36  ;;  %v107_v35 = vld [vmem:[%s2250_s0 + $0x2e0] sm:$0xff]  ;;  %v101_v36 = vld [vmem:[%s2250_s0 + $0x2b0] sm:$0xff] }
  0x5d   :  { %1049 = vmatprep.mubr.bf16.mxu1 %v150_v37  ;;  %v109_v37 = vld [vmem:[%s2250_s0 + $0x2f0] sm:$0xff]  ;;  %v187_v42 = vpack.c.bf16 %v107_v35, %v99_v34 }
  0x5e   :  { %v189_v43 = vpack.c.bf16 %v109_v37, %v101_v36 }
  0x63   :  { %953 = vmatmul.mubr.bf16.vlgmr.msra.gmra.mrb[32].mxu0 %v147_v46  ;;  %v115_v46 = vld [vmem:[%s2250_s0 + $0x320] sm:$0xff] }
  0x64   :  { %1050 = vmatmul.mubr.bf16.vlgmr.msra.gmra.mrb[32].mxu1 %v149_v47  ;;  %960 = vmatprep.mubr.bf16.mxu0 %v156_v48  ;;  %v123_v47 = vld [vmem:[%s2250_s0 + $0x360] sm:$0xff]  ;;  %v117_v48 = vld [vmem:[%s2250_s0 + $0x330] sm:$0xff] }
  0x65   :  { %1057 = vmatprep.mubr.bf16.mxu1 %v158_v49  ;;  %v125_v49 = vld [vmem:[%s2250_s0 + $0x370] sm:$0xff]  ;;  %v195_v54 = vpack.c.bf16 %v123_v47, %v115_v46 }
  0x66   :  { %v197_v55 = vpack.c.bf16 %v125_v49, %v117_v48 }
  0x6b   :  { %961 = vmatmul.mubr.bf16.gmra.mrb[36].mxu0 %v155_v58  ;;  %v131_v58 = vld [vmem:[%s2250_s0 + $0x3a0] sm:$0xff] }
  0x6c   :  { %1058 = vmatmul.mubr.bf16.gmra.mrb[36].mxu1 %v157_v59  ;;  %968 = vmatprep.mubr.bf16.mxu0 %v164_v60  ;;  %v139_v59 = vld [vmem:[%s2250_s0 + $0x3e0] sm:$0xff]  ;;  %v133_v60 = vld [vmem:[%s2250_s0 + $0x3b0] sm:$0xff] }
  0x6d   :  { %1065 = vmatprep.mubr.bf16.mxu1 %v166_v61  ;;  %v141_v61 = vld [vmem:[%s2250_s0 + $0x3f0] sm:$0xff]  ;;  %v203_v62 = vpack.c.bf16 %v139_v59, %v131_v58 }
  0x6e   :  { %v205_v63 = vpack.c.bf16 %v141_v61, %v133_v60 }
  0x73   :  { %969 = vmatmul.mubr.bf16.gmra.mrb[40].mxu0 %v163_v6 }
  0x74   :  { %1066 = vmatmul.mubr.bf16.gmra.mrb[40].mxu1 %v165_v7  ;;  %976 = vmatprep.mubr.bf16.mxu0 %v172_v8 }
  0x75   :  { %1073 = vmatprep.mubr.bf16.mxu1 %v174_v9 }
  0x7b   :  { %977 = vmatmul.mubr.bf16.gmra.mrb[44].mxu0 %v171_v18 }
  0x7c   :  { %1074 = vmatmul.mubr.bf16.gmra.mrb[44].mxu1 %v173_v19  ;;  %984 = vmatprep.mubr.bf16.mxu0 %v180_v20 }
  0x7d   :  { %1081 = vmatprep.mubr.bf16.mxu1 %v182_v21 }
  0x83   :  { %985 = vmatmul.mubr.bf16.gmra.mrb[48].mxu0 %v179_v30 }
  0x84   :  { %1082 = vmatmul.mubr.bf16.gmra.mrb[48].mxu1 %v181_v31  ;;  %992 = vmatprep.mubr.bf16.mxu0 %v188_v32 }
  0x85   :  { %1089 = vmatprep.mubr.bf16.mxu1 %v190_v33 }
  0x8b   :  { %993 = vmatmul.mubr.bf16.gmra.mrb[52].mxu0 %v187_v42 }
  0x8c   :  { %1090 = vmatmul.mubr.bf16.gmra.mrb[52].mxu1 %v189_v43  ;;  %1000 = vmatprep.mubr.bf16.mxu0 %v196_v44 }
  0x8d   :  { %1097 = vmatprep.mubr.bf16.mxu1 %v198_v45 }
  0x93   :  { %1001 = vmatmul.mubr.bf16.gmra.mrb[56].mxu0 %v195_v54 }
  0x94   :  { %1098 = vmatmul.mubr.bf16.gmra.mrb[56].mxu1 %v197_v55  ;;  %1008 = vmatprep.mubr.bf16.mxu0 %v204_v56 }
  0x95   :  { %1105 = vmatprep.mubr.bf16.mxu1 %v206_v57 }
  0x9b   :  { %1009 = vmatmul.mubr.bf16.gmra.mrb[60].mxu0 %v203_v62 }
  0x9c   :  { %1106 = vmatmul.mubr.bf16.gmra.mrb[60].mxu1 %v205_v63 }
  0xf6   :  { %v1216_v0 = vpop.f32.mrb[0].mxu0 }
  0xf7   :  { %v1280_v1 = vpop.f32.mrb[0].mxu1  ;;  %v1217_v3 = vpop.f32.mrb[1].mxu0 }
  0xf8   :  { %v1218_v4 = vadd.f32 %v1217_v3, %v1216_v0  ;;  %v1281_v5 = vpop.f32.mrb[1].mxu1  ;;  %v1219_v6 = vpop.f32.mrb[2].mxu0 }
  0xf9   :  { %v1282_v7 = vadd.f32 %v1281_v5, %v1280_v1  ;;  %v1283_v8 = vpop.f32.mrb[2].mxu1  ;;  %v1220_v9 = vpop.f32.mrb[3].mxu0 }
  0xfa   :  { %v761_v10 = vadd.f32 %v1218_v4, %v2119_v2  ;;  %v1221_v11 = vadd.f32 %v1220_v9, %v1219_v6  ;;  %v1284_v12 = vpop.f32.mrb[3].mxu1 }
  0xfb   :  { %v1285_v13 = vadd.f32 %v1284_v12, %v1283_v8 }
  0xfc   :  { %v2122_v14 = vadd.f32 %v1282_v7, %v761_v10  ;;  %v764_v15 = vadd.f32 %v1221_v11, %v2119_v2 }
  0xfe   :  { %v2125_v16 = vadd.f32 %v1285_v13, %v764_v15  ;;  %v1222_v17 = vpop.f32.mrb[4].mxu0 }
  0xff   :  { %v1286_v18 = vpop.f32.mrb[4].mxu1  ;;  %v1223_v19 = vpop.f32.mrb[5].mxu0 }
 0x100   :  { %v1224_v20 = vadd.f32 %v1223_v19, %v1222_v17  ;;  %v1287_v21 = vpop.f32.mrb[5].mxu1  ;;  %v1225_v22 = vpop.f32.mrb[6].mxu0 }
 0x101   :  { %v1288_v23 = vadd.f32 %v1287_v21, %v1286_v18  ;;  %v1289_v24 = vpop.f32.mrb[6].mxu1  ;;  %v1226_v25 = vpop.f32.mrb[7].mxu0 }
 0x102   :  { %v769_v26 = vadd.f32 %v1224_v20, %v2119_v2  ;;  %v1227_v27 = vadd.f32 %v1226_v25, %v1225_v22  ;;  %v1290_v28 = vpop.f32.mrb[7].mxu1 }
 0x103   :  { %v1291_v29 = vadd.f32 %v1290_v28, %v1289_v24 }
 0x104   :  { %v2128_v30 = vadd.f32 %v1288_v23, %v769_v26  ;;  %v772_v31 = vadd.f32 %v1227_v27, %v2119_v2 }
 0x106   :  { %v2131_v32 = vadd.f32 %v1291_v29, %v772_v31  ;;  %v1228_v33 = vpop.f32.mrb[8].mxu0 }
 0x107   :  { %v1292_v34 = vpop.f32.mrb[8].mxu1  ;;  %v1229_v35 = vpop.f32.mrb[9].mxu0 }
 0x108   :  { %v1230_v36 = vadd.f32 %v1229_v35, %v1228_v33  ;;  %v1293_v37 = vpop.f32.mrb[9].mxu1  ;;  %v1231_v38 = vpop.f32.mrb[10].mxu0 }
 0x109   :  { %v1294_v39 = vadd.f32 %v1293_v37, %v1292_v34  ;;  %v1295_v40 = vpop.f32.mrb[10].mxu1  ;;  %v1232_v41 = vpop.f32.mrb[11].mxu0 }
 0x10a   :  { %v777_v42 = vadd.f32 %v1230_v36, %v2119_v2  ;;  %v1233_v43 = vadd.f32 %v1232_v41, %v1231_v38  ;;  %v1296_v44 = vpop.f32.mrb[11].mxu1 }
 0x10b   :  { %v1297_v45 = vadd.f32 %v1296_v44, %v1295_v40 }
 0x10c   :  { %v2134_v46 = vadd.f32 %v1294_v39, %v777_v42  ;;  %v780_v47 = vadd.f32 %v1233_v43, %v2119_v2 }
 0x10e   :  { %v2137_v48 = vadd.f32 %v1297_v45, %v780_v47  ;;  %v1234_v49 = vpop.f32.mrb[12].mxu0 }
 0x10f   :  { %v1298_v50 = vpop.f32.mrb[12].mxu1  ;;  %v1235_v51 = vpop.f32.mrb[13].mxu0 }
 0x110   :  { %v1236_v52 = vadd.f32 %v1235_v51, %v1234_v49  ;;  %v1299_v53 = vpop.f32.mrb[13].mxu1  ;;  %v1237_v54 = vpop.f32.mrb[14].mxu0 }
 0x111   :  { %v1300_v55 = vadd.f32 %v1299_v53, %v1298_v50  ;;  %v1301_v56 = vpop.f32.mrb[14].mxu1  ;;  %v1238_v57 = vpop.f32.mrb[15].mxu0 }
 0x112   :  { %v785_v58 = vadd.f32 %v1236_v52, %v2119_v2  ;;  %v1239_v59 = vadd.f32 %v1238_v57, %v1237_v54  ;;  %v1302_v60 = vpop.f32.mrb[15].mxu1 }
 0x113   :  { %v1303_v61 = vadd.f32 %v1302_v60, %v1301_v56 }
 0x114   :  { %v2140_v62 = vadd.f32 %v1300_v55, %v785_v58  ;;  %v788_v63 = vadd.f32 %v1239_v59, %v2119_v2 }
 0x116   :  { %v2143_v0 = vadd.f32 %v1303_v61, %v788_v63  ;;  %v1240_v1 = vpop.f32.mrb[16].mxu0 }
 0x117   :  { %v1304_v3 = vpop.f32.mrb[16].mxu1  ;;  %v1241_v4 = vpop.f32.mrb[17].mxu0 }
 0x118   :  { %v1242_v5 = vadd.f32 %v1241_v4, %v1240_v1  ;;  %v1305_v6 = vpop.f32.mrb[17].mxu1  ;;  %v1243_v7 = vpop.f32.mrb[18].mxu0 }
 0x119   :  { %v1306_v8 = vadd.f32 %v1305_v6, %v1304_v3  ;;  %v1307_v9 = vpop.f32.mrb[18].mxu1  ;;  %v1244_v10 = vpop.f32.mrb[19].mxu0 }
 0x11a   :  { %v793_v11 = vadd.f32 %v1242_v5, %v2119_v2  ;;  %v1245_v12 = vadd.f32 %v1244_v10, %v1243_v7  ;;  %v1308_v13 = vpop.f32.mrb[19].mxu1 }
 0x11b   :  { %v1309_v15 = vadd.f32 %v1308_v13, %v1307_v9 }
 0x11c   :  { %v2146_v17 = vadd.f32 %v1306_v8, %v793_v11  ;;  %v796_v18 = vadd.f32 %v1245_v12, %v2119_v2 }
 0x11e   :  { %v2149_v19 = vadd.f32 %v1309_v15, %v796_v18  ;;  %v1246_v20 = vpop.f32.mrb[20].mxu0 }
 0x11f   :  { %v1310_v21 = vpop.f32.mrb[20].mxu1  ;;  %v1247_v22 = vpop.f32.mrb[21].mxu0 }
 0x120   :  { %v1248_v23 = vadd.f32 %v1247_v22, %v1246_v20  ;;  %v1311_v24 = vpop.f32.mrb[21].mxu1  ;;  %v1249_v25 = vpop.f32.mrb[22].mxu0 }
 0x121   :  { %v1312_v26 = vadd.f32 %v1311_v24, %v1310_v21  ;;  %v1313_v27 = vpop.f32.mrb[22].mxu1  ;;  %v1250_v28 = vpop.f32.mrb[23].mxu0 }
 0x122   :  { %v801_v29 = vadd.f32 %v1248_v23, %v2119_v2  ;;  %v1251_v31 = vadd.f32 %v1250_v28, %v1249_v25  ;;  %v1314_v33 = vpop.f32.mrb[23].mxu1 }
 0x123   :  { %v1315_v34 = vadd.f32 %v1314_v33, %v1313_v27 }
 0x124   :  { %v2152_v35 = vadd.f32 %v1312_v26, %v801_v29  ;;  %v804_v36 = vadd.f32 %v1251_v31, %v2119_v2 }
 0x126   :  { %v2155_v37 = vadd.f32 %v1315_v34, %v804_v36  ;;  %v1252_v38 = vpop.f32.mrb[24].mxu0 }
 0x127   :  { %v1316_v39 = vpop.f32.mrb[24].mxu1  ;;  %v1253_v40 = vpop.f32.mrb[25].mxu0 }
 0x128   :  { %v1254_v41 = vadd.f32 %v1253_v40, %v1252_v38  ;;  %v1317_v42 = vpop.f32.mrb[25].mxu1  ;;  %v1255_v43 = vpop.f32.mrb[26].mxu0 }
 0x129   :  { %v1318_v44 = vadd.f32 %v1317_v42, %v1316_v39  ;;  %v1319_v45 = vpop.f32.mrb[26].mxu1  ;;  %v1256_v47 = vpop.f32.mrb[27].mxu0 }
 0x12a   :  { %v809_v49 = vadd.f32 %v1254_v41, %v2119_v2  ;;  %v1257_v50 = vadd.f32 %v1256_v47, %v1255_v43  ;;  %v1320_v51 = vpop.f32.mrb[27].mxu1 }
 0x12b   :  { %v1321_v52 = vadd.f32 %v1320_v51, %v1319_v45 }
 0x12c   :  { %v2158_v53 = vadd.f32 %v1318_v44, %v809_v49  ;;  %v812_v54 = vadd.f32 %v1257_v50, %v2119_v2 }
 0x12e   :  { %v2161_v55 = vadd.f32 %v1321_v52, %v812_v54  ;;  %v1258_v56 = vpop.f32.mrb[28].mxu0 }
 0x12f   :  { %v1322_v57 = vpop.f32.mrb[28].mxu1  ;;  %v1259_v58 = vpop.f32.mrb[29].mxu0 }
 0x130   :  { %v1260_v59 = vadd.f32 %v1259_v58, %v1258_v56  ;;  %v1323_v60 = vpop.f32.mrb[29].mxu1  ;;  %v1261_v61 = vpop.f32.mrb[30].mxu0 }
 0x131   :  { %v1324_v63 = vadd.f32 %v1323_v60, %v1322_v57  ;;  %v1325_v1 = vpop.f32.mrb[30].mxu1  ;;  %v1262_v3 = vpop.f32.mrb[31].mxu0 }
 0x132   :  { %v817_v4 = vadd.f32 %v1260_v59, %v2119_v2  ;;  %v1263_v5 = vadd.f32 %v1262_v3, %v1261_v61  ;;  %v1326_v6 = vpop.f32.mrb[31].mxu1 }
 0x133   :  { %v1327_v7 = vadd.f32 %v1326_v6, %v1325_v1 }
 0x134   :  { %v2164_v8 = vadd.f32 %v1324_v63, %v817_v4  ;;  %v820_v9 = vadd.f32 %v1263_v5, %v2119_v2 }
 0x136   :  { %v2167_v10 = vadd.f32 %v1327_v7, %v820_v9  ;;  %v1344_v11 = vpop.f32.mrb[32].mxu0 }
 0x137   :  { %v1408_v12 = vpop.f32.mrb[32].mxu1  ;;  %v1345_v13 = vpop.f32.mrb[33].mxu0 }
 0x138   :  { %v1346_v15 = vadd.f32 %v1345_v13, %v1344_v11  ;;  %v1409_v18 = vpop.f32.mrb[33].mxu1  ;;  %v1347_v20 = vpop.f32.mrb[34].mxu0 }
 0x139   :  { %v1410_v21 = vadd.f32 %v1409_v18, %v1408_v12  ;;  %v1411_v22 = vpop.f32.mrb[34].mxu1  ;;  %v1348_v23 = vpop.f32.mrb[35].mxu0 }
 0x13a   :  { %v955_v24 = vadd.f32 %v1346_v15, %v2122_v14  ;;  %v1349_v25 = vadd.f32 %v1348_v23, %v1347_v20  ;;  %v1412_v26 = vpop.f32.mrb[35].mxu1 }
 0x13b   :  { %v1413_v27 = vadd.f32 %v1412_v26, %v1411_v22 }
 0x13c   :  { %v1052_v28 = vadd.f32 %v1410_v21, %v955_v24  ;;  %v958_v2 = vadd.f32 %v1349_v25, %v2125_v16 }
 0x13e   :  { %1115 = vst.msk [vmem:[%s2252_s3] sm:$0xff] %vm1114_vm0, %v1052_v28  ;;  %v1055_v29 = vadd.f32 %v1413_v27, %v958_v2  ;;  %v1350_v31 = vpop.f32.mrb[36].mxu0 }
 0x13f   :  { %v1414_v33 = vpop.f32.mrb[36].mxu1  ;;  %v1351_v34 = vpop.f32.mrb[37].mxu0 }
 0x140   :  { %1116 = vst.msk [vmem:[%s2252_s3 + $0x8] sm:$0xff] %vm1114_vm0, %v1055_v29  ;;  %v1352_v14 = vadd.f32 %v1351_v34, %v1350_v31  ;;  %v1415_v36 = vpop.f32.mrb[37].mxu1  ;;  %v1353_v38 = vpop.f32.mrb[38].mxu0 }
 0x141   :  { %v1416_v39 = vadd.f32 %v1415_v36, %v1414_v33  ;;  %v1417_v40 = vpop.f32.mrb[38].mxu1  ;;  %v1354_v16 = vpop.f32.mrb[39].mxu0 }
 0x142   :  { %v963_v41 = vadd.f32 %v1352_v14, %v2128_v30  ;;  %v1355_v42 = vadd.f32 %v1354_v16, %v1353_v38  ;;  %v1418_v43 = vpop.f32.mrb[39].mxu1 }
 0x143   :  { %v1419_v44 = vadd.f32 %v1418_v43, %v1417_v40 }
 0x144   :  { %v1060_v45 = vadd.f32 %v1416_v39, %v963_v41  ;;  %v966_v47 = vadd.f32 %v1355_v42, %v2131_v32 }
 0x146   :  { %1117 = vst.msk [vmem:[%s2252_s3 + $0x10] sm:$0xff] %vm1114_vm0, %v1060_v45  ;;  %v1063_v49 = vadd.f32 %v1419_v44, %v966_v47  ;;  %v1356_v50 = vpop.f32.mrb[40].mxu0 }
 0x147   :  { %v1420_v51 = vpop.f32.mrb[40].mxu1  ;;  %v1357_v52 = vpop.f32.mrb[41].mxu0 }
 0x148   :  { %1118 = vst.msk [vmem:[%s2252_s3 + $0x18] sm:$0xff] %vm1114_vm0, %v1063_v49  ;;  %v1358_v30 = vadd.f32 %v1357_v52, %v1356_v50  ;;  %v1421_v54 = vpop.f32.mrb[41].mxu1  ;;  %v1359_v56 = vpop.f32.mrb[42].mxu0 }
 0x149   :  { %v1422_v57 = vadd.f32 %v1421_v54, %v1420_v51  ;;  %v1423_v58 = vpop.f32.mrb[42].mxu1  ;;  %v1360_v32 = vpop.f32.mrb[43].mxu0 }
 0x14a   :  { %v971_v59 = vadd.f32 %v1358_v30, %v2134_v46  ;;  %v1361_v60 = vadd.f32 %v1360_v32, %v1359_v56  ;;  %v1424_v61 = vpop.f32.mrb[43].mxu1 }
 0x14b   :  { %v1425_v63 = vadd.f32 %v1424_v61, %v1423_v58 }
 0x14c   :  { %v1068_v1 = vadd.f32 %v1422_v57, %v971_v59  ;;  %v974_v3 = vadd.f32 %v1361_v60, %v2137_v48 }
 0x14e   :  { %1119 = vst.msk [vmem:[%s2252_s3 + $0x20] sm:$0xff] %vm1114_vm0, %v1068_v1  ;;  %v1071_v4 = vadd.f32 %v1425_v63, %v974_v3  ;;  %v1362_v5 = vpop.f32.mrb[44].mxu0 }
 0x14f   :  { %v1426_v6 = vpop.f32.mrb[44].mxu1  ;;  %v1363_v7 = vpop.f32.mrb[45].mxu0 }
 0x150   :  { %1120 = vst.msk [vmem:[%s2252_s3 + $0x28] sm:$0xff] %vm1114_vm0, %v1071_v4  ;;  %v1364_v46 = vadd.f32 %v1363_v7, %v1362_v5  ;;  %v1427_v9 = vpop.f32.mrb[45].mxu1  ;;  %v1365_v11 = vpop.f32.mrb[46].mxu0 }
 0x151   :  { %v1428_v12 = vadd.f32 %v1427_v9, %v1426_v6  ;;  %v1429_v13 = vpop.f32.mrb[46].mxu1  ;;  %v1366_v48 = vpop.f32.mrb[47].mxu0 }
 0x152   :  { %v979_v15 = vadd.f32 %v1364_v46, %v2140_v62  ;;  %v1367_v18 = vadd.f32 %v1366_v48, %v1365_v11  ;;  %v1430_v20 = vpop.f32.mrb[47].mxu1 }
 0x153   :  { %v1431_v21 = vadd.f32 %v1430_v20, %v1429_v13 }
 0x154   :  { %v1076_v22 = vadd.f32 %v1428_v12, %v979_v15  ;;  %v982_v23 = vadd.f32 %v1367_v18, %v2143_v0 }
 0x156   :  { %1121 = vst.msk [vmem:[%s2252_s3 + $0x30] sm:$0xff] %vm1114_vm0, %v1076_v22  ;;  %v1079_v24 = vadd.f32 %v1431_v21, %v982_v23  ;;  %v1368_v25 = vpop.f32.mrb[48].mxu0 }
 0x157   :  { %v1432_v26 = vpop.f32.mrb[48].mxu1  ;;  %v1369_v27 = vpop.f32.mrb[49].mxu0 }
 0x158   :  { %1122 = vst.msk [vmem:[%s2252_s3 + $0x38] sm:$0xff] %vm1114_vm0, %v1079_v24  ;;  %v1370_v62 = vadd.f32 %v1369_v27, %v1368_v25  ;;  %v1433_v28 = vpop.f32.mrb[49].mxu1  ;;  %v1371_v2 = vpop.f32.mrb[50].mxu0 }
 0x159   :  { %v1434_v29 = vadd.f32 %v1433_v28, %v1432_v26  ;;  %v1435_v31 = vpop.f32.mrb[50].mxu1  ;;  %v1372_v0 = vpop.f32.mrb[51].mxu0 }
 0x15a   :  { %v987_v33 = vadd.f32 %v1370_v62, %v2146_v17  ;;  %v1373_v34 = vadd.f32 %v1372_v0, %v1371_v2  ;;  %v1436_v14 = vpop.f32.mrb[51].mxu1 }
 0x15b   :  { %v1437_v36 = vadd.f32 %v1436_v14, %v1435_v31 }
 0x15c   :  { %v1084_v38 = vadd.f32 %v1434_v29, %v987_v33  ;;  %v990_v39 = vadd.f32 %v1373_v34, %v2149_v19 }
 0x15e   :  { %1123 = vst.msk [vmem:[%s2252_s3 + $0x40] sm:$0xff] %vm1114_vm0, %v1084_v38  ;;  %v1087_v40 = vadd.f32 %v1437_v36, %v990_v39  ;;  %v1374_v16 = vpop.f32.mrb[52].mxu0 }
 0x15f   :  { %v1438_v41 = vpop.f32.mrb[52].mxu1  ;;  %v1375_v42 = vpop.f32.mrb[53].mxu0 }
 0x160   :  { %1124 = vst.msk [vmem:[%s2252_s3 + $0x48] sm:$0xff] %vm1114_vm0, %v1087_v40  ;;  %v1376_v17 = vadd.f32 %v1375_v42, %v1374_v16  ;;  %v1439_v43 = vpop.f32.mrb[53].mxu1  ;;  %v1377_v44 = vpop.f32.mrb[54].mxu0 }
 0x161   :  { %v1440_v45 = vadd.f32 %v1439_v43, %v1438_v41  ;;  %v1441_v47 = vpop.f32.mrb[54].mxu1  ;;  %v1378_v19 = vpop.f32.mrb[55].mxu0 }
 0x162   :  { %v995_v49 = vadd.f32 %v1376_v17, %v2152_v35  ;;  %v1379_v50 = vadd.f32 %v1378_v19, %v1377_v44  ;;  %v1442_v51 = vpop.f32.mrb[55].mxu1 }
 0x163   :  { %v1443_v52 = vadd.f32 %v1442_v51, %v1441_v47 }
 0x164   :  { %v1092_v30 = vadd.f32 %v1440_v45, %v995_v49  ;;  %v998_v54 = vadd.f32 %v1379_v50, %v2155_v37 }
 0x166   :  { %1125 = vst.msk [vmem:[%s2252_s3 + $0x50] sm:$0xff] %vm1114_vm0, %v1092_v30  ;;  %v1095_v56 = vadd.f32 %v1443_v52, %v998_v54  ;;  %v1380_v57 = vpop.f32.mrb[56].mxu0 }
 0x167   :  { %v1444_v58 = vpop.f32.mrb[56].mxu1  ;;  %v1381_v32 = vpop.f32.mrb[57].mxu0 }
 0x168   :  { %1126 = vst.msk [vmem:[%s2252_s3 + $0x58] sm:$0xff] %vm1114_vm0, %v1095_v56  ;;  %v1382_v35 = vadd.f32 %v1381_v32, %v1380_v57  ;;  %v1445_v59 = vpop.f32.mrb[57].mxu1  ;;  %v1383_v60 = vpop.f32.mrb[58].mxu0 }
 0x169   :  { %v1446_v61 = vadd.f32 %v1445_v59, %v1444_v58  ;;  %v1447_v63 = vpop.f32.mrb[58].mxu1  ;;  %v1384_v37 = vpop.f32.mrb[59].mxu0 }
 0x16a   :  { %v1003_v1 = vadd.f32 %v1382_v35, %v2158_v53  ;;  %v1385_v3 = vadd.f32 %v1384_v37, %v1383_v60  ;;  %v1448_v4 = vpop.f32.mrb[59].mxu1 }
 0x16b   :  { %v1449_v5 = vadd.f32 %v1448_v4, %v1447_v63 }
 0x16c   :  { %v1100_v6 = vadd.f32 %v1446_v61, %v1003_v1  ;;  %v1006_v7 = vadd.f32 %v1385_v3, %v2161_v55 }
 0x16e   :  { %1127 = vst.msk [vmem:[%s2252_s3 + $0x60] sm:$0xff] %vm1114_vm0, %v1100_v6  ;;  %v1103_v46 = vadd.f32 %v1449_v5, %v1006_v7  ;;  %v1386_v9 = vpop.f32.mrb[60].mxu0 }
 0x16f   :  { %v1450_v11 = vpop.f32.mrb[60].mxu1  ;;  %v1387_v12 = vpop.f32.mrb[61].mxu0 }
 0x170   :  { %1128 = vst.msk [vmem:[%s2252_s3 + $0x68] sm:$0xff] %vm1114_vm0, %v1103_v46  ;;  %v1388_v53 = vadd.f32 %v1387_v12, %v1386_v9  ;;  %v1451_v13 = vpop.f32.mrb[61].mxu1  ;;  %v1389_v48 = vpop.f32.mrb[62].mxu0 }
 0x171   :  { %v1452_v15 = vadd.f32 %v1451_v13, %v1450_v11  ;;  %v1453_v18 = vpop.f32.mrb[62].mxu1  ;;  %v1390_v55 = vpop.f32.mrb[63].mxu0 }
 0x172   :  { %v1011_v20 = vadd.f32 %v1388_v53, %v2164_v8  ;;  %v1391_v21 = vadd.f32 %v1390_v55, %v1389_v48  ;;  %v1454_v22 = vpop.f32.mrb[63].mxu1 }
 0x173   :  { %v1455_v23 = vadd.f32 %v1454_v22, %v1453_v18 }
 0x174   :  { %v1108_v24 = vadd.f32 %v1452_v15, %v1011_v20  ;;  %v1014_v25 = vadd.f32 %v1391_v21, %v2167_v10 }
 0x176   :  { %1129 = vst.msk [vmem:[%s2252_s3 + $0x70] sm:$0xff] %vm1114_vm0, %v1108_v24  ;;  %v1111_v26 = vadd.f32 %v1455_v23, %v1014_v25 }
 0x178   :  { %1130 = vst.msk [vmem:[%s2252_s3 + $0x78] sm:$0xff] %vm1114_vm0, %v1111_v26 }

// kernel: pairwise_attention_block.19
= control target key start
LH: loop header
LB: loop body
LE: loop exit
PB: predicated region body
PF: predicated region fallthrough
CT: control target
= control target key end

     0   :  { %s524_s9 = smov 0   ;;  %s526_s10 = smov 0   ;;  %s578_s0 = inlined_call_operand.vmem [shape: bf16[2,16,8,8], index: 0, kind: input, shape index: {}]   ;;  %s579_s1 = inlined_call_operand.vmem [shape: bf16[2,16,8,8], index: 1, kind: input, shape index: {}]   ;;  %s580_s2 = inlined_call_operand.vmem [shape: f32[2,16,8,8], index: 2, kind: output, shape index: {}]  }
   0x1   :  { %s528_s11 = smov 0   ;;  %s530_s12 = smov 0  }
   0x2   :  { %s532_s13 = smov 0  }
   0x3 LB: > { %s27_s14 = sadd.s32 1, %s497_s11  ;;  %s31_s15 = sadd.s32 1, %s501_s12  ;;  %s505_s13 = sphi %s532_s13, %s12_s13   ;;  %s501_s12 = sphi %s530_s12, %s584_s12   ;;  %s497_s11 = sphi %s528_s11, %s583_s11   ;;  %s493_s10 = sphi %s526_s10, %s582_s10   ;;  %s489_s9 = sphi %s524_s9, %s581_s9  }
   0x4   : > { %p29_p0 = scmp.ge.s32.totalorder %s27_s14, 16  ;;  %p407_p1 = scmp.ge.s32.totalorder %s505_s13, 1 }
   0x5   : > { %p160_p2 = scmp.lt.s32.totalorder %s505_s13, 33 }
   0x6   : > { %s586_s14 = smov (%p29_p0, %s27_s14), 0  ;;  %s588_s15 = smov (!%p29_p0, %s31_s15), %s501_s12 }
   0x7   : > { %p161_p3 = pnand %p407_p1, %p160_p2  ;;  %p33_p4 = scmp.ge.s32.totalorder %s588_s15, 2 }
   0x8   : > { %p202_p5 = scmp.lt.s32.totalorder (!%p161_p3), %s493_s10, 1  ;;  %p204_p6 = scmp.lt.s32.totalorder (!%p161_p3), %s489_s9, 15  ;;  %v507_v0 = vmov (!%p161_p3), 0.0   ;;  %vm508_vm0 = vmmov (!%p161_p3), 0   ;;  %vm235_vm1 = vcmask (!%p161_p3), 64512  }
   0x9   : > { %s590_s15 = smov (%p33_p4, %s588_s15), 0  ;;  %164 = sbr.rel (%p161_p3) target bundleno = 245 (0xf5), region = 28 }
   0xa   : > { %419 = vmatprep.subr.bf16.mxu0 (!%p161_p3), %v507_v0  ;;  %421 = vmatprep.mubr.msk.bf16.mxu0 (!%p161_p3), %vm508_vm0, %v507_v0 }
  0x10   : > { %s592_s10 = smov (!%p202_p5, %s493_s10), 1  ;;  %s594_s9 = smov (!%p204_p6, %s489_s9), 15 }
  0x11   : > { %s408_s16 = sshll.u32 %s592_s10, 4 }
  0x12   : > { %s210_s17 = sadd.s32 %s408_s16, %s594_s9 }
  0x13   : > { %s409_s18 = sshll.u32 %s210_s17, 2  ;;  %s413_s25 = sshll.u32 %s210_s17, 3 }
  0x14   : > { %s220_s21 = scalar_lea.vmem %s579_s1, %s409_s18  ;;  %s212_s24 = scalar_lea.vmem %s578_s0, %s409_s18 }
  0x15   : > { %v234_v1 = vld [vmem:[%s220_s21] sm:$0xf]  ;;  %s231_s28 = scalar_lea.vmem %s580_s2, %s413_s25 }
  0x16   : > { %v240_v2 = vsel %vm235_vm1, %v234_v1, 0  ;;  %v233_v3 = vld [vmem:[%s212_s24] sm:$0xf] }
  0x17   : > { %420 = vmatpush3.bf16.xpose.msra.mxu0 %v240_v2 }
  0x1e   : > { %422 = vmatmul.mubr.msk.bf16.vlgmr.msra.gmra.mrb[0].mxu0 %vm235_vm1, %v233_v3 }
  0xf1   : > { %v276_v4 = vpop.f32.mrb[0].mxu0 }
  0xf2   : > { %282 = vst.msk [vmem:[%s231_s28] sm:$0xff] %vm235_vm1, %v276_v4  ;;  %v423_v5 = vpop.f32.mrb[1].mxu0 }
  0xf3   : > { %v279_v6 = vpop.f32.mrb[2].mxu0 }
  0xf4   : > { %v424_v7 = vpop.f32.mrb[3].mxu0 }
  0xf5 PF: > { %s12_s13 = sadd.s32 1, %s505_s13   ;;  %s581_s9 = smov %s497_s11 }
  0xf6   : > { %p9_p7 = scmp.ge.s32.totalorder %s12_s13, 34   ;;  %s582_s10 = smov %s501_s12 }
  0xf7   : > { %s583_s11 = smov %s586_s14  ;;  %s584_s12 = smov %s590_s15 }
  0xf8   :  { %11 = sbr.rel (!%p9_p7) target bundleno = 3 (0x3), region = 61 }

// kernel: pairwise_attention_block.18
= control target key start
LH: loop header
LB: loop body
LE: loop exit
PB: predicated region body
PF: predicated region fallthrough
CT: control target
= control target key end

     0   :  { %vm44_vm0 = vcmask 130048   ;;  %vm794_vm1 = vcmask 125952   ;;  %s1076_s22 = smov 96   ;;  %s1684_s0 = inlined_call_operand.vmem [shape: f32[128,16], index: 0, kind: input, shape index: {}]   ;;  %s1685_s4 = inlined_call_operand.vmem [shape: bf16[16,64], index: 4, kind: input, shape index: {}]   ;;  %s1686_s1 = inlined_call_operand.vmem [shape: f32[128,1], index: 1, kind: input, shape index: {}]   ;;  %s1687_s2 = inlined_call_operand.vmem [shape: f32[1,16], index: 2, kind: input, shape index: {}]   ;;  %s1688_s3 = inlined_call_operand.vmem [shape: f32[1,16], index: 3, kind: input, shape index: {}]   ;;  %s1689_s5 = inlined_call_operand.vmem [shape: f32[1,64], index: 5, kind: input, shape index: {}]   ;;  %s1690_s6 = inlined_call_operand.vmem [shape: bf16[128,16], index: 6, kind: output, shape index: {0}]   ;;  %s1691_s7 = inlined_call_operand.vmem [shape: bf16[128,16], index: 7, kind: output, shape index: {1}]  }
   0x1   :  { %v26_v0 = vld [vmem:[%s1684_s0] sm:$0xff]  ;;  %v27_v2 = vld [vmem:[%s1684_s0 + $0x8] sm:$0xff]  ;;  %v28_v8 = vld [vmem:[%s1684_s0 + $0x10] sm:$0xff] }
   0x2   :  { %v34_v1 = vld [vmem:[%s1684_s0 + $0x40] sm:$0xff]  ;;  %v45_v3 = vsel %vm44_vm0, %v26_v0, 0.0  ;;  %v35_v5 = vld [vmem:[%s1684_s0 + $0x48] sm:$0xff]  ;;  %v48_v6 = vsel %vm44_vm0, %v27_v2, 0.0  ;;  %v29_v9 = vld [vmem:[%s1684_s0 + $0x18] sm:$0xff]  ;;  %v51_v10 = vsel %vm44_vm0, %v28_v8, 0.0 }
   0x3   :  { %v69_v4 = vsel %vm44_vm0, %v34_v1, 0.0  ;;  %46 = vadd.xlane.f32.xlu0 %v45_v3  ;;  %v72_v7 = vsel %vm44_vm0, %v35_v5, 0.0  ;;  %v54_v11 = vsel %vm44_vm0, %v29_v9, 0.0  ;;  %v1144_v12 = vld [vmem:[%s1684_s0 + $0x50] sm:$0xff]  ;;  %v1149_v13 = vld [vmem:[%s1684_s0 + $0x58] sm:$0xff]  ;;  %v1158_v16 = vld [vmem:[%s1684_s0 + $0x20] sm:$0xff] }
   0x4   :  { %70 = vadd.xlane.f32.xlu1 %v69_v4  ;;  %v75_v14 = vsel %vm44_vm0, %v1144_v12, 0.0  ;;  %v78_v15 = vsel %vm44_vm0, %v1149_v13, 0.0  ;;  %v1163_v17 = vld [vmem:[%s1684_s0 + $0x28] sm:$0xff]  ;;  %v57_v18 = vsel %vm44_vm0, %v1158_v16, 0.0  ;;  %v1172_v20 = vld [vmem:[%s1684_s0 + $0x60] sm:$0xff]  ;;  %v1186_v24 = vld [vmem:[%s1684_s0 + $0x30] sm:$0xff] }
   0x5   :  { %v60_v19 = vsel %vm44_vm0, %v1163_v17, 0.0  ;;  %v1177_v21 = vld [vmem:[%s1684_s0 + $0x68] sm:$0xff]  ;;  %v81_v22 = vsel %vm44_vm0, %v1172_v20, 0.0  ;;  %v1191_v25 = vld [vmem:[%s1684_s0 + $0x38] sm:$0xff]  ;;  %v63_v26 = vsel %vm44_vm0, %v1186_v24, 0.0  ;;  %v1200_v28 = vld [vmem:[%s1684_s0 + $0x70] sm:$0xff] }
   0x6   :  { %v84_v23 = vsel %vm44_vm0, %v1177_v21, 0.0  ;;  %v66_v27 = vsel %vm44_vm0, %v1191_v25, 0.0  ;;  %v1205_v29 = vld [vmem:[%s1684_s0 + $0x78] sm:$0xff]  ;;  %v87_v30 = vsel %vm44_vm0, %v1200_v28, 0.0 }
   0x7   :  { %49 = vadd.xlane.f32.xlu0 %v48_v6  ;;  %v90_v31 = vsel %vm44_vm0, %v1205_v29, 0.0 }
   0x8   :  { %73 = vadd.xlane.f32.xlu1 %v72_v7 }
   0xb   :  { %52 = vadd.xlane.f32.xlu0 %v51_v10 }
   0xc   :  { %55 = vadd.xlane.f32.xlu1 %v54_v11 }
   0xf   :  { %76 = vadd.xlane.f32.xlu0 %v75_v14 }
  0x10   :  { %79 = vadd.xlane.f32.xlu1 %v78_v15 }
  0x13   :  { %58 = vadd.xlane.f32.xlu0 %v57_v18 }
  0x14   :  { %61 = vadd.xlane.f32.xlu1 %v60_v19 }
  0x17   :  { %82 = vadd.xlane.f32.xlu0 %v81_v22 }
  0x18   :  { %85 = vadd.xlane.f32.xlu1 %v84_v23 }
  0x1b   :  { %64 = vadd.xlane.f32.xlu0 %v63_v26 }
  0x1c   :  { %67 = vadd.xlane.f32.xlu1 %v66_v27 }
  0x1f   :  { %88 = vadd.xlane.f32.xlu0 %v87_v30 }
  0x20   :  { %91 = vadd.xlane.f32.xlu1 %v90_v31 }
  0x90   :  { %v47_v32 = vpop.xlane.xlu0 %46 }
  0x91   :  { %v71_v33 = vpop.xlane.xlu1 %70  ;;  %v94_v34 = vmul.f32 0.0625, %v47_v32 }
  0x92   :  { %v102_v35 = vmul.f32 0.0625, %v71_v33 }
  0x93   :  { %v1211_v36 = vsub.f32 %v26_v0, %v94_v34 }
  0x94   :  { %v1213_v37 = vsub.f32 %v34_v1, %v102_v35  ;;  %v50_v38 = vpop.xlane.xlu0 %49 }
  0x95   :  { %v74_v39 = vpop.xlane.xlu1 %73  ;;  %v95_v40 = vmul.f32 0.0625, %v50_v38  ;;  %v126_v42 = vmul.f32 %v1211_v36, %v1211_v36 }
  0x96   :  { %v103_v41 = vmul.f32 0.0625, %v74_v39  ;;  %v134_v43 = vmul.f32 %v1213_v37, %v1213_v37 }
  0x97   :  { %v1219_v44 = vsub.f32 %v27_v2, %v95_v40  ;;  %v142_v46 = vsel %vm44_vm0, %v126_v42, 0.0 }
  0x98   :  { %v1221_v45 = vsub.f32 %v35_v5, %v103_v41  ;;  %143 = vadd.xlane.f32.xlu0 %v142_v46  ;;  %v53_v47 = vpop.xlane.xlu0 %52  ;;  %v166_v49 = vsel %vm44_vm0, %v134_v43, 0.0 }
  0x99   :  { %v56_v48 = vpop.xlane.xlu1 %55  ;;  %v96_v50 = vmul.f32 0.0625, %v53_v47  ;;  %v127_v52 = vmul.f32 %v1219_v44, %v1219_v44 }
  0x9a   :  { %v97_v51 = vmul.f32 0.0625, %v56_v48  ;;  %v135_v53 = vmul.f32 %v1221_v45, %v1221_v45 }
  0x9b   :  { %v1229_v54 = vsub.f32 %v28_v8, %v96_v50  ;;  %v145_v56 = vsel %vm44_vm0, %v127_v52, 0.0 }
  0x9c   :  { %v1231_v55 = vsub.f32 %v29_v9, %v97_v51  ;;  %167 = vadd.xlane.f32.xlu0 %v166_v49  ;;  %146 = vadd.xlane.f32.xlu1 %v145_v56  ;;  %v77_v57 = vpop.xlane.xlu0 %76  ;;  %v169_v59 = vsel %vm44_vm0, %v135_v53, 0.0  ;;  %v1074_v53 = vmov 0   ;;  %v443_v56 = vld [vmem:[%s1686_s1 + $0x8] sm:$0xff] }
  0x9d   :  { %v80_v58 = vpop.xlane.xlu1 %79  ;;  %v104_v60 = vmul.f32 0.0625, %v77_v57  ;;  %v128_v62 = vmul.f32 %v1229_v54, %v1229_v54  ;;  %976 = vset.pattern.permute.xlu1 %v1074_v53  ;;  %975 = vset.pattern.permute.xlu0 %v1074_v53  ;;  %v444_v57 = vld [vmem:[%s1686_s1 + $0x10] sm:$0xff] }
  0x9e   :  { %v105_v61 = vmul.f32 0.0625, %v80_v58  ;;  %v129_v63 = vmul.f32 %v1231_v55, %v1231_v55  ;;  %v442_v58 = vld [vmem:[%s1686_s1] sm:$0xff] }
  0x9f   :  { %v1240_v0 = vsub.f32 %v1144_v12, %v104_v60  ;;  %v148_v2 = vsel %vm44_vm0, %v128_v62, 0.0  ;;  %v445_v60 = vld [vmem:[%s1686_s1 + $0x18] sm:$0xff]  ;;  %v446_v62 = vld [vmem:[%s1686_s1 + $0x20] sm:$0xff] }
  0xa0   :  { %v1243_v1 = vsub.f32 %v1149_v13, %v105_v61  ;;  %170 = vadd.xlane.f32.xlu1 %v169_v59  ;;  %149 = vadd.xlane.f32.xlu0 %v148_v2  ;;  %v59_v3 = vpop.xlane.xlu0 %58  ;;  %v151_v5 = vsel %vm44_vm0, %v129_v63, 0.0  ;;  %v451_v59 = vld [vmem:[%s1686_s1 + $0x48] sm:$0xff]  ;;  %v453_v61 = vld [vmem:[%s1686_s1 + $0x58] sm:$0xff] }
  0xa1   :  { %v62_v4 = vpop.xlane.xlu1 %61  ;;  %v98_v6 = vmul.f32 0.0625, %v59_v3  ;;  %v136_v8 = vmul.f32 %v1240_v0, %v1240_v0  ;;  %v455_v63 = vld [vmem:[%s1686_s1 + $0x68] sm:$0xff]  ;;  %v457_v3 = vld [vmem:[%s1686_s1 + $0x78] sm:$0xff] }
  0xa2   :  { %v99_v7 = vmul.f32 0.0625, %v62_v4  ;;  %v137_v9 = vmul.f32 %v1243_v1, %v1243_v1  ;;  %v447_v2 = vld [vmem:[%s1686_s1 + $0x28] sm:$0xff]  ;;  %v448_v4 = vld [vmem:[%s1686_s1 + $0x30] sm:$0xff] }
  0xa3   :  { %v1252_v10 = vsub.f32 %v1158_v16, %v98_v6  ;;  %v172_v12 = vsel %vm44_vm0, %v136_v8, 0.0  ;;  %v450_v6 = vld [vmem:[%s1686_s1 + $0x40] sm:$0xff] }
  0xa4   :  { %v1255_v11 = vsub.f32 %v1163_v17, %v99_v7  ;;  %152 = vadd.xlane.f32.xlu1 %v151_v5  ;;  %173 = vadd.xlane.f32.xlu0 %v172_v12  ;;  %v83_v13 = vpop.xlane.xlu0 %82  ;;  %v175_v15 = vsel %vm44_vm0, %v137_v9, 0.0  ;;  %v449_v5 = vld [vmem:[%s1686_s1 + $0x38] sm:$0xff]  ;;  %v452_v7 = vld [vmem:[%s1686_s1 + $0x50] sm:$0xff]  ;;  %v454_v8 = vld [vmem:[%s1686_s1 + $0x60] sm:$0xff] }
  0xa5   :  { %v86_v14 = vpop.xlane.xlu1 %85  ;;  %v106_v18 = vmul.f32 0.0625, %v83_v13  ;;  %v130_v22 = vmul.f32 %v1252_v10, %v1252_v10  ;;  %v456_v9 = vld [vmem:[%s1686_s1 + $0x70] sm:$0xff] }
  0xa6   :  { %v107_v19 = vmul.f32 0.0625, %v86_v14  ;;  %v131_v16 = vmul.f32 %v1255_v11, %v1255_v11 }
  0xa7   :  { %v1264_v23 = vsub.f32 %v1172_v20, %v106_v18  ;;  %v154_v26 = vsel %vm44_vm0, %v130_v22, 0.0 }
  0xa8   :  { %v1267_v17 = vsub.f32 %v1177_v21, %v107_v19  ;;  %176 = vadd.xlane.f32.xlu1 %v175_v15  ;;  %155 = vadd.xlane.f32.xlu0 %v154_v26  ;;  %v65_v27 = vpop.xlane.xlu0 %64  ;;  %v157_v31 = vsel %vm44_vm0, %v131_v16, 0.0 }
  0xa9   :  { %v68_v30 = vpop.xlane.xlu1 %67  ;;  %v100_v32 = vmul.f32 0.0625, %v65_v27  ;;  %v138_v34 = vmul.f32 %v1264_v23, %v1264_v23 }
  0xaa   :  { %v101_v33 = vmul.f32 0.0625, %v68_v30  ;;  %v139_v20 = vmul.f32 %v1267_v17, %v1267_v17 }
  0xab   :  { %v1276_v35 = vsub.f32 %v1186_v24, %v100_v32  ;;  %v178_v38 = vsel %vm44_vm0, %v138_v34, 0.0 }
  0xac   :  { %v1279_v21 = vsub.f32 %v1191_v25, %v101_v33  ;;  %158 = vadd.xlane.f32.xlu1 %v157_v31  ;;  %179 = vadd.xlane.f32.xlu0 %v178_v38  ;;  %v89_v39 = vpop.xlane.xlu0 %88  ;;  %v181_v41 = vsel %vm44_vm0, %v139_v20, 0.0 }
  0xad   :  { %v92_v40 = vpop.xlane.xlu1 %91  ;;  %v108_v42 = vmul.f32 0.0625, %v89_v39  ;;  %v132_v46 = vmul.f32 %v1276_v35, %v1276_v35 }
  0xae   :  { %v109_v43 = vmul.f32 0.0625, %v92_v40  ;;  %v133_v24 = vmul.f32 %v1279_v21, %v1279_v21 }
  0xaf   :  { %v1288_v47 = vsub.f32 %v1200_v28, %v108_v42  ;;  %v160_v48 = vsel %vm44_vm0, %v132_v46, 0.0 }
  0xb0   :  { %v1291_v25 = vsub.f32 %v1205_v29, %v109_v43  ;;  %182 = vadd.xlane.f32.xlu1 %v181_v41  ;;  %161 = vadd.xlane.f32.xlu0 %v160_v48  ;;  %v163_v49 = vsel %vm44_vm0, %v133_v24, 0.0  ;;  %v977_v29 = vld [vmem:[%s1685_s4] sm:$0xff]  }
  0xb1   :  { %v140_v50 = vmul.f32 %v1288_v47, %v1288_v47  ;;  %952 = vmatprep.subr.bf16.mxu0 %v977_v29  ;;  %970 = vmatprep.subr.bf16.mxu1 %v977_v29 }
  0xb2   :  { %v141_v51 = vmul.f32 %v1291_v25, %v1291_v25  ;;  %953 = vmatpush3.bf16.msra.mxu0 %v977_v29  ;;  %971 = vmatpush3.bf16.msra.mxu1 %v977_v29 }
  0xb3   :  { %v184_v52 = vsel %vm44_vm0, %v140_v50, 0.0 }
  0xb4   :  { %164 = vadd.xlane.f32.xlu1 %v163_v49  ;;  %185 = vadd.xlane.f32.xlu0 %v184_v52  ;;  %v187_v28 = vsel %vm44_vm0, %v141_v51, 0.0  ;;  %v1356_v51 = vld [vmem:[%s1687_s2] ss:$0 sm:$0xff] }
  0xb8   :  { %188 = vadd.xlane.f32.xlu1 %v187_v28 }
  0xc9   :  { %465 = vperm.xlu1 %976, %v443_v56  }
  0xca   :  { %460 = vperm.xlu0 %975, %v442_v58  }
  0xcd   :  { %470 = vperm.xlu1 %976, %v444_v57  }
  0xce   :  { %505 = vperm.xlu0 %975, %v451_v59  }
  0xd1   :  { %475 = vperm.xlu1 %976, %v445_v60  }
  0xd2   :  { %515 = vperm.xlu0 %975, %v453_v61   ;;  %v1363_v61 = vld [vmem:[%s1688_s3] ss:$0 sm:$0xff] }
  0xd5   :  { %480 = vperm.xlu1 %976, %v446_v62  }
  0xd6   :  { %525 = vperm.xlu0 %975, %v455_v63  }
  0xd9   :  { %485 = vperm.xlu1 %976, %v447_v2  }
  0xda   :  { %535 = vperm.xlu0 %975, %v457_v3  }
  0xdd   :  { %490 = vperm.xlu1 %976, %v448_v4  }
  0xe1   :  { %495 = vperm.xlu1 %976, %v449_v5  }
  0xe5   :  { %500 = vperm.xlu1 %976, %v450_v6  }
  0xe9   :  { %510 = vperm.xlu1 %976, %v452_v7  }
  0xed   :  { %520 = vperm.xlu1 %976, %v454_v8  }
  0xf1   :  { %530 = vperm.xlu1 %976, %v456_v9  }
 0x125   :  { %v144_v12 = vpop.xlane.xlu0 %143 }
 0x126   :  { %v190_v13 = vmul.f32 0.0625, %v144_v12 }
 0x128   :  { %v206_v14 = vadd.f32 1e-05, %v190_v13 }
 0x129   :  { %v147_v15 = vpop.xlane.xlu1 %146  ;;  %v168_v18 = vpop.xlane.xlu0 %167 }
 0x12a   :  { %978 = vrsqrt.f32 %v206_v14  ;;  %v191_v19 = vmul.f32 0.0625, %v147_v15  ;;  %v198_v22 = vmul.f32 0.0625, %v168_v18 }
 0x12c   :  { %v207_v16 = vadd.f32 1e-05, %v191_v19  ;;  %v214_v26 = vadd.f32 1e-05, %v198_v22 }
 0x12d   :  { %v171_v27 = vpop.xlane.xlu1 %170  ;;  %v150_v30 = vpop.xlane.xlu0 %149 }
 0x12e   :  { %980 = vrsqrt.f32 %v207_v16  ;;  %v199_v31 = vmul.f32 0.0625, %v171_v27  ;;  %v192_v32 = vmul.f32 0.0625, %v150_v30 }
 0x12f   :  { %982 = vrsqrt.f32 %v214_v26 }
 0x130   :  { %v215_v33 = vadd.f32 1e-05, %v199_v31  ;;  %v208_v34 = vadd.f32 1e-05, %v192_v32 }
 0x131   :  { %v153_v20 = vpop.xlane.xlu1 %152  ;;  %v174_v38 = vpop.xlane.xlu0 %173 }
 0x132   :  { %984 = vrsqrt.f32 %v215_v33  ;;  %v193_v39 = vmul.f32 0.0625, %v153_v20  ;;  %v200_v40 = vmul.f32 0.0625, %v174_v38 }
 0x133   :  { %986 = vrsqrt.f32 %v208_v34 }
 0x134   :  { %v979_v41 = vpop.eup %978  ;;  %v209_v42 = vadd.f32 1e-05, %v193_v39  ;;  %v216_v43 = vadd.f32 1e-05, %v200_v40 }
 0x135   :  { %v177_v46 = vpop.xlane.xlu1 %176  ;;  %v156_v24 = vpop.xlane.xlu0 %155  ;;  %v238_v48 = vmul.f32 %v979_v41, %v1211_v36 }
 0x136   :  { %988 = vrsqrt.f32 %v209_v42  ;;  %v201_v49 = vmul.f32 0.0625, %v177_v46  ;;  %v194_v50 = vmul.f32 0.0625, %v156_v24 }
 0x137   :  { %990 = vrsqrt.f32 %v216_v43  ;;  %v260_v59 = vmul.f32 %v1356_v51, %v238_v48 }
 0x138   :  { %v981_v52 = vpop.eup %980  ;;  %v217_v28 = vadd.f32 1e-05, %v201_v49  ;;  %v210_v29 = vadd.f32 1e-05, %v194_v50 }
 0x139   :  { %v983_v53 = vpop.eup %982  ;;  %v159_v56 = vpop.xlane.xlu1 %158  ;;  %v239_v58 = vmul.f32 %v981_v52, %v1219_v44  ;;  %v282_v7 = vadd.f32 %v1363_v61, %v260_v59 }
 0x13a   :  { %v180_v57 = vpop.xlane.xlu0 %179  ;;  %992 = vrsqrt.f32 %v217_v28  ;;  %v195_v36 = vmul.f32 0.0625, %v159_v56  ;;  %v246_v62 = vmul.f32 %v983_v53, %v1213_v37 }
 0x13b   :  { %v202_v60 = vmul.f32 0.0625, %v180_v57  ;;  %994 = vrsqrt.f32 %v210_v29  ;;  %v261_v63 = vmul.f32 %v1356_v51, %v239_v58 }
 0x13c   :  { %v985_v2 = vpop.eup %984  ;;  %v211_v3 = vadd.f32 1e-05, %v195_v36  ;;  %v268_v12 = vmul.f32 %v1356_v51, %v246_v62 }
 0x13d   :  { %v218_v4 = vadd.f32 1e-05, %v202_v60  ;;  %v987_v5 = vpop.eup %986  ;;  %v183_v44 = vpop.xlane.xlu1 %182  ;;  %v283_v8 = vadd.f32 %v1363_v61, %v261_v63  ;;  %v247_v9 = vmul.f32 %v985_v2, %v1221_v45 }
 0x13e   :  { %v162_v6 = vpop.xlane.xlu0 %161  ;;  %v240_v13 = vmul.f32 %v987_v5, %v1229_v54  ;;  %996 = vrsqrt.f32 %v211_v3  ;;  %v203_v37 = vmul.f32 0.0625, %v183_v44  ;;  %v290_v31 = vadd.f32 %v1363_v61, %v268_v12 }
 0x13f   :  { %v196_v14 = vmul.f32 0.0625, %v162_v6  ;;  %998 = vrsqrt.f32 %v218_v4  ;;  %v298_v15 = vpack.c.bf16 %v283_v8, %v282_v7  ;;  %v269_v18 = vmul.f32 %v1356_v51, %v247_v9 }
 0x140   :  { %v989_v19 = vpop.eup %988  ;;  %v219_v22 = vadd.f32 1e-05, %v203_v37  ;;  %v262_v32 = vmul.f32 %v1356_v51, %v240_v13 }
 0x141   :  { %v212_v16 = vadd.f32 1e-05, %v196_v14  ;;  %v991_v26 = vpop.eup %990  ;;  %v241_v27 = vmul.f32 %v989_v19, %v1231_v55  ;;  %v165_v30 = vpop.xlane.xlu1 %164  ;;  %954 = vmatprep.mubr.msk.bf16.mxu0 %vm44_vm0, %v298_v15  ;;  %v291_v54 = vadd.f32 %v1363_v61, %v269_v18 }
 0x142   :  { %v186_v45 = vpop.xlane.xlu0 %185  ;;  %v248_v33 = vmul.f32 %v991_v26, %v1240_v0  ;;  %1000 = vrsqrt.f32 %v219_v22  ;;  %v197_v34 = vmul.f32 0.0625, %v165_v30  ;;  %v284_v24 = vadd.f32 %v1363_v61, %v262_v32 }
 0x143   :  { %v204_v20 = vmul.f32 0.0625, %v186_v45  ;;  %1002 = vrsqrt.f32 %v212_v16  ;;  %v302_v38 = vpack.c.bf16 %v291_v54, %v290_v31  ;;  %v263_v39 = vmul.f32 %v1356_v51, %v241_v27 }
 0x144   :  { %v993_v55 = vpop.eup %992  ;;  %v213_v40 = vadd.f32 1e-05, %v197_v34  ;;  %v270_v48 = vmul.f32 %v1356_v51, %v248_v33 }
 0x145   :  { %v220_v41 = vadd.f32 1e-05, %v204_v20  ;;  %v995_v42 = vpop.eup %994  ;;  %v249_v43 = vmul.f32 %v993_v55, %v1243_v1  ;;  %v189_v46 = vpop.xlane.xlu1 %188  ;;  %962 = vmatprep.mubr.msk.bf16.mxu1 %vm44_vm0, %v302_v38  ;;  %v285_v0 = vadd.f32 %v1363_v61, %v263_v39 }
 0x146   :  { %v242_v49 = vmul.f32 %v995_v42, %v1252_v10  ;;  %1004 = vrsqrt.f32 %v213_v40  ;;  %v205_v50 = vmul.f32 0.0625, %v189_v46  ;;  %v292_v57 = vadd.f32 %v1363_v61, %v270_v48 }
 0x147   :  { %1006 = vrsqrt.f32 %v220_v41  ;;  %v299_v52 = vpack.c.bf16 %v285_v0, %v284_v24  ;;  %v271_v28 = vmul.f32 %v1356_v51, %v249_v43 }
 0x148   :  { %v997_v29 = vpop.eup %996  ;;  %v221_v53 = vadd.f32 1e-05, %v205_v50  ;;  %v264_v59 = vmul.f32 %v1356_v51, %v242_v49 }
 0x149   :  { %v999_v1 = vpop.eup %998  ;;  %v243_v56 = vmul.f32 %v997_v29, %v1255_v11  ;;  %955 = vmatmul.mubr.msk.bf16.vlgmr.msra.gmra.mrb[0].mxu0 %vm44_vm0, %v299_v52  ;;  %v293_v58 = vadd.f32 %v1363_v61, %v271_v28 }
 0x14a   :  { %v250_v10 = vmul.f32 %v999_v1, %v1264_v23  ;;  %1008 = vrsqrt.f32 %v221_v53  ;;  %v286_v11 = vadd.f32 %v1363_v61, %v264_v59 }
 0x14b   :  { %v303_v36 = vpack.c.bf16 %v293_v58, %v292_v57  ;;  %v265_v60 = vmul.f32 %v1356_v51, %v243_v56 }
 0x14c   :  { %v1001_v62 = vpop.eup %1000  ;;  %v272_v4 = vmul.f32 %v1356_v51, %v250_v10 }
 0x14d   :  { %v1003_v63 = vpop.eup %1002  ;;  %v251_v2 = vmul.f32 %v1001_v62, %v1267_v17  ;;  %963 = vmatmul.mubr.msk.bf16.vlgmr.msra.gmra.mrb[0].mxu1 %vm44_vm0, %v303_v36  ;;  %v287_v3 = vadd.f32 %v1363_v61, %v265_v60 }
 0x14e   :  { %v244_v5 = vmul.f32 %v1003_v63, %v1276_v35  ;;  %v294_v17 = vadd.f32 %v1363_v61, %v272_v4 }
 0x14f   :  { %v300_v44 = vpack.c.bf16 %v287_v3, %v286_v11  ;;  %v273_v23 = vmul.f32 %v1356_v51, %v251_v2 }
 0x150   :  { %v1005_v6 = vpop.eup %1004  ;;  %v266_v12 = vmul.f32 %v1356_v51, %v244_v5 }
 0x151   :  { %v1007_v7 = vpop.eup %1006  ;;  %v245_v8 = vmul.f32 %v1005_v6, %v1279_v21  ;;  %958 = vmatprep.mubr.msk.bf16.mxu0 %vm44_vm0, %v300_v44  ;;  %v295_v9 = vadd.f32 %v1363_v61, %v273_v23 }
 0x152   :  { %v252_v13 = vmul.f32 %v1007_v7, %v1288_v47  ;;  %v288_v21 = vadd.f32 %v1363_v61, %v266_v12 }
 0x153   :  { %v304_v37 = vpack.c.bf16 %v295_v9, %v294_v17  ;;  %v267_v35 = vmul.f32 %v1356_v51, %v245_v8 }
 0x154   :  { %v1009_v14 = vpop.eup %1008  ;;  %v274_v19 = vmul.f32 %v1356_v51, %v252_v13 }
 0x155   :  { %v253_v15 = vmul.f32 %v1009_v14, %v1291_v25  ;;  %966 = vmatprep.mubr.msk.bf16.mxu1 %vm44_vm0, %v304_v37  ;;  %v289_v18 = vadd.f32 %v1363_v61, %v267_v35  ;;  %v1421_v25 = vld [vmem:[%s1689_s5] ss:$0 sm:$0xff]  ;;  %s1075_s5 = smov 112  }
 0x156   :  { %v296_v47 = vadd.f32 %v1363_v61, %v274_v19 }
 0x157   :  { %v301_v22 = vpack.c.bf16 %v289_v18, %v288_v21  ;;  %v275_v16 = vmul.f32 %v1356_v51, %v253_v15 }
 0x159   :  { %959 = vmatmul.mubr.msk.bf16.gmra.mrb[4].mxu0 %vm44_vm0, %v301_v22  ;;  %v297_v26 = vadd.f32 %v1363_v61, %v275_v16 }
 0x15b   :  { %v305_v27 = vpack.c.bf16 %v297_v26, %v296_v47 }
 0x15d   :  { %967 = vmatmul.mubr.msk.bf16.gmra.mrb[4].mxu1 %vm44_vm0, %v305_v27 }
 0x21c   :  { %v956_v30 = vpop.f32.mrb[0].mxu0 }
 0x21d   :  { %v1424_v45 = vadd.f32 %v956_v30, %v1421_v25  ;;  %v379_v31 = vpop.f32.mrb[1].mxu0 }
 0x21e   :  { %v1427_v51 = vadd.f32 %v1421_v25, %v379_v31  ;;  %v957_v54 = vpop.f32.mrb[2].mxu0 }
 0x21f   :  { %v897_v32 = vmul.f32 -1.442695, %v1424_v45  ;;  %v1431_v61 = vadd.f32 %v957_v54, %v1421_v25  ;;  %v382_v33 = vpop.f32.mrb[3].mxu0 }
 0x220   :  { %v895_v34 = vmul.f32 -1.442695, %v1427_v51  ;;  %v1435_v20 = vadd.f32 %v1421_v25, %v382_v33  ;;  %v964_v38 = vpop.f32.mrb[0].mxu1 }
 0x221   :  { %1010 = vpow2.f32 %v897_v32  ;;  %v898_v39 = vmul.f32 -1.442695, %v1431_v61  ;;  %v1439_v55 = vadd.f32 %v964_v38, %v1421_v25  ;;  %v411_v40 = vpop.f32.mrb[1].mxu1 }
 0x222   :  { %1012 = vpow2.f32 %v895_v34  ;;  %v896_v41 = vmul.f32 -1.442695, %v1435_v20  ;;  %v1443_v42 = vadd.f32 %v1421_v25, %v411_v40  ;;  %v965_v43 = vpop.f32.mrb[2].mxu1 }
 0x223   :  { %1014 = vpow2.f32 %v898_v39  ;;  %v905_v46 = vmul.f32 -1.442695, %v1439_v55  ;;  %v1447_v24 = vadd.f32 %v965_v43, %v1421_v25  ;;  %v414_v0 = vpop.f32.mrb[3].mxu1 }
 0x224   :  { %1016 = vpow2.f32 %v896_v41  ;;  %v1450_v48 = vadd.f32 %v1421_v25, %v414_v0  ;;  %v903_v49 = vmul.f32 -1.442695, %v1443_v42 }
 0x225   :  { %1018 = vpow2.f32 %v905_v46  ;;  %v906_v50 = vmul.f32 -1.442695, %v1447_v24 }
 0x226   :  { %v904_v52 = vmul.f32 -1.442695, %v1450_v48 }
 0x227   :  { %1020 = vpow2.f32 %v906_v50 }
 0x228   :  { %1022 = vpow2.f32 %v903_v49 }
 0x229   :  { %1024 = vpow2.f32 %v904_v52 }
 0x22b   :  { %v1011_v28 = vpop.eup %1010 }
 0x22c   :  { %v1013_v29 = vpop.eup %1012  ;;  %v604_v53 = vadd.f32 1.0, %v1011_v28  ;;  %v960_v1 = vpop.f32.mrb[4].mxu0 }
 0x22d   :  { %v1015_v56 = vpop.eup %1014  ;;  %v395_v57 = vpop.f32.mrb[5].mxu0  ;;  %v1456_v10 = vadd.f32 %v960_v1, %v1421_v25  ;;  %v602_v62 = vadd.f32 1.0, %v1013_v29 }
 0x22e   :  { %v1017_v58 = vpop.eup %1016  ;;  %1026 = vrcp.f32 %v604_v53  ;;  %v605_v59 = vadd.f32 1.0, %v1015_v56  ;;  %v961_v36 = vpop.f32.mrb[6].mxu0  ;;  %v1459_v63 = vadd.f32 %v1421_v25, %v395_v57 }
 0x22f   :  { %v1019_v60 = vpop.eup %1018  ;;  %v398_v2 = vpop.f32.mrb[7].mxu0  ;;  %v1462_v3 = vadd.f32 %v961_v36, %v1421_v25  ;;  %v603_v44 = vadd.f32 1.0, %v1017_v58  ;;  %v901_v8 = vmul.f32 -1.442695, %v1456_v10 }
 0x230   :  { %1028 = vrcp.f32 %v605_v59  ;;  %v612_v11 = vadd.f32 1.0, %v1019_v60  ;;  %v968_v4 = vpop.f32.mrb[4].mxu1  ;;  %v1465_v23 = vadd.f32 %v1421_v25, %v398_v2  ;;  %v899_v12 = vmul.f32 -1.442695, %v1459_v63 }
 0x231   :  { %v1021_v5 = vpop.eup %1020  ;;  %v427_v6 = vpop.f32.mrb[5].mxu1  ;;  %v902_v35 = vmul.f32 -1.442695, %v1462_v3  ;;  %v1478_v19 = vadd.f32 %v968_v4, %v1421_v25 }
 0x232   :  { %1030 = vrcp.f32 %v612_v11  ;;  %v613_v7 = vadd.f32 1.0, %v1021_v5  ;;  %v969_v17 = vpop.f32.mrb[6].mxu1  ;;  %v1023_v9 = vpop.eup %1022  ;;  %v1470_v13 = vadd.f32 %v1421_v25, %v427_v6  ;;  %v900_v15 = vmul.f32 -1.442695, %v1465_v23 }
 0x233   :  { %1032 = vrcp.f32 %v602_v62  ;;  %v430_v37 = vpop.f32.mrb[7].mxu1  ;;  %v1025_v14 = vpop.eup %1024  ;;  %v610_v18 = vadd.f32 1.0, %v1023_v9  ;;  %v1482_v26 = vadd.f32 %v969_v17, %v1421_v25  ;;  %v909_v31 = vmul.f32 -1.442695, %v1478_v19 }
 0x234   :  { %1034 = vrcp.f32 %v613_v7  ;;  %v1475_v21 = vadd.f32 %v1421_v25, %v430_v37  ;;  %v907_v22 = vmul.f32 -1.442695, %v1470_v13  ;;  %v611_v47 = vadd.f32 1.0, %v1025_v14  ;;  %v466_v6 = vpop.permute.xlu1 %465 }
 0x235   :  { %1036 = vrcp.f32 %v603_v44  ;;  %v910_v32 = vmul.f32 -1.442695, %v1482_v26 }
 0x236   :  { %1038 = vpow2.f32 %v901_v8  ;;  %v908_v27 = vmul.f32 -1.442695, %v1475_v21 }
 0x237   :  { %1040 = vpow2.f32 %v899_v12 }
 0x238   :  { %v1027_v16 = vpop.eup %1026  ;;  %1042 = vpow2.f32 %v902_v35  ;;  %v471_v7 = vpop.permute.xlu1 %470 }
 0x239   :  { %1044 = vpow2.f32 %v900_v15  ;;  %670 = vrot.lane.b32.xlu1 %v1027_v16, %s1075_s5  ;;  %v461_v35 = vpop.permute.xlu0 %460 }
 0x23a   :  { %v1029_v30 = vpop.eup %1028  ;;  %1046 = vrcp.f32 %v610_v18 }
 0x23b   :  { %1048 = vpow2.f32 %v907_v22  ;;  %672 = vrot.lane.b32.xlu0 %v1029_v30, %s1075_s5 }
 0x23c   :  { %v1031_v54 = vpop.eup %1030  ;;  %1050 = vrcp.f32 %v611_v47  ;;  %v476_v8 = vpop.permute.xlu1 %475 }
 0x23d   :  { %v1033_v33 = vpop.eup %1032  ;;  %1052 = vpow2.f32 %v908_v27  ;;  %686 = vrot.lane.b32.xlu1 %v1031_v54, %s1075_s5  ;;  %v506_v15 = vpop.permute.xlu0 %505 }
 0x23e   :  { %v1035_v25 = vpop.eup %1034  ;;  %1054 = vpow2.f32 %v909_v31  ;;  %v540_v31 = vmul.f32 %v471_v7, %v1424_v45 }
 0x23f   :  { %v1037_v34 = vpop.eup %1036  ;;  %688 = vrot.lane.b32.xlu0 %v1035_v25, %s1075_s5  ;;  %1056 = vpow2.f32 %v910_v32 }
 0x240   :  { %v1039_v38 = vpop.eup %1038  ;;  %v1503_v17 = vpop.permute.xlu1 %480 }
 0x241   :  { %v1041_v39 = vpop.eup %1040  ;;  %v608_v40 = vadd.f32 1.0, %v1039_v38  ;;  %666 = vrot.lane.b32.xlu1 %v1033_v33, %s1075_s5  ;;  %v516_v22 = vpop.permute.xlu0 %515  ;;  %v541_v33 = vmul.f32 %v476_v8, %v1431_v61 }
 0x242   :  { %v1043_v41 = vpop.eup %1042  ;;  %v606_v46 = vadd.f32 1.0, %v1041_v39 }
 0x243   :  { %v1045_v43 = vpop.eup %1044  ;;  %1058 = vrcp.f32 %v608_v40  ;;  %v609_v0 = vadd.f32 1.0, %v1043_v41  ;;  %668 = vrot.lane.b32.xlu0 %v1037_v34, %s1075_s5  ;;  %v549_v41 = vmul.f32 %v516_v22, %v1447_v24  ;;  %v538_v24 = vmul.f32 %v461_v35, %v1427_v51 }
 0x244   :  { %v1047_v49 = vpop.eup %1046  ;;  %v607_v52 = vadd.f32 1.0, %v1045_v43  ;;  %v1505_v9 = vpop.permute.xlu1 %485 }
 0x245   :  { %v1049_v50 = vpop.eup %1048  ;;  %1060 = vrcp.f32 %v609_v0  ;;  %682 = vrot.lane.b32.xlu1 %v1047_v49, %s1075_s5  ;;  %v1511_v47 = vpop.permute.xlu0 %525 }
 0x246   :  { %v1051_v28 = vpop.eup %1050  ;;  %1062 = vrcp.f32 %v606_v46  ;;  %v614_v53 = vadd.f32 1.0, %v1049_v50  ;;  %v551_v35 = vmul.f32 %v1511_v47, %v1475_v21 }
 0x247   :  { %v1053_v29 = vpop.eup %1052  ;;  %684 = vrot.lane.b32.xlu0 %v1051_v28, %s1075_s5  ;;  %1064 = vrcp.f32 %v607_v52  ;;  %v539_v52 = vmul.f32 %v466_v6, %v1435_v20 }
 0x248   :  { %v1055_v1 = vpop.eup %1054  ;;  %v615_v56 = vadd.f32 1.0, %v1053_v29  ;;  %1066 = vrcp.f32 %v614_v53  ;;  %v491_v12 = vpop.permute.xlu1 %490 }
 0x249   :  { %v1057_v57 = vpop.eup %1056  ;;  %v616_v58 = vadd.f32 1.0, %v1055_v1  ;;  %v1515_v30 = vpop.permute.xlu0 %535 }
 0x24a   :  { %v617_v36 = vadd.f32 1.0, %v1057_v57  ;;  %1068 = vrcp.f32 %v615_v56  ;;  %v547_v57 = vmul.f32 %v506_v15, %v1450_v48  ;;  %v544_v48 = vmul.f32 %v491_v12, %v1456_v10 }
 0x24b   :  { %1070 = vrcp.f32 %v616_v58  ;;  %v543_v10 = vmul.f32 %v1505_v9, %v1465_v23 }
 0x24c   :  { %1072 = vrcp.f32 %v617_v36  ;;  %v1507_v37 = vpop.permute.xlu1 %495 }
 0x24d   :  { %v1059_v59 = vpop.eup %1058 }
 0x24e   :  { %678 = vrot.lane.b32.xlu1 %v1059_v59, %s1075_s5 }
 0x24f   :  { %v1061_v60 = vpop.eup %1060 }
 0x250   :  { %680 = vrot.lane.b32.xlu0 %v1061_v60, %s1075_s5  ;;  %v1063_v62 = vpop.eup %1062  ;;  %v501_v14 = vpop.permute.xlu1 %500 }
 0x251   :  { %v1065_v2 = vpop.eup %1064  ;;  %v546_v53 = vmul.f32 %v501_v14, %v1443_v42 }
 0x252   :  { %674 = vrot.lane.b32.xlu1 %v1063_v62, %s1075_s5  ;;  %v1067_v11 = vpop.eup %1066 }
 0x254   :  { %676 = vrot.lane.b32.xlu0 %v1065_v2, %s1075_s5  ;;  %v1069_v4 = vpop.eup %1068  ;;  %v511_v18 = vpop.permute.xlu1 %510  ;;  %v545_v2 = vmul.f32 %v1507_v37, %v1462_v3 }
 0x255   :  { %v1071_v5 = vpop.eup %1070  ;;  %v548_v34 = vmul.f32 %v511_v18, %v1439_v55 }
 0x256   :  { %690 = vrot.lane.b32.xlu1 %v1067_v11, %s1075_s5  ;;  %v1073_v44 = vpop.eup %1072 }
 0x258   :  { %692 = vrot.lane.b32.xlu0 %v1069_v4, %s1075_s5  ;;  %v1509_v16 = vpop.permute.xlu1 %520 }
 0x259   :  { %v550_v12 = vmul.f32 %v1509_v16, %v1470_v13  ;;  %v553_v16 = vmul.f32 %v1515_v30, %v1482_v26 }
 0x25a   :  { %694 = vrot.lane.b32.xlu1 %v1071_v5, %s1075_s5 }
 0x25c   :  { %696 = vrot.lane.b32.xlu0 %v1073_v44, %s1075_s5  ;;  %v1513_v27 = vpop.permute.xlu1 %530  ;;  %v542_v44 = vmul.f32 %v1503_v17, %v1459_v63 }
 0x25d   :  { %v552_v15 = vmul.f32 %v1513_v27, %v1478_v19 }
 0x2ab   :  { %v671_v54 = vpop.permute.xlu1 %670 }
 0x2ac   :  { %v716_v32 = vmul.f32 %v671_v54, %v540_v31 }
 0x2ad   :  { %v673_v25 = vpop.permute.xlu0 %672 }
 0x2ae   :  { %v929_v38 = vpack.c.bf16 %v716_v32, %v716_v32  ;;  %v717_v39 = vmul.f32 %v673_v25, %v541_v33 }
 0x2af   :  { %v687_v40 = vpop.permute.xlu1 %686 }
 0x2b0   :  { %797 = vst.msk [vmem:[%s1690_s6 + $0x8] sm:$0xf] %vm794_vm1, %v929_v38  ;;  %v930_v43 = vpack.c.bf16 %v717_v39, %v717_v39  ;;  %v724_v45 = vmul.f32 %v687_v40, %v548_v34  ;;  %815 = vrot.lane.b32.xlu1 %v929_v38, %s1076_s22 }
 0x2b1   :  { %v689_v61 = vpop.permute.xlu0 %688 }
 0x2b2   :  { %798 = vst.msk [vmem:[%s1690_s6 + $0xc] sm:$0xf] %vm794_vm1, %v930_v43  ;;  %v937_v55 = vpack.c.bf16 %v724_v45, %v724_v45  ;;  %v725_v46 = vmul.f32 %v689_v61, %v549_v41  ;;  %817 = vrot.lane.b32.xlu0 %v930_v43, %s1076_s22 }
 0x2b3   :  { %v667_v0 = vpop.permute.xlu1 %666 }
 0x2b4   :  { %805 = vst.msk [vmem:[%s1690_s6 + $0x28] sm:$0xf] %vm794_vm1, %v937_v55  ;;  %v938_v49 = vpack.c.bf16 %v725_v46, %v725_v46  ;;  %v714_v50 = vmul.f32 %v667_v0, %v538_v24  ;;  %831 = vrot.lane.b32.xlu1 %v937_v55, %s1076_s22 }
 0x2b5   :  { %v669_v28 = vpop.permute.xlu0 %668 }
 0x2b6   :  { %806 = vst.msk [vmem:[%s1690_s6 + $0x2c] sm:$0xf] %vm794_vm1, %v938_v49  ;;  %v927_v29 = vpack.c.bf16 %v714_v50, %v714_v50  ;;  %v715_v51 = vmul.f32 %v669_v28, %v539_v52  ;;  %833 = vrot.lane.b32.xlu0 %v938_v49, %s1076_s22 }
 0x2b7   :  { %v683_v1 = vpop.permute.xlu1 %682 }
 0x2b8   :  { %795 = vst.msk [vmem:[%s1690_s6] sm:$0xf] %vm794_vm1, %v927_v29  ;;  %v928_v56 = vpack.c.bf16 %v715_v51, %v715_v51  ;;  %v722_v20 = vmul.f32 %v683_v1, %v546_v53  ;;  %811 = vrot.lane.b32.xlu1 %v927_v29, %s1076_s22 }
 0x2b9   :  { %v685_v58 = vpop.permute.xlu0 %684 }
 0x2ba   :  { %796 = vst.msk [vmem:[%s1690_s6 + $0x4] sm:$0xf] %vm794_vm1, %v928_v56  ;;  %v935_v59 = vpack.c.bf16 %v722_v20, %v722_v20  ;;  %v723_v42 = vmul.f32 %v685_v58, %v547_v57  ;;  %813 = vrot.lane.b32.xlu0 %v928_v56, %s1076_s22 }
 0x2bc   :  { %803 = vst.msk [vmem:[%s1690_s6 + $0x20] sm:$0xf] %vm794_vm1, %v935_v59  ;;  %v936_v36 = vpack.c.bf16 %v723_v42, %v723_v42  ;;  %827 = vrot.lane.b32.xlu1 %v935_v59, %s1076_s22 }
 0x2be   :  { %804 = vst.msk [vmem:[%s1690_s6 + $0x24] sm:$0xf] %vm794_vm1, %v936_v36  ;;  %829 = vrot.lane.b32.xlu0 %v936_v36, %s1076_s22 }
 0x2c0   :  { %v679_v60 = vpop.permute.xlu1 %678 }
 0x2c1   :  { %v720_v62 = vmul.f32 %v679_v60, %v544_v48 }
 0x2c2   :  { %v681_v11 = vpop.permute.xlu0 %680 }
 0x2c3   :  { %v933_v4 = vpack.c.bf16 %v720_v62, %v720_v62  ;;  %v721_v5 = vmul.f32 %v681_v11, %v545_v2 }
 0x2c4   :  { %v675_v6 = vpop.permute.xlu1 %674 }
 0x2c5   :  { %801 = vst.msk [vmem:[%s1690_s6 + $0x18] sm:$0xf] %vm794_vm1, %v933_v4  ;;  %v934_v7 = vpack.c.bf16 %v721_v5, %v721_v5  ;;  %v718_v8 = vmul.f32 %v675_v6, %v542_v44  ;;  %823 = vrot.lane.b32.xlu1 %v933_v4, %s1076_s22 }
 0x2c6   :  { %v677_v3 = vpop.permute.xlu0 %676 }
 0x2c7   :  { %802 = vst.msk [vmem:[%s1690_s6 + $0x1c] sm:$0xf] %vm794_vm1, %v934_v7  ;;  %v931_v63 = vpack.c.bf16 %v718_v8, %v718_v8  ;;  %v719_v17 = vmul.f32 %v677_v3, %v543_v10  ;;  %825 = vrot.lane.b32.xlu0 %v934_v7, %s1076_s22 }
 0x2c8   :  { %v691_v37 = vpop.permute.xlu1 %690 }
 0x2c9   :  { %799 = vst.msk [vmem:[%s1690_s6 + $0x10] sm:$0xf] %vm794_vm1, %v931_v63  ;;  %v932_v23 = vpack.c.bf16 %v719_v17, %v719_v17  ;;  %v726_v9 = vmul.f32 %v691_v37, %v550_v12  ;;  %819 = vrot.lane.b32.xlu1 %v931_v63, %s1076_s22 }
 0x2ca   :  { %v693_v14 = vpop.permute.xlu0 %692 }
 0x2cb   :  { %800 = vst.msk [vmem:[%s1690_s6 + $0x14] sm:$0xf] %vm794_vm1, %v932_v23  ;;  %v939_v13 = vpack.c.bf16 %v726_v9, %v726_v9  ;;  %v727_v18 = vmul.f32 %v693_v14, %v551_v35  ;;  %821 = vrot.lane.b32.xlu0 %v932_v23, %s1076_s22 }
 0x2cc   :  { %v695_v22 = vpop.permute.xlu1 %694 }
 0x2cd   :  { %807 = vst.msk [vmem:[%s1690_s6 + $0x30] sm:$0xf] %vm794_vm1, %v939_v13  ;;  %v940_v21 = vpack.c.bf16 %v727_v18, %v727_v18  ;;  %v728_v19 = vmul.f32 %v695_v22, %v552_v15  ;;  %835 = vrot.lane.b32.xlu1 %v939_v13, %s1076_s22 }
 0x2ce   :  { %v697_v47 = vpop.permute.xlu0 %696 }
 0x2cf   :  { %808 = vst.msk [vmem:[%s1690_s6 + $0x34] sm:$0xf] %vm794_vm1, %v940_v21  ;;  %v941_v27 = vpack.c.bf16 %v728_v19, %v728_v19  ;;  %v729_v31 = vmul.f32 %v697_v47, %v553_v16  ;;  %837 = vrot.lane.b32.xlu0 %v940_v21, %s1076_s22 }
 0x2d1   :  { %809 = vst.msk [vmem:[%s1690_s6 + $0x38] sm:$0xf] %vm794_vm1, %v941_v27  ;;  %v942_v26 = vpack.c.bf16 %v729_v31, %v729_v31  ;;  %839 = vrot.lane.b32.xlu1 %v941_v27, %s1076_s22 }
 0x2d3   :  { %810 = vst.msk [vmem:[%s1690_s6 + $0x3c] sm:$0xf] %vm794_vm1, %v942_v26  ;;  %841 = vrot.lane.b32.xlu0 %v942_v26, %s1076_s22 }
 0x322   :  { %v816_v30 = vpop.permute.xlu1 %815 }
 0x323   :  { %861 = vst.msk [vmem:[%s1691_s7 + $0x8] sm:$0xf] %vm794_vm1, %v816_v30 }
 0x324   :  { %v818_v54 = vpop.permute.xlu0 %817 }
 0x325   :  { %862 = vst.msk [vmem:[%s1691_s7 + $0xc] sm:$0xf] %vm794_vm1, %v818_v54 }
 0x326   :  { %v832_v32 = vpop.permute.xlu1 %831 }
 0x327   :  { %869 = vst.msk [vmem:[%s1691_s7 + $0x28] sm:$0xf] %vm794_vm1, %v832_v32 }
 0x328   :  { %v834_v33 = vpop.permute.xlu0 %833 }
 0x329   :  { %870 = vst.msk [vmem:[%s1691_s7 + $0x2c] sm:$0xf] %vm794_vm1, %v834_v33 }
 0x32a   :  { %v812_v25 = vpop.permute.xlu1 %811 }
 0x32b   :  { %859 = vst.msk [vmem:[%s1691_s7] sm:$0xf] %vm794_vm1, %v812_v25 }
 0x32c   :  { %v814_v34 = vpop.permute.xlu0 %813 }
 0x32d   :  { %860 = vst.msk [vmem:[%s1691_s7 + $0x4] sm:$0xf] %vm794_vm1, %v814_v34 }
 0x32e   :  { %v828_v38 = vpop.permute.xlu1 %827 }
 0x32f   :  { %867 = vst.msk [vmem:[%s1691_s7 + $0x20] sm:$0xf] %vm794_vm1, %v828_v38 }
 0x330   :  { %v830_v39 = vpop.permute.xlu0 %829 }
 0x331   :  { %868 = vst.msk [vmem:[%s1691_s7 + $0x24] sm:$0xf] %vm794_vm1, %v830_v39 }
 0x337   :  { %v824_v40 = vpop.permute.xlu1 %823 }
 0x338   :  { %865 = vst.msk [vmem:[%s1691_s7 + $0x18] sm:$0xf] %vm794_vm1, %v824_v40 }
 0x339   :  { %v826_v41 = vpop.permute.xlu0 %825 }
 0x33a   :  { %866 = vst.msk [vmem:[%s1691_s7 + $0x1c] sm:$0xf] %vm794_vm1, %v826_v41 }
 0x33b   :  { %v820_v43 = vpop.permute.xlu1 %819 }
 0x33c   :  { %863 = vst.msk [vmem:[%s1691_s7 + $0x10] sm:$0xf] %vm794_vm1, %v820_v43 }
 0x33d   :  { %v822_v45 = vpop.permute.xlu0 %821 }
 0x33e   :  { %864 = vst.msk [vmem:[%s1691_s7 + $0x14] sm:$0xf] %vm794_vm1, %v822_v45 }
 0x33f   :  { %v836_v61 = vpop.permute.xlu1 %835 }
 0x340   :  { %871 = vst.msk [vmem:[%s1691_s7 + $0x30] sm:$0xf] %vm794_vm1, %v836_v61 }
 0x341   :  { %v838_v55 = vpop.permute.xlu0 %837 }
 0x342   :  { %872 = vst.msk [vmem:[%s1691_s7 + $0x34] sm:$0xf] %vm794_vm1, %v838_v55 }
 0x343   :  { %v840_v46 = vpop.permute.xlu1 %839 }
 0x344   :  { %873 = vst.msk [vmem:[%s1691_s7 + $0x38] sm:$0xf] %vm794_vm1, %v840_v46 }
 0x345   :  { %v842_v24 = vpop.permute.xlu0 %841 }
 0x346   :  { %874 = vst.msk [vmem:[%s1691_s7 + $0x3c] sm:$0xf] %vm794_vm1, %v842_v24 }

// kernel: pairwise_attention_block.22
= control target key start
LH: loop header
LB: loop body
LE: loop exit
PB: predicated region body
PF: predicated region fallthrough
CT: control target
= control target key end

     0   :  { %s542_s9 = smov 0   ;;  %s544_s10 = smov 0   ;;  %s596_s0 = inlined_call_operand.vmem [shape: bf16[2,16,8,8], index: 0, kind: input, shape index: {}]   ;;  %s597_s1 = inlined_call_operand.vmem [shape: bf16[2,16,8,8], index: 1, kind: input, shape index: {}]   ;;  %s598_s2 = inlined_call_operand.vmem [shape: f32[2,16,8,8], index: 2, kind: output, shape index: {}]  }
   0x1   :  { %s546_s11 = smov 0   ;;  %s548_s12 = smov 0  }
   0x2   :  { %s550_s13 = smov 0  }
   0x3 LB: > { %s27_s14 = sadd.s32 1, %s515_s11  ;;  %s31_s15 = sadd.s32 1, %s519_s12  ;;  %s523_s13 = sphi %s550_s13, %s12_s13   ;;  %s519_s12 = sphi %s548_s12, %s602_s12   ;;  %s515_s11 = sphi %s546_s11, %s601_s11   ;;  %s511_s10 = sphi %s544_s10, %s600_s10   ;;  %s507_s9 = sphi %s542_s9, %s599_s9  }
   0x4   : > { %p29_p0 = scmp.ge.s32.totalorder %s27_s14, 16  ;;  %p424_p1 = scmp.ge.s32.totalorder %s523_s13, 1 }
   0x5   : > { %p160_p2 = scmp.lt.s32.totalorder %s523_s13, 33 }
   0x6   : > { %s604_s14 = smov (%p29_p0, %s27_s14), 0  ;;  %s606_s15 = smov (!%p29_p0, %s31_s15), %s519_s12 }
   0x7   : > { %p161_p3 = pnand %p424_p1, %p160_p2  ;;  %p33_p4 = scmp.ge.s32.totalorder %s606_s15, 2 }
   0x8   : > { %p202_p5 = scmp.lt.s32.totalorder (!%p161_p3), %s511_s10, 1  ;;  %p204_p6 = scmp.lt.s32.totalorder (!%p161_p3), %s507_s9, 15  ;;  %v525_v0 = vmov (!%p161_p3), 0.0   ;;  %vm526_vm0 = vmmov (!%p161_p3), 0   ;;  %vm255_vm1 = vcmask (!%p161_p3), 1043456   ;;  %vm251_vm2 = vcmask (!%p161_p3), 64512  }
   0x9   : > { %s608_s15 = smov (%p33_p4, %s606_s15), 0  ;;  %164 = sbr.rel (%p161_p3) target bundleno = 340 (0x154), region = 28 }
   0xa   : > { %436 = vmatprep.subr.bf16.mxu0 (!%p161_p3), %v525_v0  ;;  %438 = vmatprep.mubr.msk.bf16.mxu0 (!%p161_p3), %vm526_vm0, %v525_v0 }
  0x10   : > { %s610_s10 = smov (!%p202_p5, %s511_s10), 1  ;;  %s612_s9 = smov (!%p204_p6, %s507_s9), 15 }
  0x11   : > { %s425_s16 = sshll.u32 %s610_s10, 4 }
  0x12   : > { %s210_s17 = sadd.s32 %s425_s16, %s612_s9 }
  0x13   : > { %s426_s18 = sshll.u32 %s210_s17, 2  ;;  %s430_s25 = sshll.u32 %s210_s17, 3 }
  0x14   : > { %s212_s21 = scalar_lea.vmem %s596_s0, %s426_s18  ;;  %s220_s24 = scalar_lea.vmem %s597_s1, %s426_s18 }
  0x15   : > { %v233_v1 = vld [vmem:[%s212_s21] sm:$0xf]  ;;  %s231_s28 = scalar_lea.vmem %s598_s2, %s430_s25 }
  0x16   : > { %235 = vxpose.xlu0.c.b16.start.end [1/1] (short) (narrow) %v233_v1, 16  ;;  %v234_v2 = vld [vmem:[%s220_s24] sm:$0xf] }
  0x17   : > { %v257_v3 = vsel %vm255_vm1, %v234_v2, 0 }
  0x18   : > { %437 = vmatpush3.bf16.msra.mxu0 %v257_v3 }
  0x7c   : > { %v243_v4 = vpop.trf.xlu0 }
  0x7d   : > { %439 = vmatmul.mubr.msk.bf16.vlgmr.msra.gmra.mrb[0].mxu0 %vm251_vm2, %v243_v4 }
 0x150   : > { %v293_v5 = vpop.f32.mrb[0].mxu0 }
 0x151   : > { %299 = vst.msk [vmem:[%s231_s28] sm:$0xff] %vm251_vm2, %v293_v5  ;;  %v440_v6 = vpop.f32.mrb[1].mxu0 }
 0x152   : > { %v296_v7 = vpop.f32.mrb[2].mxu0 }
 0x153   : > { %v441_v8 = vpop.f32.mrb[3].mxu0 }
 0x154 PF: > { %s12_s13 = sadd.s32 1, %s523_s13   ;;  %s599_s9 = smov %s515_s11 }
 0x155   : > { %p9_p7 = scmp.ge.s32.totalorder %s12_s13, 34   ;;  %s600_s10 = smov %s519_s12 }
 0x156   : > { %s601_s11 = smov %s604_s14  ;;  %s602_s12 = smov %s608_s15 }
 0x157   :  { %11 = sbr.rel (!%p9_p7) target bundleno = 3 (0x3), region = 61 }

// kernel: pairwise_attention_block.20
= control target key start
LH: loop header
LB: loop body
LE: loop exit
PB: predicated region body
PF: predicated region fallthrough
CT: control target
= control target key end

     0   :  { %vm54_vm0 = vcmask 130048   ;;  %s1934_s1 = inlined_call_operand.vmem [shape: f32[128,16], index: 1, kind: input, shape index: {}]   ;;  %s1935_s0 = inlined_call_operand.vmem [shape: f32[128,16], index: 0, kind: input, shape index: {}]   ;;  %s1936_s6 = inlined_call_operand.vmem [shape: bf16[16,16], index: 6, kind: input, shape index: {}]   ;;  %s1937_s2 = inlined_call_operand.vmem [shape: f32[1,16], index: 2, kind: input, shape index: {}]   ;;  %s1938_s3 = inlined_call_operand.vmem [shape: f32[1,16], index: 3, kind: input, shape index: {}]   ;;  %s1939_s8 = inlined_call_operand.vmem [shape: bf16[16,16], index: 8, kind: input, shape index: {}]   ;;  %s1940_s7 = inlined_call_operand.vmem [shape: f32[1,16], index: 7, kind: input, shape index: {}]   ;;  %s1941_s4 = inlined_call_operand.vmem [shape: f32[1,16], index: 4, kind: input, shape index: {}]   ;;  %s1942_s5 = inlined_call_operand.vmem [shape: f32[1,16], index: 5, kind: input, shape index: {}]   ;;  %s1943_s9 = inlined_call_operand.vmem [shape: f32[1,16], index: 9, kind: input, shape index: {}]   ;;  %s1944_s10 = inlined_call_operand.vmem [shape: f32[128,16], index: 10, kind: output, shape index: {}]  }
   0x1   :  { %v36_v0 = vld [vmem:[%s1934_s1] sm:$0xff]  ;;  %v38_v1 = vld [vmem:[%s1934_s1 + $0x10] sm:$0xff]  ;;  %v37_v2 = vld [vmem:[%s1934_s1 + $0x8] sm:$0xff] }
   0x2   :  { %v55_v3 = vsel %vm54_vm0, %v36_v0, 0.0  ;;  %v61_v4 = vsel %vm54_vm0, %v38_v1, 0.0  ;;  %v39_v5 = vld [vmem:[%s1934_s1 + $0x18] sm:$0xff]  ;;  %v58_v6 = vsel %vm54_vm0, %v37_v2, 0.0  ;;  %v40_v8 = vld [vmem:[%s1934_s1 + $0x20] sm:$0xff]  ;;  %v41_v9 = vld [vmem:[%s1934_s1 + $0x28] sm:$0xff] }
   0x3   :  { %56 = vadd.xlane.f32.xlu0 %v55_v3  ;;  %62 = vadd.xlane.f32.xlu1 %v61_v4  ;;  %v64_v7 = vsel %vm54_vm0, %v39_v5, 0.0  ;;  %v67_v10 = vsel %vm54_vm0, %v40_v8, 0.0  ;;  %v70_v11 = vsel %vm54_vm0, %v41_v9, 0.0  ;;  %v1304_v12 = vld [vmem:[%s1934_s1 + $0x30] sm:$0xff]  ;;  %v1309_v13 = vld [vmem:[%s1934_s1 + $0x38] sm:$0xff]  ;;  %v1318_v16 = vld [vmem:[%s1934_s1 + $0x40] sm:$0xff] }
   0x4   :  { %v73_v14 = vsel %vm54_vm0, %v1304_v12, 0.0  ;;  %v76_v15 = vsel %vm54_vm0, %v1309_v13, 0.0  ;;  %v1323_v17 = vld [vmem:[%s1934_s1 + $0x48] sm:$0xff]  ;;  %v79_v18 = vsel %vm54_vm0, %v1318_v16, 0.0  ;;  %v1332_v20 = vld [vmem:[%s1934_s1 + $0x50] sm:$0xff]  ;;  %v1337_v21 = vld [vmem:[%s1934_s1 + $0x58] sm:$0xff] }
   0x5   :  { %v82_v19 = vsel %vm54_vm0, %v1323_v17, 0.0  ;;  %v85_v22 = vsel %vm54_vm0, %v1332_v20, 0.0  ;;  %v88_v23 = vsel %vm54_vm0, %v1337_v21, 0.0  ;;  %v1346_v24 = vld [vmem:[%s1934_s1 + $0x60] sm:$0xff]  ;;  %v1351_v25 = vld [vmem:[%s1934_s1 + $0x68] sm:$0xff]  ;;  %v1360_v28 = vld [vmem:[%s1934_s1 + $0x70] sm:$0xff] }
   0x6   :  { %v91_v26 = vsel %vm54_vm0, %v1346_v24, 0.0  ;;  %v94_v27 = vsel %vm54_vm0, %v1351_v25, 0.0  ;;  %v1365_v29 = vld [vmem:[%s1934_s1 + $0x78] sm:$0xff]  ;;  %v97_v30 = vsel %vm54_vm0, %v1360_v28, 0.0 }
   0x7   :  { %59 = vadd.xlane.f32.xlu0 %v58_v6  ;;  %65 = vadd.xlane.f32.xlu1 %v64_v7  ;;  %v100_v31 = vsel %vm54_vm0, %v1365_v29, 0.0 }
   0xb   :  { %68 = vadd.xlane.f32.xlu0 %v67_v10  ;;  %71 = vadd.xlane.f32.xlu1 %v70_v11 }
   0xf   :  { %74 = vadd.xlane.f32.xlu0 %v73_v14  ;;  %77 = vadd.xlane.f32.xlu1 %v76_v15 }
  0x13   :  { %80 = vadd.xlane.f32.xlu0 %v79_v18  ;;  %83 = vadd.xlane.f32.xlu1 %v82_v19 }
  0x17   :  { %86 = vadd.xlane.f32.xlu0 %v85_v22  ;;  %89 = vadd.xlane.f32.xlu1 %v88_v23 }
  0x1b   :  { %92 = vadd.xlane.f32.xlu0 %v91_v26  ;;  %95 = vadd.xlane.f32.xlu1 %v94_v27 }
  0x1f   :  { %98 = vadd.xlane.f32.xlu0 %v97_v30  ;;  %101 = vadd.xlane.f32.xlu1 %v100_v31 }
  0x90   :  { %v57_v32 = vpop.xlane.xlu0 %56  ;;  %v63_v33 = vpop.xlane.xlu1 %62 }
  0x91   :  { %v104_v34 = vmul.f32 0.0625, %v57_v32  ;;  %v106_v35 = vmul.f32 0.0625, %v63_v33 }
  0x93   :  { %v1371_v36 = vsub.f32 %v36_v0, %v104_v34  ;;  %v1373_v37 = vsub.f32 %v38_v1, %v106_v35 }
  0x94   :  { %v60_v38 = vpop.xlane.xlu0 %59  ;;  %v66_v39 = vpop.xlane.xlu1 %65 }
  0x95   :  { %v105_v40 = vmul.f32 0.0625, %v60_v38  ;;  %v107_v41 = vmul.f32 0.0625, %v66_v39  ;;  %v136_v42 = vmul.f32 %v1371_v36, %v1371_v36  ;;  %v138_v43 = vmul.f32 %v1373_v37, %v1373_v37 }
  0x97   :  { %v1379_v44 = vsub.f32 %v37_v2, %v105_v40  ;;  %v1381_v45 = vsub.f32 %v39_v5, %v107_v41  ;;  %v152_v46 = vsel %vm54_vm0, %v136_v42, 0.0  ;;  %v158_v49 = vsel %vm54_vm0, %v138_v43, 0.0 }
  0x98   :  { %153 = vadd.xlane.f32.xlu0 %v152_v46  ;;  %v69_v47 = vpop.xlane.xlu0 %68  ;;  %v72_v48 = vpop.xlane.xlu1 %71 }
  0x99   :  { %v108_v50 = vmul.f32 0.0625, %v69_v47  ;;  %v109_v51 = vmul.f32 0.0625, %v72_v48  ;;  %v137_v52 = vmul.f32 %v1379_v44, %v1379_v44  ;;  %v139_v53 = vmul.f32 %v1381_v45, %v1381_v45 }
  0x9b   :  { %v1389_v54 = vsub.f32 %v40_v8, %v108_v50  ;;  %v1391_v55 = vsub.f32 %v41_v9, %v109_v51  ;;  %v155_v56 = vsel %vm54_vm0, %v137_v52, 0.0  ;;  %v161_v59 = vsel %vm54_vm0, %v139_v53, 0.0 }
  0x9c   :  { %159 = vadd.xlane.f32.xlu0 %v158_v49  ;;  %156 = vadd.xlane.f32.xlu1 %v155_v56  ;;  %v75_v57 = vpop.xlane.xlu0 %74  ;;  %v78_v58 = vpop.xlane.xlu1 %77  ;;  %v1471_v56 = vld [vmem:[%s1935_s0 + $0x8] sm:$0xff] }
  0x9d   :  { %v110_v60 = vmul.f32 0.0625, %v75_v57  ;;  %v111_v61 = vmul.f32 0.0625, %v78_v58  ;;  %v140_v62 = vmul.f32 %v1389_v54, %v1389_v54  ;;  %v141_v63 = vmul.f32 %v1391_v55, %v1391_v55  ;;  %v1476_v57 = vld [vmem:[%s1935_s0 + $0x10] sm:$0xff] }
  0x9e   :  { %v329_v58 = vsel %vm54_vm0, %v1471_v56, 0.0 }
  0x9f   :  { %v1400_v0 = vsub.f32 %v1304_v12, %v110_v60  ;;  %v1403_v1 = vsub.f32 %v1309_v13, %v111_v61  ;;  %v164_v2 = vsel %vm54_vm0, %v140_v62, 0.0  ;;  %v167_v5 = vsel %vm54_vm0, %v141_v63, 0.0  ;;  %v1485_v60 = vld [vmem:[%s1935_s0 + $0x18] sm:$0xff]  ;;  %v1490_v61 = vld [vmem:[%s1935_s0 + $0x20] sm:$0xff] }
  0xa0   :  { %162 = vadd.xlane.f32.xlu1 %v161_v59  ;;  %165 = vadd.xlane.f32.xlu0 %v164_v2  ;;  %v81_v3 = vpop.xlane.xlu0 %80  ;;  %v84_v4 = vpop.xlane.xlu1 %83  ;;  %v332_v59 = vsel %vm54_vm0, %v1476_v57, 0.0  ;;  %v335_v62 = vsel %vm54_vm0, %v1485_v60, 0.0  ;;  %v338_v63 = vsel %vm54_vm0, %v1490_v61, 0.0  ;;  %v1499_v2 = vld [vmem:[%s1935_s0 + $0x28] sm:$0xff] }
  0xa1   :  { %v112_v6 = vmul.f32 0.0625, %v81_v3  ;;  %v113_v7 = vmul.f32 0.0625, %v84_v4  ;;  %v142_v8 = vmul.f32 %v1400_v0, %v1400_v0  ;;  %v143_v9 = vmul.f32 %v1403_v1, %v1403_v1  ;;  %v1504_v3 = vld [vmem:[%s1935_s0 + $0x30] sm:$0xff]  ;;  %v1092_v4 = vld [vmem:[%s1936_s6] sm:$0xff]  }
  0xa2   :  { %1056 = vmatprep.subr.bf16.mxu0 %v1092_v4 }
  0xa3   :  { %v1412_v10 = vsub.f32 %v1318_v16, %v112_v6  ;;  %v1415_v11 = vsub.f32 %v1323_v17, %v113_v7  ;;  %v170_v12 = vsel %vm54_vm0, %v142_v8, 0.0  ;;  %v173_v15 = vsel %vm54_vm0, %v143_v9, 0.0  ;;  %v1516_v7 = vld [vmem:[%s1935_s0 + $0x38] sm:$0xff]  ;;  %v1521_v8 = vld [vmem:[%s1935_s0 + $0x40] sm:$0xff]  ;;  %1057 = vmatpush3.bf16.msra.mxu0 %v1092_v4 }
  0xa4   :  { %168 = vadd.xlane.f32.xlu1 %v167_v5  ;;  %171 = vadd.xlane.f32.xlu0 %v170_v12  ;;  %v87_v13 = vpop.xlane.xlu0 %86  ;;  %v90_v14 = vpop.xlane.xlu1 %89  ;;  %v341_v5 = vsel %vm54_vm0, %v1499_v2, 0.0  ;;  %v344_v6 = vsel %vm54_vm0, %v1504_v3, 0.0  ;;  %v347_v9 = vsel %vm54_vm0, %v1516_v7, 0.0  ;;  %v350_v12 = vsel %vm54_vm0, %v1521_v8, 0.0 }
  0xa5   :  { %v114_v18 = vmul.f32 0.0625, %v87_v13  ;;  %v115_v19 = vmul.f32 0.0625, %v90_v14  ;;  %v144_v22 = vmul.f32 %v1412_v10, %v1412_v10  ;;  %v145_v16 = vmul.f32 %v1415_v11, %v1415_v11  ;;  %v1530_v13 = vld [vmem:[%s1935_s0 + $0x48] sm:$0xff]  ;;  %v1535_v14 = vld [vmem:[%s1935_s0 + $0x50] sm:$0xff] }
  0xa7   :  { %v1424_v23 = vsub.f32 %v1332_v20, %v114_v18  ;;  %v1427_v17 = vsub.f32 %v1337_v21, %v115_v19  ;;  %v176_v26 = vsel %vm54_vm0, %v144_v22, 0.0  ;;  %v179_v31 = vsel %vm54_vm0, %v145_v16, 0.0  ;;  %v1544_v19 = vld [vmem:[%s1935_s0 + $0x58] sm:$0xff]  ;;  %v1549_v22 = vld [vmem:[%s1935_s0 + $0x60] sm:$0xff] }
  0xa8   :  { %174 = vadd.xlane.f32.xlu1 %v173_v15  ;;  %177 = vadd.xlane.f32.xlu0 %v176_v26  ;;  %v93_v27 = vpop.xlane.xlu0 %92  ;;  %v96_v30 = vpop.xlane.xlu1 %95  ;;  %v353_v15 = vsel %vm54_vm0, %v1530_v13, 0.0  ;;  %v356_v18 = vsel %vm54_vm0, %v1535_v14, 0.0  ;;  %v359_v16 = vsel %vm54_vm0, %v1544_v19, 0.0  ;;  %v362_v26 = vsel %vm54_vm0, %v1549_v22, 0.0 }
  0xa9   :  { %v116_v32 = vmul.f32 0.0625, %v93_v27  ;;  %v117_v33 = vmul.f32 0.0625, %v96_v30  ;;  %v146_v34 = vmul.f32 %v1424_v23, %v1424_v23  ;;  %v147_v20 = vmul.f32 %v1427_v17, %v1427_v17  ;;  %v1558_v27 = vld [vmem:[%s1935_s0 + $0x68] sm:$0xff]  ;;  %v1563_v30 = vld [vmem:[%s1935_s0 + $0x70] sm:$0xff] }
  0xab   :  { %v1436_v35 = vsub.f32 %v1346_v24, %v116_v32  ;;  %v1439_v21 = vsub.f32 %v1351_v25, %v117_v33  ;;  %v182_v38 = vsel %vm54_vm0, %v146_v34, 0.0  ;;  %v185_v41 = vsel %vm54_vm0, %v147_v20, 0.0  ;;  %v1572_v33 = vld [vmem:[%s1935_s0 + $0x78] sm:$0xff] }
  0xac   :  { %180 = vadd.xlane.f32.xlu1 %v179_v31  ;;  %183 = vadd.xlane.f32.xlu0 %v182_v38  ;;  %v99_v39 = vpop.xlane.xlu0 %98  ;;  %v102_v40 = vpop.xlane.xlu1 %101  ;;  %v365_v31 = vsel %vm54_vm0, %v1558_v27, 0.0  ;;  %v368_v32 = vsel %vm54_vm0, %v1563_v30, 0.0  ;;  %v371_v34 = vsel %vm54_vm0, %v1572_v33, 0.0 }
  0xad   :  { %v118_v42 = vmul.f32 0.0625, %v99_v39  ;;  %v119_v43 = vmul.f32 0.0625, %v102_v40  ;;  %v148_v46 = vmul.f32 %v1436_v35, %v1436_v35  ;;  %v149_v24 = vmul.f32 %v1439_v21, %v1439_v21 }
  0xaf   :  { %v1448_v47 = vsub.f32 %v1360_v28, %v118_v42  ;;  %v1451_v25 = vsub.f32 %v1365_v29, %v119_v43  ;;  %v188_v48 = vsel %vm54_vm0, %v148_v46, 0.0  ;;  %v191_v49 = vsel %vm54_vm0, %v149_v24, 0.0  ;;  %v1462_v28 = vld [vmem:[%s1935_s0] sm:$0xff] }
  0xb0   :  { %186 = vadd.xlane.f32.xlu1 %v185_v41  ;;  %189 = vadd.xlane.f32.xlu0 %v188_v48  ;;  %v326_v53 = vsel %vm54_vm0, %v1462_v28, 0.0 }
  0xb1   :  { %v150_v50 = vmul.f32 %v1448_v47, %v1448_v47  ;;  %v151_v51 = vmul.f32 %v1451_v25, %v1451_v25 }
  0xb3   :  { %v194_v29 = vsel %vm54_vm0, %v150_v50, 0.0  ;;  %v197_v52 = vsel %vm54_vm0, %v151_v51, 0.0 }
  0xb4   :  { %192 = vadd.xlane.f32.xlu1 %v191_v49  ;;  %195 = vadd.xlane.f32.xlu0 %v194_v29 }
  0xb8   :  { %198 = vadd.xlane.f32.xlu1 %v197_v52  ;;  %327 = vadd.xlane.f32.xlu0 %v326_v53 }
  0xbc   :  { %330 = vadd.xlane.f32.xlu1 %v329_v58  ;;  %333 = vadd.xlane.f32.xlu0 %v332_v59 }
  0xc0   :  { %336 = vadd.xlane.f32.xlu1 %v335_v62  ;;  %339 = vadd.xlane.f32.xlu0 %v338_v63 }
  0xc4   :  { %342 = vadd.xlane.f32.xlu1 %v341_v5  ;;  %345 = vadd.xlane.f32.xlu0 %v344_v6 }
  0xc8   :  { %348 = vadd.xlane.f32.xlu1 %v347_v9  ;;  %351 = vadd.xlane.f32.xlu0 %v350_v12 }
  0xcc   :  { %354 = vadd.xlane.f32.xlu1 %v353_v15  ;;  %357 = vadd.xlane.f32.xlu0 %v356_v18 }
  0xd0   :  { %360 = vadd.xlane.f32.xlu1 %v359_v16  ;;  %363 = vadd.xlane.f32.xlu0 %v362_v26  ;;  %v1580_v16 = vld [vmem:[%s1937_s2] ss:$0 sm:$0xff] }
  0xd4   :  { %366 = vadd.xlane.f32.xlu1 %v365_v31  ;;  %369 = vadd.xlane.f32.xlu0 %v368_v32 }
  0xd8   :  { %372 = vadd.xlane.f32.xlu1 %v371_v34 }
 0x125   :  { %v154_v20 = vpop.xlane.xlu0 %153 }
 0x126   :  { %v200_v38 = vmul.f32 0.0625, %v154_v20 }
 0x128   :  { %v216_v39 = vadd.f32 1e-05, %v200_v38 }
 0x129   :  { %v157_v40 = vpop.xlane.xlu1 %156  ;;  %v160_v41 = vpop.xlane.xlu0 %159 }
 0x12a   :  { %1094 = vrsqrt.f32 %v216_v39  ;;  %v201_v42 = vmul.f32 0.0625, %v157_v40  ;;  %v202_v43 = vmul.f32 0.0625, %v160_v41 }
 0x12c   :  { %v217_v46 = vadd.f32 1e-05, %v201_v42  ;;  %v218_v24 = vadd.f32 1e-05, %v202_v43  ;;  %v1588_v43 = vld [vmem:[%s1938_s3] ss:$0 sm:$0xff] }
 0x12d   :  { %v163_v48 = vpop.xlane.xlu1 %162  ;;  %v166_v49 = vpop.xlane.xlu0 %165 }
 0x12e   :  { %1096 = vrsqrt.f32 %v217_v46  ;;  %v203_v50 = vmul.f32 0.0625, %v163_v48  ;;  %v204_v51 = vmul.f32 0.0625, %v166_v49 }
 0x12f   :  { %1098 = vrsqrt.f32 %v218_v24 }
 0x130   :  { %v219_v29 = vadd.f32 1e-05, %v203_v50  ;;  %v220_v52 = vadd.f32 1e-05, %v204_v51 }
 0x131   :  { %v169_v53 = vpop.xlane.xlu1 %168  ;;  %v172_v58 = vpop.xlane.xlu0 %171 }
 0x132   :  { %1100 = vrsqrt.f32 %v219_v29  ;;  %v205_v59 = vmul.f32 0.0625, %v169_v53  ;;  %v206_v62 = vmul.f32 0.0625, %v172_v58 }
 0x133   :  { %1102 = vrsqrt.f32 %v220_v52 }
 0x134   :  { %v1095_v63 = vpop.eup %1094  ;;  %v221_v4 = vadd.f32 1e-05, %v205_v59  ;;  %v222_v5 = vadd.f32 1e-05, %v206_v62 }
 0x135   :  { %v175_v6 = vpop.xlane.xlu1 %174  ;;  %v178_v9 = vpop.xlane.xlu0 %177  ;;  %v248_v12 = vmul.f32 %v1095_v63, %v1371_v36 }
 0x136   :  { %1104 = vrsqrt.f32 %v221_v4  ;;  %v207_v15 = vmul.f32 0.0625, %v175_v6  ;;  %v208_v18 = vmul.f32 0.0625, %v178_v9 }
 0x137   :  { %1106 = vrsqrt.f32 %v222_v5  ;;  %v270_v40 = vmul.f32 %v1580_v16, %v248_v12 }
 0x138   :  { %v1097_v26 = vpop.eup %1096  ;;  %v223_v31 = vadd.f32 1e-05, %v207_v15  ;;  %v224_v32 = vadd.f32 1e-05, %v208_v18 }
 0x139   :  { %v1099_v34 = vpop.eup %1098  ;;  %v181_v20 = vpop.xlane.xlu1 %180  ;;  %v249_v39 = vmul.f32 %v1097_v26, %v1379_v44 }
 0x13a   :  { %v184_v38 = vpop.xlane.xlu0 %183  ;;  %v250_v36 = vmul.f32 %v1099_v34, %v1373_v37  ;;  %1108 = vrsqrt.f32 %v223_v31  ;;  %v209_v41 = vmul.f32 0.0625, %v181_v20  ;;  %v292_v37 = vadd.f32 %v1588_v43, %v270_v40 }
 0x13b   :  { %v210_v42 = vmul.f32 0.0625, %v184_v38  ;;  %1110 = vrsqrt.f32 %v224_v32  ;;  %v271_v46 = vmul.f32 %v1580_v16, %v249_v39 }
 0x13c   :  { %v1101_v24 = vpop.eup %1100  ;;  %v225_v48 = vadd.f32 1e-05, %v209_v41  ;;  %v272_v53 = vmul.f32 %v1580_v16, %v250_v36 }
 0x13d   :  { %v226_v49 = vadd.f32 1e-05, %v210_v42  ;;  %v1103_v50 = vpop.eup %1102  ;;  %v251_v44 = vmul.f32 %v1101_v24, %v1381_v45  ;;  %v187_v51 = vpop.xlane.xlu1 %186  ;;  %v293_v52 = vadd.f32 %v1588_v43, %v271_v46 }
 0x13e   :  { %v190_v29 = vpop.xlane.xlu0 %189  ;;  %v252_v58 = vmul.f32 %v1103_v50, %v1389_v54  ;;  %1112 = vrsqrt.f32 %v225_v48  ;;  %v211_v59 = vmul.f32 0.0625, %v187_v51  ;;  %v294_v26 = vadd.f32 %v1588_v43, %v272_v53 }
 0x13f   :  { %v212_v62 = vmul.f32 0.0625, %v190_v29  ;;  %1114 = vrsqrt.f32 %v226_v49  ;;  %v578_v63 = vpack.c.bf16 %v293_v52, %v292_v37  ;;  %v273_v4 = vmul.f32 %v1580_v16, %v251_v44 }
 0x140   :  { %v1105_v5 = vpop.eup %1104  ;;  %v227_v6 = vadd.f32 1e-05, %v211_v59  ;;  %v274_v31 = vmul.f32 %v1580_v16, %v252_v58 }
 0x141   :  { %v228_v45 = vadd.f32 1e-05, %v212_v62  ;;  %v1107_v9 = vpop.eup %1106  ;;  %v253_v12 = vmul.f32 %v1105_v5, %v1391_v55  ;;  %v193_v15 = vpop.xlane.xlu1 %192  ;;  %1058 = vmatprep.mubr.msk.bf16.mxu0 %vm54_vm0, %v578_v63  ;;  %v295_v54 = vadd.f32 %v1588_v43, %v273_v4 }
 0x142   :  { %v196_v18 = vpop.xlane.xlu0 %195  ;;  %v254_v32 = vmul.f32 %v1107_v9, %v1400_v0  ;;  %1116 = vrsqrt.f32 %v227_v6  ;;  %v213_v34 = vmul.f32 0.0625, %v193_v15  ;;  %v296_v48 = vadd.f32 %v1588_v43, %v274_v31 }
 0x143   :  { %v214_v20 = vmul.f32 0.0625, %v196_v18  ;;  %1118 = vrsqrt.f32 %v228_v45  ;;  %v579_v38 = vpack.c.bf16 %v295_v54, %v294_v26  ;;  %v275_v39 = vmul.f32 %v1580_v16, %v253_v12 }
 0x144   :  { %v1109_v55 = vpop.eup %1108  ;;  %v229_v40 = vadd.f32 1e-05, %v213_v34  ;;  %v276_v49 = vmul.f32 %v1580_v16, %v254_v32 }
 0x145   :  { %v230_v36 = vadd.f32 1e-05, %v214_v20  ;;  %v1111_v41 = vpop.eup %1110  ;;  %v255_v42 = vmul.f32 %v1109_v55, %v1403_v1  ;;  %v199_v46 = vpop.xlane.xlu1 %198  ;;  %1059 = vmatmul.mubr.msk.bf16.vlgmr.msra.gmra.mrb[0].mxu0 %vm54_vm0, %v579_v38  ;;  %v297_v0 = vadd.f32 %v1588_v43, %v275_v39 }
 0x146   :  { %v328_v24 = vpop.xlane.xlu0 %327  ;;  %v256_v50 = vmul.f32 %v1111_v41, %v1412_v10  ;;  %1120 = vrsqrt.f32 %v229_v40  ;;  %v215_v44 = vmul.f32 0.0625, %v199_v46  ;;  %v298_v4 = vadd.f32 %v1588_v43, %v276_v49 }
 0x147   :  { %v374_v51 = vmul.f32 0.0625, %v328_v24  ;;  %1122 = vrsqrt.f32 %v230_v36  ;;  %v580_v29 = vpack.c.bf16 %v297_v0, %v296_v48  ;;  %v277_v37 = vmul.f32 %v1580_v16, %v255_v42 }
 0x148   :  { %v1113_v1 = vpop.eup %1112  ;;  %v231_v52 = vadd.f32 1e-05, %v215_v44  ;;  %v278_v58 = vmul.f32 %v1580_v16, %v256_v50 }
 0x149   :  { %v1612_v53 = vsub.f32 %v1462_v28, %v374_v51  ;;  %v1115_v59 = vpop.eup %1114  ;;  %v257_v62 = vmul.f32 %v1113_v1, %v1415_v11  ;;  %1062 = vmatprep.mubr.msk.bf16.mxu0 %vm54_vm0, %v580_v29  ;;  %v331_v10 = vpop.xlane.xlu1 %330  ;;  %v299_v5 = vadd.f32 %v1588_v43, %v277_v37 }
 0x14a   :  { %v334_v63 = vpop.xlane.xlu0 %333  ;;  %v258_v6 = vmul.f32 %v1115_v59, %v1424_v23  ;;  %1124 = vrsqrt.f32 %v231_v52  ;;  %v375_v45 = vmul.f32 0.0625, %v331_v10  ;;  %v300_v54 = vadd.f32 %v1588_v43, %v278_v58 }
 0x14b   :  { %v376_v9 = vmul.f32 0.0625, %v334_v63  ;;  %v581_v28 = vpack.c.bf16 %v299_v5, %v298_v4  ;;  %v406_v12 = vmul.f32 %v1612_v53, %v1612_v53  ;;  %v279_v15 = vmul.f32 %v1580_v16, %v257_v62 }
 0x14c   :  { %v1117_v11 = vpop.eup %1116  ;;  %v1624_v18 = vsub.f32 %v1471_v56, %v375_v45  ;;  %v280_v39 = vmul.f32 %v1580_v16, %v258_v6 }
 0x14d   :  { %v1627_v26 = vsub.f32 %v1476_v57, %v376_v9  ;;  %v1119_v31 = vpop.eup %1118  ;;  %v259_v23 = vmul.f32 %v1117_v11, %v1427_v17  ;;  %1063 = vmatmul.mubr.msk.bf16.gmra.mrb[4].mxu0 %vm54_vm0, %v581_v28  ;;  %v337_v32 = vpop.xlane.xlu1 %336  ;;  %v422_v34 = vsel %vm54_vm0, %v406_v12, 0.0  ;;  %v301_v38 = vadd.f32 %v1588_v43, %v279_v15 }
 0x14e   :  { %v340_v20 = vpop.xlane.xlu0 %339  ;;  %v260_v56 = vmul.f32 %v1119_v31, %v1436_v35  ;;  %v377_v55 = vmul.f32 0.0625, %v337_v32  ;;  %423 = vadd.xlane.f32.xlu0 %v422_v34  ;;  %v407_v40 = vmul.f32 %v1624_v18, %v1624_v18 }
 0x14f   :  { %v378_v57 = vmul.f32 0.0625, %v340_v20  ;;  %v582_v36 = vpack.c.bf16 %v301_v38, %v300_v54  ;;  %v408_v17 = vmul.f32 %v1627_v26, %v1627_v26  ;;  %v281_v41 = vmul.f32 %v1580_v16, %v259_v23 }
 0x150   :  { %v1121_v42 = vpop.eup %1120  ;;  %v1642_v46 = vsub.f32 %v1485_v60, %v377_v55  ;;  %v425_v35 = vsel %vm54_vm0, %v407_v40, 0.0  ;;  %v282_v48 = vmul.f32 %v1580_v16, %v260_v56  ;;  %v302_v60 = vadd.f32 %v1588_v43, %v280_v39 }
 0x151   :  { %v1645_v24 = vsub.f32 %v1490_v61, %v378_v57  ;;  %v1123_v0 = vpop.eup %1122  ;;  %v261_v49 = vmul.f32 %v1121_v42, %v1439_v21  ;;  %1066 = vmatprep.mubr.msk.bf16.mxu0 %vm54_vm0, %v582_v36  ;;  %426 = vadd.xlane.f32.xlu1 %v425_v35  ;;  %v343_v50 = vpop.xlane.xlu1 %342  ;;  %v428_v44 = vsel %vm54_vm0, %v408_v17, 0.0  ;;  %v303_v29 = vadd.f32 %v1588_v43, %v281_v41 }
 0x152   :  { %v346_v51 = vpop.xlane.xlu0 %345  ;;  %v262_v61 = vmul.f32 %v1123_v0, %v1448_v47  ;;  %v379_v37 = vmul.f32 0.0625, %v343_v50  ;;  %429 = vadd.xlane.f32.xlu0 %v428_v44  ;;  %v409_v52 = vmul.f32 %v1642_v46, %v1642_v46  ;;  %v304_v4 = vadd.f32 %v1588_v43, %v282_v48 }
 0x153   :  { %v380_v1 = vmul.f32 0.0625, %v346_v51  ;;  %v583_v21 = vpack.c.bf16 %v303_v29, %v302_v60  ;;  %v410_v58 = vmul.f32 %v1645_v24, %v1645_v24  ;;  %v283_v59 = vmul.f32 %v1580_v16, %v261_v49 }
 0x154   :  { %v1125_v62 = vpop.eup %1124  ;;  %v1661_v10 = vsub.f32 %v1499_v2, %v379_v37  ;;  %v431_v47 = vsel %vm54_vm0, %v409_v52, 0.0  ;;  %v284_v2 = vmul.f32 %v1580_v16, %v262_v61 }
 0x155   :  { %v1664_v63 = vsub.f32 %v1504_v3, %v380_v1  ;;  %v263_v5 = vmul.f32 %v1125_v62, %v1451_v25  ;;  %1067 = vmatmul.mubr.msk.bf16.gmra.mrb[8].mxu0 %vm54_vm0, %v583_v21  ;;  %432 = vadd.xlane.f32.xlu1 %v431_v47  ;;  %v349_v6 = vpop.xlane.xlu1 %348  ;;  %v434_v45 = vsel %vm54_vm0, %v410_v58, 0.0  ;;  %v305_v28 = vadd.f32 %v1588_v43, %v283_v59 }
 0x156   :  { %v352_v9 = vpop.xlane.xlu0 %351  ;;  %v381_v12 = vmul.f32 0.0625, %v349_v6  ;;  %435 = vadd.xlane.f32.xlu0 %v434_v45  ;;  %v411_v15 = vmul.f32 %v1661_v10, %v1661_v10  ;;  %v306_v39 = vadd.f32 %v1588_v43, %v284_v2  ;;  %v1093_v45 = vld [vmem:[%s1939_s8] sm:$0xff]  }
 0x157   :  { %v382_v3 = vmul.f32 0.0625, %v352_v9  ;;  %v412_v25 = vmul.f32 %v1664_v63, %v1664_v63  ;;  %v584_v11 = vpack.c.bf16 %v305_v28, %v304_v4  ;;  %v285_v54 = vmul.f32 %v1580_v16, %v263_v5  ;;  %1074 = vmatprep.subr.bf16.mxu1 %v1093_v45 }
 0x158   :  { %v1679_v31 = vsub.f32 %v1516_v7, %v381_v12  ;;  %v437_v32 = vsel %vm54_vm0, %v411_v15, 0.0  ;;  %1075 = vmatpush3.bf16.msra.mxu1 %v1093_v45 }
 0x159   :  { %v1682_v23 = vsub.f32 %v1521_v8, %v382_v3  ;;  %v440_v34 = vsel %vm54_vm0, %v412_v25, 0.0  ;;  %1070 = vmatprep.mubr.msk.bf16.mxu0 %vm54_vm0, %v584_v11  ;;  %438 = vadd.xlane.f32.xlu1 %v437_v32  ;;  %v355_v20 = vpop.xlane.xlu1 %354  ;;  %v307_v56 = vadd.f32 %v1588_v43, %v285_v54 }
 0x15a   :  { %v358_v38 = vpop.xlane.xlu0 %357  ;;  %v383_v16 = vmul.f32 0.0625, %v355_v20  ;;  %441 = vadd.xlane.f32.xlu0 %v440_v34  ;;  %v413_v8 = vmul.f32 %v1679_v31, %v1679_v31 }
 0x15b   :  { %v384_v7 = vmul.f32 0.0625, %v358_v38  ;;  %v414_v55 = vmul.f32 %v1682_v23, %v1682_v23  ;;  %v585_v57 = vpack.c.bf16 %v307_v56, %v306_v39 }
 0x15c   :  { %v1694_v40 = vsub.f32 %v1530_v13, %v383_v16  ;;  %v443_v17 = vsel %vm54_vm0, %v413_v8, 0.0 }
 0x15d   :  { %v1697_v36 = vsub.f32 %v1535_v14, %v384_v7  ;;  %v446_v43 = vsel %vm54_vm0, %v414_v55, 0.0  ;;  %1071 = vmatmul.mubr.msk.bf16.gmra.mrb[12].mxu0 %vm54_vm0, %v585_v57  ;;  %444 = vadd.xlane.f32.xlu1 %v443_v17  ;;  %v361_v41 = vpop.xlane.xlu1 %360 }
 0x15e   :  { %v364_v42 = vpop.xlane.xlu0 %363  ;;  %v385_v35 = vmul.f32 0.0625, %v361_v41  ;;  %447 = vadd.xlane.f32.xlu0 %v446_v43  ;;  %v415_v0 = vmul.f32 %v1694_v40, %v1694_v40 }
 0x15f   :  { %v386_v48 = vmul.f32 0.0625, %v364_v42  ;;  %v416_v13 = vmul.f32 %v1697_v36, %v1697_v36 }
 0x160   :  { %v1707_v14 = vsub.f32 %v1544_v19, %v385_v35  ;;  %v449_v50 = vsel %vm54_vm0, %v415_v0, 0.0 }
 0x161   :  { %v1710_v49 = vsub.f32 %v1549_v22, %v386_v48  ;;  %v452_v44 = vsel %vm54_vm0, %v416_v13, 0.0  ;;  %450 = vadd.xlane.f32.xlu1 %v449_v50  ;;  %v367_v51 = vpop.xlane.xlu1 %366 }
 0x162   :  { %v370_v60 = vpop.xlane.xlu0 %369  ;;  %v387_v29 = vmul.f32 0.0625, %v367_v51  ;;  %453 = vadd.xlane.f32.xlu0 %v452_v44  ;;  %v417_v37 = vmul.f32 %v1707_v14, %v1707_v14  ;;  %v1744_v51 = vld [vmem:[%s1940_s7] ss:$0 sm:$0xff] }
 0x163   :  { %v388_v61 = vmul.f32 0.0625, %v370_v60  ;;  %v418_v19 = vmul.f32 %v1710_v49, %v1710_v49 }
 0x164   :  { %v1719_v1 = vsub.f32 %v1558_v27, %v387_v29  ;;  %v455_v52 = vsel %vm54_vm0, %v417_v37, 0.0 }
 0x165   :  { %v1722_v22 = vsub.f32 %v1563_v30, %v388_v61  ;;  %v458_v21 = vsel %vm54_vm0, %v418_v19, 0.0  ;;  %456 = vadd.xlane.f32.xlu1 %v455_v52  ;;  %v373_v58 = vpop.xlane.xlu1 %372 }
 0x166   :  { %v389_v59 = vmul.f32 0.0625, %v373_v58  ;;  %459 = vadd.xlane.f32.xlu0 %v458_v21  ;;  %v419_v62 = vmul.f32 %v1719_v1, %v1719_v1 }
 0x167   :  { %v420_v47 = vmul.f32 %v1722_v22, %v1722_v22 }
 0x168   :  { %v1731_v27 = vsub.f32 %v1572_v33, %v389_v59  ;;  %v461_v30 = vsel %vm54_vm0, %v419_v62, 0.0 }
 0x169   :  { %v464_v4 = vsel %vm54_vm0, %v420_v47, 0.0  ;;  %462 = vadd.xlane.f32.xlu1 %v461_v30 }
 0x16a   :  { %465 = vadd.xlane.f32.xlu0 %v464_v4  ;;  %v421_v5 = vmul.f32 %v1731_v27, %v1731_v27 }
 0x16c   :  { %v467_v6 = vsel %vm54_vm0, %v421_v5, 0.0 }
 0x16d   :  { %468 = vadd.xlane.f32.xlu1 %v467_v6 }
 0x1db   :  { %v424_v33 = vpop.xlane.xlu0 %423 }
 0x1dc   :  { %v470_v54 = vmul.f32 0.0625, %v424_v33 }
 0x1de   :  { %v427_v9 = vpop.xlane.xlu1 %426  ;;  %v486_v56 = vadd.f32 1e-05, %v470_v54 }
 0x1df   :  { %v430_v28 = vpop.xlane.xlu0 %429  ;;  %v471_v32 = vmul.f32 0.0625, %v427_v9 }
 0x1e0   :  { %v472_v20 = vmul.f32 0.0625, %v430_v28  ;;  %1126 = vrsqrt.f32 %v486_v56 }
 0x1e1   :  { %v487_v7 = vadd.f32 1e-05, %v471_v32 }
 0x1e2   :  { %v433_v2 = vpop.xlane.xlu1 %432  ;;  %v488_v55 = vadd.f32 1e-05, %v472_v20 }
 0x1e3   :  { %v436_v12 = vpop.xlane.xlu0 %435  ;;  %v473_v39 = vmul.f32 0.0625, %v433_v2  ;;  %1128 = vrsqrt.f32 %v487_v7 }
 0x1e4   :  { %v474_v16 = vmul.f32 0.0625, %v436_v12  ;;  %1130 = vrsqrt.f32 %v488_v55 }
 0x1e5   :  { %v489_v17 = vadd.f32 1e-05, %v473_v39 }
 0x1e6   :  { %v439_v3 = vpop.xlane.xlu1 %438  ;;  %v490_v42 = vadd.f32 1e-05, %v474_v16 }
 0x1e7   :  { %v442_v15 = vpop.xlane.xlu0 %441  ;;  %v475_v8 = vmul.f32 0.0625, %v439_v3  ;;  %1132 = vrsqrt.f32 %v489_v17 }
 0x1e8   :  { %v476_v57 = vmul.f32 0.0625, %v442_v15  ;;  %1134 = vrsqrt.f32 %v490_v42 }
 0x1e9   :  { %v491_v0 = vadd.f32 1e-05, %v475_v8 }
 0x1ea   :  { %v445_v25 = vpop.xlane.xlu1 %444  ;;  %v492_v50 = vadd.f32 1e-05, %v476_v57  ;;  %v1127_v28 = vpop.eup %1126 }
 0x1eb   :  { %v448_v11 = vpop.xlane.xlu0 %447  ;;  %v477_v43 = vmul.f32 0.0625, %v445_v25  ;;  %1136 = vrsqrt.f32 %v491_v0 }
 0x1ec   :  { %v478_v35 = vmul.f32 0.0625, %v448_v11  ;;  %1138 = vrsqrt.f32 %v492_v50 }
 0x1ed   :  { %v493_v44 = vadd.f32 1e-05, %v477_v43  ;;  %v1129_v3 = vpop.eup %1128 }
 0x1ee   :  { %v451_v34 = vpop.xlane.xlu1 %450  ;;  %v494_v60 = vadd.f32 1e-05, %v478_v35  ;;  %v1131_v54 = vpop.eup %1130 }
 0x1ef   :  { %v454_v38 = vpop.xlane.xlu0 %453  ;;  %v479_v13 = vmul.f32 0.0625, %v451_v34  ;;  %1140 = vrsqrt.f32 %v493_v44 }
 0x1f0   :  { %v480_v19 = vmul.f32 0.0625, %v454_v38  ;;  %1142 = vrsqrt.f32 %v494_v60  ;;  %v518_v60 = vmul.f32 %v1127_v28, %v1612_v53 }
 0x1f1   :  { %v495_v29 = vadd.f32 1e-05, %v479_v13  ;;  %v1752_v34 = vpop.eup %1132 }
 0x1f2   :  { %v457_v41 = vpop.xlane.xlu1 %456  ;;  %v496_v2 = vadd.f32 1e-05, %v480_v19  ;;  %v1754_v39 = vpop.eup %1134  ;;  %v1774_v19 = vld [vmem:[%s1941_s4] ss:$0 sm:$0xff] }
 0x1f3   :  { %v460_v48 = vpop.xlane.xlu0 %459  ;;  %v481_v59 = vmul.f32 0.0625, %v457_v41  ;;  %1144 = vrsqrt.f32 %v495_v29 }
 0x1f4   :  { %v482_v30 = vmul.f32 0.0625, %v460_v48 }
 0x1f5   :  { %v497_v15 = vadd.f32 1e-05, %v481_v59  ;;  %v1757_v8 = vpop.eup %1136  ;;  %v520_v59 = vmul.f32 %v1131_v54, %v1627_v26 }
 0x1f6   :  { %v1746_v61 = vpop.xlane.xlu1 %462  ;;  %v498_v32 = vadd.f32 1e-05, %v482_v30  ;;  %v1760_v17 = vpop.eup %1138 }
 0x1f7   :  { %v466_v52 = vpop.xlane.xlu0 %465 }
 0x1f8   :  { %v484_v45 = vmul.f32 0.0625, %v466_v52  ;;  %v519_v52 = vmul.f32 %v1129_v3, %v1624_v18 }
 0x1f9   :  { %v1763_v35 = vpop.eup %1140 }
 0x1fa   :  { %v469_v25 = vpop.xlane.xlu1 %468  ;;  %v500_v20 = vadd.f32 1e-05, %v484_v45  ;;  %v1766_v13 = vpop.eup %1142  ;;  %v541_v28 = vmul.f32 %v1774_v19, %v519_v52 }
 0x1fb   :  { %v485_v56 = vmul.f32 0.0625, %v469_v25 }
 0x1fd   :  { %v501_v50 = vadd.f32 1e-05, %v485_v56  ;;  %v1769_v29 = vpop.eup %1144  ;;  %v521_v56 = vmul.f32 %v1752_v34, %v1642_v46 }
 0x1ff   :  { %v543_v52 = vmul.f32 %v1774_v19, %v521_v56 }
 0x218   :  { %v1060_v37 = vpop.f32.mrb[0].mxu0 }
 0x219   :  { %v668_v21 = vadd.f32 %v1060_v37, %v1744_v51  ;;  %v659_v58 = vpop.f32.mrb[1].mxu0 }
 0x21a   :  { %v660_v62 = vadd.f32 %v1744_v51, %v659_v58  ;;  %v1061_v47 = vpop.f32.mrb[2].mxu0 }
 0x21b   :  { %v1014_v4 = vmul.f32 -1.442695, %v668_v21  ;;  %v671_v5 = vadd.f32 %v1061_v47, %v1744_v51  ;;  %v662_v6 = vpop.f32.mrb[3].mxu0 }
 0x21c   :  { %v1012_v33 = vmul.f32 -1.442695, %v660_v62  ;;  %v663_v9 = vadd.f32 %v1744_v51, %v662_v6  ;;  %v540_v6 = vmul.f32 %v1774_v19, %v518_v60 }
 0x21d   :  { %1146 = vpow2.f32 %v1014_v4  ;;  %v1015_v12 = vmul.f32 -1.442695, %v671_v5 }
 0x21e   :  { %1148 = vpow2.f32 %v1012_v33  ;;  %v1013_v11 = vmul.f32 -1.442695, %v663_v9 }
 0x21f   :  { %1150 = vpow2.f32 %v1015_v12 }
 0x220   :  { %1152 = vpow2.f32 %v1013_v11  ;;  %v1064_v38 = vpop.f32.mrb[4].mxu0 }
 0x221   :  { %1154 = vrsqrt.f32 %v496_v2  ;;  %v684_v16 = vadd.f32 %v1064_v38, %v1744_v51  ;;  %v675_v7 = vpop.f32.mrb[5].mxu0 }
 0x222   :  { %1156 = vrsqrt.f32 %v497_v15  ;;  %v676_v55 = vadd.f32 %v1744_v51, %v675_v7  ;;  %v1065_v57 = vpop.f32.mrb[6].mxu0 }
 0x223   :  { %1158 = vrsqrt.f32 %v498_v32  ;;  %v1018_v43 = vmul.f32 -1.442695, %v684_v16  ;;  %v687_v41 = vadd.f32 %v1065_v57, %v1744_v51  ;;  %v678_v42 = vpop.f32.mrb[7].mxu0  ;;  %v1791_v32 = vld [vmem:[%s1942_s5] ss:$0 sm:$0xff] }
 0x224   :  { %1160 = vrsqrt.f32 %v500_v20  ;;  %v1016_v48 = vmul.f32 -1.442695, %v676_v55  ;;  %v679_v0 = vadd.f32 %v1744_v51, %v678_v42  ;;  %v542_v20 = vmul.f32 %v1774_v19, %v520_v59 }
 0x225   :  { %1162 = vpow2.f32 %v1018_v43  ;;  %v1019_v44 = vmul.f32 -1.442695, %v687_v41  ;;  %v562_v43 = vadd.f32 %v1791_v32, %v540_v6  ;;  %v563_v41 = vadd.f32 %v1791_v32, %v541_v28 }
 0x226   :  { %1164 = vpow2.f32 %v1016_v48  ;;  %v1017_v37 = vmul.f32 -1.442695, %v679_v0  ;;  %v522_v48 = vmul.f32 %v1754_v39, %v1645_v24  ;;  %v564_v46 = vadd.f32 %v1791_v32, %v542_v20 }
 0x227   :  { %v1147_v21 = vpop.eup %1146  ;;  %1166 = vpow2.f32 %v1019_v44  ;;  %v524_v6 = vmul.f32 %v1760_v17, %v1664_v63  ;;  %v565_v28 = vadd.f32 %v1791_v32, %v543_v52 }
 0x228   :  { %v1149_v58 = vpop.eup %1148  ;;  %v772_v62 = vadd.f32 1.0, %v1147_v21  ;;  %1168 = vpow2.f32 %v1017_v37  ;;  %v1068_v47 = vpop.f32.mrb[8].mxu0 }
 0x229   :  { %v1151_v53 = vpop.eup %1150  ;;  %1170 = vrsqrt.f32 %v501_v50  ;;  %v770_v30 = vadd.f32 1.0, %v1149_v58  ;;  %v700_v4 = vadd.f32 %v1068_v47, %v1744_v51  ;;  %v691_v5 = vpop.f32.mrb[9].mxu0  ;;  %v483_v58 = vmul.f32 0.0625, %v1746_v61 }
 0x22a   :  { %v1153_v45 = vpop.eup %1152  ;;  %1172 = vrcp.f32 %v772_v62  ;;  %v773_v33 = vadd.f32 1.0, %v1151_v53  ;;  %v692_v18 = vadd.f32 %v1744_v51, %v691_v5  ;;  %v1069_v9 = vpop.f32.mrb[10].mxu0  ;;  %v546_v20 = vmul.f32 %v1774_v19, %v524_v6 }
 0x22b   :  { %v1782_v26 = vpop.eup %1154  ;;  %1174 = vrcp.f32 %v770_v30  ;;  %v771_v2 = vadd.f32 1.0, %v1153_v45  ;;  %v1022_v12 = vmul.f32 -1.442695, %v700_v4  ;;  %v703_v3 = vadd.f32 %v1069_v9, %v1744_v51  ;;  %v694_v15 = vpop.f32.mrb[11].mxu0 }
 0x22c   :  { %v1785_v25 = vpop.eup %1156  ;;  %1176 = vrcp.f32 %v773_v33  ;;  %v1020_v11 = vmul.f32 -1.442695, %v692_v18  ;;  %v695_v54 = vadd.f32 %v1744_v51, %v694_v15  ;;  %v525_v18 = vmul.f32 %v1763_v35, %v1679_v31 }
 0x22d   :  { %v1794_v38 = vpop.eup %1158  ;;  %1178 = vrcp.f32 %v771_v2  ;;  %v1023_v16 = vmul.f32 -1.442695, %v703_v3  ;;  %v499_v3 = vadd.f32 1e-05, %v483_v58  ;;  %v529_v52 = vmul.f32 %v1785_v25, %v1707_v14 }
 0x22e   :  { %v1798_v7 = vpop.eup %1160  ;;  %1180 = vpow2.f32 %v1022_v12  ;;  %v1021_v55 = vmul.f32 -1.442695, %v695_v54  ;;  %v523_v12 = vmul.f32 %v1757_v8, %v1661_v10  ;;  %v547_v10 = vmul.f32 %v1774_v19, %v525_v18 }
 0x22f   :  { %v1163_v57 = vpop.eup %1162  ;;  %1182 = vpow2.f32 %v1020_v11 }
 0x230   :  { %v1165_v42 = vpop.eup %1164  ;;  %v776_v0 = vadd.f32 1.0, %v1163_v57  ;;  %1184 = vpow2.f32 %v1023_v16  ;;  %v1072_v50 = vpop.f32.mrb[12].mxu0 }
 0x231   :  { %v1167_v34 = vpop.eup %1166  ;;  %v774_v44 = vadd.f32 1.0, %v1165_v42  ;;  %1186 = vpow2.f32 %v1021_v55  ;;  %v716_v60 = vadd.f32 %v1072_v50, %v1744_v51  ;;  %v707_v37 = vpop.f32.mrb[13].mxu0 }
 0x232   :  { %v1169_v21 = vpop.eup %1168  ;;  %1188 = vrcp.f32 %v776_v0  ;;  %v777_v59 = vadd.f32 1.0, %v1167_v34  ;;  %v708_v24 = vadd.f32 %v1744_v51, %v707_v37  ;;  %v1073_v39 = vpop.f32.mrb[14].mxu0  ;;  %v545_v0 = vmul.f32 %v1774_v19, %v523_v12 }
 0x233   :  { %v1809_v62 = vpop.eup %1170  ;;  %1190 = vrcp.f32 %v774_v44  ;;  %v775_v47 = vadd.f32 1.0, %v1169_v21  ;;  %v1026_v53 = vmul.f32 -1.442695, %v716_v60  ;;  %v719_v30 = vadd.f32 %v1073_v39, %v1744_v51  ;;  %v710_v4 = vpop.f32.mrb[15].mxu0 }
 0x234   :  { %v1173_v5 = vpop.eup %1172  ;;  %1192 = vrcp.f32 %v777_v59  ;;  %v1024_v45 = vmul.f32 -1.442695, %v708_v24  ;;  %v711_v61 = vadd.f32 %v1744_v51, %v710_v4  ;;  %v544_v51 = vmul.f32 %v1774_v19, %v522_v48 }
 0x235   :  { %v1175_v33 = vpop.eup %1174  ;;  %1194 = vrcp.f32 %v775_v47  ;;  %v1027_v9 = vmul.f32 -1.442695, %v719_v30  ;;  %v820_v17 = vmul.f32 %v1173_v5, %v564_v46  ;;  %v528_v34 = vmul.f32 %v1782_v26, %v1697_v36 }
 0x236   :  { %v1177_v2 = vpop.eup %1176  ;;  %1196 = vpow2.f32 %v1026_v53  ;;  %v1025_v15 = vmul.f32 -1.442695, %v711_v61  ;;  %v818_v31 = vmul.f32 %v1175_v33, %v562_v43  ;;  %v568_v44 = vadd.f32 %v1791_v32, %v546_v20 }
 0x237   :  { %v1179_v63 = vpop.eup %1178  ;;  %1198 = vpow2.f32 %v1024_v45  ;;  %v821_v11 = vmul.f32 %v1177_v2, %v565_v28  ;;  %v569_v60 = vadd.f32 %v1791_v32, %v547_v10  ;;  %v566_v21 = vadd.f32 %v1791_v32, %v544_v51 }
 0x238   :  { %v1181_v54 = vpop.eup %1180  ;;  %1200 = vpow2.f32 %v1027_v9  ;;  %v819_v35 = vmul.f32 %v1179_v63, %v563_v41  ;;  %v567_v58 = vadd.f32 %v1791_v32, %v545_v0  ;;  %v526_v36 = vmul.f32 %v1766_v13, %v1682_v23 }
 0x239   :  { %v1183_v56 = vpop.eup %1182  ;;  %v780_v16 = vadd.f32 1.0, %v1181_v54  ;;  %1202 = vpow2.f32 %v1025_v15  ;;  %v835_v55 = vpack.c.bf16 %v821_v11, %v820_v17  ;;  %v527_v26 = vmul.f32 %v1769_v29, %v1694_v40 }
 0x23a   :  { %v1185_v8 = vpop.eup %1184  ;;  %1204 = vrsqrt.f32 %v499_v3  ;;  %v778_v57 = vadd.f32 1.0, %v1183_v56  ;;  %v834_v42 = vpack.c.bf16 %v819_v35, %v818_v31  ;;  %v550_v25 = vmul.f32 %v1774_v19, %v528_v34 }
 0x23b   :  { %v1187_v50 = vpop.eup %1186  ;;  %1206 = vrcp.f32 %v780_v16  ;;  %v781_v48 = vadd.f32 1.0, %v1185_v8  ;;  %v551_v33 = vmul.f32 %v1774_v19, %v529_v52  ;;  %v548_v40 = vmul.f32 %v1774_v19, %v526_v36 }
 0x23c   :  { %v1189_v46 = vpop.eup %1188  ;;  %1208 = vrcp.f32 %v778_v57  ;;  %v779_v43 = vadd.f32 1.0, %v1187_v50  ;;  %1076 = vmatprep.mubr.msk.bf16.mxu1 %vm54_vm0, %v834_v42  ;;  %v549_v13 = vmul.f32 %v1774_v19, %v527_v26  ;;  %v572_v2 = vadd.f32 %v1791_v32, %v550_v25 }
 0x23d   :  { %v1191_v41 = vpop.eup %1190  ;;  %1210 = vrcp.f32 %v781_v48  ;;  %1077 = vmatmul.mubr.msk.bf16.vlgmr.msra.gmra.mrb[0].mxu1 %vm54_vm0, %v835_v55  ;;  %v824_v24 = vmul.f32 %v1189_v46, %v568_v44  ;;  %v532_v3 = vmul.f32 %v1798_v7, %v1722_v22  ;;  %v533_v15 = vmul.f32 %v1809_v62, %v1731_v27 }
 0x23e   :  { %v1193_v37 = vpop.eup %1192  ;;  %1212 = vrcp.f32 %v779_v43  ;;  %v822_v53 = vmul.f32 %v1191_v41, %v566_v21  ;;  %v573_v63 = vadd.f32 %v1791_v32, %v551_v33  ;;  %v530_v11 = vmul.f32 %v1794_v38, %v1710_v49 }
 0x23f   :  { %v1195_v59 = vpop.eup %1194  ;;  %v825_v39 = vmul.f32 %v1193_v37, %v569_v60  ;;  %v570_v54 = vadd.f32 %v1791_v32, %v548_v40  ;;  %v571_v31 = vadd.f32 %v1791_v32, %v549_v13  ;;  %v554_v27 = vmul.f32 %v1774_v19, %v532_v3  ;;  %v1028_v60 = vld [vmem:[%s1943_s9] ss:$0 sm:$0xff] }
 0x240   :  { %v1197_v47 = vpop.eup %1196  ;;  %v823_v30 = vmul.f32 %v1195_v59, %v567_v58  ;;  %v555_v62 = vmul.f32 %v1774_v19, %v533_v15  ;;  %v552_v10 = vmul.f32 %v1774_v19, %v530_v11 }
 0x241   :  { %v1199_v4 = vpop.eup %1198  ;;  %v784_v5 = vadd.f32 1.0, %v1197_v47  ;;  %v837_v14 = vpack.c.bf16 %v825_v39, %v824_v24  ;;  %v576_v8 = vadd.f32 %v1791_v32, %v554_v27 }
 0x242   :  { %v1201_v6 = vpop.eup %1200  ;;  %v782_v45 = vadd.f32 1.0, %v1199_v4  ;;  %v836_v61 = vpack.c.bf16 %v823_v30, %v822_v53  ;;  %v577_v57 = vadd.f32 %v1791_v32, %v555_v62  ;;  %v574_v0 = vadd.f32 %v1791_v32, %v552_v10 }
 0x243   :  { %v1203_v18 = vpop.eup %1202  ;;  %1214 = vrcp.f32 %v784_v5  ;;  %v785_v23 = vadd.f32 1.0, %v1201_v6 }
 0x244   :  { %v1205_v29 = vpop.eup %1204  ;;  %1216 = vrcp.f32 %v782_v45  ;;  %v783_v9 = vadd.f32 1.0, %v1203_v18  ;;  %1080 = vmatprep.mubr.msk.bf16.mxu1 %vm54_vm0, %v836_v61 }
 0x245   :  { %v1207_v28 = vpop.eup %1206  ;;  %1218 = vrcp.f32 %v785_v23  ;;  %1081 = vmatmul.mubr.msk.bf16.gmra.mrb[4].mxu1 %vm54_vm0, %v837_v14  ;;  %v531_v51 = vmul.f32 %v1205_v29, %v1719_v1 }
 0x246   :  { %v1209_v12 = vpop.eup %1208  ;;  %1220 = vrcp.f32 %v783_v9  ;;  %v828_v20 = vmul.f32 %v1207_v28, %v572_v2 }
 0x247   :  { %v1211_v17 = vpop.eup %1210  ;;  %v826_v22 = vmul.f32 %v1209_v12, %v570_v54  ;;  %v553_v49 = vmul.f32 %v1774_v19, %v531_v51 }
 0x248   :  { %v1213_v35 = vpop.eup %1212  ;;  %v829_v56 = vmul.f32 %v1211_v17, %v573_v63 }
 0x249   :  { %v827_v7 = vmul.f32 %v1213_v35, %v571_v31  ;;  %v575_v50 = vadd.f32 %v1791_v32, %v553_v49 }
 0x24a   :  { %v839_v16 = vpack.c.bf16 %v829_v56, %v828_v20 }
 0x24b   :  { %v838_v55 = vpack.c.bf16 %v827_v7, %v826_v22 }
 0x24d   :  { %v1215_v1 = vpop.eup %1214  ;;  %1084 = vmatprep.mubr.msk.bf16.mxu1 %vm54_vm0, %v838_v55 }
 0x24e   :  { %v1217_v38 = vpop.eup %1216  ;;  %1085 = vmatmul.mubr.msk.bf16.gmra.mrb[8].mxu1 %vm54_vm0, %v839_v16  ;;  %v832_v46 = vmul.f32 %v1215_v1, %v576_v8 }
 0x24f   :  { %v1219_v42 = vpop.eup %1218  ;;  %v830_v41 = vmul.f32 %v1217_v38, %v574_v0 }
 0x250   :  { %v1221_v48 = vpop.eup %1220  ;;  %v833_v43 = vmul.f32 %v1219_v42, %v577_v57 }
 0x251   :  { %v831_v19 = vmul.f32 %v1221_v48, %v575_v50 }
 0x252   :  { %v841_v34 = vpack.c.bf16 %v833_v43, %v832_v46 }
 0x253   :  { %v840_v44 = vpack.c.bf16 %v831_v19, %v830_v41 }
 0x255   :  { %1088 = vmatprep.mubr.msk.bf16.mxu1 %vm54_vm0, %v840_v44 }
 0x256   :  { %1089 = vmatmul.mubr.msk.bf16.gmra.mrb[12].mxu1 %vm54_vm0, %v841_v34 }
 0x310   :  { %v1078_v37 = vpop.f32.mrb[0].mxu1 }
 0x311   :  { %v924_v52 = vadd.f32 %v1078_v37, %v1028_v60  ;;  %v915_v21 = vpop.f32.mrb[1].mxu1 }
 0x312   :  { %v916_v58 = vadd.f32 %v1028_v60, %v915_v21  ;;  %v1079_v32 = vpop.f32.mrb[2].mxu1 }
 0x313   :  { %980 = vst.msk [vmem:[%s1944_s10 + $0x10] sm:$0xff] %vm54_vm0, %v924_v52  ;;  %v927_v59 = vadd.f32 %v1079_v32, %v1028_v60  ;;  %v918_v36 = vpop.f32.mrb[3].mxu1 }
 0x314   :  { %978 = vst.msk [vmem:[%s1944_s10] sm:$0xff] %vm54_vm0, %v916_v58  ;;  %v919_v26 = vadd.f32 %v1028_v60, %v918_v36 }
 0x315   :  { %981 = vst.msk [vmem:[%s1944_s10 + $0x18] sm:$0xff] %vm54_vm0, %v927_v59 }
 0x316   :  { %979 = vst.msk [vmem:[%s1944_s10 + $0x8] sm:$0xff] %vm54_vm0, %v919_v26 }
 0x318   :  { %v1082_v24 = vpop.f32.mrb[4].mxu1 }
 0x319   :  { %v940_v39 = vadd.f32 %v1082_v24, %v1028_v60  ;;  %v931_v47 = vpop.f32.mrb[5].mxu1 }
 0x31a   :  { %v932_v53 = vadd.f32 %v1028_v60, %v931_v47  ;;  %v1083_v30 = vpop.f32.mrb[6].mxu1 }
 0x31b   :  { %984 = vst.msk [vmem:[%s1944_s10 + $0x30] sm:$0xff] %vm54_vm0, %v940_v39  ;;  %v943_v4 = vadd.f32 %v1083_v30, %v1028_v60  ;;  %v934_v5 = vpop.f32.mrb[7].mxu1 }
 0x31c   :  { %982 = vst.msk [vmem:[%s1944_s10 + $0x20] sm:$0xff] %vm54_vm0, %v932_v53  ;;  %v935_v14 = vadd.f32 %v1028_v60, %v934_v5 }
 0x31d   :  { %985 = vst.msk [vmem:[%s1944_s10 + $0x38] sm:$0xff] %vm54_vm0, %v943_v4 }
 0x31e   :  { %983 = vst.msk [vmem:[%s1944_s10 + $0x28] sm:$0xff] %vm54_vm0, %v935_v14 }
 0x321   :  { %v1086_v25 = vpop.f32.mrb[8].mxu1 }
 0x322   :  { %v956_v6 = vadd.f32 %v1086_v25, %v1028_v60  ;;  %v947_v45 = vpop.f32.mrb[9].mxu1 }
 0x323   :  { %v948_v61 = vadd.f32 %v1028_v60, %v947_v45  ;;  %v1087_v33 = vpop.f32.mrb[10].mxu1 }
 0x324   :  { %988 = vst.msk [vmem:[%s1944_s10 + $0x50] sm:$0xff] %vm54_vm0, %v956_v6  ;;  %v959_v18 = vadd.f32 %v1087_v33, %v1028_v60  ;;  %v950_v23 = vpop.f32.mrb[11].mxu1 }
 0x325   :  { %986 = vst.msk [vmem:[%s1944_s10 + $0x40] sm:$0xff] %vm54_vm0, %v948_v61  ;;  %v951_v40 = vadd.f32 %v1028_v60, %v950_v23 }
 0x326   :  { %989 = vst.msk [vmem:[%s1944_s10 + $0x58] sm:$0xff] %vm54_vm0, %v959_v18 }
 0x327   :  { %987 = vst.msk [vmem:[%s1944_s10 + $0x48] sm:$0xff] %vm54_vm0, %v951_v40 }
 0x329   :  { %v1090_v13 = vpop.f32.mrb[12].mxu1 }
 0x32a   :  { %v972_v29 = vadd.f32 %v1090_v13, %v1028_v60  ;;  %v963_v9 = vpop.f32.mrb[13].mxu1 }
 0x32b   :  { %v964_v28 = vadd.f32 %v1028_v60, %v963_v9  ;;  %v1091_v2 = vpop.f32.mrb[14].mxu1 }
 0x32c   :  { %992 = vst.msk [vmem:[%s1944_s10 + $0x70] sm:$0xff] %vm54_vm0, %v972_v29  ;;  %v975_v12 = vadd.f32 %v1091_v2, %v1028_v60  ;;  %v966_v3 = vpop.f32.mrb[15].mxu1 }
 0x32d   :  { %990 = vst.msk [vmem:[%s1944_s10 + $0x60] sm:$0xff] %vm54_vm0, %v964_v28  ;;  %v967_v15 = vadd.f32 %v1028_v60, %v966_v3 }
 0x32e   :  { %993 = vst.msk [vmem:[%s1944_s10 + $0x78] sm:$0xff] %vm54_vm0, %v975_v12 }
 0x32f   :  { %991 = vst.msk [vmem:[%s1944_s10 + $0x68] sm:$0xff] %vm54_vm0, %v967_v15 }

// kernel: pairwise_attention_block.24
= control target key start
LH: loop header
LB: loop body
LE: loop exit
PB: predicated region body
PF: predicated region fallthrough
CT: control target
= control target key end

     0   :  { %vm51_vm0 = vcmask 130048   ;;  %vm793_vm1 = vcmask 15360   ;;  %vm559_vm2 = vcmask 388096   ;;  %s1557_s0 = inlined_call_operand.vmem [shape: f32[128,16], index: 0, kind: input, shape index: {}]   ;;  %s1558_s5 = inlined_call_operand.vmem [shape: bf16[16,64], index: 5, kind: input, shape index: {}]   ;;  %s1559_s7 = inlined_call_operand.vmem [shape: bf16[16,2], index: 7, kind: input, shape index: {}]   ;;  %s1560_s1 = inlined_call_operand.vmem [shape: f32[1,16], index: 1, kind: input, shape index: {}]   ;;  %s1561_s3 = inlined_call_operand.vmem [shape: f32[1,16], index: 3, kind: input, shape index: {}]   ;;  %s1562_s2 = inlined_call_operand.vmem [shape: f32[1,16], index: 2, kind: input, shape index: {}]   ;;  %s1563_s4 = inlined_call_operand.vmem [shape: f32[1,16], index: 4, kind: input, shape index: {}]   ;;  %s1564_s6 = inlined_call_operand.vmem [shape: f32[1,64], index: 6, kind: input, shape index: {}]   ;;  %s1565_s10 = inlined_call_operand.vmem [shape: f32[128,2], index: 10, kind: output, shape index: {2}]   ;;  %s1566_s8 = inlined_call_operand.vmem [shape: bf16[128,48], index: 8, kind: output, shape index: {0}]   ;;  %s1567_s9 = inlined_call_operand.vmem [shape: f32[128,16], index: 9, kind: output, shape index: {1}]  }
   0x1   :  { %v33_v0 = vld [vmem:[%s1557_s0] sm:$0xff]  ;;  %v35_v1 = vld [vmem:[%s1557_s0 + $0x10] sm:$0xff]  ;;  %v34_v2 = vld [vmem:[%s1557_s0 + $0x8] sm:$0xff] }
   0x2   :  { %v52_v3 = vsel %vm51_vm0, %v33_v0, 0.0  ;;  %v58_v4 = vsel %vm51_vm0, %v35_v1, 0.0  ;;  %v36_v5 = vld [vmem:[%s1557_s0 + $0x18] sm:$0xff]  ;;  %v55_v6 = vsel %vm51_vm0, %v34_v2, 0.0  ;;  %v37_v8 = vld [vmem:[%s1557_s0 + $0x20] sm:$0xff]  ;;  %v38_v9 = vld [vmem:[%s1557_s0 + $0x28] sm:$0xff] }
   0x3   :  { %53 = vadd.xlane.f32.xlu0 %v52_v3  ;;  %59 = vadd.xlane.f32.xlu1 %v58_v4  ;;  %v61_v7 = vsel %vm51_vm0, %v36_v5, 0.0  ;;  %v64_v10 = vsel %vm51_vm0, %v37_v8, 0.0  ;;  %v67_v11 = vsel %vm51_vm0, %v38_v9, 0.0  ;;  %v1049_v12 = vld [vmem:[%s1557_s0 + $0x30] sm:$0xff]  ;;  %v1054_v13 = vld [vmem:[%s1557_s0 + $0x38] sm:$0xff]  ;;  %v1063_v16 = vld [vmem:[%s1557_s0 + $0x40] sm:$0xff] }
   0x4   :  { %v70_v14 = vsel %vm51_vm0, %v1049_v12, 0.0  ;;  %v73_v15 = vsel %vm51_vm0, %v1054_v13, 0.0  ;;  %v1068_v17 = vld [vmem:[%s1557_s0 + $0x48] sm:$0xff]  ;;  %v76_v18 = vsel %vm51_vm0, %v1063_v16, 0.0  ;;  %v1077_v20 = vld [vmem:[%s1557_s0 + $0x50] sm:$0xff]  ;;  %v1082_v21 = vld [vmem:[%s1557_s0 + $0x58] sm:$0xff] }
   0x5   :  { %v79_v19 = vsel %vm51_vm0, %v1068_v17, 0.0  ;;  %v82_v22 = vsel %vm51_vm0, %v1077_v20, 0.0  ;;  %v85_v23 = vsel %vm51_vm0, %v1082_v21, 0.0  ;;  %v1091_v24 = vld [vmem:[%s1557_s0 + $0x60] sm:$0xff]  ;;  %v1096_v25 = vld [vmem:[%s1557_s0 + $0x68] sm:$0xff]  ;;  %v1105_v28 = vld [vmem:[%s1557_s0 + $0x70] sm:$0xff] }
   0x6   :  { %v88_v26 = vsel %vm51_vm0, %v1091_v24, 0.0  ;;  %v91_v27 = vsel %vm51_vm0, %v1096_v25, 0.0  ;;  %v1110_v29 = vld [vmem:[%s1557_s0 + $0x78] sm:$0xff]  ;;  %v94_v30 = vsel %vm51_vm0, %v1105_v28, 0.0 }
   0x7   :  { %56 = vadd.xlane.f32.xlu0 %v55_v6  ;;  %62 = vadd.xlane.f32.xlu1 %v61_v7  ;;  %v97_v31 = vsel %vm51_vm0, %v1110_v29, 0.0 }
   0xb   :  { %65 = vadd.xlane.f32.xlu0 %v64_v10  ;;  %68 = vadd.xlane.f32.xlu1 %v67_v11 }
   0xf   :  { %71 = vadd.xlane.f32.xlu0 %v70_v14  ;;  %74 = vadd.xlane.f32.xlu1 %v73_v15 }
  0x13   :  { %77 = vadd.xlane.f32.xlu0 %v76_v18  ;;  %80 = vadd.xlane.f32.xlu1 %v79_v19 }
  0x17   :  { %83 = vadd.xlane.f32.xlu0 %v82_v22  ;;  %86 = vadd.xlane.f32.xlu1 %v85_v23 }
  0x1b   :  { %89 = vadd.xlane.f32.xlu0 %v88_v26  ;;  %92 = vadd.xlane.f32.xlu1 %v91_v27 }
  0x1f   :  { %95 = vadd.xlane.f32.xlu0 %v94_v30  ;;  %98 = vadd.xlane.f32.xlu1 %v97_v31 }
  0x90   :  { %v54_v32 = vpop.xlane.xlu0 %53  ;;  %v60_v33 = vpop.xlane.xlu1 %59 }
  0x91   :  { %v101_v34 = vmul.f32 0.0625, %v54_v32  ;;  %v103_v35 = vmul.f32 0.0625, %v60_v33 }
  0x93   :  { %v1116_v36 = vsub.f32 %v33_v0, %v101_v34  ;;  %v1118_v37 = vsub.f32 %v35_v1, %v103_v35 }
  0x94   :  { %v57_v38 = vpop.xlane.xlu0 %56  ;;  %v63_v39 = vpop.xlane.xlu1 %62 }
  0x95   :  { %v102_v40 = vmul.f32 0.0625, %v57_v38  ;;  %v104_v41 = vmul.f32 0.0625, %v63_v39  ;;  %v133_v42 = vmul.f32 %v1116_v36, %v1116_v36  ;;  %v135_v43 = vmul.f32 %v1118_v37, %v1118_v37 }
  0x97   :  { %v1124_v44 = vsub.f32 %v34_v2, %v102_v40  ;;  %v1126_v45 = vsub.f32 %v36_v5, %v104_v41  ;;  %v149_v46 = vsel %vm51_vm0, %v133_v42, 0.0  ;;  %v155_v49 = vsel %vm51_vm0, %v135_v43, 0.0 }
  0x98   :  { %150 = vadd.xlane.f32.xlu0 %v149_v46  ;;  %v66_v47 = vpop.xlane.xlu0 %65  ;;  %v69_v48 = vpop.xlane.xlu1 %68 }
  0x99   :  { %v105_v50 = vmul.f32 0.0625, %v66_v47  ;;  %v106_v51 = vmul.f32 0.0625, %v69_v48  ;;  %v134_v52 = vmul.f32 %v1124_v44, %v1124_v44  ;;  %v136_v53 = vmul.f32 %v1126_v45, %v1126_v45 }
  0x9b   :  { %v1134_v54 = vsub.f32 %v37_v8, %v105_v50  ;;  %v1136_v55 = vsub.f32 %v38_v9, %v106_v51  ;;  %v152_v56 = vsel %vm51_vm0, %v134_v52, 0.0  ;;  %v158_v59 = vsel %vm51_vm0, %v136_v53, 0.0  ;;  %v933_v53 = vld [vmem:[%s1559_s7] sm:$0xff]  }
  0x9c   :  { %156 = vadd.xlane.f32.xlu0 %v155_v49  ;;  %153 = vadd.xlane.f32.xlu1 %v152_v56  ;;  %v72_v57 = vpop.xlane.xlu0 %71  ;;  %v75_v58 = vpop.xlane.xlu1 %74 }
  0x9d   :  { %v107_v60 = vmul.f32 0.0625, %v72_v57  ;;  %v108_v61 = vmul.f32 0.0625, %v75_v58  ;;  %v137_v62 = vmul.f32 %v1134_v54, %v1134_v54  ;;  %v138_v63 = vmul.f32 %v1136_v55, %v1136_v55  ;;  %913 = vmatprep.subr.bf16.mxu1 %v933_v53 }
  0x9e   :  { %914 = vmatpush3.bf16.msra.mxu1 %v933_v53 }
  0x9f   :  { %v1145_v0 = vsub.f32 %v1049_v12, %v107_v60  ;;  %v1148_v1 = vsub.f32 %v1054_v13, %v108_v61  ;;  %v161_v2 = vsel %vm51_vm0, %v137_v62, 0.0  ;;  %v164_v5 = vsel %vm51_vm0, %v138_v63, 0.0 }
  0xa0   :  { %159 = vadd.xlane.f32.xlu1 %v158_v59  ;;  %162 = vadd.xlane.f32.xlu0 %v161_v2  ;;  %v78_v3 = vpop.xlane.xlu0 %77  ;;  %v81_v4 = vpop.xlane.xlu1 %80 }
  0xa1   :  { %v109_v6 = vmul.f32 0.0625, %v78_v3  ;;  %v110_v7 = vmul.f32 0.0625, %v81_v4  ;;  %v139_v8 = vmul.f32 %v1145_v0, %v1145_v0  ;;  %v140_v9 = vmul.f32 %v1148_v1, %v1148_v1 }
  0xa3   :  { %v1157_v10 = vsub.f32 %v1063_v16, %v109_v6  ;;  %v1160_v11 = vsub.f32 %v1068_v17, %v110_v7  ;;  %v167_v12 = vsel %vm51_vm0, %v139_v8, 0.0  ;;  %v170_v15 = vsel %vm51_vm0, %v140_v9, 0.0 }
  0xa4   :  { %165 = vadd.xlane.f32.xlu1 %v164_v5  ;;  %168 = vadd.xlane.f32.xlu0 %v167_v12  ;;  %v84_v13 = vpop.xlane.xlu0 %83  ;;  %v87_v14 = vpop.xlane.xlu1 %86 }
  0xa5   :  { %v111_v18 = vmul.f32 0.0625, %v84_v13  ;;  %v112_v19 = vmul.f32 0.0625, %v87_v14  ;;  %v141_v22 = vmul.f32 %v1157_v10, %v1157_v10  ;;  %v142_v16 = vmul.f32 %v1160_v11, %v1160_v11 }
  0xa7   :  { %v1169_v23 = vsub.f32 %v1077_v20, %v111_v18  ;;  %v1172_v17 = vsub.f32 %v1082_v21, %v112_v19  ;;  %v173_v26 = vsel %vm51_vm0, %v141_v22, 0.0  ;;  %v176_v31 = vsel %vm51_vm0, %v142_v16, 0.0  ;;  %v1215_v22 = vld [vmem:[%s1560_s1] ss:$0 sm:$0xff] }
  0xa8   :  { %171 = vadd.xlane.f32.xlu1 %v170_v15  ;;  %174 = vadd.xlane.f32.xlu0 %v173_v26  ;;  %v90_v27 = vpop.xlane.xlu0 %89  ;;  %v93_v30 = vpop.xlane.xlu1 %92 }
  0xa9   :  { %v113_v32 = vmul.f32 0.0625, %v90_v27  ;;  %v114_v33 = vmul.f32 0.0625, %v93_v30  ;;  %v143_v34 = vmul.f32 %v1169_v23, %v1169_v23  ;;  %v144_v20 = vmul.f32 %v1172_v17, %v1172_v17  ;;  %v1221_v30 = vld [vmem:[%s1561_s3] ss:$0 sm:$0xff] }
  0xab   :  { %v1181_v35 = vsub.f32 %v1091_v24, %v113_v32  ;;  %v1184_v21 = vsub.f32 %v1096_v25, %v114_v33  ;;  %v179_v38 = vsel %vm51_vm0, %v143_v34, 0.0  ;;  %v182_v41 = vsel %vm51_vm0, %v144_v20, 0.0 }
  0xac   :  { %177 = vadd.xlane.f32.xlu1 %v176_v31  ;;  %180 = vadd.xlane.f32.xlu0 %v179_v38  ;;  %v96_v39 = vpop.xlane.xlu0 %95  ;;  %v99_v40 = vpop.xlane.xlu1 %98 }
  0xad   :  { %v115_v42 = vmul.f32 0.0625, %v96_v39  ;;  %v116_v43 = vmul.f32 0.0625, %v99_v40  ;;  %v145_v46 = vmul.f32 %v1181_v35, %v1181_v35  ;;  %v146_v24 = vmul.f32 %v1184_v21, %v1184_v21  ;;  %v1227_v39 = vld [vmem:[%s1562_s2] ss:$0 sm:$0xff] }
  0xaf   :  { %v1193_v47 = vsub.f32 %v1105_v28, %v115_v42  ;;  %v1196_v25 = vsub.f32 %v1110_v29, %v116_v43  ;;  %v185_v48 = vsel %vm51_vm0, %v145_v46, 0.0  ;;  %v188_v49 = vsel %vm51_vm0, %v146_v24, 0.0  ;;  %v932_v29 = vld [vmem:[%s1558_s5] sm:$0xff]  }
  0xb0   :  { %183 = vadd.xlane.f32.xlu1 %v182_v41  ;;  %186 = vadd.xlane.f32.xlu0 %v185_v48  ;;  %v1234_v46 = vld [vmem:[%s1563_s4] ss:$0 sm:$0xff] }
  0xb1   :  { %v147_v50 = vmul.f32 %v1193_v47, %v1193_v47  ;;  %v148_v51 = vmul.f32 %v1196_v25, %v1196_v25  ;;  %895 = vmatprep.subr.bf16.mxu0 %v932_v29 }
  0xb2   :  { %896 = vmatpush3.bf16.msra.mxu0 %v932_v29 }
  0xb3   :  { %v191_v52 = vsel %vm51_vm0, %v147_v50, 0.0  ;;  %v194_v28 = vsel %vm51_vm0, %v148_v51, 0.0 }
  0xb4   :  { %189 = vadd.xlane.f32.xlu1 %v188_v49  ;;  %192 = vadd.xlane.f32.xlu0 %v191_v52 }
  0xb8   :  { %195 = vadd.xlane.f32.xlu1 %v194_v28 }
 0x125   :  { %v151_v56 = vpop.xlane.xlu0 %150 }
 0x126   :  { %v197_v57 = vmul.f32 0.0625, %v151_v56 }
 0x128   :  { %v213_v58 = vadd.f32 1e-05, %v197_v57 }
 0x129   :  { %v154_v59 = vpop.xlane.xlu1 %153  ;;  %v157_v60 = vpop.xlane.xlu0 %156 }
 0x12a   :  { %934 = vrsqrt.f32 %v213_v58  ;;  %v198_v61 = vmul.f32 0.0625, %v154_v59  ;;  %v199_v62 = vmul.f32 0.0625, %v157_v60 }
 0x12c   :  { %v214_v63 = vadd.f32 1e-05, %v198_v61  ;;  %v215_v2 = vadd.f32 1e-05, %v199_v62 }
 0x12d   :  { %v160_v3 = vpop.xlane.xlu1 %159  ;;  %v163_v4 = vpop.xlane.xlu0 %162 }
 0x12e   :  { %936 = vrsqrt.f32 %v214_v63  ;;  %v200_v5 = vmul.f32 0.0625, %v160_v3  ;;  %v201_v6 = vmul.f32 0.0625, %v163_v4 }
 0x12f   :  { %938 = vrsqrt.f32 %v215_v2 }
 0x130   :  { %v216_v7 = vadd.f32 1e-05, %v200_v5  ;;  %v217_v8 = vadd.f32 1e-05, %v201_v6 }
 0x131   :  { %v166_v9 = vpop.xlane.xlu1 %165  ;;  %v169_v12 = vpop.xlane.xlu0 %168 }
 0x132   :  { %940 = vrsqrt.f32 %v216_v7  ;;  %v202_v13 = vmul.f32 0.0625, %v166_v9  ;;  %v203_v14 = vmul.f32 0.0625, %v169_v12 }
 0x133   :  { %942 = vrsqrt.f32 %v217_v8 }
 0x134   :  { %v935_v15 = vpop.eup %934  ;;  %v218_v18 = vadd.f32 1e-05, %v202_v13  ;;  %v219_v19 = vadd.f32 1e-05, %v203_v14 }
 0x135   :  { %v172_v16 = vpop.xlane.xlu1 %171  ;;  %v175_v26 = vpop.xlane.xlu0 %174  ;;  %v245_v27 = vmul.f32 %v935_v15, %v1116_v36 }
 0x136   :  { %944 = vrsqrt.f32 %v218_v18  ;;  %v204_v31 = vmul.f32 0.0625, %v172_v16  ;;  %v205_v32 = vmul.f32 0.0625, %v175_v26 }
 0x137   :  { %946 = vrsqrt.f32 %v219_v19  ;;  %v267_v33 = vmul.f32 %v1215_v22, %v245_v27  ;;  %v313_v36 = vmul.f32 %v1221_v30, %v245_v27 }
 0x138   :  { %v937_v34 = vpop.eup %936  ;;  %v220_v20 = vadd.f32 1e-05, %v204_v31  ;;  %v221_v38 = vadd.f32 1e-05, %v205_v32 }
 0x139   :  { %v939_v40 = vpop.eup %938  ;;  %v178_v41 = vpop.xlane.xlu1 %177  ;;  %v246_v43 = vmul.f32 %v937_v34, %v1124_v44  ;;  %v289_v51 = vadd.f32 %v1227_v39, %v267_v33  ;;  %v335_v53 = vadd.f32 %v1234_v46, %v313_v36 }
 0x13a   :  { %v181_v42 = vpop.xlane.xlu0 %180  ;;  %v247_v24 = vmul.f32 %v939_v40, %v1118_v37  ;;  %948 = vrsqrt.f32 %v220_v20  ;;  %v206_v48 = vmul.f32 0.0625, %v178_v41 }
 0x13b   :  { %v207_v49 = vmul.f32 0.0625, %v181_v42  ;;  %950 = vrsqrt.f32 %v221_v38  ;;  %v268_v50 = vmul.f32 %v1215_v22, %v246_v43  ;;  %v314_v52 = vmul.f32 %v1221_v30, %v246_v43 }
 0x13c   :  { %v941_v28 = vpop.eup %940  ;;  %v222_v29 = vadd.f32 1e-05, %v206_v48  ;;  %v269_v56 = vmul.f32 %v1215_v22, %v247_v24  ;;  %v315_v62 = vmul.f32 %v1221_v30, %v247_v24 }
 0x13d   :  { %v223_v44 = vadd.f32 1e-05, %v207_v49  ;;  %v943_v57 = vpop.eup %942  ;;  %v248_v37 = vmul.f32 %v941_v28, %v1126_v45  ;;  %v184_v58 = vpop.xlane.xlu1 %183  ;;  %v290_v60 = vadd.f32 %v1227_v39, %v268_v50  ;;  %v336_v61 = vadd.f32 %v1234_v46, %v314_v52 }
 0x13e   :  { %v187_v59 = vpop.xlane.xlu0 %186  ;;  %v249_v63 = vmul.f32 %v943_v57, %v1134_v54  ;;  %952 = vrsqrt.f32 %v222_v29  ;;  %v208_v2 = vmul.f32 0.0625, %v184_v58  ;;  %v291_v9 = vadd.f32 %v1227_v39, %v269_v56 }
 0x13f   :  { %v209_v3 = vmul.f32 0.0625, %v187_v59  ;;  %954 = vrsqrt.f32 %v223_v44  ;;  %v351_v4 = vpack.c.bf16 %v290_v60, %v289_v51  ;;  %v656_v5 = vpack.c.bf16 %v336_v61, %v335_v53 }
 0x140   :  { %v270_v6 = vmul.f32 %v1215_v22, %v248_v37  ;;  %v945_v7 = vpop.eup %944  ;;  %v224_v45 = vadd.f32 1e-05, %v208_v2  ;;  %v316_v12 = vmul.f32 %v1221_v30, %v248_v37  ;;  %v337_v19 = vadd.f32 %v1234_v46, %v315_v62 }
 0x141   :  { %v225_v8 = vadd.f32 1e-05, %v209_v3  ;;  %v947_v13 = vpop.eup %946  ;;  %v250_v14 = vmul.f32 %v945_v7, %v1136_v55  ;;  %v190_v15 = vpop.xlane.xlu1 %189  ;;  %897 = vmatprep.mubr.msk.bf16.mxu0 %vm51_vm0, %v351_v4  ;;  %915 = vmatprep.mubr.msk.bf16.mxu1 %vm51_vm0, %v656_v5  ;;  %v271_v55 = vmul.f32 %v1215_v22, %v249_v63  ;;  %v317_v36 = vmul.f32 %v1221_v30, %v249_v63 }
 0x142   :  { %v193_v54 = vpop.xlane.xlu0 %192  ;;  %v292_v18 = vadd.f32 %v1227_v39, %v270_v6  ;;  %v251_v16 = vmul.f32 %v947_v13, %v1145_v0  ;;  %956 = vrsqrt.f32 %v224_v45  ;;  %v210_v26 = vmul.f32 0.0625, %v190_v15 }
 0x143   :  { %v211_v27 = vmul.f32 0.0625, %v193_v54  ;;  %958 = vrsqrt.f32 %v225_v8  ;;  %v338_v32 = vadd.f32 %v1234_v46, %v316_v12  ;;  %v272_v38 = vmul.f32 %v1215_v22, %v250_v14 }
 0x144   :  { %v352_v31 = vpack.c.bf16 %v292_v18, %v291_v9  ;;  %v949_v33 = vpop.eup %948  ;;  %v226_v34 = vadd.f32 1e-05, %v210_v26  ;;  %v293_v43 = vadd.f32 %v1227_v39, %v271_v55  ;;  %v318_v24 = vmul.f32 %v1221_v30, %v250_v14 }
 0x145   :  { %v227_v20 = vadd.f32 1e-05, %v211_v27  ;;  %v951_v40 = vpop.eup %950  ;;  %v252_v41 = vmul.f32 %v949_v33, %v1148_v1  ;;  %v196_v0 = vpop.xlane.xlu1 %195  ;;  %v657_v42 = vpack.c.bf16 %v338_v32, %v337_v19  ;;  %v294_v50 = vadd.f32 %v1227_v39, %v272_v38 }
 0x146   :  { %898 = vmatmul.mubr.msk.bf16.vlgmr.msra.gmra.mrb[0].mxu0 %vm51_vm0, %v352_v31  ;;  %v253_v48 = vmul.f32 %v951_v40, %v1157_v10  ;;  %960 = vrsqrt.f32 %v226_v34  ;;  %v212_v49 = vmul.f32 0.0625, %v196_v0  ;;  %v339_v51 = vadd.f32 %v1234_v46, %v317_v36 }
 0x147   :  { %962 = vrsqrt.f32 %v227_v20  ;;  %916 = vmatmul.mubr.msk.bf16.vlgmr.msra.gmra.mrb[0].mxu1 %vm51_vm0, %v657_v42  ;;  %v340_v1 = vadd.f32 %v1234_v46, %v318_v24  ;;  %v273_v52 = vmul.f32 %v1215_v22, %v251_v16  ;;  %v353_v44 = vpack.c.bf16 %v294_v50, %v293_v43 }
 0x148   :  { %v953_v28 = vpop.eup %952  ;;  %v228_v29 = vadd.f32 1e-05, %v212_v49  ;;  %v274_v53 = vmul.f32 %v1215_v22, %v252_v41  ;;  %v319_v10 = vmul.f32 %v1221_v30, %v251_v16  ;;  %v320_v59 = vmul.f32 %v1221_v30, %v252_v41 }
 0x149   :  { %v955_v56 = vpop.eup %954  ;;  %v254_v57 = vmul.f32 %v953_v28, %v1160_v11  ;;  %v658_v37 = vpack.c.bf16 %v340_v1, %v339_v51  ;;  %v295_v58 = vadd.f32 %v1227_v39, %v273_v52  ;;  %901 = vmatprep.mubr.msk.bf16.mxu0 %vm51_vm0, %v353_v44  ;;  %v275_v11 = vmul.f32 %v1215_v22, %v253_v48 }
 0x14a   :  { %v255_v60 = vmul.f32 %v955_v56, %v1169_v23  ;;  %964 = vrsqrt.f32 %v228_v29  ;;  %v296_v61 = vadd.f32 %v1227_v39, %v274_v53  ;;  %v341_v62 = vadd.f32 %v1234_v46, %v319_v10 }
 0x14b   :  { %919 = vmatprep.mubr.msk.bf16.mxu1 %vm51_vm0, %v658_v37  ;;  %v342_v63 = vadd.f32 %v1234_v46, %v320_v59  ;;  %v276_v2 = vmul.f32 %v1215_v22, %v254_v57  ;;  %v321_v3 = vmul.f32 %v1221_v30, %v253_v48  ;;  %v322_v23 = vmul.f32 %v1221_v30, %v254_v57 }
 0x14c   :  { %v957_v4 = vpop.eup %956  ;;  %v354_v5 = vpack.c.bf16 %v296_v61, %v295_v58  ;;  %v277_v6 = vmul.f32 %v1215_v22, %v255_v60  ;;  %v323_v7 = vmul.f32 %v1221_v30, %v255_v60  ;;  %v297_v12 = vadd.f32 %v1227_v39, %v275_v11 }
 0x14d   :  { %v959_v45 = vpop.eup %958  ;;  %v256_v8 = vmul.f32 %v957_v4, %v1172_v17  ;;  %v659_v9 = vpack.c.bf16 %v342_v63, %v341_v62  ;;  %v298_v13 = vadd.f32 %v1227_v39, %v276_v2  ;;  %v343_v15 = vadd.f32 %v1234_v46, %v321_v3 }
 0x14e   :  { %v257_v14 = vmul.f32 %v959_v45, %v1181_v35  ;;  %902 = vmatmul.mubr.msk.bf16.gmra.mrb[4].mxu0 %vm51_vm0, %v354_v5  ;;  %v344_v54 = vadd.f32 %v1234_v46, %v322_v23  ;;  %v299_v27 = vadd.f32 %v1227_v39, %v277_v6  ;;  %v345_v34 = vadd.f32 %v1234_v46, %v323_v7 }
 0x14f   :  { %920 = vmatmul.mubr.msk.bf16.gmra.mrb[4].mxu1 %vm51_vm0, %v659_v9  ;;  %v355_v18 = vpack.c.bf16 %v298_v13, %v297_v12  ;;  %v278_v19 = vmul.f32 %v1215_v22, %v256_v8  ;;  %v324_v17 = vmul.f32 %v1221_v30, %v256_v8 }
 0x150   :  { %v961_v16 = vpop.eup %960  ;;  %v660_v26 = vpack.c.bf16 %v344_v54, %v343_v15  ;;  %v279_v31 = vmul.f32 %v1215_v22, %v257_v14  ;;  %v325_v35 = vmul.f32 %v1221_v30, %v257_v14 }
 0x151   :  { %v963_v32 = vpop.eup %962  ;;  %v258_v55 = vmul.f32 %v961_v16, %v1184_v21  ;;  %905 = vmatprep.mubr.msk.bf16.mxu0 %vm51_vm0, %v355_v18  ;;  %v300_v33 = vadd.f32 %v1227_v39, %v278_v19  ;;  %v346_v20 = vadd.f32 %v1234_v46, %v324_v17 }
 0x152   :  { %v259_v38 = vmul.f32 %v963_v32, %v1193_v47  ;;  %923 = vmatprep.mubr.msk.bf16.mxu1 %vm51_vm0, %v660_v26  ;;  %v301_v21 = vadd.f32 %v1227_v39, %v279_v31  ;;  %v347_v43 = vadd.f32 %v1234_v46, %v325_v35 }
 0x153   :  { %v356_v36 = vpack.c.bf16 %v300_v33, %v299_v27  ;;  %v661_v40 = vpack.c.bf16 %v346_v20, %v345_v34  ;;  %v280_v41 = vmul.f32 %v1215_v22, %v258_v55  ;;  %v326_v0 = vmul.f32 %v1221_v30, %v258_v55 }
 0x154   :  { %v965_v42 = vpop.eup %964  ;;  %v281_v24 = vmul.f32 %v1215_v22, %v259_v38  ;;  %v327_v50 = vmul.f32 %v1221_v30, %v259_v38 }
 0x155   :  { %v260_v48 = vmul.f32 %v965_v42, %v1196_v25  ;;  %v302_v49 = vadd.f32 %v1227_v39, %v280_v41  ;;  %v348_v47 = vadd.f32 %v1234_v46, %v326_v0 }
 0x156   :  { %906 = vmatmul.mubr.msk.bf16.gmra.mrb[8].mxu0 %vm51_vm0, %v356_v36  ;;  %v303_v29 = vadd.f32 %v1227_v39, %v281_v24  ;;  %v349_v44 = vadd.f32 %v1234_v46, %v327_v50 }
 0x157   :  { %924 = vmatmul.mubr.msk.bf16.gmra.mrb[8].mxu1 %vm51_vm0, %v661_v40  ;;  %v357_v51 = vpack.c.bf16 %v302_v49, %v301_v21  ;;  %v662_v1 = vpack.c.bf16 %v348_v47, %v347_v43  ;;  %v282_v52 = vmul.f32 %v1215_v22, %v260_v48  ;;  %v328_v28 = vmul.f32 %v1221_v30, %v260_v48  ;;  %v1331_v22 = vld [vmem:[%s1564_s6] ss:$0 sm:$0xff]  ;;  %s966_s6 = smov 80  }
 0x159   :  { %909 = vmatprep.mubr.msk.bf16.mxu0 %vm51_vm0, %v357_v51  ;;  %927 = vmatprep.mubr.msk.bf16.mxu1 %vm51_vm0, %v662_v1  ;;  %v304_v25 = vadd.f32 %v1227_v39, %v282_v52  ;;  %v350_v53 = vadd.f32 %v1234_v46, %v328_v28 }
 0x15b   :  { %v358_v10 = vpack.c.bf16 %v304_v25, %v303_v29  ;;  %v663_v56 = vpack.c.bf16 %v350_v53, %v349_v44 }
 0x15e   :  { %910 = vmatmul.mubr.msk.bf16.gmra.mrb[12].mxu0 %vm51_vm0, %v358_v10 }
 0x15f   :  { %928 = vmatmul.mubr.msk.bf16.gmra.mrb[12].mxu1 %vm51_vm0, %v663_v56 }
 0x219   :  { %v899_v30 = vpop.f32.mrb[0].mxu0 }
 0x21a   :  { %v441_v57 = vadd.f32 %v899_v30, %v1331_v22  ;;  %v432_v39 = vpop.f32.mrb[1].mxu0  ;;  %v917_v37 = vpop.f32.mrb[0].mxu1 }
 0x21b   :  { %v433_v46 = vadd.f32 %v1331_v22, %v432_v39  ;;  %v900_v58 = vpop.f32.mrb[2].mxu0  ;;  %796 = vst.msk [vmem:[%s1565_s10 + $0x10] sm:$0xff] %vm793_vm1, %v917_v37  ;;  %v730_v60 = vpop.f32.mrb[1].mxu1 }
 0x21c   :  { %v863_v59 = vpack.c.bf16 %v441_v57, %v441_v57  ;;  %v444_v61 = vadd.f32 %v900_v58, %v1331_v22  ;;  %596 = vrot.lane.b32.xlu1 %v441_v57, %s966_s6  ;;  %v435_v62 = vpop.f32.mrb[3].mxu0  ;;  %794 = vst.msk [vmem:[%s1565_s10] sm:$0xff] %vm793_vm1, %v730_v60  ;;  %v918_v11 = vpop.f32.mrb[2].mxu1 }
 0x21d   :  { %v861_v63 = vpack.c.bf16 %v433_v46, %v433_v46  ;;  %v436_v2 = vadd.f32 %v1331_v22, %v435_v62  ;;  %592 = vrot.lane.b32.xlu0 %v433_v46, %s966_s6  ;;  %797 = vst.msk [vmem:[%s1565_s10 + $0x18] sm:$0xff] %vm793_vm1, %v918_v11  ;;  %v733_v4 = vpop.f32.mrb[3].mxu1 }
 0x21e   :  { %562 = vst.msk [vmem:[%s1566_s8 + $0x8] sm:$0xf] %vm559_vm2, %v863_v59  ;;  %v864_v3 = vpack.c.bf16 %v444_v61, %v444_v61 }
 0x21f   :  { %560 = vst.msk [vmem:[%s1566_s8] sm:$0xf] %vm559_vm2, %v861_v63  ;;  %v862_v5 = vpack.c.bf16 %v436_v2, %v436_v2 }
 0x220   :  { %795 = vst.msk [vmem:[%s1565_s10 + $0x8] sm:$0xff] %vm793_vm1, %v733_v4  ;;  %598 = vrot.lane.b32.xlu1 %v444_v61, %s966_s6 }
 0x221   :  { %563 = vst.msk [vmem:[%s1566_s8 + $0xc] sm:$0xf] %vm559_vm2, %v864_v3  ;;  %561 = vst.msk [vmem:[%s1566_s8 + $0x4] sm:$0xf] %vm559_vm2, %v862_v5  ;;  %v903_v23 = vpop.f32.mrb[4].mxu0 }
 0x222   :  { %v457_v6 = vadd.f32 %v903_v23, %v1331_v22  ;;  %v921_v7 = vpop.f32.mrb[4].mxu1  ;;  %v448_v45 = vpop.f32.mrb[5].mxu0 }
 0x223   :  { %800 = vst.msk [vmem:[%s1565_s10 + $0x30] sm:$0xff] %vm793_vm1, %v921_v7  ;;  %v449_v8 = vadd.f32 %v1331_v22, %v448_v45  ;;  %v746_v9 = vpop.f32.mrb[5].mxu1  ;;  %v904_v12 = vpop.f32.mrb[6].mxu0 }
 0x224   :  { %594 = vrot.lane.b32.xlu1 %v436_v2, %s966_s6  ;;  %v867_v13 = vpack.c.bf16 %v457_v6, %v457_v6  ;;  %798 = vst.msk [vmem:[%s1565_s10 + $0x20] sm:$0xff] %vm793_vm1, %v746_v9  ;;  %v460_v14 = vadd.f32 %v904_v12, %v1331_v22  ;;  %v922_v15 = vpop.f32.mrb[6].mxu1  ;;  %604 = vrot.lane.b32.xlu0 %v457_v6, %s966_s6  ;;  %v451_v54 = vpop.f32.mrb[7].mxu0 }
 0x225   :  { %v865_v18 = vpack.c.bf16 %v449_v8, %v449_v8  ;;  %801 = vst.msk [vmem:[%s1565_s10 + $0x38] sm:$0xff] %vm793_vm1, %v922_v15  ;;  %v749_v19 = vpop.f32.mrb[7].mxu1  ;;  %v452_v17 = vadd.f32 %v1331_v22, %v451_v54 }
 0x226   :  { %566 = vst.msk [vmem:[%s1566_s8 + $0x18] sm:$0xf] %vm559_vm2, %v867_v13  ;;  %v868_v16 = vpack.c.bf16 %v460_v14, %v460_v14 }
 0x227   :  { %799 = vst.msk [vmem:[%s1565_s10 + $0x28] sm:$0xff] %vm793_vm1, %v749_v19  ;;  %v866_v26 = vpack.c.bf16 %v452_v17, %v452_v17 }
 0x228   :  { %564 = vst.msk [vmem:[%s1566_s8 + $0x10] sm:$0xf] %vm559_vm2, %v865_v18  ;;  %606 = vrot.lane.b32.xlu1 %v460_v14, %s966_s6  ;;  %567 = vst.msk [vmem:[%s1566_s8 + $0x1c] sm:$0xf] %vm559_vm2, %v868_v16  ;;  %600 = vrot.lane.b32.xlu0 %v449_v8, %s966_s6 }
 0x229   :  { %565 = vst.msk [vmem:[%s1566_s8 + $0x14] sm:$0xf] %vm559_vm2, %v866_v26  ;;  %v907_v27 = vpop.f32.mrb[8].mxu0 }
 0x22a   :  { %v473_v31 = vadd.f32 %v907_v27, %v1331_v22  ;;  %v925_v35 = vpop.f32.mrb[8].mxu1  ;;  %v464_v32 = vpop.f32.mrb[9].mxu0 }
 0x22b   :  { %804 = vst.msk [vmem:[%s1565_s10 + $0x50] sm:$0xff] %vm793_vm1, %v925_v35  ;;  %v465_v55 = vadd.f32 %v1331_v22, %v464_v32  ;;  %v762_v33 = vpop.f32.mrb[9].mxu1  ;;  %v908_v34 = vpop.f32.mrb[10].mxu0 }
 0x22c   :  { %602 = vrot.lane.b32.xlu1 %v452_v17, %s966_s6  ;;  %v871_v20 = vpack.c.bf16 %v473_v31, %v473_v31  ;;  %802 = vst.msk [vmem:[%s1565_s10 + $0x40] sm:$0xff] %vm793_vm1, %v762_v33  ;;  %v476_v38 = vadd.f32 %v908_v34, %v1331_v22  ;;  %v926_v36 = vpop.f32.mrb[10].mxu1  ;;  %612 = vrot.lane.b32.xlu0 %v473_v31, %s966_s6  ;;  %v467_v40 = vpop.f32.mrb[11].mxu0 }
 0x22d   :  { %v869_v41 = vpack.c.bf16 %v465_v55, %v465_v55  ;;  %805 = vst.msk [vmem:[%s1565_s10 + $0x58] sm:$0xff] %vm793_vm1, %v926_v36  ;;  %v765_v0 = vpop.f32.mrb[11].mxu1  ;;  %v468_v42 = vadd.f32 %v1331_v22, %v467_v40 }
 0x22e   :  { %570 = vst.msk [vmem:[%s1566_s8 + $0x28] sm:$0xf] %vm559_vm2, %v871_v20  ;;  %v872_v21 = vpack.c.bf16 %v476_v38, %v476_v38 }
 0x22f   :  { %803 = vst.msk [vmem:[%s1565_s10 + $0x48] sm:$0xff] %vm793_vm1, %v765_v0  ;;  %v870_v43 = vpack.c.bf16 %v468_v42, %v468_v42 }
 0x230   :  { %568 = vst.msk [vmem:[%s1566_s8 + $0x20] sm:$0xf] %vm559_vm2, %v869_v41  ;;  %614 = vrot.lane.b32.xlu1 %v476_v38, %s966_s6  ;;  %571 = vst.msk [vmem:[%s1566_s8 + $0x2c] sm:$0xf] %vm559_vm2, %v872_v21  ;;  %608 = vrot.lane.b32.xlu0 %v465_v55, %s966_s6 }
 0x231   :  { %569 = vst.msk [vmem:[%s1566_s8 + $0x24] sm:$0xf] %vm559_vm2, %v870_v43  ;;  %v911_v24 = vpop.f32.mrb[12].mxu0 }
 0x232   :  { %v489_v48 = vadd.f32 %v911_v24, %v1331_v22  ;;  %v929_v49 = vpop.f32.mrb[12].mxu1  ;;  %v480_v47 = vpop.f32.mrb[13].mxu0 }
 0x233   :  { %808 = vst.msk [vmem:[%s1565_s10 + $0x70] sm:$0xff] %vm793_vm1, %v929_v49  ;;  %v481_v50 = vadd.f32 %v1331_v22, %v480_v47  ;;  %v778_v51 = vpop.f32.mrb[13].mxu1  ;;  %v912_v1 = vpop.f32.mrb[14].mxu0 }
 0x234   :  { %610 = vrot.lane.b32.xlu1 %v468_v42, %s966_s6  ;;  %v875_v52 = vpack.c.bf16 %v489_v48, %v489_v48  ;;  %806 = vst.msk [vmem:[%s1565_s10 + $0x60] sm:$0xff] %vm793_vm1, %v778_v51  ;;  %v492_v28 = vadd.f32 %v912_v1, %v1331_v22  ;;  %v930_v29 = vpop.f32.mrb[14].mxu1  ;;  %v483_v25 = vpop.f32.mrb[15].mxu0 }
 0x235   :  { %v873_v44 = vpack.c.bf16 %v481_v50, %v481_v50  ;;  %809 = vst.msk [vmem:[%s1565_s10 + $0x78] sm:$0xff] %vm793_vm1, %v930_v29  ;;  %v484_v53 = vadd.f32 %v1331_v22, %v483_v25  ;;  %v781_v10 = vpop.f32.mrb[15].mxu1  ;;  %616 = vrot.lane.b32.xlu0 %v481_v50, %s966_s6 }
 0x236   :  { %574 = vst.msk [vmem:[%s1566_s8 + $0x38] sm:$0xf] %vm559_vm2, %v875_v52  ;;  %v876_v56 = vpack.c.bf16 %v492_v28, %v492_v28 }
 0x237   :  { %807 = vst.msk [vmem:[%s1565_s10 + $0x68] sm:$0xff] %vm793_vm1, %v781_v10  ;;  %v874_v22 = vpack.c.bf16 %v484_v53, %v484_v53 }
 0x238   :  { %572 = vst.msk [vmem:[%s1566_s8 + $0x30] sm:$0xf] %vm559_vm2, %v873_v44  ;;  %618 = vrot.lane.b32.xlu1 %v484_v53, %s966_s6  ;;  %575 = vst.msk [vmem:[%s1566_s8 + $0x3c] sm:$0xf] %vm559_vm2, %v876_v56 }
 0x239   :  { %573 = vst.msk [vmem:[%s1566_s8 + $0x34] sm:$0xf] %vm559_vm2, %v874_v22  ;;  %620 = vrot.lane.b32.xlu0 %v489_v48, %s966_s6 }
 0x23c   :  { %622 = vrot.lane.b32.xlu1 %v492_v28, %s966_s6 }
 0x28e   :  { %v597_v30 = vpop.permute.xlu1 %596 }
 0x28f   :  { %642 = vst.msk [vmem:[%s1567_s9 + $0x10] sm:$0xff] %vm51_vm0, %v597_v30  ;;  %v593_v57 = vpop.permute.xlu0 %592 }
 0x290   :  { %640 = vst.msk [vmem:[%s1567_s9] sm:$0xff] %vm51_vm0, %v593_v57 }
 0x292   :  { %v599_v39 = vpop.permute.xlu1 %598 }
 0x293   :  { %643 = vst.msk [vmem:[%s1567_s9 + $0x18] sm:$0xff] %vm51_vm0, %v599_v39 }
 0x296   :  { %v595_v37 = vpop.permute.xlu1 %594  ;;  %v605_v46 = vpop.permute.xlu0 %604 }
 0x297   :  { %641 = vst.msk [vmem:[%s1567_s9 + $0x8] sm:$0xff] %vm51_vm0, %v595_v37  ;;  %646 = vst.msk [vmem:[%s1567_s9 + $0x30] sm:$0xff] %vm51_vm0, %v605_v46 }
 0x29a   :  { %v607_v58 = vpop.permute.xlu1 %606  ;;  %v601_v59 = vpop.permute.xlu0 %600 }
 0x29b   :  { %647 = vst.msk [vmem:[%s1567_s9 + $0x38] sm:$0xff] %vm51_vm0, %v607_v58  ;;  %644 = vst.msk [vmem:[%s1567_s9 + $0x20] sm:$0xff] %vm51_vm0, %v601_v59 }
 0x29e   :  { %v603_v60 = vpop.permute.xlu1 %602  ;;  %v613_v61 = vpop.permute.xlu0 %612 }
 0x29f   :  { %645 = vst.msk [vmem:[%s1567_s9 + $0x28] sm:$0xff] %vm51_vm0, %v603_v60  ;;  %650 = vst.msk [vmem:[%s1567_s9 + $0x50] sm:$0xff] %vm51_vm0, %v613_v61 }
 0x2a2   :  { %v615_v62 = vpop.permute.xlu1 %614  ;;  %v609_v63 = vpop.permute.xlu0 %608 }
 0x2a3   :  { %651 = vst.msk [vmem:[%s1567_s9 + $0x58] sm:$0xff] %vm51_vm0, %v615_v62  ;;  %648 = vst.msk [vmem:[%s1567_s9 + $0x40] sm:$0xff] %vm51_vm0, %v609_v63 }
 0x2a6   :  { %v611_v11 = vpop.permute.xlu1 %610 }
 0x2a7   :  { %649 = vst.msk [vmem:[%s1567_s9 + $0x48] sm:$0xff] %vm51_vm0, %v611_v11  ;;  %v617_v2 = vpop.permute.xlu0 %616 }
 0x2a8   :  { %652 = vst.msk [vmem:[%s1567_s9 + $0x60] sm:$0xff] %vm51_vm0, %v617_v2 }
 0x2aa   :  { %v619_v3 = vpop.permute.xlu1 %618 }
 0x2ab   :  { %653 = vst.msk [vmem:[%s1567_s9 + $0x68] sm:$0xff] %vm51_vm0, %v619_v3  ;;  %v621_v4 = vpop.permute.xlu0 %620 }
 0x2ac   :  { %654 = vst.msk [vmem:[%s1567_s9 + $0x70] sm:$0xff] %vm51_vm0, %v621_v4 }
 0x2ae   :  { %v623_v5 = vpop.permute.xlu1 %622 }
 0x2af   :  { %655 = vst.msk [vmem:[%s1567_s9 + $0x78] sm:$0xff] %vm51_vm0, %v623_v5 }

// kernel: pairwise_attention_block.25
= control target key start
LH: loop header
LB: loop body
LE: loop exit
PB: predicated region body
PF: predicated region fallthrough
CT: control target
= control target key end

     0   :  { %s950_s18 = smov 0   ;;  %s952_s19 = smov 0   ;;  %s1076_s0 = inlined_call_operand.vmem [shape: bf16[2,8,8,48], index: 0, kind: input, shape index: {}]   ;;  %s1077_s1 = inlined_call_operand.vmem [shape: f32[2,2,8,8], index: 1, kind: input, shape index: {}]   ;;  %s1078_s2 = inlined_call_operand.vmem [shape: f32[2,8,8], index: 2, kind: input, shape index: {}, may-alias: {2,4}]   ;;  %s1079_s3 = inlined_call_operand.vmem [shape: f32[2,8,8,1], index: 3, kind: input, shape index: {}]   ;;  %s1080_s4 = inlined_call_operand.vmem [shape: f32[2,8,1,8], index: 4, kind: input, shape index: {}, may-alias: {2,4}]   ;;  %s1081_s5 = inlined_call_operand.vmem [shape: f32[2,8,8,16], index: 5, kind: output, shape index: {}]  }
   0x1   :  { %s954_s20 = smov 0   ;;  %s956_s21 = smov 0  }
   0x2   :  { %s958_s22 = smov 0  }
   0x3 LB: > { %s24_s23 = sadd.s32 1, %s901_s20  ;;  %s27_s24 = sadd.s32 1, %s905_s21  ;;  %s909_s22 = sphi %s958_s22, %s15_s22   ;;  %s905_s21 = sphi %s956_s21, %s1087_s21   ;;  %s901_s20 = sphi %s954_s20, %s1086_s20   ;;  %s897_s19 = sphi %s952_s19, %s1085_s19   ;;  %s893_s18 = sphi %s950_s18, %s1084_s18  }
   0x4   : > { %p25_p0 = scmp.ge.s32.totalorder %s24_s23, 8  ;;  %p760_p1 = scmp.ge.s32.totalorder %s909_s22, 1 }
   0x5   : > { %p254_p2 = scmp.lt.s32.totalorder %s909_s22, 17 }
   0x6   : > { %s1089_s23 = smov (%p25_p0, %s24_s23), 0  ;;  %s1091_s24 = smov (!%p25_p0, %s27_s24), %s905_s21 }
   0x7   : > { %p255_p3 = pnand %p760_p1, %p254_p2  ;;  %p29_p4 = scmp.ge.s32.totalorder %s1091_s24, 2 }
   0x8   : > { %p312_p5 = scmp.lt.s32.totalorder (!%p255_p3), %s897_s19, 1  ;;  %p314_p6 = scmp.lt.s32.totalorder (!%p255_p3), %s893_s18, 7  ;;  %v911_v0 = vmov (!%p255_p3), 0.0   ;;  %vm912_vm0 = vmmov (!%p255_p3), 0   ;;  %v913_v1 = vmov (!%p255_p3), 0   ;;  %vm377_vm2 = vcmask (!%p255_p3), 64512  }
   0x9   : > { %s1093_s24 = smov (%p29_p4, %s1091_s24), 0  ;;  %258 = sbr.rel (%p255_p3) target bundleno = 1550 (0x60e), region = 40 }
   0xa   : > { %788 = vmatprep.subr.bf16.mxu0 (!%p255_p3), %v911_v0  ;;  %790 = vmatprep.mubr.msk.bf16.mxu0 (!%p255_p3), %vm912_vm0, %v911_v0  ;;  %s914_s10 = smov (!%p255_p3), 112   ;;  %v366_v8 = vlaneseq (!%p255_p3)  ;;  %s917_s30 = smov (!%p255_p3), 96   ;;  %vm446_vm8 = vcmask (!%p255_p3), 1043456   ;;  %vm611_vm9 = vcmask (!%p255_p3), 130048  }
   0xb   : > { %794 = vmatprep.subr.bf16.mxu1 (!%p255_p3), %v911_v0  ;;  %796 = vmatprep.mubr.msk.bf16.mxu1 (!%p255_p3), %vm912_vm0, %v911_v0  ;;  %s919_s7 = smov (!%p255_p3), 8  }
   0xc   : > { %861 = vset.pattern.permute.xlu0 (!%p255_p3), %v913_v1  ;;  %v367_v10 = vshrl.u32 (!%p255_p3), %v366_v8, 7 }
   0xe   : > { %v368_v11 = vsub.s32 (!%p255_p3), 0, %v367_v10 }
  0x10   : > { %s1095_s19 = smov (!%p312_p5, %s897_s19), 1  ;;  %s1097_s18 = smov (!%p314_p6, %s893_s18), 7 }
  0x11   : > { %s761_s25 = sshll.u32 %s1095_s19, 3  ;;  %s779_s14 = sshll.u32 %s1095_s19, 4 }
  0x12   : > { %s991_s26 = sadd.s32 %s761_s25, %s1097_s18  ;;  %s328_s17 = scalar_lea.vmem %s1078_s2, %s761_s25 }
  0x13   : > { %s762_s27 = sshll.u32 %s991_s26, 2  ;;  %s767_s28 = sshll.u32 %s991_s26, 3  ;;  %v354_v13 = vld [vmem:[%s328_s17] sm:$0xff] }
  0x14   : > { %s319_s6 = scalar_lea.vmem %s1076_s0, %s762_s27  ;;  %s336_s9 = scalar_lea.vmem %s1079_s3, %s767_s28  ;;  %vm355_vm4 = vcmp.gt.f32.partialorder %v354_v13, 0.5 }
  0x15   : > { %v353_v2 = vld [vmem:[%s319_s6] sm:$0xf]  ;;  %s343_s13 = scalar_lea.vmem %s1080_s4, %s991_s26  ;;  %s1024_s29 = scalar_lea.vmem %s1077_s1, %s779_s14 }
  0x16   : > { %v356_v3 = vld [vmem:[%s336_s9] sm:$0xff]  ;;  %v1003_v4 = vcombine.low %v353_v2, %v353_v2  ;;  %s915_s19 = smov 104   ;;  %s916_s25 = smov 120   ;;  %v775_v45 = vld [vmem:[%s1024_s29 + $0x8] sm:$0xff] }
  0x17   : > { %vm357_vm1 = vcmp.gt.f32.partialorder %v356_v3, 0.5  ;;  %v358_v9 = vld [vmem:[%s343_s13] sm:$0x1]  ;;  %v543_v47 = vsel %vm355_vm4, %v775_v45, -1e+30  ;;  %s918_s6 = smov 88  }
  0x18   : > { %375 = vrot.lane.b32.xlu0 %v1003_v4, %s914_s10  ;;  %v360_v5 = vsel %vm357_vm1, 1, %v913_v1  ;;  %vm359_vm3 = vcmp.gt.f32.partialorder %v358_v9, 0.5  ;;  %v425_v16 = vld [vmem:[%s1024_s29] sm:$0xff]  ;;  %s351_s10 = scalar_lea.vmem %s1081_s5, %s767_s28 }
  0x19   : > { %v365_v12 = vsel %vm359_vm3, 1, %v913_v1  ;;  %v426_v18 = vsel %vm355_vm4, %v425_v16, -1e+30 }
  0x1a   : > { %v369_v14 = vrot.slane %v365_v12, %v368_v11 }
  0x1c   : > { %362 = vperm.xlu0 %861, %v360_v5   ;;  %vm370_vm5 = vcmp.eq.s32.totalorder %v369_v14, 1 }
  0x20   : > { %492 = vrot.lane.b32.xlu0 %v1003_v4, %s915_s19 }
  0x24   : > { %490 = vrot.lane.b32.xlu0 %v1003_v4, %s916_s25 }
  0x8a   : > { %v376_v6 = vpop.permute.xlu0 %375 }
  0x8b   : > { %v382_v7 = vsel %vm377_vm2, %v376_v6, 0 }
  0x8c   : > { %789 = vmatpush3.bf16.xpose.msra.mxu0 %v382_v7 }
  0x8d   : > { %806 = vmatprep.subr.bf16.mxu0 %v911_v0 }
  0x93   : > { %791 = vmatmul.mubr.msk.bf16.vlgmr.msra.gmra.mrb[0].mxu0 %vm377_vm2, %v353_v2 }
  0x94   : > { %808 = vmatprep.mubr.msk.bf16.mxu0 %vm912_vm0, %v911_v0 }
  0x9b   : > { %v363_v15 = vpop.permute.xlu0 %362 }
  0x9c   : > { %vm364_vm6 = vcmp.eq.s32.totalorder %v363_v15, 1 }
  0x9d   : > { %vm1028_vm7 = vmand %vm364_vm6, %vm370_vm5 }
  0x9f   : > { %v493_v36 = vpop.permute.xlu0 %492 }
  0xa0   : > { %v498_v38 = vsel %vm377_vm2, %v493_v36, 0 }
  0xa3   : > { %v491_v40 = vpop.permute.xlu0 %490 }
 0x166   : > { %v418_v17 = vpop.f32.mrb[0].mxu0 }
 0x167   : > { %v424_v19 = vmul.f32 0.35355338, %v418_v17  ;;  %v792_v20 = vpop.f32.mrb[1].mxu0 }
 0x168   : > { %v421_v21 = vpop.f32.mrb[2].mxu0 }
 0x169   : > { %v427_v23 = vadd.f32 %v426_v18, %v424_v19  ;;  %v793_v24 = vpop.f32.mrb[3].mxu0 }
 0x16b   : > { %v428_v25 = vsel %vm1028_vm7, %v427_v23, -1e+30 }
 0x16c   : > { %v429_v26 = vsel %vm377_vm2, %v428_v25, -inf }
 0x16d   : > { %430 = vmax.xlane.f32.xlu1 %v429_v26 }
 0x1fa   : > { %v431_v27 = vpop.xlane.xlu1 %430 }
 0x1fb   : > { %v432_v28 = vsub.f32 %v428_v25, %v431_v27 }
 0x1fd   : > { %v433_v29 = vmul.f32 1.442695, %v432_v28 }
 0x1ff   : > { %863 = vpow2.f32 %v433_v29 }
 0x209   : > { %v864_v30 = vpop.eup %863 }
 0x20a   : > { %v435_v31 = vsel %vm377_vm2, %v864_v30, 0.0 }
 0x20b   : > { %436 = vadd.xlane.f32.xlu1 %v435_v31 }
 0x21c   : > { %441 = vrot.lane.b32.xlu1 %v1003_v4, %s917_s30 }
 0x298   : > { %v437_v32 = vpop.xlane.xlu1 %436 }
 0x299   : > { %865 = vrcp.f32 %v437_v32 }
 0x29c   : > { %v442_v33 = vpop.permute.xlu1 %441 }
 0x29d   : > { %v448_v34 = vsel %vm446_vm8, %v442_v33, 0 }
 0x29e   : > { %795 = vmatpush3.bf16.msra.mxu1 %v448_v34 }
 0x29f   : > { %800 = vmatprep.subr.bf16.mxu1 %v911_v0 }
 0x2a3   : > { %v866_v35 = vpop.eup %865 }
 0x2a4   : > { %v439_v37 = vmul.f32 %v866_v35, %v864_v30 }
 0x2a6   : > { %v440_v39 = vpack.c.bf16 %v439_v37, %v439_v37 }
 0x2a8   : > { %797 = vmatmul.mubr.msk.bf16.vlgmr.msra.gmra.mrb[0].mxu1 %vm377_vm2, %v440_v39 }
 0x2a9   : > { %801 = vmatpush3.bf16.xpose.msra.mxu1 %v498_v38  ;;  %802 = vmatprep.mubr.msk.bf16.mxu1 %vm912_vm0, %v911_v0 }
 0x2b0   : > { %803 = vmatmul.mubr.msk.bf16.vlgmr.msra.gmra.mrb[4].mxu1 %vm377_vm2, %v491_v40 }
 0x37b   : > { %v484_v41 = vpop.f32.mrb[0].mxu1 }
 0x37c   : > { %v798_v42 = vpop.f32.mrb[1].mxu1 }
 0x37d   : > { %v487_v43 = vpop.f32.mrb[2].mxu1 }
 0x37e   : > { %v799_v44 = vpop.f32.mrb[3].mxu1 }
 0x383   : > { %v534_v46 = vpop.f32.mrb[4].mxu1 }
 0x384   : > { %v540_v48 = vmul.f32 0.35355338, %v534_v46  ;;  %v804_v49 = vpop.f32.mrb[5].mxu1 }
 0x385   : > { %v537_v50 = vpop.f32.mrb[6].mxu1 }
 0x386   : > { %v544_v51 = vadd.f32 %v543_v47, %v540_v48  ;;  %v805_v52 = vpop.f32.mrb[7].mxu1 }
 0x388   : > { %v545_v53 = vsel %vm1028_vm7, %v544_v51, -1e+30 }
 0x389   : > { %v546_v54 = vsel %vm377_vm2, %v545_v53, -inf }
 0x38a   : > { %547 = vmax.xlane.f32.xlu0 %v546_v54 }
 0x3a0   : > { %558 = vrot.lane.b32.xlu0 %v1003_v4, %s918_s6 }
 0x417   : > { %v548_v55 = vpop.xlane.xlu0 %547 }
 0x418   : > { %v549_v56 = vsub.f32 %v545_v53, %v548_v55 }
 0x41a   : > { %v550_v57 = vmul.f32 1.442695, %v549_v56 }
 0x41b   : > { %v559_v60 = vpop.permute.xlu0 %558 }
 0x41c   : > { %867 = vpow2.f32 %v550_v57  ;;  %v564_v61 = vsel %vm446_vm8, %v559_v60, 0 }
 0x41d   : > { %807 = vmatpush3.bf16.msra.mxu0 %v564_v61 }
 0x426   : > { %v868_v58 = vpop.eup %867 }
 0x427   : > { %v552_v59 = vsel %vm377_vm2, %v868_v58, 0.0 }
 0x428   : > { %553 = vadd.xlane.f32.xlu1 %v552_v59 }
 0x4b5   : > { %v554_v62 = vpop.xlane.xlu1 %553 }
 0x4b6   : > { %869 = vrcp.f32 %v554_v62 }
 0x4c0   : > { %v870_v63 = vpop.eup %869 }
 0x4c1   : > { %v556_v0 = vmul.f32 %v870_v63, %v868_v58 }
 0x4c3   : > { %v557_v1 = vpack.c.bf16 %v556_v0, %v556_v0 }
 0x4c5   : > { %809 = vmatmul.mubr.msk.bf16.vlgmr.msra.gmra.mrb[4].mxu0 %vm377_vm2, %v557_v1 }
 0x598   : > { %v600_v2 = vpop.f32.mrb[4].mxu0 }
 0x599   : > { %607 = vrot.lane.b32.xlu1 %v600_v2, %s919_s7  ;;  %v810_v3 = vpop.f32.mrb[5].mxu0 }
 0x59a   : > { %v603_v4 = vpop.f32.mrb[6].mxu0 }
 0x59b   : > { %v811_v5 = vpop.f32.mrb[7].mxu0 }
 0x60b   : > { %v608_v6 = vpop.permute.xlu1 %607 }
 0x60c   : > { %v610_v7 = vsel %vm377_vm2, %v484_v41, %v608_v6 }
 0x60d   : > { %612 = vst.msk [vmem:[%s351_s10] sm:$0xff] %vm611_vm9, %v610_v7 }
 0x60e PF: > { %s15_s22 = sadd.s32 1, %s909_s22   ;;  %s1084_s18 = smov %s901_s20 }
 0x60f   : > { %p12_p7 = scmp.ge.s32.totalorder %s15_s22, 18   ;;  %s1085_s19 = smov %s905_s21 }
 0x610   : > { %s1086_s20 = smov %s1089_s23  ;;  %s1087_s21 = smov %s1093_s24 }
 0x611   :  { %14 = sbr.rel (!%p12_p7) target bundleno = 3 (0x3), region = 83 }

// kernel: pairwise_attention_block.26
= control target key start
LH: loop header
LB: loop body
LE: loop exit
PB: predicated region body
PF: predicated region fallthrough
CT: control target
= control target key end

     0   :  { %vm185_vm0 = vcmask 130048   ;;  %s646_s2 = inlined_call_operand.vmem [shape: bf16[16,16], index: 2, kind: input, shape index: {}]   ;;  %s647_s1 = inlined_call_operand.vmem [shape: f32[128,16], index: 1, kind: input, shape index: {}]   ;;  %s648_s0 = inlined_call_operand.vmem [shape: f32[128,16], index: 0, kind: input, shape index: {}]   ;;  %s649_s3 = inlined_call_operand.vmem [shape: f32[1,16], index: 3, kind: input, shape index: {}]   ;;  %s650_s4 = inlined_call_operand.vmem [shape: f32[128,16], index: 4, kind: output, shape index: {}]  }
   0x1   :  { %v382_v0 = vld [vmem:[%s646_s2] sm:$0xff]   ;;  %v35_v2 = vld [vmem:[%s647_s1 + $0x8] sm:$0xff]  ;;  %v36_v9 = vld [vmem:[%s647_s1 + $0x10] sm:$0xff] }
   0x2   :  { %v34_v1 = vld [vmem:[%s647_s1] sm:$0xff]  ;;  %362 = vmatprep.subr.bf16.mxu0 %v382_v0  ;;  %380 = vmatprep.subr.bf16.mxu1 %v382_v0  ;;  %v328_v4 = vmul.f32 -1.442695, %v35_v2  ;;  %v43_v6 = vld [vmem:[%s647_s1 + $0x48] sm:$0xff]  ;;  %v37_v10 = vld [vmem:[%s647_s1 + $0x18] sm:$0xff] }
   0x3   :  { %v327_v3 = vmul.f32 -1.442695, %v34_v1  ;;  %363 = vmatpush3.bf16.msra.mxu0 %v382_v0  ;;  %381 = vmatpush3.bf16.msra.mxu1 %v382_v0  ;;  %v42_v5 = vld [vmem:[%s647_s1 + $0x40] sm:$0xff]  ;;  %v336_v8 = vmul.f32 -1.442695, %v43_v6  ;;  %v44_v13 = vld [vmem:[%s647_s1 + $0x50] sm:$0xff] }
   0x4   :  { %v335_v7 = vmul.f32 -1.442695, %v42_v5  ;;  %v329_v11 = vmul.f32 -1.442695, %v36_v9  ;;  %v330_v12 = vmul.f32 -1.442695, %v37_v10 }
   0x5   :  { %383 = vpow2.f32 %v327_v3  ;;  %v45_v14 = vld [vmem:[%s647_s1 + $0x58] sm:$0xff]  ;;  %v337_v15 = vmul.f32 -1.442695, %v44_v13  ;;  %v38_v17 = vld [vmem:[%s647_s1 + $0x20] sm:$0xff]  ;;  %v39_v18 = vld [vmem:[%s647_s1 + $0x28] sm:$0xff] }
   0x6   :  { %385 = vpow2.f32 %v328_v4  ;;  %v338_v16 = vmul.f32 -1.442695, %v45_v14  ;;  %v331_v19 = vmul.f32 -1.442695, %v38_v17  ;;  %v332_v20 = vmul.f32 -1.442695, %v39_v18 }
   0x7   :  { %387 = vpow2.f32 %v335_v7  ;;  %v46_v21 = vld [vmem:[%s647_s1 + $0x60] sm:$0xff]  ;;  %v47_v22 = vld [vmem:[%s647_s1 + $0x68] sm:$0xff]  ;;  %v40_v24 = vld [vmem:[%s647_s1 + $0x30] sm:$0xff] }
   0x8   :  { %389 = vpow2.f32 %v336_v8  ;;  %v339_v23 = vmul.f32 -1.442695, %v46_v21  ;;  %v340_v25 = vmul.f32 -1.442695, %v47_v22  ;;  %v333_v26 = vmul.f32 -1.442695, %v40_v24 }
   0x9   :  { %391 = vpow2.f32 %v329_v11  ;;  %v41_v44 = vld [vmem:[%s647_s1 + $0x38] sm:$0xff]  ;;  %v48_v49 = vld [vmem:[%s647_s1 + $0x70] sm:$0xff]  ;;  %v18_v51 = vld [vmem:[%s648_s0] sm:$0xff] }
   0xa   :  { %393 = vpow2.f32 %v330_v12  ;;  %v334_v53 = vmul.f32 -1.442695, %v41_v44  ;;  %v49_v54 = vld [vmem:[%s647_s1 + $0x78] sm:$0xff]  ;;  %v19_v56 = vld [vmem:[%s648_s0 + $0x8] sm:$0xff]  ;;  %v26_v59 = vld [vmem:[%s648_s0 + $0x40] sm:$0xff] }
   0xb   :  { %395 = vpow2.f32 %v337_v15  ;;  %v341_v60 = vmul.f32 -1.442695, %v48_v49  ;;  %v27_v63 = vld [vmem:[%s648_s0 + $0x48] sm:$0xff]  ;;  %v342_v0 = vmul.f32 -1.442695, %v49_v54  ;;  %v20_v3 = vld [vmem:[%s648_s0 + $0x10] sm:$0xff] }
   0xc   :  { %397 = vpow2.f32 %v338_v16  ;;  %v21_v6 = vld [vmem:[%s648_s0 + $0x18] sm:$0xff]  ;;  %v28_v10 = vld [vmem:[%s648_s0 + $0x50] sm:$0xff]  ;;  %v22_v17 = vld [vmem:[%s648_s0 + $0x20] sm:$0xff] }
   0xd   :  { %399 = vpow2.f32 %v331_v19  ;;  %v29_v13 = vld [vmem:[%s648_s0 + $0x58] sm:$0xff]  ;;  %v24_v44 = vld [vmem:[%s648_s0 + $0x30] sm:$0xff] }
   0xe   :  { %401 = vpow2.f32 %v332_v20  ;;  %v23_v20 = vld [vmem:[%s648_s0 + $0x28] sm:$0xff] }
   0xf   :  { %v384_v27 = vpop.eup %383  ;;  %403 = vpow2.f32 %v339_v23 }
  0x10   :  { %v386_v28 = vpop.eup %385  ;;  %v98_v29 = vadd.f32 1.0, %v384_v27  ;;  %405 = vpow2.f32 %v340_v25  ;;  %v30_v25 = vld [vmem:[%s648_s0 + $0x60] sm:$0xff] }
  0x11   :  { %v388_v30 = vpop.eup %387  ;;  %v99_v31 = vadd.f32 1.0, %v386_v28  ;;  %407 = vpow2.f32 %v333_v26  ;;  %v31_v28 = vld [vmem:[%s648_s0 + $0x68] sm:$0xff] }
  0x12   :  { %v390_v32 = vpop.eup %389  ;;  %409 = vrcp.f32 %v98_v29  ;;  %v106_v33 = vadd.f32 1.0, %v388_v30 }
  0x13   :  { %v392_v34 = vpop.eup %391  ;;  %411 = vrcp.f32 %v99_v31  ;;  %v107_v35 = vadd.f32 1.0, %v390_v32 }
  0x14   :  { %v394_v36 = vpop.eup %393  ;;  %413 = vrcp.f32 %v106_v33  ;;  %v100_v37 = vadd.f32 1.0, %v392_v34 }
  0x15   :  { %v396_v38 = vpop.eup %395  ;;  %415 = vrcp.f32 %v107_v35  ;;  %v101_v39 = vadd.f32 1.0, %v394_v36 }
  0x16   :  { %v398_v40 = vpop.eup %397  ;;  %417 = vrcp.f32 %v100_v37  ;;  %v108_v41 = vadd.f32 1.0, %v396_v38 }
  0x17   :  { %v400_v42 = vpop.eup %399  ;;  %419 = vrcp.f32 %v101_v39  ;;  %v109_v43 = vadd.f32 1.0, %v398_v40 }
  0x18   :  { %v402_v45 = vpop.eup %401  ;;  %421 = vrcp.f32 %v108_v41  ;;  %v102_v46 = vadd.f32 1.0, %v400_v42 }
  0x19   :  { %v404_v47 = vpop.eup %403  ;;  %423 = vrcp.f32 %v109_v43  ;;  %v103_v48 = vadd.f32 1.0, %v402_v45  ;;  %v25_v45 = vld [vmem:[%s648_s0 + $0x38] sm:$0xff] }
  0x1a   :  { %v406_v50 = vpop.eup %405  ;;  %425 = vrcp.f32 %v102_v46  ;;  %v110_v52 = vadd.f32 1.0, %v404_v47 }
  0x1b   :  { %v408_v55 = vpop.eup %407  ;;  %427 = vrcp.f32 %v103_v48  ;;  %v111_v57 = vadd.f32 1.0, %v406_v50  ;;  %v32_v48 = vld [vmem:[%s648_s0 + $0x70] sm:$0xff]  ;;  %v33_v50 = vld [vmem:[%s648_s0 + $0x78] sm:$0xff] }
  0x1c   :  { %v410_v58 = vpop.eup %409  ;;  %429 = vrcp.f32 %v110_v52  ;;  %v104_v21 = vadd.f32 1.0, %v408_v55 }
  0x1d   :  { %v412_v61 = vpop.eup %411  ;;  %v146_v62 = vmul.f32 %v410_v58, %v18_v51  ;;  %431 = vrcp.f32 %v111_v57  ;;  %v343_v57 = vld [vmem:[%s649_s3] ss:$0 sm:$0xff] }
  0x1e   :  { %v414_v1 = vpop.eup %413  ;;  %v147_v2 = vmul.f32 %v412_v61, %v19_v56  ;;  %433 = vpow2.f32 %v334_v53 }
  0x1f   :  { %v416_v4 = vpop.eup %415  ;;  %v154_v5 = vmul.f32 %v414_v1, %v26_v59  ;;  %435 = vpow2.f32 %v341_v60 }
  0x20   :  { %v418_v7 = vpop.eup %417  ;;  %v162_v8 = vpack.c.bf16 %v147_v2, %v146_v62  ;;  %v155_v9 = vmul.f32 %v416_v4, %v27_v63  ;;  %437 = vpow2.f32 %v342_v0 }
  0x21   :  { %v420_v11 = vpop.eup %419  ;;  %v148_v12 = vmul.f32 %v418_v7, %v20_v3  ;;  %439 = vrcp.f32 %v104_v21 }
  0x22   :  { %v422_v14 = vpop.eup %421  ;;  %364 = vmatprep.mubr.msk.bf16.mxu0 %vm185_vm0, %v162_v8  ;;  %v166_v15 = vpack.c.bf16 %v155_v9, %v154_v5  ;;  %v149_v16 = vmul.f32 %v420_v11, %v21_v6 }
  0x23   :  { %v424_v18 = vpop.eup %423  ;;  %v156_v19 = vmul.f32 %v422_v14, %v28_v10 }
  0x24   :  { %v426_v22 = vpop.eup %425  ;;  %372 = vmatprep.mubr.msk.bf16.mxu1 %vm185_vm0, %v166_v15  ;;  %v163_v23 = vpack.c.bf16 %v149_v16, %v148_v12  ;;  %v157_v24 = vmul.f32 %v424_v18, %v29_v13 }
  0x25   :  { %v428_v26 = vpop.eup %427  ;;  %v150_v27 = vmul.f32 %v426_v22, %v22_v17 }
  0x26   :  { %v430_v29 = vpop.eup %429  ;;  %365 = vmatmul.mubr.msk.bf16.vlgmr.msra.gmra.mrb[0].mxu0 %vm185_vm0, %v163_v23  ;;  %v167_v30 = vpack.c.bf16 %v157_v24, %v156_v19  ;;  %v151_v31 = vmul.f32 %v428_v26, %v23_v20 }
  0x27   :  { %v432_v32 = vpop.eup %431  ;;  %v158_v33 = vmul.f32 %v430_v29, %v30_v25 }
  0x28   :  { %v434_v34 = vpop.eup %433  ;;  %373 = vmatmul.mubr.msk.bf16.vlgmr.msra.gmra.mrb[0].mxu1 %vm185_vm0, %v167_v30  ;;  %v164_v35 = vpack.c.bf16 %v151_v31, %v150_v27  ;;  %v159_v36 = vmul.f32 %v432_v32, %v31_v28 }
  0x29   :  { %v105_v37 = vadd.f32 1.0, %v434_v34  ;;  %v436_v38 = vpop.eup %435 }
  0x2a   :  { %368 = vmatprep.mubr.msk.bf16.mxu0 %vm185_vm0, %v164_v35  ;;  %v168_v39 = vpack.c.bf16 %v159_v36, %v158_v33  ;;  %v438_v40 = vpop.eup %437  ;;  %v112_v41 = vadd.f32 1.0, %v436_v38 }
  0x2b   :  { %441 = vrcp.f32 %v105_v37  ;;  %v113_v42 = vadd.f32 1.0, %v438_v40  ;;  %v440_v43 = vpop.eup %439 }
  0x2c   :  { %376 = vmatprep.mubr.msk.bf16.mxu1 %vm185_vm0, %v168_v39  ;;  %443 = vrcp.f32 %v112_v41  ;;  %v152_v46 = vmul.f32 %v440_v43, %v24_v44 }
  0x2d   :  { %445 = vrcp.f32 %v113_v42 }
  0x35   :  { %v442_v47 = vpop.eup %441 }
  0x36   :  { %v153_v49 = vmul.f32 %v442_v47, %v25_v45  ;;  %v444_v51 = vpop.eup %443 }
  0x37   :  { %v446_v52 = vpop.eup %445  ;;  %v160_v54 = vmul.f32 %v444_v51, %v32_v48 }
  0x38   :  { %v165_v53 = vpack.c.bf16 %v153_v49, %v152_v46  ;;  %v161_v55 = vmul.f32 %v446_v52, %v33_v50 }
  0x3a   :  { %369 = vmatmul.mubr.msk.bf16.gmra.mrb[4].mxu0 %vm185_vm0, %v165_v53  ;;  %v169_v56 = vpack.c.bf16 %v161_v55, %v160_v54 }
  0x3c   :  { %377 = vmatmul.mubr.msk.bf16.gmra.mrb[4].mxu1 %vm185_vm0, %v169_v56 }
  0xf9   :  { %v366_v58 = vpop.f32.mrb[0].mxu0 }
  0xfa   :  { %v253_v59 = vadd.f32 %v366_v58, %v343_v57  ;;  %v244_v60 = vpop.f32.mrb[1].mxu0 }
  0xfb   :  { %v374_v61 = vpop.f32.mrb[0].mxu1  ;;  %v245_v62 = vadd.f32 %v343_v57, %v244_v60  ;;  %v367_v63 = vpop.f32.mrb[2].mxu0 }
  0xfc   :  { %309 = vst.msk [vmem:[%s650_s4 + $0x10] sm:$0xff] %vm185_vm0, %v253_v59  ;;  %v285_v0 = vadd.f32 %v374_v61, %v343_v57  ;;  %v276_v1 = vpop.f32.mrb[1].mxu1  ;;  %v256_v2 = vadd.f32 %v367_v63, %v343_v57  ;;  %v247_v3 = vpop.f32.mrb[3].mxu0 }
  0xfd   :  { %307 = vst.msk [vmem:[%s650_s4] sm:$0xff] %vm185_vm0, %v245_v62  ;;  %v277_v4 = vadd.f32 %v343_v57, %v276_v1  ;;  %v375_v5 = vpop.f32.mrb[2].mxu1  ;;  %v248_v6 = vadd.f32 %v343_v57, %v247_v3 }
  0xfe   :  { %317 = vst.msk [vmem:[%s650_s4 + $0x50] sm:$0xff] %vm185_vm0, %v285_v0  ;;  %310 = vst.msk [vmem:[%s650_s4 + $0x18] sm:$0xff] %vm185_vm0, %v256_v2  ;;  %v288_v7 = vadd.f32 %v375_v5, %v343_v57  ;;  %v279_v8 = vpop.f32.mrb[3].mxu1 }
  0xff   :  { %315 = vst.msk [vmem:[%s650_s4 + $0x40] sm:$0xff] %vm185_vm0, %v277_v4  ;;  %308 = vst.msk [vmem:[%s650_s4 + $0x8] sm:$0xff] %vm185_vm0, %v248_v6  ;;  %v280_v9 = vadd.f32 %v343_v57, %v279_v8 }
 0x100   :  { %318 = vst.msk [vmem:[%s650_s4 + $0x58] sm:$0xff] %vm185_vm0, %v288_v7 }
 0x101   :  { %316 = vst.msk [vmem:[%s650_s4 + $0x48] sm:$0xff] %vm185_vm0, %v280_v9 }
 0x10d   :  { %v370_v10 = vpop.f32.mrb[4].mxu0 }
 0x10e   :  { %v269_v11 = vadd.f32 %v370_v10, %v343_v57  ;;  %v260_v12 = vpop.f32.mrb[5].mxu0 }
 0x10f   :  { %v261_v13 = vadd.f32 %v343_v57, %v260_v12  ;;  %v371_v14 = vpop.f32.mrb[6].mxu0  ;;  %v378_v15 = vpop.f32.mrb[4].mxu1 }
 0x110   :  { %313 = vst.msk [vmem:[%s650_s4 + $0x30] sm:$0xff] %vm185_vm0, %v269_v11  ;;  %v272_v16 = vadd.f32 %v371_v14, %v343_v57  ;;  %v263_v17 = vpop.f32.mrb[7].mxu0  ;;  %v301_v18 = vadd.f32 %v378_v15, %v343_v57  ;;  %v292_v19 = vpop.f32.mrb[5].mxu1 }
 0x111   :  { %311 = vst.msk [vmem:[%s650_s4 + $0x20] sm:$0xff] %vm185_vm0, %v261_v13  ;;  %v264_v20 = vadd.f32 %v343_v57, %v263_v17  ;;  %v293_v21 = vadd.f32 %v343_v57, %v292_v19  ;;  %v379_v22 = vpop.f32.mrb[6].mxu1 }
 0x112   :  { %314 = vst.msk [vmem:[%s650_s4 + $0x38] sm:$0xff] %vm185_vm0, %v272_v16  ;;  %321 = vst.msk [vmem:[%s650_s4 + $0x70] sm:$0xff] %vm185_vm0, %v301_v18  ;;  %v304_v23 = vadd.f32 %v379_v22, %v343_v57  ;;  %v295_v24 = vpop.f32.mrb[7].mxu1 }
 0x113   :  { %312 = vst.msk [vmem:[%s650_s4 + $0x28] sm:$0xff] %vm185_vm0, %v264_v20  ;;  %319 = vst.msk [vmem:[%s650_s4 + $0x60] sm:$0xff] %vm185_vm0, %v293_v21  ;;  %v296_v25 = vadd.f32 %v343_v57, %v295_v24 }
 0x114   :  { %322 = vst.msk [vmem:[%s650_s4 + $0x78] sm:$0xff] %vm185_vm0, %v304_v23 }
 0x115   :  { %320 = vst.msk [vmem:[%s650_s4 + $0x68] sm:$0xff] %vm185_vm0, %v296_v25 }

</bundles_post_ra>
